<compile_context>
chip_gen: v7x
topology: tpu7x:2x2x1
jax: 0.10.0
libtpu: 0.0.40
codegen_flags: <defaults>
</compile_context>

<pallas_src>
import jax
import jax.numpy as jnp
from jax.experimental import pallas as pl
from jax.experimental.pallas import tpu as pltpu

D_IN = 6000
D_OUT = 28
OUT_PAD = 128     # lane-dense padded output width


def _round_up(n, m):
    return ((n + m - 1) // m) * m


def encoder_jm_kernel(alpha_ref,                 # SMEM (3,) PReLU slopes, f32
                      x_ref,                     # (TB, 6000) f32
                      w1_ref, b1_ref,            # (6000,512) bf16, (1,512) f32
                      w2_ref, b2_ref,            # (512,256)  bf16, (1,256) f32
                      w3_ref, b3_ref,            # (256,128)  bf16, (1,128) f32
                      w4_ref, b4_ref,            # (128,128)  bf16, (1,128) f32
                      o_ref):                    # (TB, 128) f32
    # Layer 1: Linear(6000 -> 512) + PReLU.
    # Cast x f32 -> bf16 in-kernel (VPU filler); MXU accumulates in f32.
    x = x_ref[...].astype(jnp.bfloat16)
    h = jnp.dot(x, w1_ref[...],
                preferred_element_type=jnp.float32) + b1_ref[...]
    h = jnp.where(h >= 0, h, alpha_ref[0] * h)

    # Layer 2: Linear(512 -> 256) + PReLU
    h = jnp.dot(h.astype(jnp.bfloat16), w2_ref[...],
                preferred_element_type=jnp.float32) + b2_ref[...]
    h = jnp.where(h >= 0, h, alpha_ref[1] * h)

    # Layer 3: Linear(256 -> 128) + PReLU
    h = jnp.dot(h.astype(jnp.bfloat16), w3_ref[...],
                preferred_element_type=jnp.float32) + b3_ref[...]
    h = jnp.where(h >= 0, h, alpha_ref[2] * h)

    # Layer 4: Linear(128 -> 28); output columns padded to 128 (pads are zero)
    out = jnp.dot(h.astype(jnp.bfloat16), w4_ref[...],
                  preferred_element_type=jnp.float32) + b4_ref[...]
    o_ref[...] = out.astype(o_ref.dtype)


def _pick_tuning(tile_b_max, vmem_limit_bytes):
    """Per-generation defaults: bigger tiles / VMEM on 128-MiB chips."""
    if tile_b_max is not None and vmem_limit_bytes is not None:
        return tile_b_max, vmem_limit_bytes
    vmem_cap = 64 * 1024 * 1024          # conservative default (v7x per-TC)
    try:
        vmem_cap = int(pltpu.get_tpu_info().vmem_capacity_bytes)
    except Exception:
        pass
    big_vmem = vmem_cap >= 96 * 1024 * 1024       # v5e / v6e: 128 MiB
    if tile_b_max is None:
        tile_b_max = 1024 if big_vmem else 512    # v7x: cap at 512
    if vmem_limit_bytes is None:
        vmem_limit_bytes = (96 if big_vmem else 48) * 1024 * 1024
    return tile_b_max, vmem_limit_bytes


def encoder_jm(x, params, *, tile_b_max=None, vmem_limit_bytes=None):
    """x: (B, 6000) float32. params: dict with w1..w4, b1..b4, alphas(3,)."""
    B, d_in = x.shape
    assert d_in == D_IN

    tile_b_max, vmem_limit_bytes = _pick_tuning(tile_b_max, vmem_limit_bytes)

    # Tile: multiple of 8 sublanes, at most tile_b_max, and never the whole
    # batch in one step when B allows >= 2 steps (keeps both v7x TCs busy).
    half_b = _round_up(max((B + 1) // 2, 8), 8)
    tile_b = min(tile_b_max, half_b)
    b_pad = _round_up(B, tile_b)
    grid = (b_pad // tile_b,)

    # x stays f32 and un-padded along K; only pad batch rows when needed.
    x_p = x.astype(jnp.float32)
    if b_pad != B:
        x_p = jnp.pad(x_p, ((0, b_pad - B), (0, 0)))

    # bf16 weights for the MXU; biases / PReLU math stay f32.
    w1 = params["w1"].astype(jnp.bfloat16)                      # (6000, 512)
    w2 = params["w2"].astype(jnp.bfloat16)                      # (512, 256)
    w3 = params["w3"].astype(jnp.bfloat16)                      # (256, 128)
    w4 = jnp.pad(params["w4"],
                 ((0, 0), (0, OUT_PAD - D_OUT))).astype(jnp.bfloat16)
    b1, b2, b3 = params["b1"], params["b2"], params["b3"]
    b4 = jnp.pad(params["b4"], ((0, 0), (0, OUT_PAD - D_OUT)))
    alphas = params["alphas"].astype(jnp.float32)

    # Constant index maps -> the pipeline fetches each weight once and keeps
    # it resident across the batch grid (block index never changes).
    def const_spec(shape):
        return pl.BlockSpec(shape, lambda i: (0, 0))

    grid_spec = pltpu.PrefetchScalarGridSpec(
        num_scalar_prefetch=0,
        grid=grid,
        in_specs=[
            pl.BlockSpec(memory_space=pltpu.MemorySpace.SMEM),    # alphas
            pl.BlockSpec((tile_b, D_IN), lambda i: (i, 0)),       # x tile, f32
            const_spec(w1.shape), const_spec(b1.shape),
            const_spec(w2.shape), const_spec(b2.shape),
            const_spec(w3.shape), const_spec(b3.shape),
            const_spec(w4.shape), const_spec(b4.shape),
        ],
        out_specs=pl.BlockSpec((tile_b, OUT_PAD), lambda i: (i, 0)),
    )

    out = pl.pallas_call(
        encoder_jm_kernel,
        out_shape=jax.ShapeDtypeStruct((b_pad, OUT_PAD), jnp.float32),
        grid_spec=grid_spec,
        compiler_params=pltpu.CompilerParams(
            dimension_semantics=("parallel",),
            vmem_limit_bytes=vmem_limit_bytes,
        ),
    )(alphas, x_p, w1, b1, w2, b2, w3, b3, w4, b4)

    return out[:B, :D_OUT]


def init_params(key):
    """Deterministic synthetic init matching nn.Linear / nn.PReLU shapes."""
    dims = [D_IN, 512, 256, 128, D_OUT]
    params = {}
    keys = jax.random.split(key, 8)
    for idx in range(4):
        fan_in, fan_out = dims[idx], dims[idx + 1]
        bound = 1.0 / jnp.sqrt(fan_in)
        w = jax.random.uniform(keys[2 * idx], (fan_in, fan_out),
                               minval=-bound, maxval=bound, dtype=jnp.float32)
        b = jax.random.uniform(keys[2 * idx + 1], (1, fan_out),
                               minval=-bound, maxval=bound, dtype=jnp.float32)
        params[f"w{idx + 1}"] = w
        params[f"b{idx + 1}"] = b
    # nn.PReLU() default: single slope, init 0.25 (one per PReLU module -> 3)
    params["alphas"] = jnp.full((3,), 0.25, dtype=jnp.float32)
    return params


def encoder_jm_reference_f32(x, params):
    h = x
    for idx in range(3):
        h = h @ params[f"w{idx + 1}"] + params[f"b{idx + 1}"]
        a = params["alphas"][idx]
        h = jnp.where(h >= 0, h, a * h)
    return h @ params["w4"] + params["b4"]


def encoder_jm_reference_bf16(x, params):
    """Reference with the same bf16-operand / f32-accumulate matmuls."""
    h = x
    for idx in range(4):
        w = params[f"w{idx + 1}"].astype(jnp.bfloat16)
        h = jnp.dot(h.astype(jnp.bfloat16), w,
                    preferred_element_type=jnp.float32) + params[f"b{idx + 1}"]
        if idx < 3:
            a = params["alphas"][idx]
            h = jnp.where(h >= 0, h, a * h)
    return h


if __name__ == "__main__":
    key = jax.random.PRNGKey(0)
    k_param, k_x = jax.random.split(key)

    params = init_params(k_param)
    B = 12   # small batch; exercises batch padding, a 2-step parallel grid,
             # and the 28-column output slice
    x = jax.random.normal(k_x, (B, D_IN), dtype=jnp.float32)

    out = jax.block_until_ready(encoder_jm(x, params))
    assert out.shape == (B, D_OUT)

    ref_bf16 = encoder_jm_reference_bf16(x, params)
    ref_f32 = encoder_jm_reference_f32(x, params)
    err_bf16 = float(jnp.max(jnp.abs(out - ref_bf16)))
    err_f32 = float(jnp.max(jnp.abs(out - ref_f32)))
    assert jnp.allclose(out, ref_bf16, atol=1e-2, rtol=1e-2), \
        f"mismatch vs bf16-matched reference (max err {err_bf16})"
    assert jnp.allclose(out, ref_f32, atol=5e-2, rtol=5e-2), \
        f"mismatch vs f32 reference (max err {err_f32})"

    print("KERNEL_OK")
</pallas_src>

<mosaic_0001>
module attributes {stable_mosaic.version = 11 : i64} {
  func.func @encoder_jm_kernel(%arg0: i32, %arg1: memref<3xf32, #tpu.memory_space<smem>>, %arg2: memref<8x6000xf32, #tpu.memory_space<vmem>>, %arg3: memref<6000x512xbf16, #tpu.memory_space<vmem>>, %arg4: memref<1x512xf32, #tpu.memory_space<vmem>>, %arg5: memref<512x256xbf16, #tpu.memory_space<vmem>>, %arg6: memref<1x256xf32, #tpu.memory_space<vmem>>, %arg7: memref<256x128xbf16, #tpu.memory_space<vmem>>, %arg8: memref<1x128xf32, #tpu.memory_space<vmem>>, %arg9: memref<128x128xbf16, #tpu.memory_space<vmem>>, %arg10: memref<1x128xf32, #tpu.memory_space<vmem>>, %arg11: memref<8x128xf32, #tpu.memory_space<vmem>>) attributes {dimension_semantics = [#tpu.dimension_semantics<parallel>], iteration_bounds = array<i64: 2>, scalar_prefetch = 0 : i64, scratch_operands = 0 : i64, tpu.core_type = #tpu.core_type<tc>, window_params = [{transform_indices = @transform_0, window_bounds = array<i64: 3>}, {transform_indices = @transform_1, window_bounds = array<i64: 8, 6000>}, {pipeline_mode = #tpu.pipeline_mode<synchronous>, transform_indices = @transform_2, window_bounds = array<i64: 6000, 512>}, {pipeline_mode = #tpu.pipeline_mode<synchronous>, transform_indices = @transform_3, window_bounds = array<i64: 1, 512>}, {pipeline_mode = #tpu.pipeline_mode<synchronous>, transform_indices = @transform_4, window_bounds = array<i64: 512, 256>}, {pipeline_mode = #tpu.pipeline_mode<synchronous>, transform_indices = @transform_5, window_bounds = array<i64: 1, 256>}, {pipeline_mode = #tpu.pipeline_mode<synchronous>, transform_indices = @transform_6, window_bounds = array<i64: 256, 128>}, {pipeline_mode = #tpu.pipeline_mode<synchronous>, transform_indices = @transform_7, window_bounds = array<i64: 1, 128>}, {pipeline_mode = #tpu.pipeline_mode<synchronous>, transform_indices = @transform_8, window_bounds = array<i64: 128, 128>}, {pipeline_mode = #tpu.pipeline_mode<synchronous>, transform_indices = @transform_9, window_bounds = array<i64: 1, 128>}, {transform_indices = @transform_10, window_bounds = array<i64: 8, 128>}]} {
    %c0 = arith.constant 0 : index
    %c0_0 = arith.constant 0 : index
    %0 = vector.load %arg2[%c0, %c0_0] : memref<8x6000xf32, #tpu.memory_space<vmem>>, vector<8x6000xf32>
    %1 = arith.truncf %0 : vector<8x6000xf32> to vector<8x6000xbf16>
    %c0_1 = arith.constant 0 : index
    %c0_2 = arith.constant 0 : index
    %2 = vector.load %arg3[%c0_1, %c0_2] : memref<6000x512xbf16, #tpu.memory_space<vmem>>, vector<6000x512xbf16>
    %cst = arith.constant dense<0.000000e+00> : vector<8x512xf32>
    %3 = tpu.matmul %1, %2, %cst {dimension_numbers = #tpu.dot_dimension_numbers<[1], [0], [0], [1], [0, 0, 1, 1], [], []>} : vector<8x6000xbf16>, vector<6000x512xbf16>, vector<8x512xf32> -> vector<8x512xf32>
    %c0_3 = arith.constant 0 : index
    %c0_4 = arith.constant 0 : index
    %4 = vector.load %arg4[%c0_3, %c0_4] : memref<1x512xf32, #tpu.memory_space<vmem>>, vector<1x512xf32>
    %5 = vector.broadcast %4 : vector<1x512xf32> to vector<8x512xf32>
    %6 = arith.addf %3, %5 : vector<8x512xf32>
    %cst_5 = arith.constant 0.000000e+00 : f32
    %7 = vector.broadcast %cst_5 : f32 to vector<8x512xf32>
    %8 = arith.cmpf oge, %6, %7 : vector<8x512xf32>
    %c0_6 = arith.constant 0 : index
    %9 = memref.load %arg1[%c0_6] : memref<3xf32, #tpu.memory_space<smem>>
    %10 = vector.broadcast %9 : f32 to vector<8x512xf32>
    %11 = arith.mulf %10, %6 : vector<8x512xf32>
    %12 = arith.select %8, %6, %11 : vector<8x512xi1>, vector<8x512xf32>
    %13 = arith.truncf %12 : vector<8x512xf32> to vector<8x512xbf16>
    %c0_7 = arith.constant 0 : index
    %c0_8 = arith.constant 0 : index
    %14 = vector.load %arg5[%c0_7, %c0_8] : memref<512x256xbf16, #tpu.memory_space<vmem>>, vector<512x256xbf16>
    %cst_9 = arith.constant dense<0.000000e+00> : vector<8x256xf32>
    %15 = tpu.matmul %13, %14, %cst_9 {dimension_numbers = #tpu.dot_dimension_numbers<[1], [0], [0], [1], [0, 0, 1, 1], [], []>} : vector<8x512xbf16>, vector<512x256xbf16>, vector<8x256xf32> -> vector<8x256xf32>
    %c0_10 = arith.constant 0 : index
    %c0_11 = arith.constant 0 : index
    %16 = vector.load %arg6[%c0_10, %c0_11] : memref<1x256xf32, #tpu.memory_space<vmem>>, vector<1x256xf32>
    %17 = vector.broadcast %16 : vector<1x256xf32> to vector<8x256xf32>
    %18 = arith.addf %15, %17 : vector<8x256xf32>
    %cst_12 = arith.constant 0.000000e+00 : f32
    %19 = vector.broadcast %cst_12 : f32 to vector<8x256xf32>
    %20 = arith.cmpf oge, %18, %19 : vector<8x256xf32>
    %c1 = arith.constant 1 : index
    %21 = memref.load %arg1[%c1] : memref<3xf32, #tpu.memory_space<smem>>
    %22 = vector.broadcast %21 : f32 to vector<8x256xf32>
    %23 = arith.mulf %22, %18 : vector<8x256xf32>
    %24 = arith.select %20, %18, %23 : vector<8x256xi1>, vector<8x256xf32>
    %25 = arith.truncf %24 : vector<8x256xf32> to vector<8x256xbf16>
    %c0_13 = arith.constant 0 : index
    %c0_14 = arith.constant 0 : index
    %26 = vector.load %arg7[%c0_13, %c0_14] : memref<256x128xbf16, #tpu.memory_space<vmem>>, vector<256x128xbf16>
    %cst_15 = arith.constant dense<0.000000e+00> : vector<8x128xf32>
    %27 = tpu.matmul %25, %26, %cst_15 {dimension_numbers = #tpu.dot_dimension_numbers<[1], [0], [0], [1], [0, 0, 1, 1], [], []>} : vector<8x256xbf16>, vector<256x128xbf16>, vector<8x128xf32> -> vector<8x128xf32>
    %c0_16 = arith.constant 0 : index
    %c0_17 = arith.constant 0 : index
    %28 = vector.load %arg8[%c0_16, %c0_17] : memref<1x128xf32, #tpu.memory_space<vmem>>, vector<1x128xf32>
    %29 = vector.broadcast %28 : vector<1x128xf32> to vector<8x128xf32>
    %30 = arith.addf %27, %29 : vector<8x128xf32>
    %cst_18 = arith.constant 0.000000e+00 : f32
    %31 = vector.broadcast %cst_18 : f32 to vector<8x128xf32>
    %32 = arith.cmpf oge, %30, %31 : vector<8x128xf32>
    %c2 = arith.constant 2 : index
    %33 = memref.load %arg1[%c2] : memref<3xf32, #tpu.memory_space<smem>>
    %34 = vector.broadcast %33 : f32 to vector<8x128xf32>
    %35 = arith.mulf %34, %30 : vector<8x128xf32>
    %36 = arith.select %32, %30, %35 : vector<8x128xi1>, vector<8x128xf32>
    %37 = arith.truncf %36 : vector<8x128xf32> to vector<8x128xbf16>
    %c0_19 = arith.constant 0 : index
    %c0_20 = arith.constant 0 : index
    %38 = vector.load %arg9[%c0_19, %c0_20] : memref<128x128xbf16, #tpu.memory_space<vmem>>, vector<128x128xbf16>
    %cst_21 = arith.constant dense<0.000000e+00> : vector<8x128xf32>
    %39 = tpu.matmul %37, %38, %cst_21 {dimension_numbers = #tpu.dot_dimension_numbers<[1], [0], [0], [1], [0, 0, 1, 1], [], []>} : vector<8x128xbf16>, vector<128x128xbf16>, vector<8x128xf32> -> vector<8x128xf32>
    %c0_22 = arith.constant 0 : index
    %c0_23 = arith.constant 0 : index
    %40 = vector.load %arg10[%c0_22, %c0_23] : memref<1x128xf32, #tpu.memory_space<vmem>>, vector<1x128xf32>
    %41 = vector.broadcast %40 : vector<1x128xf32> to vector<8x128xf32>
    %42 = arith.addf %39, %41 : vector<8x128xf32>
    %c0_24 = arith.constant 0 : index
    %c0_25 = arith.constant 0 : index
    %43 = vector.load %arg11[%c0_24, %c0_25] : memref<8x128xf32, #tpu.memory_space<vmem>>, vector<8x128xf32>
    tpu.vector_store %arg11[%c0_24, %c0_25], %42 {strides = array<i32>} : memref<8x128xf32, #tpu.memory_space<vmem>>, vector<8x128xf32>,
    return
  }
  func.func @transform_0(%arg0: i32) -> i32 {
    %c0_i32 = arith.constant 0 : i32
    %c0_i32_0 = arith.constant 0 : i32
    return %c0_i32 : i32
  }
  func.func @transform_1(%arg0: i32) -> (i32, i32) {
    %c0_i32 = arith.constant 0 : i32
    %c0_i32_0 = arith.constant 0 : i32
    return %arg0, %c0_i32 : i32, i32
  }
  func.func @transform_2(%arg0: i32) -> (i32, i32) {
    %c0_i32 = arith.constant 0 : i32
    %c0_i32_0 = arith.constant 0 : i32
    %c0_i32_1 = arith.constant 0 : i32
    return %c0_i32, %c0_i32_0 : i32, i32
  }
  func.func @transform_3(%arg0: i32) -> (i32, i32) {
    %c0_i32 = arith.constant 0 : i32
    %c0_i32_0 = arith.constant 0 : i32
    %c0_i32_1 = arith.constant 0 : i32
    return %c0_i32, %c0_i32_0 : i32, i32
  }
  func.func @transform_4(%arg0: i32) -> (i32, i32) {
    %c0_i32 = arith.constant 0 : i32
    %c0_i32_0 = arith.constant 0 : i32
    %c0_i32_1 = arith.constant 0 : i32
    return %c0_i32, %c0_i32_0 : i32, i32
  }
  func.func @transform_5(%arg0: i32) -> (i32, i32) {
    %c0_i32 = arith.constant 0 : i32
    %c0_i32_0 = arith.constant 0 : i32
    %c0_i32_1 = arith.constant 0 : i32
    return %c0_i32, %c0_i32_0 : i32, i32
  }
  func.func @transform_6(%arg0: i32) -> (i32, i32) {
    %c0_i32 = arith.constant 0 : i32
    %c0_i32_0 = arith.constant 0 : i32
    %c0_i32_1 = arith.constant 0 : i32
    return %c0_i32, %c0_i32_0 : i32, i32
  }
  func.func @transform_7(%arg0: i32) -> (i32, i32) {
    %c0_i32 = arith.constant 0 : i32
    %c0_i32_0 = arith.constant 0 : i32
    %c0_i32_1 = arith.constant 0 : i32
    return %c0_i32, %c0_i32_0 : i32, i32
  }
  func.func @transform_8(%arg0: i32) -> (i32, i32) {
    %c0_i32 = arith.constant 0 : i32
    %c0_i32_0 = arith.constant 0 : i32
    %c0_i32_1 = arith.constant 0 : i32
    return %c0_i32, %c0_i32_0 : i32, i32
  }
  func.func @transform_9(%arg0: i32) -> (i32, i32) {
    %c0_i32 = arith.constant 0 : i32
    %c0_i32_0 = arith.constant 0 : i32
    %c0_i32_1 = arith.constant 0 : i32
    return %c0_i32, %c0_i32_0 : i32, i32
  }
  func.func @transform_10(%arg0: i32) -> (i32, i32) {
    %c0_i32 = arith.constant 0 : i32
    %c0_i32_0 = arith.constant 0 : i32
    return %arg0, %c0_i32 : i32, i32
  }
}

</mosaic_0001>

<bundles_post_ra>
// kernel: tpu_custom_call.1
= control target key start
LH: loop header
LB: loop body
LE: loop exit
PB: predicated region body
PF: predicated region fallthrough
CT: control target
= control target key end

     0   :  { %s18006_s0 = inlined_call_operand.hbm [shape: f32[3], index: 0, kind: input, shape index: {}]   ;;  %s18007_s1 = inlined_call_operand.hbm [shape: f32[16,6000], index: 1, kind: input, shape index: {}]   ;;  %s18008_s2 = inlined_call_operand.hbm [shape: bf16[6000,512], index: 2, kind: input, shape index: {}]   ;;  %s18009_s3 = inlined_call_operand.hbm [shape: f32[1,512], index: 3, kind: input, shape index: {}]   ;;  %s18010_s4 = inlined_call_operand.hbm [shape: bf16[512,256], index: 4, kind: input, shape index: {}]   ;;  %s18011_s5 = inlined_call_operand.hbm [shape: f32[1,256], index: 5, kind: input, shape index: {}]   ;;  %s18012_s6 = inlined_call_operand.hbm [shape: bf16[256,128], index: 6, kind: input, shape index: {}]   ;;  %s18013_s7 = inlined_call_operand.hbm [shape: f32[1,128], index: 7, kind: input, shape index: {}]   ;;  %s18014_s8 = inlined_call_operand.hbm [shape: bf16[128,128], index: 8, kind: input, shape index: {}]   ;;  %s18015_s9 = inlined_call_operand.hbm [shape: f32[1,128], index: 9, kind: input, shape index: {}]   ;;  %s18016_s10 = inlined_call_operand.hbm [shape: f32[16,128], index: 10, kind: output, shape index: {}]  }
   0x1   :  { %18022 = sst [smem:[#allocation28_spill]] %s18006_s0 }
   0x2   :  { %18023 = sst [smem:[#allocation29_spill]] %s18008_s2 }
   0x3   :  { %18024 = sst [smem:[#allocation30_spill]] %s18016_s10 }
   0x4   :  { %15 = vsyncpa [#allocation5], 0 }
   0x5   :  { %16 = vsyncpa [#allocation3], 0 }
   0x6   :  { %18 = vsyncpa [#allocation3 + $0x1], 0 }
   0x7   :  { %19 = vsyncpa [#allocation8], 0 }
   0x8   :  { %20 = vsyncpa [#allocation11], 0 }
   0x9   :  { %21 = vsyncpa [#allocation14], 0 }
   0xa   :  { %22 = vsyncpa [#allocation17], 0 }
   0xb   :  { %23 = vsyncpa [#allocation4], 0 }
   0xc   :  { %25 = vsyncpa [#allocation4 + $0x1], 0  ;;  %s17370_s13 = smov 0   ;;  %s17372_s14 = smov 0  }
   0xd   :  { %s17374_s15 = smov 0   ;;  %s17376_s16 = smov 0  }
   0xe LB: > { %s17295_s17 = smov [#allocation7]   ;;  %s17391_s19 = sadd.s32 4294967295, %s17293_s16   ;;  %s17293_s16 = sphi %s17376_s16, %s18055_s16   ;;  %s17289_s15 = sphi %s17374_s15, %s18054_s15   ;;  %s17285_s14 = sphi %s17372_s14, %s18053_s14   ;;  %s17281_s13 = sphi %s17370_s13, %s18052_s13  }
   0xf   : > { %s298_s18 = sshll.u32 %s17295_s17, 4  ;;  %p12557_p0 = scmp.ge.s32.totalorder %s17293_s16, 1  ;;  %s17396_s18 = int_to_ptr.vmem [resolvable:$true] %s298_s18 }
  0x10   : > { %p18019_p1 = scmp.eq.s32.totalorder %s17391_s19, 0  ;;  %p277_p2 = scmp.lt.s32.totalorder %s17293_s16, 3 }
  0x11   : > { %s17296_s21 = smov [#allocation10]   ;;  %s17297_s24 = smov [#allocation13]  }
  0x12   : > { %p17398_p3 = pnand %p12557_p0, %p277_p2  ;;  %s322_s22 = sshll.u32 %s17296_s21, 4  ;;  %s17411_s22 = int_to_ptr.vmem [resolvable:$true] %s322_s22 }
  0x13   : > { %s17413_s25 = sshll.u32 %s17297_s24, 4  ;;  %s18028_s2 = sld [smem:[#allocation29_spill]]  ;;  %s347_s25 = int_to_ptr.vmem [resolvable:$true] %s17413_s25 }
  0x14   : > { %s18025_s20 = scalar_select %p17398_p3, 1, 0 }
  0x15   : > { %p14464_p5 = pneg %p17398_p3 }
  0x16   : > { %18026 = sst [smem:[#allocation27_spill]] %s18025_s20 }
  0x17   : > { %p17407_p6 = pnand %p14464_p5, %p18019_p1 }
  0x19   : > { %s16940_s28 = scalar_lea.hbm %s18028_s2, 192000  ;;  %p17423_p8 = pneg %p17407_p6 }
  0x1a   : > { %p16941_p7 = scmp.ne.s32.totalorder %s18028_s2, %s16940_s28  ;;  %p16947_p11 = scmp.lt.u32.totalorder %s16940_s28, %s18028_s2 }
  0x1c   : > { %p16943_p9 = pnand %p17423_p8, %p16941_p7 }
  0x1e   : > { %p16944_p10 = pneg %p16943_p9 }
  0x20   : > { %p16949_p12 = pnand %p16947_p11, %p16944_p10 }
  0x22   : > { %16952 = shalt.err (!%p16949_p12)
}
  0x23   : > { %s16953_s21 = scalar_lea.vmem %s17396_s18, 192000  ;;  %p16961_p5 = scmp.lt.s32.totalorder %s17396_s18, %s17396_s18 }
  0x24   : > { %p16954_p13 = scmp.ne.s32.totalorder %s17396_s18, %s16953_s21  ;;  %p16962_p4 = scmp.lt.s32.totalorder %s16953_s21, %s16953_s21 }
  0x26   : > { %p16956_p0 = pnand %p16954_p13, %p17423_p8  ;;  %p16963_p7 = por %p16962_p4, %p16961_p5 }
  0x28   : > { %p16957_p2 = pneg %p16956_p0 }
  0x2a   : > { %p16964_p9 = pnand %p16963_p7, %p16957_p2 }
  0x2c   : > { %16967 = shalt.err (!%p16964_p9)
}
  0x2d   : > { %s17298_s24 = smov 256   ;;  %s17299_s26 = smov 16  }
  0x2e   : > { %14470 = dma.hbm_to_vmem [thread:$0]  (!%p17407_p6), %s18028_s2, 192000, %s17396_s18, [#allocation8], %s17298_s24, %s17298_s24, %s17299_s26  }
  0x2f   : > { %s16968_s12 = scalar_lea.hbm %s18010_s4, 8192 }
  0x30   : > { %p16969_p4 = scmp.ne.s32.totalorder %s18010_s4, %s16968_s12  ;;  %p16975_p12 = scmp.lt.u32.totalorder %s16968_s12, %s18010_s4 }
  0x32   : > { %p16971_p10 = pnand %p16969_p4, %p17423_p8 }
  0x34   : > { %p16972_p11 = pneg %p16971_p10 }
  0x36   : > { %p16977_p13 = pnand %p16975_p12, %p16972_p11 }
  0x38   : > { %16980 = shalt.err (!%p16977_p13)
}
  0x39   : > { %s16981_s18 = scalar_lea.vmem %s17411_s22, 8192  ;;  %p16989_p7 = scmp.lt.s32.totalorder %s17411_s22, %s17411_s22 }
  0x3a   : > { %p16982_p0 = scmp.ne.s32.totalorder %s17411_s22, %s16981_s18  ;;  %p16990_p9 = scmp.lt.s32.totalorder %s16981_s18, %s16981_s18 }
  0x3c   : > { %p16984_p2 = pnand %p16982_p0, %p17423_p8  ;;  %p16991_p4 = por %p16990_p9, %p16989_p7 }
  0x3e   : > { %p16985_p5 = pneg %p16984_p2 }
  0x40   : > { %p16992_p10 = pnand %p16991_p4, %p16985_p5 }
  0x42   : > { %16995 = shalt.err (!%p16992_p10)
}
  0x43   : > { %s17300_s10 = smov 128   ;;  %s17301_s20 = smov 8  }
  0x44   : > { %14476 = dma.hbm_to_vmem [thread:$0]  (!%p17407_p6), %s18010_s4, 8192, %s17411_s22, [#allocation11], %s17300_s10, %s17300_s10, %s17301_s20  }
  0x45   : > { %s16996_s29 = scalar_lea.hbm %s18012_s6, 2048 }
  0x46   : > { %p16997_p11 = scmp.ne.s32.totalorder %s18012_s6, %s16996_s29  ;;  %p17003_p0 = scmp.lt.u32.totalorder %s16996_s29, %s18012_s6 }
  0x48   : > { %p16999_p12 = pnand %p16997_p11, %p17423_p8 }
  0x4a   : > { %p17000_p13 = pneg %p16999_p12 }
  0x4c   : > { %p17005_p2 = pnand %p17003_p0, %p17000_p13 }
  0x4e   : > { %17008 = shalt.err (!%p17005_p2)
}
  0x4f   : > { %s17009_s18 = scalar_lea.vmem %s347_s25, 2048  ;;  %p17017_p4 = scmp.lt.s32.totalorder %s347_s25, %s347_s25 }
  0x50   : > { %p17010_p5 = scmp.ne.s32.totalorder %s347_s25, %s17009_s18  ;;  %p17018_p10 = scmp.lt.s32.totalorder %s17009_s18, %s17009_s18 }
  0x52   : > { %p17012_p7 = pnand %p17010_p5, %p17423_p8  ;;  %p17019_p1 = por %p17018_p10, %p17017_p4 }
  0x54   : > { %p17013_p9 = pneg %p17012_p7 }
  0x56   : > { %p17020_p3 = pnand %p17019_p1, %p17013_p9 }
  0x58   : > { %17023 = shalt.err (!%p17020_p3)
}
  0x59   : > { %s17302_s22 = smov 64   ;;  %s17303_s10 = smov 4  }
  0x5a   : > { %14482 = dma.hbm_to_vmem [thread:$0]  (!%p17407_p6), %s18012_s6, 2048, %s347_s25, [#allocation14], %s17302_s22, %s17302_s22, %s17303_s10  }
  0x5b   : > { %s17304_s26 = smov [#allocation16]   ;;  %s17024_s30 = scalar_lea.hbm %s18014_s8, 1024 }
  0x5c   : > { %s370_s27 = sshll.u32 %s17304_s26, 4  ;;  %p17025_p1 = scmp.ne.s32.totalorder %s18014_s8, %s17024_s30  ;;  %s371_s27 = int_to_ptr.vmem [resolvable:$true] %s370_s27 }
  0x5d   : > { %p17031_p12 = scmp.lt.u32.totalorder %s17024_s30, %s18014_s8 }
  0x5e   : > { %p17027_p3 = pnand %p17025_p1, %p17423_p8 }
  0x60   : > { %p17028_p11 = pneg %p17027_p3 }
  0x62   : > { %p17033_p13 = pnand %p17031_p12, %p17028_p11 }
  0x64   : > { %17036 = shalt.err (!%p17033_p13)
}
  0x65   : > { %s17037_s25 = scalar_lea.vmem %s371_s27, 1024  ;;  %p17045_p7 = scmp.lt.s32.totalorder %s371_s27, %s371_s27 }
  0x66   : > { %p17038_p0 = scmp.ne.s32.totalorder %s371_s27, %s17037_s25  ;;  %p17046_p9 = scmp.lt.s32.totalorder %s17037_s25, %s17037_s25 }
  0x68   : > { %p17040_p2 = pnand %p17038_p0, %p17423_p8  ;;  %p17047_p4 = por %p17046_p9, %p17045_p7 }
  0x6a   : > { %p17041_p5 = pneg %p17040_p2 }
  0x6c   : > { %p17048_p10 = pnand %p17047_p4, %p17041_p5 }
  0x6e   : > { %17051 = shalt.err (!%p17048_p10)
}
  0x6f   : > { %14488 = dma.hbm_to_vmem [thread:$0]  (!%p17407_p6), %s18014_s8, 1024, %s371_s27, [#allocation17], %s17302_s22, %s17302_s22, %s17303_s10  }
  0x70   : > { %s18030_s0 = sld [smem:[#allocation28_spill]] }
  0x76   : > { %s17052_s29 = scalar_lea.hbm %s18030_s0, 16 }
  0x77   : > { %p17053_p1 = scmp.ne.s32.totalorder %s18030_s0, %s17052_s29  ;;  %p17059_p12 = scmp.lt.u32.totalorder %s17052_s29, %s18030_s0 }
  0x79   : > { %p17055_p3 = pnand %p17053_p1, %p17423_p8 }
  0x7b   : > { %p17056_p11 = pneg %p17055_p3 }
  0x7d   : > { %p17061_p13 = pnand %p17059_p12, %p17056_p11 }
  0x7f   : > { %17064 = shalt.err (!%p17061_p13)
}
  0x80   : > { %s17305_s18 = smov [#allocation2]   ;;  %s17306_s27 = smov [#allocation9]  }
  0x81   : > { %14467 = dma.hbm_to_smem (!%p17407_p6), %s18030_s0, 16, %s17305_s18, [#allocation5]  }
  0x82   : > { %s312_s25 = sshll.u32 %s17306_s27, 4  ;;  %s17307_s20 = smov [#allocation12]   ;;  %s313_s25 = int_to_ptr.vmem [resolvable:$true] %s312_s25 }
  0x83   : > { %s336_s24 = sshll.u32 %s17307_s20, 4  ;;  %s17065_s30 = scalar_lea.hbm %s18009_s3, 64  ;;  %s337_s24 = int_to_ptr.vmem [resolvable:$true] %s336_s24 }
  0x84   : > { %p17066_p0 = scmp.ne.s32.totalorder %s18009_s3, %s17065_s30  ;;  %p17072_p7 = scmp.lt.u32.totalorder %s17065_s30, %s18009_s3 }
  0x86   : > { %p17068_p2 = pnand %p17066_p0, %p17423_p8 }
  0x88   : > { %p17069_p5 = pneg %p17068_p2 }
  0x8a   : > { %p17074_p9 = pnand %p17072_p7, %p17069_p5 }
  0x8c   : > { %17077 = shalt.err (!%p17074_p9)
}
  0x8d   : > { %s17078_s18 = scalar_lea.vmem %s313_s25, 64  ;;  %p17086_p3 = scmp.lt.s32.totalorder %s313_s25, %s313_s25 }
  0x8e   : > { %p17079_p4 = scmp.ne.s32.totalorder %s313_s25, %s17078_s18  ;;  %p17087_p11 = scmp.lt.s32.totalorder %s17078_s18, %s17078_s18 }
  0x90   : > { %p17081_p10 = pnand %p17079_p4, %p17423_p8  ;;  %p17088_p12 = por %p17087_p11, %p17086_p3 }
  0x92   : > { %p17082_p1 = pneg %p17081_p10 }
  0x94   : > { %p17089_p13 = pnand %p17088_p12, %p17082_p1 }
  0x96   : > { %17092 = shalt.err (!%p17089_p13)
}
  0x97   : > { %14473 = dma.hbm_to_vmem [thread:$0]  (!%p17407_p6), %s18009_s3, 64, %s313_s25, [#allocation8]  }
  0x98   : > { %s17093_s26 = scalar_lea.hbm %s18011_s5, 32 }
  0x99   : > { %p17094_p0 = scmp.ne.s32.totalorder %s18011_s5, %s17093_s26  ;;  %p17100_p7 = scmp.lt.u32.totalorder %s17093_s26, %s18011_s5 }
  0x9b   : > { %p17096_p2 = pnand %p17094_p0, %p17423_p8 }
  0x9d   : > { %p17097_p5 = pneg %p17096_p2 }
  0x9f   : > { %p17102_p9 = pnand %p17100_p7, %p17097_p5 }
  0xa1   : > { %17105 = shalt.err (!%p17102_p9)
}
  0xa2   : > { %s17106_s17 = scalar_lea.vmem %s337_s24, 32  ;;  %p17114_p3 = scmp.lt.s32.totalorder %s337_s24, %s337_s24 }
  0xa3   : > { %p17107_p4 = scmp.ne.s32.totalorder %s337_s24, %s17106_s17  ;;  %p17115_p11 = scmp.lt.s32.totalorder %s17106_s17, %s17106_s17 }
  0xa5   : > { %p17109_p10 = pnand %p17107_p4, %p17423_p8  ;;  %p17116_p12 = por %p17115_p11, %p17114_p3 }
  0xa7   : > { %p17110_p1 = pneg %p17109_p10 }
  0xa9   : > { %p17117_p13 = pnand %p17116_p12, %p17110_p1 }
  0xab   : > { %17120 = shalt.err (!%p17117_p13)
}
  0xac   : > { %14479 = dma.hbm_to_vmem [thread:$0]  (!%p17407_p6), %s18011_s5, 32, %s337_s24, [#allocation11]  }
  0xad   : > { %s17308_s18 = smov [#allocation15]   ;;  %s17309_s10 = smov [#allocation18]  }
  0xae   : > { %s360_s22 = sshll.u32 %s17308_s18, 4  ;;  %s384_s27 = sshll.u32 %s17309_s10, 4  ;;  %s361_s22 = int_to_ptr.vmem [resolvable:$true] %s360_s22  ;;  %s385_s27 = int_to_ptr.vmem [resolvable:$true] %s384_s27 }
  0xaf   : > { %s17121_s28 = scalar_lea.hbm %s18013_s7, 16 }
  0xb0   : > { %p17122_p0 = scmp.ne.s32.totalorder %s18013_s7, %s17121_s28  ;;  %p17128_p7 = scmp.lt.u32.totalorder %s17121_s28, %s18013_s7 }
  0xb2   : > { %p17124_p2 = pnand %p17122_p0, %p17423_p8 }
  0xb4   : > { %p17125_p5 = pneg %p17124_p2 }
  0xb6   : > { %p17130_p9 = pnand %p17128_p7, %p17125_p5 }
  0xb8   : > { %17133 = shalt.err (!%p17130_p9)
}
  0xb9   : > { %s17134_s24 = scalar_lea.vmem %s361_s22, 16  ;;  %s17141_s25 = scalar_lea.vmem %s361_s22, 32 }
  0xba   : > { %p17135_p4 = scmp.ne.s32.totalorder %s361_s22, %s17134_s24  ;;  %p17142_p3 = scmp.lt.s32.totalorder %s361_s22, %s361_s22 }
  0xbb   : > { %p17143_p11 = scmp.lt.s32.totalorder %s17141_s25, %s17134_s24 }
  0xbc   : > { %p17137_p10 = pnand %p17135_p4, %p17423_p8 }
  0xbd   : > { %p17144_p12 = por %p17143_p11, %p17142_p3 }
  0xbe   : > { %p17138_p1 = pneg %p17137_p10 }
  0xc0   : > { %p17145_p13 = pnand %p17144_p12, %p17138_p1 }
  0xc2   : > { %17148 = shalt.err (!%p17145_p13)
}
  0xc3   : > { %14485 = dma.hbm_to_vmem [thread:$0]  (!%p17407_p6), %s18013_s7, 16, %s361_s22, [#allocation14]  }
  0xc4   : > { %s17149_s26 = scalar_lea.hbm %s18015_s9, 16 }
  0xc5   : > { %p17150_p0 = scmp.ne.s32.totalorder %s18015_s9, %s17149_s26  ;;  %p17156_p7 = scmp.lt.u32.totalorder %s17149_s26, %s18015_s9 }
  0xc7   : > { %p17152_p2 = pnand %p17150_p0, %p17423_p8 }
  0xc9   : > { %p17153_p5 = pneg %p17152_p2 }
  0xcb   : > { %p17158_p9 = pnand %p17156_p7, %p17153_p5 }
  0xcd   : > { %17161 = shalt.err (!%p17158_p9)
}
  0xce   : > { %s17162_s17 = scalar_lea.vmem %s385_s27, 16  ;;  %s17169_s22 = scalar_lea.vmem %s385_s27, 32 }
  0xcf   : > { %p17163_p4 = scmp.ne.s32.totalorder %s385_s27, %s17162_s17  ;;  %p17170_p3 = scmp.lt.s32.totalorder %s385_s27, %s385_s27 }
  0xd0   : > { %p17171_p11 = scmp.lt.s32.totalorder %s17169_s22, %s17162_s17 }
  0xd1   : > { %p17165_p10 = pnand %p17163_p4, %p17423_p8 }
  0xd2   : > { %p17172_p12 = por %p17171_p11, %p17170_p3 }
  0xd3   : > { %p17166_p1 = pneg %p17165_p10 }
  0xd5   : > { %p17173_p13 = pnand %p17172_p12, %p17166_p1 }
  0xd7   : > { %17176 = shalt.err (!%p17173_p13)
}
  0xd8   : > { %14491 = dma.hbm_to_vmem [thread:$0]  (!%p17407_p6), %s18015_s9, 16, %s385_s27, [#allocation17]  }
  0xd9   : > { %s12556_s11 = sadd.s32 4294967294, %s17293_s16   ;;  %s17594_s23 = sadd.s32 1, %s17293_s16  }
  0xda   : > { %s59_s21 = sadd.s32 1, %s17289_s15  ;;  %s56_s18 = ssub.s32 %s17293_s16, %s17594_s23 }
  0xdb   : > { %p66_p8 = scmp.ne.s32.totalorder %s17289_s15, %s17285_s14  ;;  %p57_p0 = scmp.eq.s32.totalorder %s56_s18, 0 }
  0xdc   : > { %p67_p2 = scmp.eq.s32.totalorder %s17293_s16, 0  ;;  %p72_p5 = scmp.ne.s32.totalorder %s17285_s14, %s17281_s13 }
  0xdd   : > { %p264_p7 = scmp.eq.s32.totalorder %s17391_s19, 1  ;;  %p18031_p4 = scmp.eq.s32.totalorder %s17391_s19, 0 }
  0xde   : > { %s17606_s10 = scalar_select %p57_p0, %s17289_s15, %s59_s21  }
  0xdf   : > { %p68_p9 = por %p67_p2, %p66_p8  ;;  %p17610_p10 = por %p18031_p4, %p72_p5 }
  0xe0   : > { %p17614_p6 = por %p264_p7, %p66_p8  ;;  %p270_p1 = scmp.eq.s32.totalorder %s12556_s11, 1 }
  0xe1   : > { %p14509_p3 = scmp.lt.s32.totalorder %s17293_s16, 2  ;;  %s395_s26 = sand.u32 1, %s17289_s15  }
  0xe2   : > { %s18033_s27 = scalar_select %p17614_p6, 1, 0 }
  0xe3   : > { %p17620_p11 = por %p270_p1, %p72_p5  ;;  %s14421_s30 = smul.u32 376, %s395_s26 }
  0xe4   : > { %p17624_p12 = pnand %p14509_p3, %p68_p9  ;;  %s14422_s12 = smul.u32 6016, %s17293_s16 }
  0xe5   : > { %s18034_s28 = scalar_select %p17620_p11, 1, 0 }
  0xe6   : > { %s17632_s24 = scalar_lea.hbm %s18007_s1, %s14422_s12  ;;  %s399_s25 = scalar_lea.vmem [#allocation6], %s14421_s30 }
  0xe7   : > { %s407_s11 = sshll.u32 %s399_s25, 4  ;;  %s396_s21 = scalar_lea.sflag [#allocation3], %s395_s26  ;;  %s17634_s11 = int_to_ptr.vmem [resolvable:$true] %s407_s11 }
  0xe8   : > { %s17177_s18 = scalar_lea.hbm %s17632_s24, 6016  ;;  %p17179_p8 = pneg %p17624_p12 }
  0xe9   : > { %p17178_p13 = scmp.ne.s32.totalorder %s17632_s24, %s17177_s18  ;;  %s17182_s22 = scalar_lea.hbm %s18007_s1, 12032 }
  0xea   : > { %p17183_p5 = scmp.lt.u32.totalorder %s17632_s24, %s18007_s1  ;;  %p17184_p7 = scmp.lt.u32.totalorder %s17182_s22, %s17177_s18 }
  0xeb   : > { %p17180_p0 = pnand %p17179_p8, %p17178_p13  ;;  %p17186_p4 = scmp.lt.u32.totalorder %s17177_s18, %s17632_s24 }
  0xec   : > { %p17185_p9 = por %p17184_p7, %p17183_p5 }
  0xed   : > { %p17181_p2 = pneg %p17180_p0 }
  0xee   : > { %p17187_p1 = por %p17186_p4, %p17185_p9 }
  0xf0   : > { %p17188_p3 = pnand %p17187_p1, %p17181_p2 }
  0xf2   : > { %17191 = shalt.err (!%p17188_p3)
}
  0xf3   : > { %s17192_s26 = scalar_lea.vmem %s17634_s11, 6016  ;;  %s17310_s30 = smov [#allocation6]  }
  0xf4   : > { %p17193_p13 = scmp.ne.s32.totalorder %s17634_s11, %s17192_s26  ;;  %s17197_s25 = sshll.u32 %s17310_s30, 4  ;;  %s17198_s25 = int_to_ptr.vmem [resolvable:$false] %s17197_s25 }
  0xf5   : > { %s17199_s0 = scalar_lea.vmem %s17198_s25, 12032  ;;  %p17200_p6 = scmp.lt.s32.totalorder %s17634_s11, %s17198_s25 }
  0xf6   : > { %p17195_p0 = pnand %p17193_p13, %p17179_p8  ;;  %p17201_p5 = scmp.lt.s32.totalorder %s17199_s0, %s17192_s26 }
  0xf8   : > { %p17196_p11 = pneg %p17195_p0  ;;  %p17202_p7 = por %p17201_p5, %p17200_p6 }
  0xfa   : > { %p17203_p9 = pnand %p17202_p7, %p17196_p11 }
  0xfc   : > { %17206 = shalt.err (!%p17203_p9)
}
  0xfd   : > { %14495 = dma.hbm_to_vmem [thread:$0]  (!%p17624_p12), %s17632_s24, 6016, %s17634_s11, %s396_s21  }
  0xfe   : > { %s18036_s2 = sld [smem:[#allocation27_spill]] }
 0x104   : > { %p18037_p2 = scmp.ne.s32.totalorder %s18036_s2, 0 }
 0x105   : > { %p18038_p8 = scmp.eq.s32.totalorder (!%p18037_p2), %s17391_s19, 0 }
 0x106   : > { %416 = sbr.rel (%p18037_p2) target bundleno = 2720 (0xaa0), region = 60 }
 0x10d   : > { %17252 = dma.done.wait (%p18038_p8), [#allocation5], 16   ;;  %p18039_p4 = pmov %p18038_p8 }
 0x10e   : > { %s17668_s18 = sand.u32 1, %s17285_s14  }
 0x10f   : > { %17254 = vsyncadd (%p18039_p4), [#allocation5], 4294967280  ;;  %s14423_s17 = smul.u32 376, %s17668_s18  ;;  %s423_s29 = scalar_lea.sflag [#allocation3], %s17668_s18 }
 0x111   : > { %s17672_s12 = scalar_lea.vmem [#allocation6], %s14423_s17 }
 0x112   : > { %17256 = dma.done.wait (%p17610_p10), %s423_s29, 6016  }
 0x113   : > { %17258 = vsyncadd (%p17610_p10), %s423_s29, 4294961280  ;;  %p18040_p6 = pmov %p18039_p4 }
 0x114   : > { %p18041_p11 = pmov %p18039_p4 }
 0x115   : > { %17260 = dma.done.wait (%p18040_p6), [#allocation8], 192064  }
 0x116   : > { %17262 = vsyncadd (%p18041_p11), [#allocation8], 4294775232  ;;  %p18042_p12 = pmov %p18039_p4 }
 0x117   : > { %p18043_p1 = pmov %p18039_p4 }
 0x118   : > { %17264 = dma.done.wait (%p18042_p12), [#allocation11], 8224  }
 0x119   : > { %17266 = vsyncadd (%p18043_p1), [#allocation11], 4294959072  ;;  %p18044_p3 = pmov %p18043_p1 }
 0x11a   : > { %p18045_p13 = pmov %p18043_p1 }
 0x11b   : > { %17268 = dma.done.wait (%p18044_p3), [#allocation14], 2064  }
 0x11c   : > { %17270 = vsyncadd (%p18045_p13), [#allocation14], 4294965232  ;;  %p18046_p10 = pmov %p18043_p1 }
 0x11d   : > { %p18047_p0 = pmov %p18043_p1 }
 0x11e   : > { %17272 = dma.done.wait (%p18046_p10), [#allocation17], 1040  }
 0x11f   : > { %17274 = vsyncadd (%p18047_p0), [#allocation17], 4294966256 }
 0x120   : > { %463 = sfence }
 0x121   : > { %v14570_v0 = vld [vmem:[#allocation7 + $0x4] ss:$16 sps:$4 sm:$0xff]   ;;  %v17311_v2 = vmov 0   ;;  %v14574_v3 = vld [vmem:[#allocation7] ss:$16 sps:$4 sm:$0xff]   ;;  %vm9613_vm0 = vcmask 916480  }
 0x122   : > { %v14572_v1 = vld [vmem:[#allocation7 + $0x2e04] ss:$16 sps:$4 sm:$0xff]   ;;  %10592 = vmatprep.mubr.bf16.mxu1 %v17311_v2  ;;  %9617 = vmatprep.subr.bf16.mxu0 %v14570_v0  ;;  %v14575_v4 = vld [vmem:[#allocation7 + $0x2e00] ss:$16 sps:$4 sm:$0xff]   ;;  %v14616_v31 = vld [vmem:[#allocation7 + $0xc] ss:$16 sps:$4 sm:$0xff]  }
 0x123   : > { %10560 = vmatprep.subr.bf16.mxu1 %v14572_v1  ;;  %v14576_v5 = vld [vmem:[#allocation7 + $0x24] ss:$16 sps:$4 sm:$0xff]   ;;  %9618 = vmatpush1.bf16.msra.mxu0 %v14574_v3  ;;  %v14580_v7 = vld [vmem:[#allocation7 + $0x20] ss:$16 sps:$4 sm:$0xff]   ;;  %v14614_v32 = vld [vmem:[#allocation7 + $0x8] ss:$16 sps:$4 sm:$0xff]  }
 0x124   : > { %10561 = vmatpush1.bf16.msra.mxu1 %v14575_v4  ;;  %v14578_v6 = vld [vmem:[#allocation7 + $0x2e24] ss:$16 sps:$4 sm:$0xff]   ;;  %9619 = vmatprep.subr.bf16.mxu0 %v14576_v5  ;;  %v14581_v8 = vld [vmem:[#allocation7 + $0x2e20] ss:$16 sps:$4 sm:$0xff]   ;;  %v14622_v36 = vld [vmem:[#allocation7 + $0x2c] ss:$16 sps:$4 sm:$0xff]  }
 0x125   : > { %10562 = vmatprep.subr.bf16.mxu1 %v14578_v6  ;;  %v14582_v9 = vld [vmem:[#allocation7 + $0x44] ss:$16 sps:$4 sm:$0xff]   ;;  %v14586_v11 = vld [vmem:[#allocation7 + $0x40] ss:$16 sps:$4 sm:$0xff]   ;;  %v14620_v37 = vld [vmem:[#allocation7 + $0x28] ss:$16 sps:$4 sm:$0xff]  }
 0x126   : > { %v14584_v10 = vld [vmem:[#allocation7 + $0x2e44] ss:$16 sps:$4 sm:$0xff]   ;;  %v14587_v12 = vld [vmem:[#allocation7 + $0x2e40] ss:$16 sps:$4 sm:$0xff]   ;;  %v14628_v40 = vld [vmem:[#allocation7 + $0x4c] ss:$16 sps:$4 sm:$0xff]  }
 0x127   : > { %9620 = vmatpush1.bf16.msra.mxu0 %v14580_v7  ;;  %v14588_v13 = vld [vmem:[#allocation7 + $0x64] ss:$16 sps:$4 sm:$0xff]   ;;  %v14592_v15 = vld [vmem:[#allocation7 + $0x60] ss:$16 sps:$4 sm:$0xff]   ;;  %v14626_v41 = vld [vmem:[#allocation7 + $0x48] ss:$16 sps:$4 sm:$0xff]  }
 0x128   : > { %10563 = vmatpush1.bf16.msra.mxu1 %v14581_v8  ;;  %9621 = vmatprep.subr.bf16.mxu0 %v14582_v9  ;;  %v14590_v14 = vld [vmem:[#allocation7 + $0x2e64] ss:$16 sps:$4 sm:$0xff]   ;;  %v14593_v16 = vld [vmem:[#allocation7 + $0x2e60] ss:$16 sps:$4 sm:$0xff]   ;;  %v14634_v44 = vld [vmem:[#allocation7 + $0x6c] ss:$16 sps:$4 sm:$0xff]  }
 0x129   : > { %10564 = vmatprep.subr.bf16.mxu1 %v14584_v10  ;;  %v14594_v17 = vld [vmem:[#allocation7 + $0x84] ss:$16 sps:$4 sm:$0xff]   ;;  %v14598_v19 = vld [vmem:[#allocation7 + $0x80] ss:$16 sps:$4 sm:$0xff]   ;;  %v14632_v45 = vld [vmem:[#allocation7 + $0x68] ss:$16 sps:$4 sm:$0xff]  }
 0x12a   : > { %v14596_v18 = vld [vmem:[#allocation7 + $0x2e84] ss:$16 sps:$4 sm:$0xff]   ;;  %v14599_v20 = vld [vmem:[#allocation7 + $0x2e80] ss:$16 sps:$4 sm:$0xff]   ;;  %v14640_v48 = vld [vmem:[#allocation7 + $0x8c] ss:$16 sps:$4 sm:$0xff]  }
 0x12b   : > { %9622 = vmatpush1.bf16.msra.mxu0 %v14586_v11  ;;  %v14600_v21 = vld [vmem:[#allocation7 + $0xa4] ss:$16 sps:$4 sm:$0xff]   ;;  %v14604_v23 = vld [vmem:[#allocation7 + $0xa0] ss:$16 sps:$4 sm:$0xff]   ;;  %v14638_v50 = vld [vmem:[#allocation7 + $0x88] ss:$16 sps:$4 sm:$0xff]  }
 0x12c   : > { %10565 = vmatpush1.bf16.msra.mxu1 %v14587_v12  ;;  %9623 = vmatprep.subr.bf16.mxu0 %v14588_v13  ;;  %v14602_v22 = vld [vmem:[#allocation7 + $0x2ea4] ss:$16 sps:$4 sm:$0xff]   ;;  %v14605_v24 = vld [vmem:[#allocation7 + $0x2ea0] ss:$16 sps:$4 sm:$0xff]   ;;  %v14646_v54 = vld [vmem:[#allocation7 + $0xac] ss:$16 sps:$4 sm:$0xff]  }
 0x12d   : > { %10566 = vmatprep.subr.bf16.mxu1 %v14590_v14  ;;  %v14606_v25 = vld [vmem:[#allocation7 + $0xc4] ss:$16 sps:$4 sm:$0xff]   ;;  %v14610_v27 = vld [vmem:[#allocation7 + $0xc0] ss:$16 sps:$4 sm:$0xff]   ;;  %v14644_v55 = vld [vmem:[#allocation7 + $0xa8] ss:$16 sps:$4 sm:$0xff]  }
 0x12e   : > { %v14608_v26 = vld [vmem:[#allocation7 + $0x2ec4] ss:$16 sps:$4 sm:$0xff]   ;;  %v14611_v28 = vld [vmem:[#allocation7 + $0x2ec0] ss:$16 sps:$4 sm:$0xff]   ;;  %v14652_v58 = vld [vmem:[#allocation7 + $0xcc] ss:$16 sps:$4 sm:$0xff]  }
 0x12f   : > { %9624 = vmatpush1.bf16.msra.mxu0 %v14592_v15  ;;  %v14612_v29 = vld [vmem:[#allocation7 + $0xe4] ss:$16 sps:$4 sm:$0xff]   ;;  %v14617_v34 = vld [vmem:[#allocation7 + $0xe0] ss:$16 sps:$4 sm:$0xff]   ;;  %v14650_v59 = vld [vmem:[#allocation7 + $0xc8] ss:$16 sps:$4 sm:$0xff]  }
 0x130   : > { %10567 = vmatpush1.bf16.msra.mxu1 %v14593_v16  ;;  %9625 = vmatprep.subr.bf16.mxu0 %v14594_v17  ;;  %v543_v30 = vld [vmem:[%s17672_s12 + $0x170] sm:$0xff]  ;;  %v498_v49 = vld [vmem:[%s17672_s12 + $0x8] sm:$0xff]  ;;  %v497_v7 = vld [vmem:[%s17672_s12] sm:$0xff]  ;;  %s11589_s20 = sld [smem:[#allocation2]]  ;;  %s14146_s24 = sld [smem:[#allocation2 + $0x1]]  ;;  %vm17313_vm7 = vmmov 0  }
 0x131   : > { %10568 = vmatprep.subr.bf16.mxu1 %v14596_v18  ;;  %v17696_v33 = vpack.c.bf16 %v543_v30, %v543_v30  ;;  %v14618_v35 = vld [vmem:[#allocation7 + $0x104] ss:$16 sps:$4 sm:$0xff]   ;;  %v14623_v38 = vld [vmem:[#allocation7 + $0x100] ss:$16 sps:$4 sm:$0xff]   ;;  %v545_v52 = vpack.c.bf16 %v498_v49, %v498_v49  ;;  %v14658_v62 = vld [vmem:[#allocation7 + $0xec] ss:$16 sps:$4 sm:$0xff]   ;;  %v17702_v10 = vpack.c.bf16 %v497_v7, %v497_v7 }
 0x132   : > { %v14624_v39 = vld [vmem:[#allocation7 + $0x124] ss:$16 sps:$4 sm:$0xff]   ;;  %v14629_v42 = vld [vmem:[#allocation7 + $0x120] ss:$16 sps:$4 sm:$0xff]   ;;  %v14656_v63 = vld [vmem:[#allocation7 + $0xe8] ss:$16 sps:$4 sm:$0xff]  }
 0x133   : > { %9626 = vmatpush1.bf16.msra.mxu0 %v14598_v19  ;;  %v14630_v43 = vld [vmem:[#allocation7 + $0x144] ss:$16 sps:$4 sm:$0xff]   ;;  %v14635_v46 = vld [vmem:[#allocation7 + $0x140] ss:$16 sps:$4 sm:$0xff]   ;;  %9649 = vmatprep.mubr.bf16.mxu0 %v545_v52  ;;  %v14664_v3 = vld [vmem:[#allocation7 + $0x10c] ss:$16 sps:$4 sm:$0xff]  }
 0x134   : > { %10569 = vmatpush1.bf16.msra.mxu1 %v14599_v20  ;;  %9627 = vmatprep.subr.bf16.mxu0 %v14600_v21  ;;  %v14636_v47 = vld [vmem:[#allocation7 + $0x164] ss:$16 sps:$4 sm:$0xff]   ;;  %v14641_v51 = vld [vmem:[#allocation7 + $0x160] ss:$16 sps:$4 sm:$0xff]   ;;  %v14662_v4 = vld [vmem:[#allocation7 + $0x108] ss:$16 sps:$4 sm:$0xff]  }
 0x135   : > { %10570 = vmatprep.subr.bf16.mxu1 %v14602_v22  ;;  %v14642_v53 = vld [vmem:[#allocation7 + $0x184] ss:$16 sps:$4 sm:$0xff]   ;;  %v14647_v56 = vld [vmem:[#allocation7 + $0x180] ss:$16 sps:$4 sm:$0xff]   ;;  %v14671_v8 = vld [vmem:[#allocation7 + $0x12c] ss:$16 sps:$4 sm:$0xff]  }
 0x136   : > { %v14648_v57 = vld [vmem:[#allocation7 + $0x1a4] ss:$16 sps:$4 sm:$0xff]   ;;  %v14653_v60 = vld [vmem:[#allocation7 + $0x1a0] ss:$16 sps:$4 sm:$0xff]   ;;  %v14669_v11 = vld [vmem:[#allocation7 + $0x128] ss:$16 sps:$4 sm:$0xff]  }
 0x137   : > { %9628 = vmatpush1.bf16.msra.mxu0 %v14604_v23  ;;  %v14654_v61 = vld [vmem:[#allocation7 + $0x1c4] ss:$16 sps:$4 sm:$0xff]   ;;  %v14659_v0 = vld [vmem:[#allocation7 + $0x1c0] ss:$16 sps:$4 sm:$0xff]   ;;  %v14677_v13 = vld [vmem:[#allocation7 + $0x14c] ss:$16 sps:$4 sm:$0xff]  }
 0x138   : > { %10571 = vmatpush1.bf16.msra.mxu1 %v14605_v24  ;;  %9629 = vmatprep.subr.bf16.mxu0 %v14606_v25  ;;  %v14660_v1 = vld [vmem:[#allocation7 + $0x1e4] ss:$16 sps:$4 sm:$0xff]   ;;  %v14665_v5 = vld [vmem:[#allocation7 + $0x1e0] ss:$16 sps:$4 sm:$0xff]   ;;  %v14675_v15 = vld [vmem:[#allocation7 + $0x148] ss:$16 sps:$4 sm:$0xff]  }
 0x139   : > { %10572 = vmatprep.subr.bf16.mxu1 %v14608_v26  ;;  %v14668_v6 = vld [vmem:[#allocation7 + $0x204] ss:$16 sps:$4 sm:$0xff]   ;;  %v14666_v9 = vld [vmem:[#allocation7 + $0x200] ss:$16 sps:$4 sm:$0xff]   ;;  %v14683_v17 = vld [vmem:[#allocation7 + $0x16c] ss:$16 sps:$4 sm:$0xff]  }
 0x13a   : > { %v14674_v12 = vld [vmem:[#allocation7 + $0x224] ss:$16 sps:$4 sm:$0xff]   ;;  %v14672_v14 = vld [vmem:[#allocation7 + $0x220] ss:$16 sps:$4 sm:$0xff]   ;;  %v14681_v19 = vld [vmem:[#allocation7 + $0x168] ss:$16 sps:$4 sm:$0xff]  }
 0x13b   : > { %9630 = vmatpush1.bf16.msra.mxu0 %v14610_v27  ;;  %v14680_v16 = vld [vmem:[#allocation7 + $0x244] ss:$16 sps:$4 sm:$0xff]   ;;  %v14678_v18 = vld [vmem:[#allocation7 + $0x240] ss:$16 sps:$4 sm:$0xff]   ;;  %v14689_v21 = vld [vmem:[#allocation7 + $0x18c] ss:$16 sps:$4 sm:$0xff]  }
 0x13c   : > { %10573 = vmatpush1.bf16.msra.mxu1 %v14611_v28  ;;  %9631 = vmatprep.subr.bf16.mxu0 %v14612_v29  ;;  %v14686_v20 = vld [vmem:[#allocation7 + $0x264] ss:$16 sps:$4 sm:$0xff]   ;;  %v14684_v22 = vld [vmem:[#allocation7 + $0x260] ss:$16 sps:$4 sm:$0xff]   ;;  %v14687_v23 = vld [vmem:[#allocation7 + $0x188] ss:$16 sps:$4 sm:$0xff]  }
 0x13d   : > { %10601 = vmatprep.subr.bf16.mxu1 %v14616_v31  ;;  %v14692_v24 = vld [vmem:[#allocation7 + $0x284] ss:$16 sps:$4 sm:$0xff]   ;;  %v14695_v25 = vld [vmem:[#allocation7 + $0x1ac] ss:$16 sps:$4 sm:$0xff]   ;;  %v14690_v26 = vld [vmem:[#allocation7 + $0x280] ss:$16 sps:$4 sm:$0xff]  }
 0x13e   : > { %v14693_v27 = vld [vmem:[#allocation7 + $0x1a8] ss:$16 sps:$4 sm:$0xff]   ;;  %v14698_v28 = vld [vmem:[#allocation7 + $0x2a4] ss:$16 sps:$4 sm:$0xff]   ;;  %v14701_v29 = vld [vmem:[#allocation7 + $0x1cc] ss:$16 sps:$4 sm:$0xff]  }
 0x13f   : > { %14080 = vmatmul.mubr.msk.bf16.vlgmr.msra.gmra.mrb[0].mxu1 %vm9613_vm0, %v17696_v33  ;;  %9632 = vmatpush1.bf16.msra.mxu0 %v14617_v34  ;;  %v14696_v30 = vld [vmem:[#allocation7 + $0x2a0] ss:$16 sps:$4 sm:$0xff]   ;;  %v14699_v31 = vld [vmem:[#allocation7 + $0x1c8] ss:$16 sps:$4 sm:$0xff]   ;;  %v14707_v34 = vld [vmem:[#allocation7 + $0x1ec] ss:$16 sps:$4 sm:$0xff]  }
 0x140   : > { %10602 = vmatpush1.bf16.msra.mxu1 %v14614_v32  ;;  %9633 = vmatprep.subr.bf16.mxu0 %v14618_v35  ;;  %v14704_v32 = vld [vmem:[#allocation7 + $0x2c4] ss:$16 sps:$4 sm:$0xff]   ;;  %v14720_v49 = vld [vmem:[#allocation7 + $0x320] ss:$16 sps:$4 sm:$0xff]   ;;  %v14753_v7 = vld [vmem:[#allocation7 + $0x2e8] ss:$16 sps:$4 sm:$0xff]  }
 0x141   : > { %10603 = vmatprep.subr.bf16.mxu1 %v14622_v36  ;;  %10633 = vmatprep.mubr.bf16.mxu1 %v545_v52  ;;  %v500_v35 = vld [vmem:[%s17672_s12 + $0x18] sm:$0xff]  ;;  %s14164_s11 = sld [smem:[#allocation2 + $0x2]]  ;;  %s12579_s21 = sshll.u32 %s17668_s18, 3 }
 0x142   : > { %v14702_v36 = vld [vmem:[#allocation7 + $0x2c0] ss:$16 sps:$4 sm:$0xff]   ;;  %v14731_v52 = vld [vmem:[#allocation7 + $0x26c] ss:$16 sps:$4 sm:$0xff]   ;;  %s14175_s22 = sshll.u32 %s17391_s19, 7  ;;  %s495_s26 = scalar_lea.vmem [#allocation19], %s12579_s21 }
 0x143   : > { %9634 = vmatpush1.bf16.msra.mxu0 %v14623_v38  ;;  %v14705_v38 = vld [vmem:[#allocation7 + $0x1e8] ss:$16 sps:$4 sm:$0xff]   ;;  %s12398_s30 = sshll.u32 %s495_s26, 4  ;;  %s18048_s2 = sld [smem:[#allocation30_spill]]  ;;  %s17964_s30 = int_to_ptr.vmem [resolvable:$true] %s12398_s30 }
 0x144   : > { %10604 = vmatpush1.bf16.msra.mxu1 %v14620_v37  ;;  %9635 = vmatprep.subr.bf16.mxu0 %v14624_v39  ;;  %v547_v37 = vpack.c.bf16 %v500_v35, %v500_v35  ;;  %v14710_v39 = vld [vmem:[#allocation7 + $0x2e4] ss:$16 sps:$4 sm:$0xff]   ;;  %v14786_v35 = vld [vmem:[#allocation7 + $0x480] ss:$16 sps:$4 sm:$0xff]   ;;  %s12385_s29 = scalar_lea.sflag [#allocation4], %s17668_s18  ;;  %s17207_s19 = scalar_lea.vmem %s17964_s30, 128 }
 0x145   : > { %10605 = vmatprep.subr.bf16.mxu1 %v14628_v40  ;;  %v14713_v40 = vld [vmem:[#allocation7 + $0x20c] ss:$16 sps:$4 sm:$0xff]   ;;  %p17208_p5 = scmp.ne.s32.totalorder %s17964_s30, %s17207_s19  ;;  %p18049_p7 = scmp.ne.s32.totalorder %s18033_s27, 0 }
 0x147   : > { %9636 = vmatpush1.bf16.msra.mxu0 %v14629_v42  ;;  %v14711_v42 = vld [vmem:[#allocation7 + $0x208] ss:$16 sps:$4 sm:$0xff]   ;;  %p17209_p9 = pnand %p17208_p5, %p18049_p7 }
 0x148   : > { %10606 = vmatpush1.bf16.msra.mxu1 %v14626_v41  ;;  %9637 = vmatprep.subr.bf16.mxu0 %v14630_v43  ;;  %v14708_v41 = vld [vmem:[#allocation7 + $0x2e0] ss:$16 sps:$4 sm:$0xff]   ;;  %v14716_v43 = vld [vmem:[#allocation7 + $0x304] ss:$16 sps:$4 sm:$0xff]  }
 0x149   : > { %10607 = vmatprep.subr.bf16.mxu1 %v14634_v44  ;;  %v14719_v44 = vld [vmem:[#allocation7 + $0x22c] ss:$16 sps:$4 sm:$0xff]   ;;  %s17962_s17 = scalar_lea.hbm %s18048_s2, %s14175_s22  ;;  %p17210_p2 = pneg %p17209_p9 }
 0x14b   : > { %9638 = vmatpush1.bf16.msra.mxu0 %v14635_v46  ;;  %v14717_v46 = vld [vmem:[#allocation7 + $0x228] ss:$16 sps:$4 sm:$0xff]  }
 0x14c   : > { %10608 = vmatpush1.bf16.msra.mxu1 %v14632_v45  ;;  %9639 = vmatprep.subr.bf16.mxu0 %v14636_v47  ;;  %v14714_v45 = vld [vmem:[#allocation7 + $0x300] ss:$16 sps:$4 sm:$0xff]   ;;  %v14722_v47 = vld [vmem:[#allocation7 + $0x324] ss:$16 sps:$4 sm:$0xff]  }
 0x14d   : > { %10609 = vmatprep.subr.bf16.mxu1 %v14640_v48  ;;  %v14725_v48 = vld [vmem:[#allocation7 + $0x24c] ss:$16 sps:$4 sm:$0xff]  }
 0x14f   : > { %9640 = vmatpush1.bf16.msra.mxu0 %v14641_v51  ;;  %v14728_v51 = vld [vmem:[#allocation7 + $0x344] ss:$16 sps:$4 sm:$0xff]  }
 0x150   : > { %10610 = vmatpush1.bf16.msra.mxu1 %v14638_v50  ;;  %9641 = vmatprep.subr.bf16.mxu0 %v14642_v53  ;;  %v14723_v50 = vld [vmem:[#allocation7 + $0x248] ss:$16 sps:$4 sm:$0xff]   ;;  %v14726_v53 = vld [vmem:[#allocation7 + $0x340] ss:$16 sps:$4 sm:$0xff]  }
 0x151   : > { %10611 = vmatprep.subr.bf16.mxu1 %v14646_v54  ;;  %v14729_v54 = vld [vmem:[#allocation7 + $0x268] ss:$16 sps:$4 sm:$0xff]  }
 0x153   : > { %9642 = vmatpush1.bf16.msra.mxu0 %v14647_v56  ;;  %v14737_v56 = vld [vmem:[#allocation7 + $0x28c] ss:$16 sps:$4 sm:$0xff]  }
 0x154   : > { %10612 = vmatpush1.bf16.msra.mxu1 %v14644_v55  ;;  %9643 = vmatprep.subr.bf16.mxu0 %v14648_v57  ;;  %v14734_v55 = vld [vmem:[#allocation7 + $0x364] ss:$16 sps:$4 sm:$0xff]   ;;  %v14732_v57 = vld [vmem:[#allocation7 + $0x360] ss:$16 sps:$4 sm:$0xff]  }
 0x155   : > { %10613 = vmatprep.subr.bf16.mxu1 %v14652_v58  ;;  %v14735_v58 = vld [vmem:[#allocation7 + $0x288] ss:$16 sps:$4 sm:$0xff]  }
 0x157   : > { %9644 = vmatpush1.bf16.msra.mxu0 %v14653_v60  ;;  %v14743_v60 = vld [vmem:[#allocation7 + $0x2ac] ss:$16 sps:$4 sm:$0xff]  }
 0x158   : > { %10614 = vmatpush1.bf16.msra.mxu1 %v14650_v59  ;;  %9645 = vmatprep.subr.bf16.mxu0 %v14654_v61  ;;  %v14740_v59 = vld [vmem:[#allocation7 + $0x384] ss:$16 sps:$4 sm:$0xff]   ;;  %v14738_v61 = vld [vmem:[#allocation7 + $0x380] ss:$16 sps:$4 sm:$0xff]  }
 0x159   : > { %10615 = vmatprep.subr.bf16.mxu1 %v14658_v62  ;;  %v14741_v62 = vld [vmem:[#allocation7 + $0x2a8] ss:$16 sps:$4 sm:$0xff]  }
 0x15b   : > { %9646 = vmatpush1.bf16.msra.mxu0 %v14659_v0  ;;  %v14749_v0 = vld [vmem:[#allocation7 + $0x2cc] ss:$16 sps:$4 sm:$0xff]  }
 0x15c   : > { %10616 = vmatpush1.bf16.msra.mxu1 %v14656_v63  ;;  %9647 = vmatprep.subr.bf16.mxu0 %v14660_v1  ;;  %v14746_v63 = vld [vmem:[#allocation7 + $0x3a4] ss:$16 sps:$4 sm:$0xff]   ;;  %v14744_v1 = vld [vmem:[#allocation7 + $0x3a0] ss:$16 sps:$4 sm:$0xff]  }
 0x15d   : > { %10617 = vmatprep.subr.bf16.mxu1 %v14664_v3  ;;  %v14747_v3 = vld [vmem:[#allocation7 + $0x2c8] ss:$16 sps:$4 sm:$0xff]  }
 0x15f   : > { %9648 = vmatpush1.bf16.msra.mxu0 %v14665_v5  ;;  %v14755_v5 = vld [vmem:[#allocation7 + $0x2ec] ss:$16 sps:$4 sm:$0xff]  }
 0x160   : > { %10618 = vmatpush1.bf16.msra.mxu1 %v14662_v4  ;;  %9658 = vmatprep.subr.bf16.mxu0 %v14668_v6  ;;  %v14752_v4 = vld [vmem:[#allocation7 + $0x3c4] ss:$16 sps:$4 sm:$0xff]   ;;  %v14750_v6 = vld [vmem:[#allocation7 + $0x3c0] ss:$16 sps:$4 sm:$0xff]  }
 0x161   : > { %10619 = vmatprep.subr.bf16.mxu1 %v14671_v8  ;;  %v14758_v8 = vld [vmem:[#allocation7 + $0x3e4] ss:$16 sps:$4 sm:$0xff]  }
 0x162   : > { %9650 = vmatmul.mubr.bf16.vlgmr.msra.gmra.mrb[0].mxu0 %v17702_v10 }
 0x163   : > { %9659 = vmatpush1.bf16.msra.mxu0 %v14666_v9  ;;  %9690 = vmatprep.mubr.bf16.mxu0 %v547_v37  ;;  %v14761_v9 = vld [vmem:[#allocation7 + $0x30c] ss:$16 sps:$4 sm:$0xff]  }
 0x164   : > { %10620 = vmatpush1.bf16.msra.mxu1 %v14669_v11  ;;  %9660 = vmatprep.subr.bf16.mxu0 %v14674_v12  ;;  %v14759_v11 = vld [vmem:[#allocation7 + $0x308] ss:$16 sps:$4 sm:$0xff]  }
 0x165   : > { %10621 = vmatprep.subr.bf16.mxu1 %v14677_v13  ;;  %v499_v12 = vld [vmem:[%s17672_s12 + $0x10] sm:$0xff] }
 0x166   : > { %v14764_v13 = vld [vmem:[#allocation7 + $0x404] ss:$16 sps:$4 sm:$0xff]  }
 0x167   : > { %9661 = vmatpush1.bf16.msra.mxu0 %v14672_v14  ;;  %v14767_v14 = vld [vmem:[#allocation7 + $0x32c] ss:$16 sps:$4 sm:$0xff]  }
 0x168   : > { %10622 = vmatpush1.bf16.msra.mxu1 %v14675_v15  ;;  %9662 = vmatprep.subr.bf16.mxu0 %v14680_v16  ;;  %v14762_v15 = vld [vmem:[#allocation7 + $0x400] ss:$16 sps:$4 sm:$0xff]   ;;  %v17708_v16 = vpack.c.bf16 %v499_v12, %v499_v12 }
 0x169   : > { %10623 = vmatprep.subr.bf16.mxu1 %v14683_v17  ;;  %v14765_v17 = vld [vmem:[#allocation7 + $0x328] ss:$16 sps:$4 sm:$0xff]   ;;  %v14846_v12 = vld [vmem:[#allocation7 + $0x5c0] ss:$16 sps:$4 sm:$0xff]  }
 0x16b   : > { %9663 = vmatpush1.bf16.msra.mxu0 %v14678_v18  ;;  %v14770_v18 = vld [vmem:[#allocation7 + $0x424] ss:$16 sps:$4 sm:$0xff]  }
 0x16c   : > { %10624 = vmatpush1.bf16.msra.mxu1 %v14681_v19  ;;  %9664 = vmatprep.subr.bf16.mxu0 %v14686_v20  ;;  %v14773_v19 = vld [vmem:[#allocation7 + $0x34c] ss:$16 sps:$4 sm:$0xff]  }
 0x16d   : > { %10625 = vmatprep.subr.bf16.mxu1 %v14689_v21  ;;  %v502_v20 = vld [vmem:[%s17672_s12 + $0x28] sm:$0xff] }
 0x16e   : > { %v17711_v21 = vpack.c.bf16 %v502_v20, %v502_v20  ;;  %v14863_v20 = vld [vmem:[#allocation7 + $0x52c] ss:$16 sps:$4 sm:$0xff]  }
 0x16f   : > { %9665 = vmatpush1.bf16.msra.mxu0 %v14684_v22  ;;  %v14768_v22 = vld [vmem:[#allocation7 + $0x420] ss:$16 sps:$4 sm:$0xff]  }
 0x170   : > { %10626 = vmatpush1.bf16.msra.mxu1 %v14687_v23  ;;  %9666 = vmatprep.subr.bf16.mxu0 %v14692_v24  ;;  %v14771_v23 = vld [vmem:[#allocation7 + $0x348] ss:$16 sps:$4 sm:$0xff]   ;;  %v14776_v24 = vld [vmem:[#allocation7 + $0x444] ss:$16 sps:$4 sm:$0xff]  }
 0x171   : > { %10627 = vmatprep.subr.bf16.mxu1 %v14695_v25  ;;  %v14779_v25 = vld [vmem:[#allocation7 + $0x36c] ss:$16 sps:$4 sm:$0xff]  }
 0x173   : > { %9667 = vmatpush1.bf16.msra.mxu0 %v14690_v26  ;;  %v14774_v26 = vld [vmem:[#allocation7 + $0x440] ss:$16 sps:$4 sm:$0xff]  }
 0x174   : > { %10628 = vmatpush1.bf16.msra.mxu1 %v14693_v27  ;;  %9668 = vmatprep.subr.bf16.mxu0 %v14698_v28  ;;  %v14777_v27 = vld [vmem:[#allocation7 + $0x368] ss:$16 sps:$4 sm:$0xff]   ;;  %v14782_v28 = vld [vmem:[#allocation7 + $0x464] ss:$16 sps:$4 sm:$0xff]  }
 0x175   : > { %10629 = vmatprep.subr.bf16.mxu1 %v14701_v29  ;;  %v14785_v29 = vld [vmem:[#allocation7 + $0x38c] ss:$16 sps:$4 sm:$0xff]  }
 0x177   : > { %9669 = vmatpush1.bf16.msra.mxu0 %v14696_v30  ;;  %v14780_v30 = vld [vmem:[#allocation7 + $0x460] ss:$16 sps:$4 sm:$0xff]  }
 0x178   : > { %10630 = vmatpush1.bf16.msra.mxu1 %v14699_v31  ;;  %9670 = vmatprep.subr.bf16.mxu0 %v14704_v32  ;;  %v14783_v31 = vld [vmem:[#allocation7 + $0x388] ss:$16 sps:$4 sm:$0xff]   ;;  %v14788_v32 = vld [vmem:[#allocation7 + $0x484] ss:$16 sps:$4 sm:$0xff]  }
 0x179   : > { %10631 = vmatprep.subr.bf16.mxu1 %v14707_v34  ;;  %v14791_v34 = vld [vmem:[#allocation7 + $0x3ac] ss:$16 sps:$4 sm:$0xff]  }
 0x17b   : > { %9671 = vmatpush1.bf16.msra.mxu0 %v14702_v36  ;;  %v14789_v36 = vld [vmem:[#allocation7 + $0x3a8] ss:$16 sps:$4 sm:$0xff]  }
 0x17c   : > { %10632 = vmatpush1.bf16.msra.mxu1 %v14705_v38  ;;  %9672 = vmatprep.subr.bf16.mxu0 %v14710_v39  ;;  %v14797_v38 = vld [vmem:[#allocation7 + $0x3cc] ss:$16 sps:$4 sm:$0xff]   ;;  %v14792_v39 = vld [vmem:[#allocation7 + $0x4a0] ss:$16 sps:$4 sm:$0xff]  }
 0x17d   : > { %10642 = vmatprep.subr.bf16.mxu1 %v14713_v40  ;;  %v14795_v40 = vld [vmem:[#allocation7 + $0x3c8] ss:$16 sps:$4 sm:$0xff]  }
 0x17f   : > { %10634 = vmatmul.mubr.bf16.vlgmr.msra.gmra.mrb[4].mxu1 %v17702_v10  ;;  %9673 = vmatpush1.bf16.msra.mxu0 %v14708_v41  ;;  %v14756_v10 = vld [vmem:[#allocation7 + $0x3e0] ss:$16 sps:$4 sm:$0xff]   ;;  %v14800_v41 = vld [vmem:[#allocation7 + $0x4c4] ss:$16 sps:$4 sm:$0xff]  }
 0x180   : > { %10643 = vmatpush1.bf16.msra.mxu1 %v14711_v42  ;;  %9674 = vmatprep.subr.bf16.mxu0 %v14716_v43  ;;  %v14803_v42 = vld [vmem:[#allocation7 + $0x3ec] ss:$16 sps:$4 sm:$0xff]   ;;  %v14798_v43 = vld [vmem:[#allocation7 + $0x4c0] ss:$16 sps:$4 sm:$0xff]  }
 0x181   : > { %10644 = vmatprep.subr.bf16.mxu1 %v14719_v44  ;;  %10674 = vmatprep.mubr.bf16.mxu1 %v547_v37  ;;  %v14794_v37 = vld [vmem:[#allocation7 + $0x4a4] ss:$16 sps:$4 sm:$0xff]   ;;  %v14801_v44 = vld [vmem:[#allocation7 + $0x3e8] ss:$16 sps:$4 sm:$0xff]  }
 0x183   : > { %9675 = vmatpush1.bf16.msra.mxu0 %v14714_v45  ;;  %v14806_v45 = vld [vmem:[#allocation7 + $0x4e4] ss:$16 sps:$4 sm:$0xff]  }
 0x184   : > { %10645 = vmatpush1.bf16.msra.mxu1 %v14717_v46  ;;  %9676 = vmatprep.subr.bf16.mxu0 %v14722_v47  ;;  %v14809_v46 = vld [vmem:[#allocation7 + $0x40c] ss:$16 sps:$4 sm:$0xff]   ;;  %v14804_v47 = vld [vmem:[#allocation7 + $0x4e0] ss:$16 sps:$4 sm:$0xff]  }
 0x185   : > { %10646 = vmatprep.subr.bf16.mxu1 %v14725_v48  ;;  %v14807_v48 = vld [vmem:[#allocation7 + $0x408] ss:$16 sps:$4 sm:$0xff]  }
 0x187   : > { %9677 = vmatpush1.bf16.msra.mxu0 %v14720_v49  ;;  %v14812_v49 = vld [vmem:[#allocation7 + $0x504] ss:$16 sps:$4 sm:$0xff]  }
 0x188   : > { %10647 = vmatpush1.bf16.msra.mxu1 %v14723_v50  ;;  %9678 = vmatprep.subr.bf16.mxu0 %v14728_v51  ;;  %v14815_v50 = vld [vmem:[#allocation7 + $0x42c] ss:$16 sps:$4 sm:$0xff]   ;;  %v14810_v51 = vld [vmem:[#allocation7 + $0x500] ss:$16 sps:$4 sm:$0xff]  }
 0x189   : > { %10648 = vmatprep.subr.bf16.mxu1 %v14731_v52  ;;  %v14813_v52 = vld [vmem:[#allocation7 + $0x428] ss:$16 sps:$4 sm:$0xff]  }
 0x18b   : > { %9679 = vmatpush1.bf16.msra.mxu0 %v14726_v53  ;;  %v14818_v53 = vld [vmem:[#allocation7 + $0x524] ss:$16 sps:$4 sm:$0xff]  }
 0x18c   : > { %10649 = vmatpush1.bf16.msra.mxu1 %v14729_v54  ;;  %9680 = vmatprep.subr.bf16.mxu0 %v14734_v55  ;;  %v14821_v54 = vld [vmem:[#allocation7 + $0x44c] ss:$16 sps:$4 sm:$0xff]   ;;  %v14816_v55 = vld [vmem:[#allocation7 + $0x520] ss:$16 sps:$4 sm:$0xff]  }
 0x18d   : > { %10650 = vmatprep.subr.bf16.mxu1 %v14737_v56  ;;  %v14819_v56 = vld [vmem:[#allocation7 + $0x448] ss:$16 sps:$4 sm:$0xff]  }
 0x18f   : > { %9681 = vmatpush1.bf16.msra.mxu0 %v14732_v57  ;;  %v14824_v57 = vld [vmem:[#allocation7 + $0x544] ss:$16 sps:$4 sm:$0xff]  }
 0x190   : > { %10651 = vmatpush1.bf16.msra.mxu1 %v14735_v58  ;;  %9682 = vmatprep.subr.bf16.mxu0 %v14740_v59  ;;  %v14827_v58 = vld [vmem:[#allocation7 + $0x46c] ss:$16 sps:$4 sm:$0xff]   ;;  %v14822_v59 = vld [vmem:[#allocation7 + $0x540] ss:$16 sps:$4 sm:$0xff]  }
 0x191   : > { %10652 = vmatprep.subr.bf16.mxu1 %v14743_v60  ;;  %v14825_v60 = vld [vmem:[#allocation7 + $0x468] ss:$16 sps:$4 sm:$0xff]  }
 0x193   : > { %9683 = vmatpush1.bf16.msra.mxu0 %v14738_v61  ;;  %v14830_v61 = vld [vmem:[#allocation7 + $0x564] ss:$16 sps:$4 sm:$0xff]  }
 0x194   : > { %10653 = vmatpush1.bf16.msra.mxu1 %v14741_v62  ;;  %9684 = vmatprep.subr.bf16.mxu0 %v14746_v63  ;;  %v14833_v62 = vld [vmem:[#allocation7 + $0x48c] ss:$16 sps:$4 sm:$0xff]   ;;  %v14828_v63 = vld [vmem:[#allocation7 + $0x560] ss:$16 sps:$4 sm:$0xff]  }
 0x195   : > { %10654 = vmatprep.subr.bf16.mxu1 %v14749_v0  ;;  %v14831_v0 = vld [vmem:[#allocation7 + $0x488] ss:$16 sps:$4 sm:$0xff]  }
 0x197   : > { %9685 = vmatpush1.bf16.msra.mxu0 %v14744_v1  ;;  %v14836_v1 = vld [vmem:[#allocation7 + $0x584] ss:$16 sps:$4 sm:$0xff]  }
 0x198   : > { %10655 = vmatpush1.bf16.msra.mxu1 %v14747_v3  ;;  %9686 = vmatprep.subr.bf16.mxu0 %v14752_v4  ;;  %v14839_v3 = vld [vmem:[#allocation7 + $0x4ac] ss:$16 sps:$4 sm:$0xff]   ;;  %v14834_v4 = vld [vmem:[#allocation7 + $0x580] ss:$16 sps:$4 sm:$0xff]  }
 0x199   : > { %10656 = vmatprep.subr.bf16.mxu1 %v14755_v5  ;;  %v14837_v5 = vld [vmem:[#allocation7 + $0x4a8] ss:$16 sps:$4 sm:$0xff]  }
 0x19b   : > { %9687 = vmatpush1.bf16.msra.mxu0 %v14750_v6  ;;  %v14842_v6 = vld [vmem:[#allocation7 + $0x5a4] ss:$16 sps:$4 sm:$0xff]  }
 0x19c   : > { %10657 = vmatpush1.bf16.msra.mxu1 %v14753_v7  ;;  %9688 = vmatprep.subr.bf16.mxu0 %v14758_v8  ;;  %v14845_v7 = vld [vmem:[#allocation7 + $0x4cc] ss:$16 sps:$4 sm:$0xff]   ;;  %v14840_v8 = vld [vmem:[#allocation7 + $0x5a0] ss:$16 sps:$4 sm:$0xff]  }
 0x19d   : > { %10658 = vmatprep.subr.bf16.mxu1 %v14761_v9  ;;  %v14843_v9 = vld [vmem:[#allocation7 + $0x4c8] ss:$16 sps:$4 sm:$0xff]  }
 0x19f   : > { %9689 = vmatpush1.bf16.msra.mxu0 %v14756_v10  ;;  %v14848_v10 = vld [vmem:[#allocation7 + $0x5c4] ss:$16 sps:$4 sm:$0xff]  }
 0x1a0   : > { %10659 = vmatpush1.bf16.msra.mxu1 %v14759_v11  ;;  %9699 = vmatprep.subr.bf16.mxu0 %v14764_v13  ;;  %v14851_v11 = vld [vmem:[#allocation7 + $0x4ec] ss:$16 sps:$4 sm:$0xff]   ;;  %v14849_v13 = vld [vmem:[#allocation7 + $0x4e8] ss:$16 sps:$4 sm:$0xff]  }
 0x1a1   : > { %10660 = vmatprep.subr.bf16.mxu1 %v14767_v14  ;;  %v14854_v14 = vld [vmem:[#allocation7 + $0x5e4] ss:$16 sps:$4 sm:$0xff]  }
 0x1a2   : > { %9691 = vmatmul.mubr.bf16.vlgmr.msra.gmra.mrb[0].mxu0 %v17708_v16 }
 0x1a3   : > { %9700 = vmatpush1.bf16.msra.mxu0 %v14762_v15  ;;  %9731 = vmatprep.mubr.bf16.mxu0 %v17711_v21  ;;  %v14857_v15 = vld [vmem:[#allocation7 + $0x50c] ss:$16 sps:$4 sm:$0xff]  }
 0x1a4   : > { %10661 = vmatpush1.bf16.msra.mxu1 %v14765_v17  ;;  %9701 = vmatprep.subr.bf16.mxu0 %v14770_v18  ;;  %v14855_v17 = vld [vmem:[#allocation7 + $0x508] ss:$16 sps:$4 sm:$0xff]  }
 0x1a5   : > { %10662 = vmatprep.subr.bf16.mxu1 %v14773_v19  ;;  %v501_v18 = vld [vmem:[%s17672_s12 + $0x20] sm:$0xff] }
 0x1a6   : > { %v14860_v19 = vld [vmem:[#allocation7 + $0x604] ss:$16 sps:$4 sm:$0xff]  }
 0x1a7   : > { %9702 = vmatpush1.bf16.msra.mxu0 %v14768_v22  ;;  %v17718_v22 = vpack.c.bf16 %v501_v18, %v501_v18  ;;  %v14944_v18 = vld [vmem:[#allocation7 + $0x7c4] ss:$16 sps:$4 sm:$0xff]  }
 0x1a8   : > { %10663 = vmatpush1.bf16.msra.mxu1 %v14771_v23  ;;  %9703 = vmatprep.subr.bf16.mxu0 %v14776_v24  ;;  %v504_v23 = vld [vmem:[%s17672_s12 + $0x38] sm:$0xff] }
 0x1a9   : > { %10664 = vmatprep.subr.bf16.mxu1 %v14779_v25  ;;  %v14861_v24 = vld [vmem:[#allocation7 + $0x528] ss:$16 sps:$4 sm:$0xff]   ;;  %v14866_v25 = vld [vmem:[#allocation7 + $0x624] ss:$16 sps:$4 sm:$0xff]  }
 0x1ab   : > { %9704 = vmatpush1.bf16.msra.mxu0 %v14774_v26  ;;  %v14869_v26 = vld [vmem:[#allocation7 + $0x54c] ss:$16 sps:$4 sm:$0xff]  }
 0x1ac   : > { %10665 = vmatpush1.bf16.msra.mxu1 %v14777_v27  ;;  %9705 = vmatprep.subr.bf16.mxu0 %v14782_v28  ;;  %v17721_v27 = vpack.c.bf16 %v504_v23, %v504_v23  ;;  %v14864_v28 = vld [vmem:[#allocation7 + $0x620] ss:$16 sps:$4 sm:$0xff]   ;;  %v14945_v23 = vld [vmem:[#allocation7 + $0x6e8] ss:$16 sps:$4 sm:$0xff]  }
 0x1ad   : > { %10666 = vmatprep.subr.bf16.mxu1 %v14785_v29  ;;  %v14867_v29 = vld [vmem:[#allocation7 + $0x548] ss:$16 sps:$4 sm:$0xff]  }
 0x1af   : > { %9706 = vmatpush1.bf16.msra.mxu0 %v14780_v30  ;;  %v14872_v30 = vld [vmem:[#allocation7 + $0x644] ss:$16 sps:$4 sm:$0xff]  }
 0x1b0   : > { %10667 = vmatpush1.bf16.msra.mxu1 %v14783_v31  ;;  %9707 = vmatprep.subr.bf16.mxu0 %v14788_v32  ;;  %v14875_v31 = vld [vmem:[#allocation7 + $0x56c] ss:$16 sps:$4 sm:$0xff]   ;;  %v14870_v32 = vld [vmem:[#allocation7 + $0x640] ss:$16 sps:$4 sm:$0xff]  }
 0x1b1   : > { %10668 = vmatprep.subr.bf16.mxu1 %v14791_v34  ;;  %v14873_v34 = vld [vmem:[#allocation7 + $0x568] ss:$16 sps:$4 sm:$0xff]  }
 0x1b3   : > { %9708 = vmatpush1.bf16.msra.mxu0 %v14786_v35  ;;  %v14878_v35 = vld [vmem:[#allocation7 + $0x664] ss:$16 sps:$4 sm:$0xff]  }
 0x1b4   : > { %10669 = vmatpush1.bf16.msra.mxu1 %v14789_v36  ;;  %9709 = vmatprep.subr.bf16.mxu0 %v14794_v37  ;;  %v14881_v36 = vld [vmem:[#allocation7 + $0x58c] ss:$16 sps:$4 sm:$0xff]   ;;  %v14876_v37 = vld [vmem:[#allocation7 + $0x660] ss:$16 sps:$4 sm:$0xff]  }
 0x1b5   : > { %10670 = vmatprep.subr.bf16.mxu1 %v14797_v38  ;;  %v14879_v38 = vld [vmem:[#allocation7 + $0x588] ss:$16 sps:$4 sm:$0xff]  }
 0x1b7   : > { %9710 = vmatpush1.bf16.msra.mxu0 %v14792_v39  ;;  %v14884_v39 = vld [vmem:[#allocation7 + $0x684] ss:$16 sps:$4 sm:$0xff]  }
 0x1b8   : > { %10671 = vmatpush1.bf16.msra.mxu1 %v14795_v40  ;;  %9711 = vmatprep.subr.bf16.mxu0 %v14800_v41  ;;  %v14887_v40 = vld [vmem:[#allocation7 + $0x5ac] ss:$16 sps:$4 sm:$0xff]   ;;  %v14882_v41 = vld [vmem:[#allocation7 + $0x680] ss:$16 sps:$4 sm:$0xff]  }
 0x1b9   : > { %10672 = vmatprep.subr.bf16.mxu1 %v14803_v42  ;;  %v14885_v42 = vld [vmem:[#allocation7 + $0x5a8] ss:$16 sps:$4 sm:$0xff]  }
 0x1bb   : > { %9712 = vmatpush1.bf16.msra.mxu0 %v14798_v43  ;;  %v14890_v43 = vld [vmem:[#allocation7 + $0x6a4] ss:$16 sps:$4 sm:$0xff]  }
 0x1bc   : > { %10673 = vmatpush1.bf16.msra.mxu1 %v14801_v44  ;;  %9713 = vmatprep.subr.bf16.mxu0 %v14806_v45  ;;  %v14893_v44 = vld [vmem:[#allocation7 + $0x5cc] ss:$16 sps:$4 sm:$0xff]   ;;  %v14888_v45 = vld [vmem:[#allocation7 + $0x6a0] ss:$16 sps:$4 sm:$0xff]  }
 0x1bd   : > { %10683 = vmatprep.subr.bf16.mxu1 %v14809_v46  ;;  %v14891_v46 = vld [vmem:[#allocation7 + $0x5c8] ss:$16 sps:$4 sm:$0xff]  }
 0x1bf   : > { %10675 = vmatmul.mubr.bf16.vlgmr.msra.gmra.mrb[4].mxu1 %v17708_v16  ;;  %9714 = vmatpush1.bf16.msra.mxu0 %v14804_v47  ;;  %v14852_v16 = vld [vmem:[#allocation7 + $0x5e0] ss:$16 sps:$4 sm:$0xff]   ;;  %v14896_v47 = vld [vmem:[#allocation7 + $0x6c4] ss:$16 sps:$4 sm:$0xff]  }
 0x1c0   : > { %10684 = vmatpush1.bf16.msra.mxu1 %v14807_v48  ;;  %9715 = vmatprep.subr.bf16.mxu0 %v14812_v49  ;;  %v14899_v48 = vld [vmem:[#allocation7 + $0x5ec] ss:$16 sps:$4 sm:$0xff]   ;;  %v14894_v49 = vld [vmem:[#allocation7 + $0x6c0] ss:$16 sps:$4 sm:$0xff]  }
 0x1c1   : > { %10685 = vmatprep.subr.bf16.mxu1 %v14815_v50  ;;  %10715 = vmatprep.mubr.bf16.mxu1 %v17711_v21  ;;  %v14858_v21 = vld [vmem:[#allocation7 + $0x600] ss:$16 sps:$4 sm:$0xff]   ;;  %v14897_v50 = vld [vmem:[#allocation7 + $0x5e8] ss:$16 sps:$4 sm:$0xff]  }
 0x1c3   : > { %9716 = vmatpush1.bf16.msra.mxu0 %v14810_v51  ;;  %v14902_v51 = vld [vmem:[#allocation7 + $0x6e4] ss:$16 sps:$4 sm:$0xff]  }
 0x1c4   : > { %10686 = vmatpush1.bf16.msra.mxu1 %v14813_v52  ;;  %9717 = vmatprep.subr.bf16.mxu0 %v14818_v53  ;;  %v14905_v52 = vld [vmem:[#allocation7 + $0x60c] ss:$16 sps:$4 sm:$0xff]   ;;  %v14900_v53 = vld [vmem:[#allocation7 + $0x6e0] ss:$16 sps:$4 sm:$0xff]  }
 0x1c5   : > { %10687 = vmatprep.subr.bf16.mxu1 %v14821_v54  ;;  %v14903_v54 = vld [vmem:[#allocation7 + $0x608] ss:$16 sps:$4 sm:$0xff]  }
 0x1c7   : > { %9718 = vmatpush1.bf16.msra.mxu0 %v14816_v55  ;;  %v14908_v55 = vld [vmem:[#allocation7 + $0x704] ss:$16 sps:$4 sm:$0xff]  }
 0x1c8   : > { %10688 = vmatpush1.bf16.msra.mxu1 %v14819_v56  ;;  %9719 = vmatprep.subr.bf16.mxu0 %v14824_v57  ;;  %v14911_v56 = vld [vmem:[#allocation7 + $0x62c] ss:$16 sps:$4 sm:$0xff]   ;;  %v14906_v57 = vld [vmem:[#allocation7 + $0x700] ss:$16 sps:$4 sm:$0xff]  }
 0x1c9   : > { %10689 = vmatprep.subr.bf16.mxu1 %v14827_v58  ;;  %v14909_v58 = vld [vmem:[#allocation7 + $0x628] ss:$16 sps:$4 sm:$0xff]  }
 0x1cb   : > { %9720 = vmatpush1.bf16.msra.mxu0 %v14822_v59  ;;  %v14914_v59 = vld [vmem:[#allocation7 + $0x724] ss:$16 sps:$4 sm:$0xff]  }
 0x1cc   : > { %10690 = vmatpush1.bf16.msra.mxu1 %v14825_v60  ;;  %9721 = vmatprep.subr.bf16.mxu0 %v14830_v61  ;;  %v14917_v60 = vld [vmem:[#allocation7 + $0x64c] ss:$16 sps:$4 sm:$0xff]   ;;  %v14912_v61 = vld [vmem:[#allocation7 + $0x720] ss:$16 sps:$4 sm:$0xff]  }
 0x1cd   : > { %10691 = vmatprep.subr.bf16.mxu1 %v14833_v62  ;;  %v14915_v62 = vld [vmem:[#allocation7 + $0x648] ss:$16 sps:$4 sm:$0xff]  }
 0x1cf   : > { %9722 = vmatpush1.bf16.msra.mxu0 %v14828_v63  ;;  %v14920_v63 = vld [vmem:[#allocation7 + $0x744] ss:$16 sps:$4 sm:$0xff]  }
 0x1d0   : > { %10692 = vmatpush1.bf16.msra.mxu1 %v14831_v0  ;;  %9723 = vmatprep.subr.bf16.mxu0 %v14836_v1  ;;  %v14923_v0 = vld [vmem:[#allocation7 + $0x66c] ss:$16 sps:$4 sm:$0xff]   ;;  %v14918_v1 = vld [vmem:[#allocation7 + $0x740] ss:$16 sps:$4 sm:$0xff]  }
 0x1d1   : > { %10693 = vmatprep.subr.bf16.mxu1 %v14839_v3  ;;  %v14921_v3 = vld [vmem:[#allocation7 + $0x668] ss:$16 sps:$4 sm:$0xff]  }
 0x1d3   : > { %9724 = vmatpush1.bf16.msra.mxu0 %v14834_v4  ;;  %v14926_v4 = vld [vmem:[#allocation7 + $0x764] ss:$16 sps:$4 sm:$0xff]  }
 0x1d4   : > { %10694 = vmatpush1.bf16.msra.mxu1 %v14837_v5  ;;  %9725 = vmatprep.subr.bf16.mxu0 %v14842_v6  ;;  %v14929_v5 = vld [vmem:[#allocation7 + $0x68c] ss:$16 sps:$4 sm:$0xff]   ;;  %v14924_v6 = vld [vmem:[#allocation7 + $0x760] ss:$16 sps:$4 sm:$0xff]  }
 0x1d5   : > { %10695 = vmatprep.subr.bf16.mxu1 %v14845_v7  ;;  %v14927_v7 = vld [vmem:[#allocation7 + $0x688] ss:$16 sps:$4 sm:$0xff]  }
 0x1d7   : > { %9726 = vmatpush1.bf16.msra.mxu0 %v14840_v8  ;;  %v14932_v8 = vld [vmem:[#allocation7 + $0x784] ss:$16 sps:$4 sm:$0xff]  }
 0x1d8   : > { %10696 = vmatpush1.bf16.msra.mxu1 %v14843_v9  ;;  %9727 = vmatprep.subr.bf16.mxu0 %v14848_v10  ;;  %v14935_v9 = vld [vmem:[#allocation7 + $0x6ac] ss:$16 sps:$4 sm:$0xff]   ;;  %v14930_v10 = vld [vmem:[#allocation7 + $0x780] ss:$16 sps:$4 sm:$0xff]  }
 0x1d9   : > { %10697 = vmatprep.subr.bf16.mxu1 %v14851_v11  ;;  %v14933_v11 = vld [vmem:[#allocation7 + $0x6a8] ss:$16 sps:$4 sm:$0xff]  }
 0x1db   : > { %9728 = vmatpush1.bf16.msra.mxu0 %v14846_v12  ;;  %v14938_v12 = vld [vmem:[#allocation7 + $0x7a4] ss:$16 sps:$4 sm:$0xff]  }
 0x1dc   : > { %10698 = vmatpush1.bf16.msra.mxu1 %v14849_v13  ;;  %9729 = vmatprep.subr.bf16.mxu0 %v14854_v14  ;;  %v14941_v13 = vld [vmem:[#allocation7 + $0x6cc] ss:$16 sps:$4 sm:$0xff]  }
 0x1dd   : > { %10699 = vmatprep.subr.bf16.mxu1 %v14857_v15  ;;  %v14936_v15 = vld [vmem:[#allocation7 + $0x7a0] ss:$16 sps:$4 sm:$0xff]  }
 0x1df   : > { %9730 = vmatpush1.bf16.msra.mxu0 %v14852_v16 }
 0x1e0   : > { %10700 = vmatpush1.bf16.msra.mxu1 %v14855_v17  ;;  %9740 = vmatprep.subr.bf16.mxu0 %v14860_v19  ;;  %v14939_v17 = vld [vmem:[#allocation7 + $0x6c8] ss:$16 sps:$4 sm:$0xff]  }
 0x1e1   : > { %10701 = vmatprep.subr.bf16.mxu1 %v14863_v20  ;;  %v14947_v20 = vld [vmem:[#allocation7 + $0x6ec] ss:$16 sps:$4 sm:$0xff]  }
 0x1e2   : > { %9732 = vmatmul.mubr.bf16.vlgmr.msra.gmra.mrb[0].mxu0 %v17718_v22 }
 0x1e3   : > { %9741 = vmatpush1.bf16.msra.mxu0 %v14858_v21  ;;  %9772 = vmatprep.mubr.bf16.mxu0 %v17721_v27 }
 0x1e4   : > { %10702 = vmatpush1.bf16.msra.mxu1 %v14861_v24  ;;  %9742 = vmatprep.subr.bf16.mxu0 %v14866_v25  ;;  %v14950_v24 = vld [vmem:[#allocation7 + $0x7e4] ss:$16 sps:$4 sm:$0xff]   ;;  %v14953_v25 = vld [vmem:[#allocation7 + $0x70c] ss:$16 sps:$4 sm:$0xff]  }
 0x1e5   : > { %10703 = vmatprep.subr.bf16.mxu1 %v14869_v26  ;;  %v14948_v26 = vld [vmem:[#allocation7 + $0x7e0] ss:$16 sps:$4 sm:$0xff]  }
 0x1e7   : > { %9743 = vmatpush1.bf16.msra.mxu0 %v14864_v28  ;;  %v14956_v28 = vld [vmem:[#allocation7 + $0x804] ss:$16 sps:$4 sm:$0xff]  }
 0x1e8   : > { %10704 = vmatpush1.bf16.msra.mxu1 %v14867_v29  ;;  %9744 = vmatprep.subr.bf16.mxu0 %v14872_v30  ;;  %v503_v29 = vld [vmem:[%s17672_s12 + $0x30] sm:$0xff] }
 0x1e9   : > { %10705 = vmatprep.subr.bf16.mxu1 %v14875_v31  ;;  %v14959_v30 = vld [vmem:[#allocation7 + $0x72c] ss:$16 sps:$4 sm:$0xff]   ;;  %v14954_v31 = vld [vmem:[#allocation7 + $0x800] ss:$16 sps:$4 sm:$0xff]  }
 0x1eb   : > { %9745 = vmatpush1.bf16.msra.mxu0 %v14870_v32  ;;  %v17732_v32 = vpack.c.bf16 %v503_v29, %v503_v29  ;;  %v15043_v29 = vld [vmem:[#allocation7 + $0x8ec] ss:$16 sps:$4 sm:$0xff]  }
 0x1ec   : > { %10706 = vmatpush1.bf16.msra.mxu1 %v14873_v34  ;;  %9746 = vmatprep.subr.bf16.mxu0 %v14878_v35  ;;  %v506_v34 = vld [vmem:[%s17672_s12 + $0x48] sm:$0xff] }
 0x1ed   : > { %10707 = vmatprep.subr.bf16.mxu1 %v14881_v36  ;;  %v14957_v35 = vld [vmem:[#allocation7 + $0x728] ss:$16 sps:$4 sm:$0xff]   ;;  %v14962_v36 = vld [vmem:[#allocation7 + $0x824] ss:$16 sps:$4 sm:$0xff]  }
 0x1ef   : > { %9747 = vmatpush1.bf16.msra.mxu0 %v14876_v37  ;;  %v14965_v37 = vld [vmem:[#allocation7 + $0x74c] ss:$16 sps:$4 sm:$0xff]  }
 0x1f0   : > { %10708 = vmatpush1.bf16.msra.mxu1 %v14879_v38  ;;  %9748 = vmatprep.subr.bf16.mxu0 %v14884_v39  ;;  %v17735_v38 = vpack.c.bf16 %v506_v34, %v506_v34  ;;  %v14960_v39 = vld [vmem:[#allocation7 + $0x820] ss:$16 sps:$4 sm:$0xff]   ;;  %v15049_v34 = vld [vmem:[#allocation7 + $0x90c] ss:$16 sps:$4 sm:$0xff]  }
 0x1f1   : > { %10709 = vmatprep.subr.bf16.mxu1 %v14887_v40  ;;  %v14963_v40 = vld [vmem:[#allocation7 + $0x748] ss:$16 sps:$4 sm:$0xff]  }
 0x1f3   : > { %9749 = vmatpush1.bf16.msra.mxu0 %v14882_v41  ;;  %v14968_v41 = vld [vmem:[#allocation7 + $0x844] ss:$16 sps:$4 sm:$0xff]  }
 0x1f4   : > { %10710 = vmatpush1.bf16.msra.mxu1 %v14885_v42  ;;  %9750 = vmatprep.subr.bf16.mxu0 %v14890_v43  ;;  %v14971_v42 = vld [vmem:[#allocation7 + $0x76c] ss:$16 sps:$4 sm:$0xff]   ;;  %v14966_v43 = vld [vmem:[#allocation7 + $0x840] ss:$16 sps:$4 sm:$0xff]  }
 0x1f5   : > { %10711 = vmatprep.subr.bf16.mxu1 %v14893_v44  ;;  %v14969_v44 = vld [vmem:[#allocation7 + $0x768] ss:$16 sps:$4 sm:$0xff]  }
 0x1f7   : > { %9751 = vmatpush1.bf16.msra.mxu0 %v14888_v45  ;;  %v14974_v45 = vld [vmem:[#allocation7 + $0x864] ss:$16 sps:$4 sm:$0xff]  }
 0x1f8   : > { %10712 = vmatpush1.bf16.msra.mxu1 %v14891_v46  ;;  %9752 = vmatprep.subr.bf16.mxu0 %v14896_v47  ;;  %v14977_v46 = vld [vmem:[#allocation7 + $0x78c] ss:$16 sps:$4 sm:$0xff]   ;;  %v14972_v47 = vld [vmem:[#allocation7 + $0x860] ss:$16 sps:$4 sm:$0xff]  }
 0x1f9   : > { %10713 = vmatprep.subr.bf16.mxu1 %v14899_v48  ;;  %v14975_v48 = vld [vmem:[#allocation7 + $0x788] ss:$16 sps:$4 sm:$0xff]  }
 0x1fb   : > { %9753 = vmatpush1.bf16.msra.mxu0 %v14894_v49  ;;  %v14980_v49 = vld [vmem:[#allocation7 + $0x884] ss:$16 sps:$4 sm:$0xff]  }
 0x1fc   : > { %10714 = vmatpush1.bf16.msra.mxu1 %v14897_v50  ;;  %9754 = vmatprep.subr.bf16.mxu0 %v14902_v51  ;;  %v14983_v50 = vld [vmem:[#allocation7 + $0x7ac] ss:$16 sps:$4 sm:$0xff]   ;;  %v14978_v51 = vld [vmem:[#allocation7 + $0x880] ss:$16 sps:$4 sm:$0xff]  }
 0x1fd   : > { %10724 = vmatprep.subr.bf16.mxu1 %v14905_v52  ;;  %v14981_v52 = vld [vmem:[#allocation7 + $0x7a8] ss:$16 sps:$4 sm:$0xff]  }
 0x1ff   : > { %10716 = vmatmul.mubr.bf16.vlgmr.msra.gmra.mrb[4].mxu1 %v17718_v22  ;;  %9755 = vmatpush1.bf16.msra.mxu0 %v14900_v53  ;;  %v14942_v22 = vld [vmem:[#allocation7 + $0x7c0] ss:$16 sps:$4 sm:$0xff]   ;;  %v14986_v53 = vld [vmem:[#allocation7 + $0x8a4] ss:$16 sps:$4 sm:$0xff]  }
 0x200   : > { %10725 = vmatpush1.bf16.msra.mxu1 %v14903_v54  ;;  %9756 = vmatprep.subr.bf16.mxu0 %v14908_v55  ;;  %v14989_v54 = vld [vmem:[#allocation7 + $0x7cc] ss:$16 sps:$4 sm:$0xff]   ;;  %v14984_v55 = vld [vmem:[#allocation7 + $0x8a0] ss:$16 sps:$4 sm:$0xff]  }
 0x201   : > { %10726 = vmatprep.subr.bf16.mxu1 %v14911_v56  ;;  %10756 = vmatprep.mubr.bf16.mxu1 %v17721_v27  ;;  %v14951_v27 = vld [vmem:[#allocation7 + $0x708] ss:$16 sps:$4 sm:$0xff]  }
 0x202   : > { %v14987_v56 = vld [vmem:[#allocation7 + $0x7c8] ss:$16 sps:$4 sm:$0xff]  }
 0x203   : > { %9757 = vmatpush1.bf16.msra.mxu0 %v14906_v57  ;;  %v14992_v57 = vld [vmem:[#allocation7 + $0x8c4] ss:$16 sps:$4 sm:$0xff]  }
 0x204   : > { %10727 = vmatpush1.bf16.msra.mxu1 %v14909_v58  ;;  %9758 = vmatprep.subr.bf16.mxu0 %v14914_v59  ;;  %v14995_v58 = vld [vmem:[#allocation7 + $0x7ec] ss:$16 sps:$4 sm:$0xff]   ;;  %v14990_v59 = vld [vmem:[#allocation7 + $0x8c0] ss:$16 sps:$4 sm:$0xff]  }
 0x205   : > { %10728 = vmatprep.subr.bf16.mxu1 %v14917_v60  ;;  %v14993_v60 = vld [vmem:[#allocation7 + $0x7e8] ss:$16 sps:$4 sm:$0xff]  }
 0x207   : > { %9759 = vmatpush1.bf16.msra.mxu0 %v14912_v61  ;;  %v14998_v61 = vld [vmem:[#allocation7 + $0x8e4] ss:$16 sps:$4 sm:$0xff]  }
 0x208   : > { %10729 = vmatpush1.bf16.msra.mxu1 %v14915_v62  ;;  %9760 = vmatprep.subr.bf16.mxu0 %v14920_v63  ;;  %v15001_v62 = vld [vmem:[#allocation7 + $0x80c] ss:$16 sps:$4 sm:$0xff]   ;;  %v14996_v63 = vld [vmem:[#allocation7 + $0x8e0] ss:$16 sps:$4 sm:$0xff]  }
 0x209   : > { %10730 = vmatprep.subr.bf16.mxu1 %v14923_v0  ;;  %v14999_v0 = vld [vmem:[#allocation7 + $0x808] ss:$16 sps:$4 sm:$0xff]  }
 0x20b   : > { %9761 = vmatpush1.bf16.msra.mxu0 %v14918_v1  ;;  %v15004_v1 = vld [vmem:[#allocation7 + $0x904] ss:$16 sps:$4 sm:$0xff]  }
 0x20c   : > { %10731 = vmatpush1.bf16.msra.mxu1 %v14921_v3  ;;  %9762 = vmatprep.subr.bf16.mxu0 %v14926_v4  ;;  %v15007_v3 = vld [vmem:[#allocation7 + $0x82c] ss:$16 sps:$4 sm:$0xff]   ;;  %v15002_v4 = vld [vmem:[#allocation7 + $0x900] ss:$16 sps:$4 sm:$0xff]  }
 0x20d   : > { %10732 = vmatprep.subr.bf16.mxu1 %v14929_v5  ;;  %v15005_v5 = vld [vmem:[#allocation7 + $0x828] ss:$16 sps:$4 sm:$0xff]  }
 0x20f   : > { %9763 = vmatpush1.bf16.msra.mxu0 %v14924_v6  ;;  %v15010_v6 = vld [vmem:[#allocation7 + $0x924] ss:$16 sps:$4 sm:$0xff]  }
 0x210   : > { %10733 = vmatpush1.bf16.msra.mxu1 %v14927_v7  ;;  %9764 = vmatprep.subr.bf16.mxu0 %v14932_v8  ;;  %v15013_v7 = vld [vmem:[#allocation7 + $0x84c] ss:$16 sps:$4 sm:$0xff]   ;;  %v15008_v8 = vld [vmem:[#allocation7 + $0x920] ss:$16 sps:$4 sm:$0xff]  }
 0x211   : > { %10734 = vmatprep.subr.bf16.mxu1 %v14935_v9  ;;  %v15011_v9 = vld [vmem:[#allocation7 + $0x848] ss:$16 sps:$4 sm:$0xff]  }
 0x212   : > { %v17727_v14 = vpop.f32.mrb[0].mxu1 }
 0x213   : > { %v17729_v16 = vpop.f32.mrb[1].mxu1  ;;  %9765 = vmatpush1.bf16.msra.mxu0 %v14930_v10  ;;  %v15016_v10 = vld [vmem:[#allocation7 + $0x944] ss:$16 sps:$4 sm:$0xff]  }
 0x214   : > { %10735 = vmatpush1.bf16.msra.mxu1 %v14933_v11  ;;  %v10598_v19 = vpop.f32.mrb[2].mxu1  ;;  %9766 = vmatprep.subr.bf16.mxu0 %v14938_v12  ;;  %v15019_v11 = vld [vmem:[#allocation7 + $0x86c] ss:$16 sps:$4 sm:$0xff]   ;;  %v15014_v12 = vld [vmem:[#allocation7 + $0x940] ss:$16 sps:$4 sm:$0xff]  }
 0x215   : > { %10736 = vmatprep.subr.bf16.mxu1 %v14941_v13  ;;  %v10599_v21 = vpop.f32.mrb[3].mxu1  ;;  %v15017_v13 = vld [vmem:[#allocation7 + $0x868] ss:$16 sps:$4 sm:$0xff]  }
 0x216   : > { %v15023_v19 = vld [vmem:[#allocation7 + $0x888] ss:$16 sps:$4 sm:$0xff]   ;;  %v15031_v21 = vld [vmem:[#allocation7 + $0x8ac] ss:$16 sps:$4 sm:$0xff]  }
 0x217   : > { %9767 = vmatpush1.bf16.msra.mxu0 %v14936_v15  ;;  %v15022_v15 = vld [vmem:[#allocation7 + $0x964] ss:$16 sps:$4 sm:$0xff]  }
 0x218   : > { %10737 = vmatpush1.bf16.msra.mxu1 %v14939_v17  ;;  %9768 = vmatprep.subr.bf16.mxu0 %v14944_v18  ;;  %v15025_v17 = vld [vmem:[#allocation7 + $0x88c] ss:$16 sps:$4 sm:$0xff]   ;;  %v15020_v18 = vld [vmem:[#allocation7 + $0x960] ss:$16 sps:$4 sm:$0xff]  }
 0x219   : > { %10738 = vmatprep.subr.bf16.mxu1 %v14947_v20  ;;  %v15028_v20 = vld [vmem:[#allocation7 + $0x984] ss:$16 sps:$4 sm:$0xff]  }
 0x21b   : > { %9769 = vmatpush1.bf16.msra.mxu0 %v14942_v22  ;;  %v15026_v22 = vld [vmem:[#allocation7 + $0x980] ss:$16 sps:$4 sm:$0xff]  }
 0x21c   : > { %10739 = vmatpush1.bf16.msra.mxu1 %v14945_v23  ;;  %9770 = vmatprep.subr.bf16.mxu0 %v14950_v24  ;;  %v15029_v23 = vld [vmem:[#allocation7 + $0x8a8] ss:$16 sps:$4 sm:$0xff]   ;;  %v15034_v24 = vld [vmem:[#allocation7 + $0x9a4] ss:$16 sps:$4 sm:$0xff]  }
 0x21d   : > { %10740 = vmatprep.subr.bf16.mxu1 %v14953_v25  ;;  %v15037_v25 = vld [vmem:[#allocation7 + $0x8cc] ss:$16 sps:$4 sm:$0xff]  }
 0x21f   : > { %9771 = vmatpush1.bf16.msra.mxu0 %v14948_v26  ;;  %v15032_v26 = vld [vmem:[#allocation7 + $0x9a0] ss:$16 sps:$4 sm:$0xff]  }
 0x220   : > { %10741 = vmatpush1.bf16.msra.mxu1 %v14951_v27  ;;  %9781 = vmatprep.subr.bf16.mxu0 %v14956_v28  ;;  %v15035_v27 = vld [vmem:[#allocation7 + $0x8c8] ss:$16 sps:$4 sm:$0xff]   ;;  %v15040_v28 = vld [vmem:[#allocation7 + $0x9c4] ss:$16 sps:$4 sm:$0xff]  }
 0x221   : > { %10742 = vmatprep.subr.bf16.mxu1 %v14959_v30  ;;  %v15038_v30 = vld [vmem:[#allocation7 + $0x9c0] ss:$16 sps:$4 sm:$0xff]  }
 0x222   : > { %9773 = vmatmul.mubr.bf16.vlgmr.msra.gmra.mrb[0].mxu0 %v17732_v32 }
 0x223   : > { %9782 = vmatpush1.bf16.msra.mxu0 %v14954_v31  ;;  %9813 = vmatprep.mubr.bf16.mxu0 %v17735_v38  ;;  %v15041_v31 = vld [vmem:[#allocation7 + $0x8e8] ss:$16 sps:$4 sm:$0xff]  }
 0x224   : > { %10743 = vmatpush1.bf16.msra.mxu1 %v14957_v35  ;;  %9783 = vmatprep.subr.bf16.mxu0 %v14962_v36  ;;  %v15044_v35 = vld [vmem:[#allocation7 + $0x9e0] ss:$16 sps:$4 sm:$0xff]   ;;  %v15047_v36 = vld [vmem:[#allocation7 + $0x908] ss:$16 sps:$4 sm:$0xff]  }
 0x225   : > { %10744 = vmatprep.subr.bf16.mxu1 %v14965_v37  ;;  %v15052_v37 = vld [vmem:[#allocation7 + $0xa04] ss:$16 sps:$4 sm:$0xff]  }
 0x227   : > { %9784 = vmatpush1.bf16.msra.mxu0 %v14960_v39  ;;  %v15055_v39 = vld [vmem:[#allocation7 + $0x92c] ss:$16 sps:$4 sm:$0xff]  }
 0x228   : > { %10745 = vmatpush1.bf16.msra.mxu1 %v14963_v40  ;;  %9785 = vmatprep.subr.bf16.mxu0 %v14968_v41  ;;  %v508_v40 = vld [vmem:[%s17672_s12 + $0x58] sm:$0xff] }
 0x229   : > { %10746 = vmatprep.subr.bf16.mxu1 %v14971_v42  ;;  %v15050_v42 = vld [vmem:[#allocation7 + $0xa00] ss:$16 sps:$4 sm:$0xff]  }
 0x22b   : > { %9786 = vmatpush1.bf16.msra.mxu0 %v14966_v43  ;;  %v15053_v43 = vld [vmem:[#allocation7 + $0x928] ss:$16 sps:$4 sm:$0xff]  }
 0x22c   : > { %10747 = vmatpush1.bf16.msra.mxu1 %v14969_v44  ;;  %9787 = vmatprep.subr.bf16.mxu0 %v14974_v45  ;;  %v15058_v44 = vld [vmem:[#allocation7 + $0xa24] ss:$16 sps:$4 sm:$0xff]   ;;  %v15061_v45 = vld [vmem:[#allocation7 + $0x94c] ss:$16 sps:$4 sm:$0xff]  }
 0x22d   : > { %10748 = vmatprep.subr.bf16.mxu1 %v14977_v46  ;;  %v17745_v46 = vpack.c.bf16 %v508_v40, %v508_v40  ;;  %v15137_v40 = vld [vmem:[#allocation7 + $0xae8] ss:$16 sps:$4 sm:$0xff]  }
 0x22f   : > { %9788 = vmatpush1.bf16.msra.mxu0 %v14972_v47  ;;  %v15056_v47 = vld [vmem:[#allocation7 + $0xa20] ss:$16 sps:$4 sm:$0xff]  }
 0x230   : > { %10749 = vmatpush1.bf16.msra.mxu1 %v14975_v48  ;;  %9789 = vmatprep.subr.bf16.mxu0 %v14980_v49  ;;  %v15059_v48 = vld [vmem:[#allocation7 + $0x948] ss:$16 sps:$4 sm:$0xff]   ;;  %v15064_v49 = vld [vmem:[#allocation7 + $0xa44] ss:$16 sps:$4 sm:$0xff]  }
 0x231   : > { %10750 = vmatprep.subr.bf16.mxu1 %v14983_v50  ;;  %v15067_v50 = vld [vmem:[#allocation7 + $0x96c] ss:$16 sps:$4 sm:$0xff]  }
 0x233   : > { %9790 = vmatpush1.bf16.msra.mxu0 %v14978_v51  ;;  %v15062_v51 = vld [vmem:[#allocation7 + $0xa40] ss:$16 sps:$4 sm:$0xff]  }
 0x234   : > { %10751 = vmatpush1.bf16.msra.mxu1 %v14981_v52  ;;  %9791 = vmatprep.subr.bf16.mxu0 %v14986_v53  ;;  %v15065_v52 = vld [vmem:[#allocation7 + $0x968] ss:$16 sps:$4 sm:$0xff]   ;;  %v15070_v53 = vld [vmem:[#allocation7 + $0xa64] ss:$16 sps:$4 sm:$0xff]  }
 0x235   : > { %10752 = vmatprep.subr.bf16.mxu1 %v14989_v54  ;;  %v15073_v54 = vld [vmem:[#allocation7 + $0x98c] ss:$16 sps:$4 sm:$0xff]  }
 0x237   : > { %9792 = vmatpush1.bf16.msra.mxu0 %v14984_v55  ;;  %v15068_v55 = vld [vmem:[#allocation7 + $0xa60] ss:$16 sps:$4 sm:$0xff]  }
 0x238   : > { %10753 = vmatpush1.bf16.msra.mxu1 %v14987_v56  ;;  %9793 = vmatprep.subr.bf16.mxu0 %v14992_v57  ;;  %v15071_v56 = vld [vmem:[#allocation7 + $0x988] ss:$16 sps:$4 sm:$0xff]   ;;  %v15076_v57 = vld [vmem:[#allocation7 + $0xa84] ss:$16 sps:$4 sm:$0xff]  }
 0x239   : > { %10754 = vmatprep.subr.bf16.mxu1 %v14995_v58  ;;  %v15079_v58 = vld [vmem:[#allocation7 + $0x9ac] ss:$16 sps:$4 sm:$0xff]  }
 0x23b   : > { %9794 = vmatpush1.bf16.msra.mxu0 %v14990_v59  ;;  %v15074_v59 = vld [vmem:[#allocation7 + $0xa80] ss:$16 sps:$4 sm:$0xff]  }
 0x23c   : > { %10755 = vmatpush1.bf16.msra.mxu1 %v14993_v60  ;;  %9795 = vmatprep.subr.bf16.mxu0 %v14998_v61  ;;  %v15077_v60 = vld [vmem:[#allocation7 + $0x9a8] ss:$16 sps:$4 sm:$0xff]   ;;  %v15082_v61 = vld [vmem:[#allocation7 + $0xaa4] ss:$16 sps:$4 sm:$0xff]  }
 0x23d   : > { %10765 = vmatprep.subr.bf16.mxu1 %v15001_v62  ;;  %v15085_v62 = vld [vmem:[#allocation7 + $0x9cc] ss:$16 sps:$4 sm:$0xff]  }
 0x23f   : > { %10757 = vmatmul.mubr.bf16.vlgmr.msra.gmra.mrb[4].mxu1 %v17732_v32  ;;  %9796 = vmatpush1.bf16.msra.mxu0 %v14996_v63  ;;  %v15046_v32 = vld [vmem:[#allocation7 + $0x9e4] ss:$16 sps:$4 sm:$0xff]   ;;  %v15080_v63 = vld [vmem:[#allocation7 + $0xaa0] ss:$16 sps:$4 sm:$0xff]  }
 0x240   : > { %10766 = vmatpush1.bf16.msra.mxu1 %v14999_v0  ;;  %9797 = vmatprep.subr.bf16.mxu0 %v15004_v1  ;;  %v15083_v0 = vld [vmem:[#allocation7 + $0x9c8] ss:$16 sps:$4 sm:$0xff]   ;;  %v15088_v1 = vld [vmem:[#allocation7 + $0xac4] ss:$16 sps:$4 sm:$0xff]  }
 0x241   : > { %10767 = vmatprep.subr.bf16.mxu1 %v15007_v3  ;;  %10797 = vmatprep.mubr.bf16.mxu1 %v17735_v38  ;;  %v505_v38 = vld [vmem:[%s17672_s12 + $0x40] sm:$0xff] }
 0x242   : > { %v17743_v41 = vpack.c.bf16 %v505_v38, %v505_v38  ;;  %v15091_v3 = vld [vmem:[#allocation7 + $0x9ec] ss:$16 sps:$4 sm:$0xff]  }
 0x243   : > { %9798 = vmatpush1.bf16.msra.mxu0 %v15002_v4  ;;  %v15086_v4 = vld [vmem:[#allocation7 + $0xac0] ss:$16 sps:$4 sm:$0xff]   ;;  %v15139_v38 = vld [vmem:[#allocation7 + $0xaec] ss:$16 sps:$4 sm:$0xff]  }
 0x244   : > { %10768 = vmatpush1.bf16.msra.mxu1 %v15005_v5  ;;  %9799 = vmatprep.subr.bf16.mxu0 %v15010_v6  ;;  %v15089_v5 = vld [vmem:[#allocation7 + $0x9e8] ss:$16 sps:$4 sm:$0xff]   ;;  %v15094_v6 = vld [vmem:[#allocation7 + $0xae4] ss:$16 sps:$4 sm:$0xff]  }
 0x245   : > { %10769 = vmatprep.subr.bf16.mxu1 %v15013_v7  ;;  %v15097_v7 = vld [vmem:[#allocation7 + $0xa0c] ss:$16 sps:$4 sm:$0xff]  }
 0x247   : > { %9800 = vmatpush1.bf16.msra.mxu0 %v15008_v8  ;;  %v15092_v8 = vld [vmem:[#allocation7 + $0xae0] ss:$16 sps:$4 sm:$0xff]  }
 0x248   : > { %10770 = vmatpush1.bf16.msra.mxu1 %v15011_v9  ;;  %9801 = vmatprep.subr.bf16.mxu0 %v15016_v10  ;;  %v15095_v9 = vld [vmem:[#allocation7 + $0xa08] ss:$16 sps:$4 sm:$0xff]   ;;  %v15100_v10 = vld [vmem:[#allocation7 + $0xb04] ss:$16 sps:$4 sm:$0xff]  }
 0x249   : > { %10771 = vmatprep.subr.bf16.mxu1 %v15019_v11  ;;  %v15103_v11 = vld [vmem:[#allocation7 + $0xa2c] ss:$16 sps:$4 sm:$0xff]  }
 0x24b   : > { %9802 = vmatpush1.bf16.msra.mxu0 %v15014_v12  ;;  %v15098_v12 = vld [vmem:[#allocation7 + $0xb00] ss:$16 sps:$4 sm:$0xff]  }
 0x24c   : > { %10772 = vmatpush1.bf16.msra.mxu1 %v15017_v13  ;;  %9803 = vmatprep.subr.bf16.mxu0 %v15022_v15  ;;  %v15101_v13 = vld [vmem:[#allocation7 + $0xa28] ss:$16 sps:$4 sm:$0xff]   ;;  %v15106_v15 = vld [vmem:[#allocation7 + $0xb24] ss:$16 sps:$4 sm:$0xff]  }
 0x24d   : > { %10773 = vmatprep.subr.bf16.mxu1 %v15025_v17  ;;  %v15109_v17 = vld [vmem:[#allocation7 + $0xa4c] ss:$16 sps:$4 sm:$0xff]  }
 0x24f   : > { %9804 = vmatpush1.bf16.msra.mxu0 %v15020_v18  ;;  %v15104_v18 = vld [vmem:[#allocation7 + $0xb20] ss:$16 sps:$4 sm:$0xff]  }
 0x250   : > { %10774 = vmatpush1.bf16.msra.mxu1 %v15023_v19  ;;  %9805 = vmatprep.subr.bf16.mxu0 %v15028_v20  ;;  %v15107_v19 = vld [vmem:[#allocation7 + $0xa48] ss:$16 sps:$4 sm:$0xff]   ;;  %v15112_v20 = vld [vmem:[#allocation7 + $0xb44] ss:$16 sps:$4 sm:$0xff]  }
 0x251   : > { %10775 = vmatprep.subr.bf16.mxu1 %v15031_v21  ;;  %v15115_v21 = vld [vmem:[#allocation7 + $0xa6c] ss:$16 sps:$4 sm:$0xff]  }
 0x253   : > { %9806 = vmatpush1.bf16.msra.mxu0 %v15026_v22  ;;  %v15110_v22 = vld [vmem:[#allocation7 + $0xb40] ss:$16 sps:$4 sm:$0xff]  }
 0x254   : > { %10776 = vmatpush1.bf16.msra.mxu1 %v15029_v23  ;;  %9807 = vmatprep.subr.bf16.mxu0 %v15034_v24  ;;  %v15113_v23 = vld [vmem:[#allocation7 + $0xa68] ss:$16 sps:$4 sm:$0xff]   ;;  %v15118_v24 = vld [vmem:[#allocation7 + $0xb64] ss:$16 sps:$4 sm:$0xff]  }
 0x255   : > { %10777 = vmatprep.subr.bf16.mxu1 %v15037_v25  ;;  %v15121_v25 = vld [vmem:[#allocation7 + $0xa8c] ss:$16 sps:$4 sm:$0xff]  }
 0x257   : > { %9808 = vmatpush1.bf16.msra.mxu0 %v15032_v26  ;;  %v15116_v26 = vld [vmem:[#allocation7 + $0xb60] ss:$16 sps:$4 sm:$0xff]  }
 0x258   : > { %10778 = vmatpush1.bf16.msra.mxu1 %v15035_v27  ;;  %9809 = vmatprep.subr.bf16.mxu0 %v15040_v28  ;;  %v15119_v27 = vld [vmem:[#allocation7 + $0xa88] ss:$16 sps:$4 sm:$0xff]   ;;  %v15124_v28 = vld [vmem:[#allocation7 + $0xb84] ss:$16 sps:$4 sm:$0xff]  }
 0x259   : > { %10779 = vmatprep.subr.bf16.mxu1 %v15043_v29  ;;  %v15127_v29 = vld [vmem:[#allocation7 + $0xaac] ss:$16 sps:$4 sm:$0xff]  }
 0x25b   : > { %9810 = vmatpush1.bf16.msra.mxu0 %v15038_v30  ;;  %v15122_v30 = vld [vmem:[#allocation7 + $0xb80] ss:$16 sps:$4 sm:$0xff]  }
 0x25c   : > { %10780 = vmatpush1.bf16.msra.mxu1 %v15041_v31  ;;  %9811 = vmatprep.subr.bf16.mxu0 %v15046_v32  ;;  %v15125_v31 = vld [vmem:[#allocation7 + $0xaa8] ss:$16 sps:$4 sm:$0xff]   ;;  %v15130_v32 = vld [vmem:[#allocation7 + $0xba4] ss:$16 sps:$4 sm:$0xff]  }
 0x25d   : > { %10781 = vmatprep.subr.bf16.mxu1 %v15049_v34  ;;  %v15133_v34 = vld [vmem:[#allocation7 + $0xacc] ss:$16 sps:$4 sm:$0xff]  }
 0x25f   : > { %9812 = vmatpush1.bf16.msra.mxu0 %v15044_v35  ;;  %v15128_v35 = vld [vmem:[#allocation7 + $0xba0] ss:$16 sps:$4 sm:$0xff]  }
 0x260   : > { %10782 = vmatpush1.bf16.msra.mxu1 %v15047_v36  ;;  %9822 = vmatprep.subr.bf16.mxu0 %v15052_v37  ;;  %v15131_v36 = vld [vmem:[#allocation7 + $0xac8] ss:$16 sps:$4 sm:$0xff]   ;;  %v15136_v37 = vld [vmem:[#allocation7 + $0xbc4] ss:$16 sps:$4 sm:$0xff]  }
 0x261   : > { %10783 = vmatprep.subr.bf16.mxu1 %v15055_v39  ;;  %v15134_v39 = vld [vmem:[#allocation7 + $0xbc0] ss:$16 sps:$4 sm:$0xff]  }
 0x262   : > { %9814 = vmatmul.mubr.bf16.vlgmr.msra.gmra.mrb[0].mxu0 %v17743_v41 }
 0x263   : > { %9823 = vmatpush1.bf16.msra.mxu0 %v15050_v42  ;;  %9854 = vmatprep.mubr.bf16.mxu0 %v17745_v46  ;;  %v15145_v42 = vld [vmem:[#allocation7 + $0xb0c] ss:$16 sps:$4 sm:$0xff]  }
 0x264   : > { %10784 = vmatpush1.bf16.msra.mxu1 %v15053_v43  ;;  %9824 = vmatprep.subr.bf16.mxu0 %v15058_v44  ;;  %v15140_v43 = vld [vmem:[#allocation7 + $0xbe0] ss:$16 sps:$4 sm:$0xff]   ;;  %v15143_v44 = vld [vmem:[#allocation7 + $0xb08] ss:$16 sps:$4 sm:$0xff]  }
 0x265   : > { %10785 = vmatprep.subr.bf16.mxu1 %v15061_v45  ;;  %v15148_v45 = vld [vmem:[#allocation7 + $0xc04] ss:$16 sps:$4 sm:$0xff]  }
 0x267   : > { %9825 = vmatpush1.bf16.msra.mxu0 %v15056_v47  ;;  %v15151_v47 = vld [vmem:[#allocation7 + $0xb2c] ss:$16 sps:$4 sm:$0xff]  }
 0x268   : > { %10786 = vmatpush1.bf16.msra.mxu1 %v15059_v48  ;;  %9826 = vmatprep.subr.bf16.mxu0 %v15064_v49  ;;  %v510_v48 = vld [vmem:[%s17672_s12 + $0x68] sm:$0xff] }
 0x269   : > { %10787 = vmatprep.subr.bf16.mxu1 %v15067_v50  ;;  %v15146_v50 = vld [vmem:[#allocation7 + $0xc00] ss:$16 sps:$4 sm:$0xff]  }
 0x26b   : > { %9827 = vmatpush1.bf16.msra.mxu0 %v15062_v51  ;;  %v15149_v51 = vld [vmem:[#allocation7 + $0xb28] ss:$16 sps:$4 sm:$0xff]  }
 0x26c   : > { %10788 = vmatpush1.bf16.msra.mxu1 %v15065_v52  ;;  %9828 = vmatprep.subr.bf16.mxu0 %v15070_v53  ;;  %v15154_v52 = vld [vmem:[#allocation7 + $0xc24] ss:$16 sps:$4 sm:$0xff]   ;;  %v15157_v53 = vld [vmem:[#allocation7 + $0xb4c] ss:$16 sps:$4 sm:$0xff]  }
 0x26d   : > { %10789 = vmatprep.subr.bf16.mxu1 %v15073_v54  ;;  %v17755_v54 = vpack.c.bf16 %v510_v48, %v510_v48  ;;  %v15233_v48 = vld [vmem:[#allocation7 + $0xce8] ss:$16 sps:$4 sm:$0xff]  }
 0x26f   : > { %9829 = vmatpush1.bf16.msra.mxu0 %v15068_v55  ;;  %v15152_v55 = vld [vmem:[#allocation7 + $0xc20] ss:$16 sps:$4 sm:$0xff]  }
 0x270   : > { %10790 = vmatpush1.bf16.msra.mxu1 %v15071_v56  ;;  %9830 = vmatprep.subr.bf16.mxu0 %v15076_v57  ;;  %v15155_v56 = vld [vmem:[#allocation7 + $0xb48] ss:$16 sps:$4 sm:$0xff]   ;;  %v15160_v57 = vld [vmem:[#allocation7 + $0xc44] ss:$16 sps:$4 sm:$0xff]  }
 0x271   : > { %10791 = vmatprep.subr.bf16.mxu1 %v15079_v58  ;;  %v15163_v58 = vld [vmem:[#allocation7 + $0xb6c] ss:$16 sps:$4 sm:$0xff]  }
 0x273   : > { %9831 = vmatpush1.bf16.msra.mxu0 %v15074_v59  ;;  %v15158_v59 = vld [vmem:[#allocation7 + $0xc40] ss:$16 sps:$4 sm:$0xff]  }
 0x274   : > { %10792 = vmatpush1.bf16.msra.mxu1 %v15077_v60  ;;  %9832 = vmatprep.subr.bf16.mxu0 %v15082_v61  ;;  %v15161_v60 = vld [vmem:[#allocation7 + $0xb68] ss:$16 sps:$4 sm:$0xff]   ;;  %v15166_v61 = vld [vmem:[#allocation7 + $0xc64] ss:$16 sps:$4 sm:$0xff]  }
 0x275   : > { %10793 = vmatprep.subr.bf16.mxu1 %v15085_v62  ;;  %v15169_v62 = vld [vmem:[#allocation7 + $0xb8c] ss:$16 sps:$4 sm:$0xff]  }
 0x277   : > { %9833 = vmatpush1.bf16.msra.mxu0 %v15080_v63  ;;  %v15164_v63 = vld [vmem:[#allocation7 + $0xc60] ss:$16 sps:$4 sm:$0xff]  }
 0x278   : > { %10794 = vmatpush1.bf16.msra.mxu1 %v15083_v0  ;;  %9834 = vmatprep.subr.bf16.mxu0 %v15088_v1  ;;  %v15167_v0 = vld [vmem:[#allocation7 + $0xb88] ss:$16 sps:$4 sm:$0xff]   ;;  %v15172_v1 = vld [vmem:[#allocation7 + $0xc84] ss:$16 sps:$4 sm:$0xff]  }
 0x279   : > { %10795 = vmatprep.subr.bf16.mxu1 %v15091_v3  ;;  %v15175_v3 = vld [vmem:[#allocation7 + $0xbac] ss:$16 sps:$4 sm:$0xff]  }
 0x27b   : > { %9835 = vmatpush1.bf16.msra.mxu0 %v15086_v4  ;;  %v15170_v4 = vld [vmem:[#allocation7 + $0xc80] ss:$16 sps:$4 sm:$0xff]  }
 0x27c   : > { %10796 = vmatpush1.bf16.msra.mxu1 %v15089_v5  ;;  %9836 = vmatprep.subr.bf16.mxu0 %v15094_v6  ;;  %v15173_v5 = vld [vmem:[#allocation7 + $0xba8] ss:$16 sps:$4 sm:$0xff]   ;;  %v15178_v6 = vld [vmem:[#allocation7 + $0xca4] ss:$16 sps:$4 sm:$0xff]  }
 0x27d   : > { %10806 = vmatprep.subr.bf16.mxu1 %v15097_v7  ;;  %v15181_v7 = vld [vmem:[#allocation7 + $0xbcc] ss:$16 sps:$4 sm:$0xff]  }
 0x27f   : > { %10798 = vmatmul.mubr.bf16.vlgmr.msra.gmra.mrb[4].mxu1 %v17743_v41  ;;  %9837 = vmatpush1.bf16.msra.mxu0 %v15092_v8  ;;  %v15142_v41 = vld [vmem:[#allocation7 + $0xbe4] ss:$16 sps:$4 sm:$0xff]   ;;  %v15176_v8 = vld [vmem:[#allocation7 + $0xca0] ss:$16 sps:$4 sm:$0xff]  }
 0x280   : > { %10807 = vmatpush1.bf16.msra.mxu1 %v15095_v9  ;;  %9838 = vmatprep.subr.bf16.mxu0 %v15100_v10  ;;  %v15179_v9 = vld [vmem:[#allocation7 + $0xbc8] ss:$16 sps:$4 sm:$0xff]   ;;  %v15184_v10 = vld [vmem:[#allocation7 + $0xcc4] ss:$16 sps:$4 sm:$0xff]  }
 0x281   : > { %10808 = vmatprep.subr.bf16.mxu1 %v15103_v11  ;;  %10838 = vmatprep.mubr.bf16.mxu1 %v17745_v46  ;;  %v507_v46 = vld [vmem:[%s17672_s12 + $0x50] sm:$0xff] }
 0x282   : > { %v17753_v49 = vpack.c.bf16 %v507_v46, %v507_v46  ;;  %v15187_v11 = vld [vmem:[#allocation7 + $0xbec] ss:$16 sps:$4 sm:$0xff]  }
 0x283   : > { %9839 = vmatpush1.bf16.msra.mxu0 %v15098_v12  ;;  %v15182_v12 = vld [vmem:[#allocation7 + $0xcc0] ss:$16 sps:$4 sm:$0xff]   ;;  %v15235_v46 = vld [vmem:[#allocation7 + $0xcec] ss:$16 sps:$4 sm:$0xff]  }
 0x284   : > { %10809 = vmatpush1.bf16.msra.mxu1 %v15101_v13  ;;  %9840 = vmatprep.subr.bf16.mxu0 %v15106_v15  ;;  %v15185_v13 = vld [vmem:[#allocation7 + $0xbe8] ss:$16 sps:$4 sm:$0xff]   ;;  %v15190_v15 = vld [vmem:[#allocation7 + $0xce4] ss:$16 sps:$4 sm:$0xff]  }
 0x285   : > { %10810 = vmatprep.subr.bf16.mxu1 %v15109_v17  ;;  %v15193_v17 = vld [vmem:[#allocation7 + $0xc0c] ss:$16 sps:$4 sm:$0xff]  }
 0x287   : > { %9841 = vmatpush1.bf16.msra.mxu0 %v15104_v18  ;;  %v15188_v18 = vld [vmem:[#allocation7 + $0xce0] ss:$16 sps:$4 sm:$0xff]  }
 0x288   : > { %10811 = vmatpush1.bf16.msra.mxu1 %v15107_v19  ;;  %9842 = vmatprep.subr.bf16.mxu0 %v15112_v20  ;;  %v15191_v19 = vld [vmem:[#allocation7 + $0xc08] ss:$16 sps:$4 sm:$0xff]   ;;  %v15196_v20 = vld [vmem:[#allocation7 + $0xd04] ss:$16 sps:$4 sm:$0xff]  }
 0x289   : > { %10812 = vmatprep.subr.bf16.mxu1 %v15115_v21  ;;  %v15199_v21 = vld [vmem:[#allocation7 + $0xc2c] ss:$16 sps:$4 sm:$0xff]  }
 0x28b   : > { %9843 = vmatpush1.bf16.msra.mxu0 %v15110_v22  ;;  %v15194_v22 = vld [vmem:[#allocation7 + $0xd00] ss:$16 sps:$4 sm:$0xff]  }
 0x28c   : > { %10813 = vmatpush1.bf16.msra.mxu1 %v15113_v23  ;;  %9844 = vmatprep.subr.bf16.mxu0 %v15118_v24  ;;  %v15197_v23 = vld [vmem:[#allocation7 + $0xc28] ss:$16 sps:$4 sm:$0xff]   ;;  %v15202_v24 = vld [vmem:[#allocation7 + $0xd24] ss:$16 sps:$4 sm:$0xff]  }
 0x28d   : > { %10814 = vmatprep.subr.bf16.mxu1 %v15121_v25  ;;  %v15205_v25 = vld [vmem:[#allocation7 + $0xc4c] ss:$16 sps:$4 sm:$0xff]  }
 0x28f   : > { %9845 = vmatpush1.bf16.msra.mxu0 %v15116_v26  ;;  %v15200_v26 = vld [vmem:[#allocation7 + $0xd20] ss:$16 sps:$4 sm:$0xff]  }
 0x290   : > { %10815 = vmatpush1.bf16.msra.mxu1 %v15119_v27  ;;  %9846 = vmatprep.subr.bf16.mxu0 %v15124_v28  ;;  %v15203_v27 = vld [vmem:[#allocation7 + $0xc48] ss:$16 sps:$4 sm:$0xff]   ;;  %v15208_v28 = vld [vmem:[#allocation7 + $0xd44] ss:$16 sps:$4 sm:$0xff]  }
 0x291   : > { %10816 = vmatprep.subr.bf16.mxu1 %v15127_v29  ;;  %v15211_v29 = vld [vmem:[#allocation7 + $0xc6c] ss:$16 sps:$4 sm:$0xff]  }
 0x293   : > { %9847 = vmatpush1.bf16.msra.mxu0 %v15122_v30  ;;  %v15206_v30 = vld [vmem:[#allocation7 + $0xd40] ss:$16 sps:$4 sm:$0xff]  }
 0x294   : > { %10817 = vmatpush1.bf16.msra.mxu1 %v15125_v31  ;;  %9848 = vmatprep.subr.bf16.mxu0 %v15130_v32  ;;  %v15209_v31 = vld [vmem:[#allocation7 + $0xc68] ss:$16 sps:$4 sm:$0xff]   ;;  %v15214_v32 = vld [vmem:[#allocation7 + $0xd64] ss:$16 sps:$4 sm:$0xff]  }
 0x295   : > { %10818 = vmatprep.subr.bf16.mxu1 %v15133_v34  ;;  %v15217_v34 = vld [vmem:[#allocation7 + $0xc8c] ss:$16 sps:$4 sm:$0xff]  }
 0x297   : > { %9849 = vmatpush1.bf16.msra.mxu0 %v15128_v35  ;;  %v15212_v35 = vld [vmem:[#allocation7 + $0xd60] ss:$16 sps:$4 sm:$0xff]  }
 0x298   : > { %10819 = vmatpush1.bf16.msra.mxu1 %v15131_v36  ;;  %9850 = vmatprep.subr.bf16.mxu0 %v15136_v37  ;;  %v15215_v36 = vld [vmem:[#allocation7 + $0xc88] ss:$16 sps:$4 sm:$0xff]   ;;  %v15220_v37 = vld [vmem:[#allocation7 + $0xd84] ss:$16 sps:$4 sm:$0xff]  }
 0x299   : > { %10820 = vmatprep.subr.bf16.mxu1 %v15139_v38  ;;  %v15223_v38 = vld [vmem:[#allocation7 + $0xcac] ss:$16 sps:$4 sm:$0xff]  }
 0x29b   : > { %9851 = vmatpush1.bf16.msra.mxu0 %v15134_v39  ;;  %v15218_v39 = vld [vmem:[#allocation7 + $0xd80] ss:$16 sps:$4 sm:$0xff]  }
 0x29c   : > { %10821 = vmatpush1.bf16.msra.mxu1 %v15137_v40  ;;  %9852 = vmatprep.subr.bf16.mxu0 %v15142_v41  ;;  %v15221_v40 = vld [vmem:[#allocation7 + $0xca8] ss:$16 sps:$4 sm:$0xff]   ;;  %v15226_v41 = vld [vmem:[#allocation7 + $0xda4] ss:$16 sps:$4 sm:$0xff]  }
 0x29d   : > { %10822 = vmatprep.subr.bf16.mxu1 %v15145_v42  ;;  %v15229_v42 = vld [vmem:[#allocation7 + $0xccc] ss:$16 sps:$4 sm:$0xff]  }
 0x29f   : > { %9853 = vmatpush1.bf16.msra.mxu0 %v15140_v43  ;;  %v15224_v43 = vld [vmem:[#allocation7 + $0xda0] ss:$16 sps:$4 sm:$0xff]  }
 0x2a0   : > { %10823 = vmatpush1.bf16.msra.mxu1 %v15143_v44  ;;  %9863 = vmatprep.subr.bf16.mxu0 %v15148_v45  ;;  %v15227_v44 = vld [vmem:[#allocation7 + $0xcc8] ss:$16 sps:$4 sm:$0xff]   ;;  %v15232_v45 = vld [vmem:[#allocation7 + $0xdc4] ss:$16 sps:$4 sm:$0xff]  }
 0x2a1   : > { %10824 = vmatprep.subr.bf16.mxu1 %v15151_v47  ;;  %v15230_v47 = vld [vmem:[#allocation7 + $0xdc0] ss:$16 sps:$4 sm:$0xff]  }
 0x2a2   : > { %9855 = vmatmul.mubr.bf16.vlgmr.msra.gmra.mrb[0].mxu0 %v17753_v49 }
 0x2a3   : > { %9864 = vmatpush1.bf16.msra.mxu0 %v15146_v50  ;;  %9895 = vmatprep.mubr.bf16.mxu0 %v17755_v54  ;;  %v15241_v50 = vld [vmem:[#allocation7 + $0xd0c] ss:$16 sps:$4 sm:$0xff]  }
 0x2a4   : > { %10825 = vmatpush1.bf16.msra.mxu1 %v15149_v51  ;;  %9865 = vmatprep.subr.bf16.mxu0 %v15154_v52  ;;  %v15236_v51 = vld [vmem:[#allocation7 + $0xde0] ss:$16 sps:$4 sm:$0xff]   ;;  %v15239_v52 = vld [vmem:[#allocation7 + $0xd08] ss:$16 sps:$4 sm:$0xff]  }
 0x2a5   : > { %10826 = vmatprep.subr.bf16.mxu1 %v15157_v53  ;;  %v15244_v53 = vld [vmem:[#allocation7 + $0xe04] ss:$16 sps:$4 sm:$0xff]  }
 0x2a7   : > { %9866 = vmatpush1.bf16.msra.mxu0 %v15152_v55  ;;  %v15247_v55 = vld [vmem:[#allocation7 + $0xd2c] ss:$16 sps:$4 sm:$0xff]  }
 0x2a8   : > { %10827 = vmatpush1.bf16.msra.mxu1 %v15155_v56  ;;  %9867 = vmatprep.subr.bf16.mxu0 %v15160_v57  ;;  %v512_v56 = vld [vmem:[%s17672_s12 + $0x78] sm:$0xff] }
 0x2a9   : > { %10828 = vmatprep.subr.bf16.mxu1 %v15163_v58  ;;  %v15242_v58 = vld [vmem:[#allocation7 + $0xe00] ss:$16 sps:$4 sm:$0xff]  }
 0x2ab   : > { %9868 = vmatpush1.bf16.msra.mxu0 %v15158_v59  ;;  %v15245_v59 = vld [vmem:[#allocation7 + $0xd28] ss:$16 sps:$4 sm:$0xff]  }
 0x2ac   : > { %10829 = vmatpush1.bf16.msra.mxu1 %v15161_v60  ;;  %9869 = vmatprep.subr.bf16.mxu0 %v15166_v61  ;;  %v15250_v60 = vld [vmem:[#allocation7 + $0xe24] ss:$16 sps:$4 sm:$0xff]   ;;  %v15253_v61 = vld [vmem:[#allocation7 + $0xd4c] ss:$16 sps:$4 sm:$0xff]  }
 0x2ad   : > { %10830 = vmatprep.subr.bf16.mxu1 %v15169_v62  ;;  %v17765_v62 = vpack.c.bf16 %v512_v56, %v512_v56  ;;  %v15329_v56 = vld [vmem:[#allocation7 + $0xee8] ss:$16 sps:$4 sm:$0xff]  }
 0x2af   : > { %9870 = vmatpush1.bf16.msra.mxu0 %v15164_v63  ;;  %v15248_v63 = vld [vmem:[#allocation7 + $0xe20] ss:$16 sps:$4 sm:$0xff]  }
 0x2b0   : > { %10831 = vmatpush1.bf16.msra.mxu1 %v15167_v0  ;;  %9871 = vmatprep.subr.bf16.mxu0 %v15172_v1  ;;  %v15251_v0 = vld [vmem:[#allocation7 + $0xd48] ss:$16 sps:$4 sm:$0xff]   ;;  %v15256_v1 = vld [vmem:[#allocation7 + $0xe44] ss:$16 sps:$4 sm:$0xff]  }
 0x2b1   : > { %10832 = vmatprep.subr.bf16.mxu1 %v15175_v3  ;;  %v15259_v3 = vld [vmem:[#allocation7 + $0xd6c] ss:$16 sps:$4 sm:$0xff]  }
 0x2b3   : > { %9872 = vmatpush1.bf16.msra.mxu0 %v15170_v4  ;;  %v15254_v4 = vld [vmem:[#allocation7 + $0xe40] ss:$16 sps:$4 sm:$0xff]  }
 0x2b4   : > { %10833 = vmatpush1.bf16.msra.mxu1 %v15173_v5  ;;  %9873 = vmatprep.subr.bf16.mxu0 %v15178_v6  ;;  %v15257_v5 = vld [vmem:[#allocation7 + $0xd68] ss:$16 sps:$4 sm:$0xff]   ;;  %v15262_v6 = vld [vmem:[#allocation7 + $0xe64] ss:$16 sps:$4 sm:$0xff]  }
 0x2b5   : > { %10834 = vmatprep.subr.bf16.mxu1 %v15181_v7  ;;  %v15265_v7 = vld [vmem:[#allocation7 + $0xd8c] ss:$16 sps:$4 sm:$0xff]  }
 0x2b7   : > { %9874 = vmatpush1.bf16.msra.mxu0 %v15176_v8  ;;  %v15260_v8 = vld [vmem:[#allocation7 + $0xe60] ss:$16 sps:$4 sm:$0xff]  }
 0x2b8   : > { %10835 = vmatpush1.bf16.msra.mxu1 %v15179_v9  ;;  %9875 = vmatprep.subr.bf16.mxu0 %v15184_v10  ;;  %v15263_v9 = vld [vmem:[#allocation7 + $0xd88] ss:$16 sps:$4 sm:$0xff]   ;;  %v15268_v10 = vld [vmem:[#allocation7 + $0xe84] ss:$16 sps:$4 sm:$0xff]  }
 0x2b9   : > { %10836 = vmatprep.subr.bf16.mxu1 %v15187_v11  ;;  %v15271_v11 = vld [vmem:[#allocation7 + $0xdac] ss:$16 sps:$4 sm:$0xff]  }
 0x2bb   : > { %9876 = vmatpush1.bf16.msra.mxu0 %v15182_v12  ;;  %v15266_v12 = vld [vmem:[#allocation7 + $0xe80] ss:$16 sps:$4 sm:$0xff]  }
 0x2bc   : > { %10837 = vmatpush1.bf16.msra.mxu1 %v15185_v13  ;;  %9877 = vmatprep.subr.bf16.mxu0 %v15190_v15  ;;  %v15269_v13 = vld [vmem:[#allocation7 + $0xda8] ss:$16 sps:$4 sm:$0xff]   ;;  %v15274_v15 = vld [vmem:[#allocation7 + $0xea4] ss:$16 sps:$4 sm:$0xff]  }
 0x2bd   : > { %10847 = vmatprep.subr.bf16.mxu1 %v15193_v17  ;;  %v15277_v17 = vld [vmem:[#allocation7 + $0xdcc] ss:$16 sps:$4 sm:$0xff]  }
 0x2bf   : > { %10839 = vmatmul.mubr.bf16.vlgmr.msra.gmra.mrb[4].mxu1 %v17753_v49  ;;  %9878 = vmatpush1.bf16.msra.mxu0 %v15188_v18  ;;  %v15238_v49 = vld [vmem:[#allocation7 + $0xde4] ss:$16 sps:$4 sm:$0xff]   ;;  %v15272_v18 = vld [vmem:[#allocation7 + $0xea0] ss:$16 sps:$4 sm:$0xff]  }
 0x2c0   : > { %10848 = vmatpush1.bf16.msra.mxu1 %v15191_v19  ;;  %9879 = vmatprep.subr.bf16.mxu0 %v15196_v20  ;;  %v15275_v19 = vld [vmem:[#allocation7 + $0xdc8] ss:$16 sps:$4 sm:$0xff]   ;;  %v15280_v20 = vld [vmem:[#allocation7 + $0xec4] ss:$16 sps:$4 sm:$0xff]  }
 0x2c1   : > { %10849 = vmatprep.subr.bf16.mxu1 %v15199_v21  ;;  %10879 = vmatprep.mubr.bf16.mxu1 %v17755_v54  ;;  %v509_v54 = vld [vmem:[%s17672_s12 + $0x60] sm:$0xff] }
 0x2c2   : > { %v17763_v57 = vpack.c.bf16 %v509_v54, %v509_v54  ;;  %v15283_v21 = vld [vmem:[#allocation7 + $0xdec] ss:$16 sps:$4 sm:$0xff]  }
 0x2c3   : > { %9880 = vmatpush1.bf16.msra.mxu0 %v15194_v22  ;;  %v15278_v22 = vld [vmem:[#allocation7 + $0xec0] ss:$16 sps:$4 sm:$0xff]   ;;  %v15331_v54 = vld [vmem:[#allocation7 + $0xeec] ss:$16 sps:$4 sm:$0xff]  }
 0x2c4   : > { %10850 = vmatpush1.bf16.msra.mxu1 %v15197_v23  ;;  %9881 = vmatprep.subr.bf16.mxu0 %v15202_v24  ;;  %v15281_v23 = vld [vmem:[#allocation7 + $0xde8] ss:$16 sps:$4 sm:$0xff]   ;;  %v15286_v24 = vld [vmem:[#allocation7 + $0xee4] ss:$16 sps:$4 sm:$0xff]  }
 0x2c5   : > { %10851 = vmatprep.subr.bf16.mxu1 %v15205_v25  ;;  %v15289_v25 = vld [vmem:[#allocation7 + $0xe0c] ss:$16 sps:$4 sm:$0xff]  }
 0x2c7   : > { %9882 = vmatpush1.bf16.msra.mxu0 %v15200_v26  ;;  %v15284_v26 = vld [vmem:[#allocation7 + $0xee0] ss:$16 sps:$4 sm:$0xff]  }
 0x2c8   : > { %10852 = vmatpush1.bf16.msra.mxu1 %v15203_v27  ;;  %9883 = vmatprep.subr.bf16.mxu0 %v15208_v28  ;;  %v15287_v27 = vld [vmem:[#allocation7 + $0xe08] ss:$16 sps:$4 sm:$0xff]   ;;  %v15292_v28 = vld [vmem:[#allocation7 + $0xf04] ss:$16 sps:$4 sm:$0xff]  }
 0x2c9   : > { %10853 = vmatprep.subr.bf16.mxu1 %v15211_v29  ;;  %v15295_v29 = vld [vmem:[#allocation7 + $0xe2c] ss:$16 sps:$4 sm:$0xff]  }
 0x2cb   : > { %9884 = vmatpush1.bf16.msra.mxu0 %v15206_v30  ;;  %v15290_v30 = vld [vmem:[#allocation7 + $0xf00] ss:$16 sps:$4 sm:$0xff]  }
 0x2cc   : > { %10854 = vmatpush1.bf16.msra.mxu1 %v15209_v31  ;;  %9885 = vmatprep.subr.bf16.mxu0 %v15214_v32  ;;  %v15293_v31 = vld [vmem:[#allocation7 + $0xe28] ss:$16 sps:$4 sm:$0xff]   ;;  %v15298_v32 = vld [vmem:[#allocation7 + $0xf24] ss:$16 sps:$4 sm:$0xff]  }
 0x2cd   : > { %10855 = vmatprep.subr.bf16.mxu1 %v15217_v34  ;;  %v15301_v34 = vld [vmem:[#allocation7 + $0xe4c] ss:$16 sps:$4 sm:$0xff]  }
 0x2cf   : > { %9886 = vmatpush1.bf16.msra.mxu0 %v15212_v35  ;;  %v15296_v35 = vld [vmem:[#allocation7 + $0xf20] ss:$16 sps:$4 sm:$0xff]  }
 0x2d0   : > { %10856 = vmatpush1.bf16.msra.mxu1 %v15215_v36  ;;  %9887 = vmatprep.subr.bf16.mxu0 %v15220_v37  ;;  %v15299_v36 = vld [vmem:[#allocation7 + $0xe48] ss:$16 sps:$4 sm:$0xff]   ;;  %v15304_v37 = vld [vmem:[#allocation7 + $0xf44] ss:$16 sps:$4 sm:$0xff]  }
 0x2d1   : > { %10857 = vmatprep.subr.bf16.mxu1 %v15223_v38  ;;  %v15307_v38 = vld [vmem:[#allocation7 + $0xe6c] ss:$16 sps:$4 sm:$0xff]  }
 0x2d3   : > { %9888 = vmatpush1.bf16.msra.mxu0 %v15218_v39  ;;  %v15302_v39 = vld [vmem:[#allocation7 + $0xf40] ss:$16 sps:$4 sm:$0xff]  }
 0x2d4   : > { %10858 = vmatpush1.bf16.msra.mxu1 %v15221_v40  ;;  %9889 = vmatprep.subr.bf16.mxu0 %v15226_v41  ;;  %v15305_v40 = vld [vmem:[#allocation7 + $0xe68] ss:$16 sps:$4 sm:$0xff]   ;;  %v15310_v41 = vld [vmem:[#allocation7 + $0xf64] ss:$16 sps:$4 sm:$0xff]  }
 0x2d5   : > { %10859 = vmatprep.subr.bf16.mxu1 %v15229_v42  ;;  %v15313_v42 = vld [vmem:[#allocation7 + $0xe8c] ss:$16 sps:$4 sm:$0xff]  }
 0x2d7   : > { %9890 = vmatpush1.bf16.msra.mxu0 %v15224_v43  ;;  %v15308_v43 = vld [vmem:[#allocation7 + $0xf60] ss:$16 sps:$4 sm:$0xff]  }
 0x2d8   : > { %10860 = vmatpush1.bf16.msra.mxu1 %v15227_v44  ;;  %9891 = vmatprep.subr.bf16.mxu0 %v15232_v45  ;;  %v15311_v44 = vld [vmem:[#allocation7 + $0xe88] ss:$16 sps:$4 sm:$0xff]   ;;  %v15316_v45 = vld [vmem:[#allocation7 + $0xf84] ss:$16 sps:$4 sm:$0xff]  }
 0x2d9   : > { %10861 = vmatprep.subr.bf16.mxu1 %v15235_v46  ;;  %v15319_v46 = vld [vmem:[#allocation7 + $0xeac] ss:$16 sps:$4 sm:$0xff]  }
 0x2db   : > { %9892 = vmatpush1.bf16.msra.mxu0 %v15230_v47  ;;  %v15314_v47 = vld [vmem:[#allocation7 + $0xf80] ss:$16 sps:$4 sm:$0xff]  }
 0x2dc   : > { %10862 = vmatpush1.bf16.msra.mxu1 %v15233_v48  ;;  %9893 = vmatprep.subr.bf16.mxu0 %v15238_v49  ;;  %v15317_v48 = vld [vmem:[#allocation7 + $0xea8] ss:$16 sps:$4 sm:$0xff]   ;;  %v15322_v49 = vld [vmem:[#allocation7 + $0xfa4] ss:$16 sps:$4 sm:$0xff]  }
 0x2dd   : > { %10863 = vmatprep.subr.bf16.mxu1 %v15241_v50  ;;  %v15325_v50 = vld [vmem:[#allocation7 + $0xecc] ss:$16 sps:$4 sm:$0xff]  }
 0x2df   : > { %9894 = vmatpush1.bf16.msra.mxu0 %v15236_v51  ;;  %v15320_v51 = vld [vmem:[#allocation7 + $0xfa0] ss:$16 sps:$4 sm:$0xff]  }
 0x2e0   : > { %10864 = vmatpush1.bf16.msra.mxu1 %v15239_v52  ;;  %9904 = vmatprep.subr.bf16.mxu0 %v15244_v53  ;;  %v15323_v52 = vld [vmem:[#allocation7 + $0xec8] ss:$16 sps:$4 sm:$0xff]   ;;  %v15328_v53 = vld [vmem:[#allocation7 + $0xfc4] ss:$16 sps:$4 sm:$0xff]  }
 0x2e1   : > { %10865 = vmatprep.subr.bf16.mxu1 %v15247_v55  ;;  %v15326_v55 = vld [vmem:[#allocation7 + $0xfc0] ss:$16 sps:$4 sm:$0xff]  }
 0x2e2   : > { %9896 = vmatmul.mubr.bf16.vlgmr.msra.gmra.mrb[0].mxu0 %v17763_v57 }
 0x2e3   : > { %9905 = vmatpush1.bf16.msra.mxu0 %v15242_v58  ;;  %9936 = vmatprep.mubr.bf16.mxu0 %v17765_v62  ;;  %v15337_v58 = vld [vmem:[#allocation7 + $0xf0c] ss:$16 sps:$4 sm:$0xff]  }
 0x2e4   : > { %10866 = vmatpush1.bf16.msra.mxu1 %v15245_v59  ;;  %9906 = vmatprep.subr.bf16.mxu0 %v15250_v60  ;;  %v15332_v59 = vld [vmem:[#allocation7 + $0xfe0] ss:$16 sps:$4 sm:$0xff]   ;;  %v15335_v60 = vld [vmem:[#allocation7 + $0xf08] ss:$16 sps:$4 sm:$0xff]  }
 0x2e5   : > { %10867 = vmatprep.subr.bf16.mxu1 %v15253_v61  ;;  %v15340_v61 = vld [vmem:[#allocation7 + $0x1004] ss:$16 sps:$4 sm:$0xff]  }
 0x2e7   : > { %9907 = vmatpush1.bf16.msra.mxu0 %v15248_v63  ;;  %v15343_v63 = vld [vmem:[#allocation7 + $0xf2c] ss:$16 sps:$4 sm:$0xff]  }
 0x2e8   : > { %10868 = vmatpush1.bf16.msra.mxu1 %v15251_v0  ;;  %9908 = vmatprep.subr.bf16.mxu0 %v15256_v1  ;;  %v514_v0 = vld [vmem:[%s17672_s12 + $0x88] sm:$0xff] }
 0x2e9   : > { %10869 = vmatprep.subr.bf16.mxu1 %v15259_v3  ;;  %v15338_v3 = vld [vmem:[#allocation7 + $0x1000] ss:$16 sps:$4 sm:$0xff]  }
 0x2eb   : > { %9909 = vmatpush1.bf16.msra.mxu0 %v15254_v4  ;;  %v15341_v4 = vld [vmem:[#allocation7 + $0xf28] ss:$16 sps:$4 sm:$0xff]  }
 0x2ec   : > { %10870 = vmatpush1.bf16.msra.mxu1 %v15257_v5  ;;  %9910 = vmatprep.subr.bf16.mxu0 %v15262_v6  ;;  %v15346_v5 = vld [vmem:[#allocation7 + $0x1024] ss:$16 sps:$4 sm:$0xff]   ;;  %v15349_v6 = vld [vmem:[#allocation7 + $0xf4c] ss:$16 sps:$4 sm:$0xff]  }
 0x2ed   : > { %10871 = vmatprep.subr.bf16.mxu1 %v15265_v7  ;;  %v17775_v7 = vpack.c.bf16 %v514_v0, %v514_v0  ;;  %v15425_v0 = vld [vmem:[#allocation7 + $0x10e8] ss:$16 sps:$4 sm:$0xff]  }
 0x2ef   : > { %9911 = vmatpush1.bf16.msra.mxu0 %v15260_v8  ;;  %v15344_v8 = vld [vmem:[#allocation7 + $0x1020] ss:$16 sps:$4 sm:$0xff]  }
 0x2f0   : > { %10872 = vmatpush1.bf16.msra.mxu1 %v15263_v9  ;;  %9912 = vmatprep.subr.bf16.mxu0 %v15268_v10  ;;  %v15347_v9 = vld [vmem:[#allocation7 + $0xf48] ss:$16 sps:$4 sm:$0xff]   ;;  %v15352_v10 = vld [vmem:[#allocation7 + $0x1044] ss:$16 sps:$4 sm:$0xff]  }
 0x2f1   : > { %10873 = vmatprep.subr.bf16.mxu1 %v15271_v11  ;;  %v15355_v11 = vld [vmem:[#allocation7 + $0xf6c] ss:$16 sps:$4 sm:$0xff]  }
 0x2f3   : > { %9913 = vmatpush1.bf16.msra.mxu0 %v15266_v12  ;;  %v15350_v12 = vld [vmem:[#allocation7 + $0x1040] ss:$16 sps:$4 sm:$0xff]  }
 0x2f4   : > { %10874 = vmatpush1.bf16.msra.mxu1 %v15269_v13  ;;  %9914 = vmatprep.subr.bf16.mxu0 %v15274_v15  ;;  %v15353_v13 = vld [vmem:[#allocation7 + $0xf68] ss:$16 sps:$4 sm:$0xff]   ;;  %v15358_v15 = vld [vmem:[#allocation7 + $0x1064] ss:$16 sps:$4 sm:$0xff]  }
 0x2f5   : > { %10875 = vmatprep.subr.bf16.mxu1 %v15277_v17  ;;  %v15361_v17 = vld [vmem:[#allocation7 + $0xf8c] ss:$16 sps:$4 sm:$0xff]  }
 0x2f7   : > { %9915 = vmatpush1.bf16.msra.mxu0 %v15272_v18  ;;  %v15356_v18 = vld [vmem:[#allocation7 + $0x1060] ss:$16 sps:$4 sm:$0xff]  }
 0x2f8   : > { %10876 = vmatpush1.bf16.msra.mxu1 %v15275_v19  ;;  %9916 = vmatprep.subr.bf16.mxu0 %v15280_v20  ;;  %v15359_v19 = vld [vmem:[#allocation7 + $0xf88] ss:$16 sps:$4 sm:$0xff]   ;;  %v15364_v20 = vld [vmem:[#allocation7 + $0x1084] ss:$16 sps:$4 sm:$0xff]  }
 0x2f9   : > { %10877 = vmatprep.subr.bf16.mxu1 %v15283_v21  ;;  %v15367_v21 = vld [vmem:[#allocation7 + $0xfac] ss:$16 sps:$4 sm:$0xff]  }
 0x2fb   : > { %9917 = vmatpush1.bf16.msra.mxu0 %v15278_v22  ;;  %v15362_v22 = vld [vmem:[#allocation7 + $0x1080] ss:$16 sps:$4 sm:$0xff]  }
 0x2fc   : > { %10878 = vmatpush1.bf16.msra.mxu1 %v15281_v23  ;;  %9918 = vmatprep.subr.bf16.mxu0 %v15286_v24  ;;  %v15365_v23 = vld [vmem:[#allocation7 + $0xfa8] ss:$16 sps:$4 sm:$0xff]   ;;  %v15370_v24 = vld [vmem:[#allocation7 + $0x10a4] ss:$16 sps:$4 sm:$0xff]  }
 0x2fd   : > { %10888 = vmatprep.subr.bf16.mxu1 %v15289_v25  ;;  %v15373_v25 = vld [vmem:[#allocation7 + $0xfcc] ss:$16 sps:$4 sm:$0xff]  }
 0x2ff   : > { %10880 = vmatmul.mubr.bf16.vlgmr.msra.gmra.mrb[4].mxu1 %v17763_v57  ;;  %9919 = vmatpush1.bf16.msra.mxu0 %v15284_v26  ;;  %v15334_v57 = vld [vmem:[#allocation7 + $0xfe4] ss:$16 sps:$4 sm:$0xff]   ;;  %v15368_v26 = vld [vmem:[#allocation7 + $0x10a0] ss:$16 sps:$4 sm:$0xff]  }
 0x300   : > { %10889 = vmatpush1.bf16.msra.mxu1 %v15287_v27  ;;  %9920 = vmatprep.subr.bf16.mxu0 %v15292_v28  ;;  %v15371_v27 = vld [vmem:[#allocation7 + $0xfc8] ss:$16 sps:$4 sm:$0xff]   ;;  %v15376_v28 = vld [vmem:[#allocation7 + $0x10c4] ss:$16 sps:$4 sm:$0xff]  }
 0x301   : > { %10890 = vmatprep.subr.bf16.mxu1 %v15295_v29  ;;  %10920 = vmatprep.mubr.bf16.mxu1 %v17765_v62  ;;  %v511_v62 = vld [vmem:[%s17672_s12 + $0x70] sm:$0xff] }
 0x302   : > { %v17773_v1 = vpack.c.bf16 %v511_v62, %v511_v62  ;;  %v15379_v29 = vld [vmem:[#allocation7 + $0xfec] ss:$16 sps:$4 sm:$0xff]  }
 0x303   : > { %9921 = vmatpush1.bf16.msra.mxu0 %v15290_v30  ;;  %v15374_v30 = vld [vmem:[#allocation7 + $0x10c0] ss:$16 sps:$4 sm:$0xff]   ;;  %v15427_v62 = vld [vmem:[#allocation7 + $0x10ec] ss:$16 sps:$4 sm:$0xff]  }
 0x304   : > { %10891 = vmatpush1.bf16.msra.mxu1 %v15293_v31  ;;  %9922 = vmatprep.subr.bf16.mxu0 %v15298_v32  ;;  %v15377_v31 = vld [vmem:[#allocation7 + $0xfe8] ss:$16 sps:$4 sm:$0xff]   ;;  %v15382_v32 = vld [vmem:[#allocation7 + $0x10e4] ss:$16 sps:$4 sm:$0xff]  }
 0x305   : > { %10892 = vmatprep.subr.bf16.mxu1 %v15301_v34  ;;  %v15385_v34 = vld [vmem:[#allocation7 + $0x100c] ss:$16 sps:$4 sm:$0xff]  }
 0x307   : > { %9923 = vmatpush1.bf16.msra.mxu0 %v15296_v35  ;;  %v15380_v35 = vld [vmem:[#allocation7 + $0x10e0] ss:$16 sps:$4 sm:$0xff]  }
 0x308   : > { %10893 = vmatpush1.bf16.msra.mxu1 %v15299_v36  ;;  %9924 = vmatprep.subr.bf16.mxu0 %v15304_v37  ;;  %v15383_v36 = vld [vmem:[#allocation7 + $0x1008] ss:$16 sps:$4 sm:$0xff]   ;;  %v15388_v37 = vld [vmem:[#allocation7 + $0x1104] ss:$16 sps:$4 sm:$0xff]  }
 0x309   : > { %10894 = vmatprep.subr.bf16.mxu1 %v15307_v38  ;;  %v15391_v38 = vld [vmem:[#allocation7 + $0x102c] ss:$16 sps:$4 sm:$0xff]  }
 0x30b   : > { %9925 = vmatpush1.bf16.msra.mxu0 %v15302_v39  ;;  %v15386_v39 = vld [vmem:[#allocation7 + $0x1100] ss:$16 sps:$4 sm:$0xff]  }
 0x30c   : > { %10895 = vmatpush1.bf16.msra.mxu1 %v15305_v40  ;;  %9926 = vmatprep.subr.bf16.mxu0 %v15310_v41  ;;  %v15389_v40 = vld [vmem:[#allocation7 + $0x1028] ss:$16 sps:$4 sm:$0xff]   ;;  %v15394_v41 = vld [vmem:[#allocation7 + $0x1124] ss:$16 sps:$4 sm:$0xff]  }
 0x30d   : > { %10896 = vmatprep.subr.bf16.mxu1 %v15313_v42  ;;  %v15397_v42 = vld [vmem:[#allocation7 + $0x104c] ss:$16 sps:$4 sm:$0xff]  }
 0x30f   : > { %9927 = vmatpush1.bf16.msra.mxu0 %v15308_v43  ;;  %v15392_v43 = vld [vmem:[#allocation7 + $0x1120] ss:$16 sps:$4 sm:$0xff]  }
 0x310   : > { %10897 = vmatpush1.bf16.msra.mxu1 %v15311_v44  ;;  %9928 = vmatprep.subr.bf16.mxu0 %v15316_v45  ;;  %v15395_v44 = vld [vmem:[#allocation7 + $0x1048] ss:$16 sps:$4 sm:$0xff]   ;;  %v15400_v45 = vld [vmem:[#allocation7 + $0x1144] ss:$16 sps:$4 sm:$0xff]  }
 0x311   : > { %10898 = vmatprep.subr.bf16.mxu1 %v15319_v46  ;;  %v15403_v46 = vld [vmem:[#allocation7 + $0x106c] ss:$16 sps:$4 sm:$0xff]  }
 0x313   : > { %9929 = vmatpush1.bf16.msra.mxu0 %v15314_v47  ;;  %v15398_v47 = vld [vmem:[#allocation7 + $0x1140] ss:$16 sps:$4 sm:$0xff]  }
 0x314   : > { %10899 = vmatpush1.bf16.msra.mxu1 %v15317_v48  ;;  %9930 = vmatprep.subr.bf16.mxu0 %v15322_v49  ;;  %v15401_v48 = vld [vmem:[#allocation7 + $0x1068] ss:$16 sps:$4 sm:$0xff]   ;;  %v15406_v49 = vld [vmem:[#allocation7 + $0x1164] ss:$16 sps:$4 sm:$0xff]  }
 0x315   : > { %10900 = vmatprep.subr.bf16.mxu1 %v15325_v50  ;;  %v15409_v50 = vld [vmem:[#allocation7 + $0x108c] ss:$16 sps:$4 sm:$0xff]  }
 0x317   : > { %9931 = vmatpush1.bf16.msra.mxu0 %v15320_v51  ;;  %v15404_v51 = vld [vmem:[#allocation7 + $0x1160] ss:$16 sps:$4 sm:$0xff]  }
 0x318   : > { %10901 = vmatpush1.bf16.msra.mxu1 %v15323_v52  ;;  %9932 = vmatprep.subr.bf16.mxu0 %v15328_v53  ;;  %v15407_v52 = vld [vmem:[#allocation7 + $0x1088] ss:$16 sps:$4 sm:$0xff]   ;;  %v15412_v53 = vld [vmem:[#allocation7 + $0x1184] ss:$16 sps:$4 sm:$0xff]  }
 0x319   : > { %10902 = vmatprep.subr.bf16.mxu1 %v15331_v54  ;;  %v15415_v54 = vld [vmem:[#allocation7 + $0x10ac] ss:$16 sps:$4 sm:$0xff]  }
 0x31b   : > { %9933 = vmatpush1.bf16.msra.mxu0 %v15326_v55  ;;  %v15410_v55 = vld [vmem:[#allocation7 + $0x1180] ss:$16 sps:$4 sm:$0xff]  }
 0x31c   : > { %10903 = vmatpush1.bf16.msra.mxu1 %v15329_v56  ;;  %9934 = vmatprep.subr.bf16.mxu0 %v15334_v57  ;;  %v15413_v56 = vld [vmem:[#allocation7 + $0x10a8] ss:$16 sps:$4 sm:$0xff]   ;;  %v15418_v57 = vld [vmem:[#allocation7 + $0x11a4] ss:$16 sps:$4 sm:$0xff]  }
 0x31d   : > { %10904 = vmatprep.subr.bf16.mxu1 %v15337_v58  ;;  %v15421_v58 = vld [vmem:[#allocation7 + $0x10cc] ss:$16 sps:$4 sm:$0xff]  }
 0x31f   : > { %9935 = vmatpush1.bf16.msra.mxu0 %v15332_v59  ;;  %v15416_v59 = vld [vmem:[#allocation7 + $0x11a0] ss:$16 sps:$4 sm:$0xff]  }
 0x320   : > { %10905 = vmatpush1.bf16.msra.mxu1 %v15335_v60  ;;  %9945 = vmatprep.subr.bf16.mxu0 %v15340_v61  ;;  %v15419_v60 = vld [vmem:[#allocation7 + $0x10c8] ss:$16 sps:$4 sm:$0xff]   ;;  %v15424_v61 = vld [vmem:[#allocation7 + $0x11c4] ss:$16 sps:$4 sm:$0xff]  }
 0x321   : > { %10906 = vmatprep.subr.bf16.mxu1 %v15343_v63  ;;  %v15422_v63 = vld [vmem:[#allocation7 + $0x11c0] ss:$16 sps:$4 sm:$0xff]  }
 0x322   : > { %9937 = vmatmul.mubr.bf16.vlgmr.msra.gmra.mrb[0].mxu0 %v17773_v1 }
 0x323   : > { %9946 = vmatpush1.bf16.msra.mxu0 %v15338_v3  ;;  %9977 = vmatprep.mubr.bf16.mxu0 %v17775_v7  ;;  %v15433_v3 = vld [vmem:[#allocation7 + $0x110c] ss:$16 sps:$4 sm:$0xff]  }
 0x324   : > { %10907 = vmatpush1.bf16.msra.mxu1 %v15341_v4  ;;  %9947 = vmatprep.subr.bf16.mxu0 %v15346_v5  ;;  %v15428_v4 = vld [vmem:[#allocation7 + $0x11e0] ss:$16 sps:$4 sm:$0xff]   ;;  %v15431_v5 = vld [vmem:[#allocation7 + $0x1108] ss:$16 sps:$4 sm:$0xff]  }
 0x325   : > { %10908 = vmatprep.subr.bf16.mxu1 %v15349_v6  ;;  %v15436_v6 = vld [vmem:[#allocation7 + $0x1204] ss:$16 sps:$4 sm:$0xff]  }
 0x327   : > { %9948 = vmatpush1.bf16.msra.mxu0 %v15344_v8  ;;  %v15439_v8 = vld [vmem:[#allocation7 + $0x112c] ss:$16 sps:$4 sm:$0xff]  }
 0x328   : > { %10909 = vmatpush1.bf16.msra.mxu1 %v15347_v9  ;;  %9949 = vmatprep.subr.bf16.mxu0 %v15352_v10  ;;  %v516_v9 = vld [vmem:[%s17672_s12 + $0x98] sm:$0xff] }
 0x329   : > { %10910 = vmatprep.subr.bf16.mxu1 %v15355_v11  ;;  %v15434_v11 = vld [vmem:[#allocation7 + $0x1200] ss:$16 sps:$4 sm:$0xff]  }
 0x32b   : > { %9950 = vmatpush1.bf16.msra.mxu0 %v15350_v12  ;;  %v15437_v12 = vld [vmem:[#allocation7 + $0x1128] ss:$16 sps:$4 sm:$0xff]  }
 0x32c   : > { %10911 = vmatpush1.bf16.msra.mxu1 %v15353_v13  ;;  %9951 = vmatprep.subr.bf16.mxu0 %v15358_v15  ;;  %v15442_v13 = vld [vmem:[#allocation7 + $0x1224] ss:$16 sps:$4 sm:$0xff]   ;;  %v15445_v15 = vld [vmem:[#allocation7 + $0x114c] ss:$16 sps:$4 sm:$0xff]  }
 0x32d   : > { %10912 = vmatprep.subr.bf16.mxu1 %v15361_v17  ;;  %v17785_v17 = vpack.c.bf16 %v516_v9, %v516_v9  ;;  %v15521_v9 = vld [vmem:[#allocation7 + $0x12e8] ss:$16 sps:$4 sm:$0xff]  }
 0x32f   : > { %9952 = vmatpush1.bf16.msra.mxu0 %v15356_v18  ;;  %v15440_v18 = vld [vmem:[#allocation7 + $0x1220] ss:$16 sps:$4 sm:$0xff]  }
 0x330   : > { %10913 = vmatpush1.bf16.msra.mxu1 %v15359_v19  ;;  %9953 = vmatprep.subr.bf16.mxu0 %v15364_v20  ;;  %v15443_v19 = vld [vmem:[#allocation7 + $0x1148] ss:$16 sps:$4 sm:$0xff]   ;;  %v15448_v20 = vld [vmem:[#allocation7 + $0x1244] ss:$16 sps:$4 sm:$0xff]  }
 0x331   : > { %10914 = vmatprep.subr.bf16.mxu1 %v15367_v21  ;;  %v15451_v21 = vld [vmem:[#allocation7 + $0x116c] ss:$16 sps:$4 sm:$0xff]  }
 0x333   : > { %9954 = vmatpush1.bf16.msra.mxu0 %v15362_v22  ;;  %v15446_v22 = vld [vmem:[#allocation7 + $0x1240] ss:$16 sps:$4 sm:$0xff]  }
 0x334   : > { %10915 = vmatpush1.bf16.msra.mxu1 %v15365_v23  ;;  %9955 = vmatprep.subr.bf16.mxu0 %v15370_v24  ;;  %v15449_v23 = vld [vmem:[#allocation7 + $0x1168] ss:$16 sps:$4 sm:$0xff]   ;;  %v15454_v24 = vld [vmem:[#allocation7 + $0x1264] ss:$16 sps:$4 sm:$0xff]  }
 0x335   : > { %10916 = vmatprep.subr.bf16.mxu1 %v15373_v25  ;;  %v15457_v25 = vld [vmem:[#allocation7 + $0x118c] ss:$16 sps:$4 sm:$0xff]  }
 0x337   : > { %9956 = vmatpush1.bf16.msra.mxu0 %v15368_v26  ;;  %v15452_v26 = vld [vmem:[#allocation7 + $0x1260] ss:$16 sps:$4 sm:$0xff]  }
 0x338   : > { %10917 = vmatpush1.bf16.msra.mxu1 %v15371_v27  ;;  %9957 = vmatprep.subr.bf16.mxu0 %v15376_v28  ;;  %v15455_v27 = vld [vmem:[#allocation7 + $0x1188] ss:$16 sps:$4 sm:$0xff]   ;;  %v15460_v28 = vld [vmem:[#allocation7 + $0x1284] ss:$16 sps:$4 sm:$0xff]  }
 0x339   : > { %10918 = vmatprep.subr.bf16.mxu1 %v15379_v29  ;;  %v15463_v29 = vld [vmem:[#allocation7 + $0x11ac] ss:$16 sps:$4 sm:$0xff]  }
 0x33b   : > { %9958 = vmatpush1.bf16.msra.mxu0 %v15374_v30  ;;  %v15458_v30 = vld [vmem:[#allocation7 + $0x1280] ss:$16 sps:$4 sm:$0xff]  }
 0x33c   : > { %10919 = vmatpush1.bf16.msra.mxu1 %v15377_v31  ;;  %9959 = vmatprep.subr.bf16.mxu0 %v15382_v32  ;;  %v15461_v31 = vld [vmem:[#allocation7 + $0x11a8] ss:$16 sps:$4 sm:$0xff]   ;;  %v15466_v32 = vld [vmem:[#allocation7 + $0x12a4] ss:$16 sps:$4 sm:$0xff]  }
 0x33d   : > { %10929 = vmatprep.subr.bf16.mxu1 %v15385_v34  ;;  %v15469_v34 = vld [vmem:[#allocation7 + $0x11cc] ss:$16 sps:$4 sm:$0xff]  }
 0x33f   : > { %10921 = vmatmul.mubr.bf16.vlgmr.msra.gmra.mrb[4].mxu1 %v17773_v1  ;;  %9960 = vmatpush1.bf16.msra.mxu0 %v15380_v35  ;;  %v15430_v1 = vld [vmem:[#allocation7 + $0x11e4] ss:$16 sps:$4 sm:$0xff]   ;;  %v15464_v35 = vld [vmem:[#allocation7 + $0x12a0] ss:$16 sps:$4 sm:$0xff]  }
 0x340   : > { %10930 = vmatpush1.bf16.msra.mxu1 %v15383_v36  ;;  %9961 = vmatprep.subr.bf16.mxu0 %v15388_v37  ;;  %v15467_v36 = vld [vmem:[#allocation7 + $0x11c8] ss:$16 sps:$4 sm:$0xff]   ;;  %v15472_v37 = vld [vmem:[#allocation7 + $0x12c4] ss:$16 sps:$4 sm:$0xff]  }
 0x341   : > { %10931 = vmatprep.subr.bf16.mxu1 %v15391_v38  ;;  %10961 = vmatprep.mubr.bf16.mxu1 %v17775_v7  ;;  %v513_v7 = vld [vmem:[%s17672_s12 + $0x80] sm:$0xff] }
 0x342   : > { %v17783_v10 = vpack.c.bf16 %v513_v7, %v513_v7  ;;  %v15475_v38 = vld [vmem:[#allocation7 + $0x11ec] ss:$16 sps:$4 sm:$0xff]  }
 0x343   : > { %9962 = vmatpush1.bf16.msra.mxu0 %v15386_v39  ;;  %v15470_v39 = vld [vmem:[#allocation7 + $0x12c0] ss:$16 sps:$4 sm:$0xff]   ;;  %v15523_v7 = vld [vmem:[#allocation7 + $0x12ec] ss:$16 sps:$4 sm:$0xff]  }
 0x344   : > { %10932 = vmatpush1.bf16.msra.mxu1 %v15389_v40  ;;  %9963 = vmatprep.subr.bf16.mxu0 %v15394_v41  ;;  %v15473_v40 = vld [vmem:[#allocation7 + $0x11e8] ss:$16 sps:$4 sm:$0xff]   ;;  %v15478_v41 = vld [vmem:[#allocation7 + $0x12e4] ss:$16 sps:$4 sm:$0xff]  }
 0x345   : > { %10933 = vmatprep.subr.bf16.mxu1 %v15397_v42  ;;  %v15481_v42 = vld [vmem:[#allocation7 + $0x120c] ss:$16 sps:$4 sm:$0xff]  }
 0x347   : > { %9964 = vmatpush1.bf16.msra.mxu0 %v15392_v43  ;;  %v15476_v43 = vld [vmem:[#allocation7 + $0x12e0] ss:$16 sps:$4 sm:$0xff]  }
 0x348   : > { %10934 = vmatpush1.bf16.msra.mxu1 %v15395_v44  ;;  %9965 = vmatprep.subr.bf16.mxu0 %v15400_v45  ;;  %v15479_v44 = vld [vmem:[#allocation7 + $0x1208] ss:$16 sps:$4 sm:$0xff]   ;;  %v15484_v45 = vld [vmem:[#allocation7 + $0x1304] ss:$16 sps:$4 sm:$0xff]  }
 0x349   : > { %10935 = vmatprep.subr.bf16.mxu1 %v15403_v46  ;;  %v15487_v46 = vld [vmem:[#allocation7 + $0x122c] ss:$16 sps:$4 sm:$0xff]  }
 0x34b   : > { %9966 = vmatpush1.bf16.msra.mxu0 %v15398_v47  ;;  %v15482_v47 = vld [vmem:[#allocation7 + $0x1300] ss:$16 sps:$4 sm:$0xff]  }
 0x34c   : > { %10936 = vmatpush1.bf16.msra.mxu1 %v15401_v48  ;;  %9967 = vmatprep.subr.bf16.mxu0 %v15406_v49  ;;  %v15485_v48 = vld [vmem:[#allocation7 + $0x1228] ss:$16 sps:$4 sm:$0xff]   ;;  %v15490_v49 = vld [vmem:[#allocation7 + $0x1324] ss:$16 sps:$4 sm:$0xff]  }
 0x34d   : > { %10937 = vmatprep.subr.bf16.mxu1 %v15409_v50  ;;  %v15493_v50 = vld [vmem:[#allocation7 + $0x124c] ss:$16 sps:$4 sm:$0xff]  }
 0x34f   : > { %9968 = vmatpush1.bf16.msra.mxu0 %v15404_v51  ;;  %v15488_v51 = vld [vmem:[#allocation7 + $0x1320] ss:$16 sps:$4 sm:$0xff]  }
 0x350   : > { %10938 = vmatpush1.bf16.msra.mxu1 %v15407_v52  ;;  %9969 = vmatprep.subr.bf16.mxu0 %v15412_v53  ;;  %v15491_v52 = vld [vmem:[#allocation7 + $0x1248] ss:$16 sps:$4 sm:$0xff]   ;;  %v15496_v53 = vld [vmem:[#allocation7 + $0x1344] ss:$16 sps:$4 sm:$0xff]  }
 0x351   : > { %10939 = vmatprep.subr.bf16.mxu1 %v15415_v54  ;;  %v15499_v54 = vld [vmem:[#allocation7 + $0x126c] ss:$16 sps:$4 sm:$0xff]  }
 0x353   : > { %9970 = vmatpush1.bf16.msra.mxu0 %v15410_v55  ;;  %v15494_v55 = vld [vmem:[#allocation7 + $0x1340] ss:$16 sps:$4 sm:$0xff]  }
 0x354   : > { %10940 = vmatpush1.bf16.msra.mxu1 %v15413_v56  ;;  %9971 = vmatprep.subr.bf16.mxu0 %v15418_v57  ;;  %v15497_v56 = vld [vmem:[#allocation7 + $0x1268] ss:$16 sps:$4 sm:$0xff]   ;;  %v15502_v57 = vld [vmem:[#allocation7 + $0x1364] ss:$16 sps:$4 sm:$0xff]  }
 0x355   : > { %10941 = vmatprep.subr.bf16.mxu1 %v15421_v58  ;;  %v15505_v58 = vld [vmem:[#allocation7 + $0x128c] ss:$16 sps:$4 sm:$0xff]  }
 0x357   : > { %9972 = vmatpush1.bf16.msra.mxu0 %v15416_v59  ;;  %v15500_v59 = vld [vmem:[#allocation7 + $0x1360] ss:$16 sps:$4 sm:$0xff]  }
 0x358   : > { %10942 = vmatpush1.bf16.msra.mxu1 %v15419_v60  ;;  %9973 = vmatprep.subr.bf16.mxu0 %v15424_v61  ;;  %v15503_v60 = vld [vmem:[#allocation7 + $0x1288] ss:$16 sps:$4 sm:$0xff]   ;;  %v15508_v61 = vld [vmem:[#allocation7 + $0x1384] ss:$16 sps:$4 sm:$0xff]  }
 0x359   : > { %10943 = vmatprep.subr.bf16.mxu1 %v15427_v62  ;;  %v15511_v62 = vld [vmem:[#allocation7 + $0x12ac] ss:$16 sps:$4 sm:$0xff]  }
 0x35b   : > { %9974 = vmatpush1.bf16.msra.mxu0 %v15422_v63  ;;  %v15506_v63 = vld [vmem:[#allocation7 + $0x1380] ss:$16 sps:$4 sm:$0xff]  }
 0x35c   : > { %10944 = vmatpush1.bf16.msra.mxu1 %v15425_v0  ;;  %9975 = vmatprep.subr.bf16.mxu0 %v15430_v1  ;;  %v15509_v0 = vld [vmem:[#allocation7 + $0x12a8] ss:$16 sps:$4 sm:$0xff]   ;;  %v15514_v1 = vld [vmem:[#allocation7 + $0x13a4] ss:$16 sps:$4 sm:$0xff]  }
 0x35d   : > { %10945 = vmatprep.subr.bf16.mxu1 %v15433_v3  ;;  %v15517_v3 = vld [vmem:[#allocation7 + $0x12cc] ss:$16 sps:$4 sm:$0xff]  }
 0x35f   : > { %9976 = vmatpush1.bf16.msra.mxu0 %v15428_v4  ;;  %v15512_v4 = vld [vmem:[#allocation7 + $0x13a0] ss:$16 sps:$4 sm:$0xff]  }
 0x360   : > { %10946 = vmatpush1.bf16.msra.mxu1 %v15431_v5  ;;  %9986 = vmatprep.subr.bf16.mxu0 %v15436_v6  ;;  %v15515_v5 = vld [vmem:[#allocation7 + $0x12c8] ss:$16 sps:$4 sm:$0xff]   ;;  %v15520_v6 = vld [vmem:[#allocation7 + $0x13c4] ss:$16 sps:$4 sm:$0xff]  }
 0x361   : > { %10947 = vmatprep.subr.bf16.mxu1 %v15439_v8  ;;  %v15518_v8 = vld [vmem:[#allocation7 + $0x13c0] ss:$16 sps:$4 sm:$0xff]  }
 0x362   : > { %9978 = vmatmul.mubr.bf16.vlgmr.msra.gmra.mrb[0].mxu0 %v17783_v10 }
 0x363   : > { %9987 = vmatpush1.bf16.msra.mxu0 %v15434_v11  ;;  %10018 = vmatprep.mubr.bf16.mxu0 %v17785_v17  ;;  %v15529_v11 = vld [vmem:[#allocation7 + $0x130c] ss:$16 sps:$4 sm:$0xff]  }
 0x364   : > { %10948 = vmatpush1.bf16.msra.mxu1 %v15437_v12  ;;  %9988 = vmatprep.subr.bf16.mxu0 %v15442_v13  ;;  %v15524_v12 = vld [vmem:[#allocation7 + $0x13e0] ss:$16 sps:$4 sm:$0xff]   ;;  %v15527_v13 = vld [vmem:[#allocation7 + $0x1308] ss:$16 sps:$4 sm:$0xff]  }
 0x365   : > { %10949 = vmatprep.subr.bf16.mxu1 %v15445_v15  ;;  %v15532_v15 = vld [vmem:[#allocation7 + $0x1404] ss:$16 sps:$4 sm:$0xff]  }
 0x367   : > { %9989 = vmatpush1.bf16.msra.mxu0 %v15440_v18  ;;  %v15535_v18 = vld [vmem:[#allocation7 + $0x132c] ss:$16 sps:$4 sm:$0xff]  }
 0x368   : > { %10950 = vmatpush1.bf16.msra.mxu1 %v15443_v19  ;;  %9990 = vmatprep.subr.bf16.mxu0 %v15448_v20  ;;  %v518_v19 = vld [vmem:[%s17672_s12 + $0xa8] sm:$0xff] }
 0x369   : > { %10951 = vmatprep.subr.bf16.mxu1 %v15451_v21  ;;  %v15530_v21 = vld [vmem:[#allocation7 + $0x1400] ss:$16 sps:$4 sm:$0xff]  }
 0x36b   : > { %9991 = vmatpush1.bf16.msra.mxu0 %v15446_v22  ;;  %v15533_v22 = vld [vmem:[#allocation7 + $0x1328] ss:$16 sps:$4 sm:$0xff]  }
 0x36c   : > { %10952 = vmatpush1.bf16.msra.mxu1 %v15449_v23  ;;  %9992 = vmatprep.subr.bf16.mxu0 %v15454_v24  ;;  %v15538_v23 = vld [vmem:[#allocation7 + $0x1424] ss:$16 sps:$4 sm:$0xff]   ;;  %v15541_v24 = vld [vmem:[#allocation7 + $0x134c] ss:$16 sps:$4 sm:$0xff]  }
 0x36d   : > { %10953 = vmatprep.subr.bf16.mxu1 %v15457_v25  ;;  %v17795_v25 = vpack.c.bf16 %v518_v19, %v518_v19  ;;  %v15617_v19 = vld [vmem:[#allocation7 + $0x14e8] ss:$16 sps:$4 sm:$0xff]  }
 0x36f   : > { %9993 = vmatpush1.bf16.msra.mxu0 %v15452_v26  ;;  %v15536_v26 = vld [vmem:[#allocation7 + $0x1420] ss:$16 sps:$4 sm:$0xff]  }
 0x370   : > { %10954 = vmatpush1.bf16.msra.mxu1 %v15455_v27  ;;  %9994 = vmatprep.subr.bf16.mxu0 %v15460_v28  ;;  %v15539_v27 = vld [vmem:[#allocation7 + $0x1348] ss:$16 sps:$4 sm:$0xff]   ;;  %v15544_v28 = vld [vmem:[#allocation7 + $0x1444] ss:$16 sps:$4 sm:$0xff]  }
 0x371   : > { %10955 = vmatprep.subr.bf16.mxu1 %v15463_v29  ;;  %v15547_v29 = vld [vmem:[#allocation7 + $0x136c] ss:$16 sps:$4 sm:$0xff]  }
 0x373   : > { %9995 = vmatpush1.bf16.msra.mxu0 %v15458_v30  ;;  %v15542_v30 = vld [vmem:[#allocation7 + $0x1440] ss:$16 sps:$4 sm:$0xff]  }
 0x374   : > { %10956 = vmatpush1.bf16.msra.mxu1 %v15461_v31  ;;  %9996 = vmatprep.subr.bf16.mxu0 %v15466_v32  ;;  %v15545_v31 = vld [vmem:[#allocation7 + $0x1368] ss:$16 sps:$4 sm:$0xff]   ;;  %v15550_v32 = vld [vmem:[#allocation7 + $0x1464] ss:$16 sps:$4 sm:$0xff]  }
 0x375   : > { %10957 = vmatprep.subr.bf16.mxu1 %v15469_v34  ;;  %v15553_v34 = vld [vmem:[#allocation7 + $0x138c] ss:$16 sps:$4 sm:$0xff]  }
 0x377   : > { %9997 = vmatpush1.bf16.msra.mxu0 %v15464_v35  ;;  %v15548_v35 = vld [vmem:[#allocation7 + $0x1460] ss:$16 sps:$4 sm:$0xff]  }
 0x378   : > { %10958 = vmatpush1.bf16.msra.mxu1 %v15467_v36  ;;  %9998 = vmatprep.subr.bf16.mxu0 %v15472_v37  ;;  %v15551_v36 = vld [vmem:[#allocation7 + $0x1388] ss:$16 sps:$4 sm:$0xff]   ;;  %v15556_v37 = vld [vmem:[#allocation7 + $0x1484] ss:$16 sps:$4 sm:$0xff]  }
 0x379   : > { %10959 = vmatprep.subr.bf16.mxu1 %v15475_v38  ;;  %v15559_v38 = vld [vmem:[#allocation7 + $0x13ac] ss:$16 sps:$4 sm:$0xff]  }
 0x37b   : > { %9999 = vmatpush1.bf16.msra.mxu0 %v15470_v39  ;;  %v15554_v39 = vld [vmem:[#allocation7 + $0x1480] ss:$16 sps:$4 sm:$0xff]  }
 0x37c   : > { %10960 = vmatpush1.bf16.msra.mxu1 %v15473_v40  ;;  %10000 = vmatprep.subr.bf16.mxu0 %v15478_v41  ;;  %v15557_v40 = vld [vmem:[#allocation7 + $0x13a8] ss:$16 sps:$4 sm:$0xff]   ;;  %v15562_v41 = vld [vmem:[#allocation7 + $0x14a4] ss:$16 sps:$4 sm:$0xff]  }
 0x37d   : > { %10970 = vmatprep.subr.bf16.mxu1 %v15481_v42  ;;  %v15565_v42 = vld [vmem:[#allocation7 + $0x13cc] ss:$16 sps:$4 sm:$0xff]  }
 0x37f   : > { %10962 = vmatmul.mubr.bf16.vlgmr.msra.gmra.mrb[4].mxu1 %v17783_v10  ;;  %10001 = vmatpush1.bf16.msra.mxu0 %v15476_v43  ;;  %v15526_v10 = vld [vmem:[#allocation7 + $0x13e4] ss:$16 sps:$4 sm:$0xff]   ;;  %v15560_v43 = vld [vmem:[#allocation7 + $0x14a0] ss:$16 sps:$4 sm:$0xff]  }
 0x380   : > { %10971 = vmatpush1.bf16.msra.mxu1 %v15479_v44  ;;  %10002 = vmatprep.subr.bf16.mxu0 %v15484_v45  ;;  %v15563_v44 = vld [vmem:[#allocation7 + $0x13c8] ss:$16 sps:$4 sm:$0xff]   ;;  %v15568_v45 = vld [vmem:[#allocation7 + $0x14c4] ss:$16 sps:$4 sm:$0xff]  }
 0x381   : > { %10972 = vmatprep.subr.bf16.mxu1 %v15487_v46  ;;  %11002 = vmatprep.mubr.bf16.mxu1 %v17785_v17  ;;  %v515_v17 = vld [vmem:[%s17672_s12 + $0x90] sm:$0xff] }
 0x382   : > { %v17793_v20 = vpack.c.bf16 %v515_v17, %v515_v17  ;;  %v15571_v46 = vld [vmem:[#allocation7 + $0x13ec] ss:$16 sps:$4 sm:$0xff]  }
 0x383   : > { %10003 = vmatpush1.bf16.msra.mxu0 %v15482_v47  ;;  %v15566_v47 = vld [vmem:[#allocation7 + $0x14c0] ss:$16 sps:$4 sm:$0xff]   ;;  %v15619_v17 = vld [vmem:[#allocation7 + $0x14ec] ss:$16 sps:$4 sm:$0xff]  }
 0x384   : > { %10973 = vmatpush1.bf16.msra.mxu1 %v15485_v48  ;;  %10004 = vmatprep.subr.bf16.mxu0 %v15490_v49  ;;  %v15569_v48 = vld [vmem:[#allocation7 + $0x13e8] ss:$16 sps:$4 sm:$0xff]   ;;  %v15574_v49 = vld [vmem:[#allocation7 + $0x14e4] ss:$16 sps:$4 sm:$0xff]  }
 0x385   : > { %10974 = vmatprep.subr.bf16.mxu1 %v15493_v50  ;;  %v15577_v50 = vld [vmem:[#allocation7 + $0x140c] ss:$16 sps:$4 sm:$0xff]  }
 0x387   : > { %10005 = vmatpush1.bf16.msra.mxu0 %v15488_v51  ;;  %v15572_v51 = vld [vmem:[#allocation7 + $0x14e0] ss:$16 sps:$4 sm:$0xff]  }
 0x388   : > { %10975 = vmatpush1.bf16.msra.mxu1 %v15491_v52  ;;  %10006 = vmatprep.subr.bf16.mxu0 %v15496_v53  ;;  %v15575_v52 = vld [vmem:[#allocation7 + $0x1408] ss:$16 sps:$4 sm:$0xff]   ;;  %v15580_v53 = vld [vmem:[#allocation7 + $0x1504] ss:$16 sps:$4 sm:$0xff]  }
 0x389   : > { %10976 = vmatprep.subr.bf16.mxu1 %v15499_v54  ;;  %v15583_v54 = vld [vmem:[#allocation7 + $0x142c] ss:$16 sps:$4 sm:$0xff]  }
 0x38b   : > { %10007 = vmatpush1.bf16.msra.mxu0 %v15494_v55  ;;  %v15578_v55 = vld [vmem:[#allocation7 + $0x1500] ss:$16 sps:$4 sm:$0xff]  }
 0x38c   : > { %10977 = vmatpush1.bf16.msra.mxu1 %v15497_v56  ;;  %10008 = vmatprep.subr.bf16.mxu0 %v15502_v57  ;;  %v15581_v56 = vld [vmem:[#allocation7 + $0x1428] ss:$16 sps:$4 sm:$0xff]   ;;  %v15586_v57 = vld [vmem:[#allocation7 + $0x1524] ss:$16 sps:$4 sm:$0xff]  }
 0x38d   : > { %10978 = vmatprep.subr.bf16.mxu1 %v15505_v58  ;;  %v15589_v58 = vld [vmem:[#allocation7 + $0x144c] ss:$16 sps:$4 sm:$0xff]  }
 0x38f   : > { %10009 = vmatpush1.bf16.msra.mxu0 %v15500_v59  ;;  %v15584_v59 = vld [vmem:[#allocation7 + $0x1520] ss:$16 sps:$4 sm:$0xff]  }
 0x390   : > { %10979 = vmatpush1.bf16.msra.mxu1 %v15503_v60  ;;  %10010 = vmatprep.subr.bf16.mxu0 %v15508_v61  ;;  %v15587_v60 = vld [vmem:[#allocation7 + $0x1448] ss:$16 sps:$4 sm:$0xff]   ;;  %v15592_v61 = vld [vmem:[#allocation7 + $0x1544] ss:$16 sps:$4 sm:$0xff]  }
 0x391   : > { %10980 = vmatprep.subr.bf16.mxu1 %v15511_v62  ;;  %v15595_v62 = vld [vmem:[#allocation7 + $0x146c] ss:$16 sps:$4 sm:$0xff]  }
 0x393   : > { %10011 = vmatpush1.bf16.msra.mxu0 %v15506_v63  ;;  %v15590_v63 = vld [vmem:[#allocation7 + $0x1540] ss:$16 sps:$4 sm:$0xff]  }
 0x394   : > { %10981 = vmatpush1.bf16.msra.mxu1 %v15509_v0  ;;  %10012 = vmatprep.subr.bf16.mxu0 %v15514_v1  ;;  %v15593_v0 = vld [vmem:[#allocation7 + $0x1468] ss:$16 sps:$4 sm:$0xff]   ;;  %v15598_v1 = vld [vmem:[#allocation7 + $0x1564] ss:$16 sps:$4 sm:$0xff]  }
 0x395   : > { %10982 = vmatprep.subr.bf16.mxu1 %v15517_v3  ;;  %v15601_v3 = vld [vmem:[#allocation7 + $0x148c] ss:$16 sps:$4 sm:$0xff]  }
 0x397   : > { %10013 = vmatpush1.bf16.msra.mxu0 %v15512_v4  ;;  %v15596_v4 = vld [vmem:[#allocation7 + $0x1560] ss:$16 sps:$4 sm:$0xff]  }
 0x398   : > { %10983 = vmatpush1.bf16.msra.mxu1 %v15515_v5  ;;  %10014 = vmatprep.subr.bf16.mxu0 %v15520_v6  ;;  %v15599_v5 = vld [vmem:[#allocation7 + $0x1488] ss:$16 sps:$4 sm:$0xff]   ;;  %v15604_v6 = vld [vmem:[#allocation7 + $0x1584] ss:$16 sps:$4 sm:$0xff]  }
 0x399   : > { %10984 = vmatprep.subr.bf16.mxu1 %v15523_v7  ;;  %v15607_v7 = vld [vmem:[#allocation7 + $0x14ac] ss:$16 sps:$4 sm:$0xff]  }
 0x39b   : > { %10015 = vmatpush1.bf16.msra.mxu0 %v15518_v8  ;;  %v15602_v8 = vld [vmem:[#allocation7 + $0x1580] ss:$16 sps:$4 sm:$0xff]  }
 0x39c   : > { %10985 = vmatpush1.bf16.msra.mxu1 %v15521_v9  ;;  %10016 = vmatprep.subr.bf16.mxu0 %v15526_v10  ;;  %v15605_v9 = vld [vmem:[#allocation7 + $0x14a8] ss:$16 sps:$4 sm:$0xff]   ;;  %v15610_v10 = vld [vmem:[#allocation7 + $0x15a4] ss:$16 sps:$4 sm:$0xff]  }
 0x39d   : > { %10986 = vmatprep.subr.bf16.mxu1 %v15529_v11  ;;  %v15613_v11 = vld [vmem:[#allocation7 + $0x14cc] ss:$16 sps:$4 sm:$0xff]  }
 0x39f   : > { %10017 = vmatpush1.bf16.msra.mxu0 %v15524_v12  ;;  %v15608_v12 = vld [vmem:[#allocation7 + $0x15a0] ss:$16 sps:$4 sm:$0xff]  }
 0x3a0   : > { %10987 = vmatpush1.bf16.msra.mxu1 %v15527_v13  ;;  %10027 = vmatprep.subr.bf16.mxu0 %v15532_v15  ;;  %v15611_v13 = vld [vmem:[#allocation7 + $0x14c8] ss:$16 sps:$4 sm:$0xff]   ;;  %v15616_v15 = vld [vmem:[#allocation7 + $0x15c4] ss:$16 sps:$4 sm:$0xff]  }
 0x3a1   : > { %10988 = vmatprep.subr.bf16.mxu1 %v15535_v18  ;;  %v15614_v18 = vld [vmem:[#allocation7 + $0x15c0] ss:$16 sps:$4 sm:$0xff]  }
 0x3a2   : > { %10019 = vmatmul.mubr.bf16.vlgmr.msra.gmra.mrb[0].mxu0 %v17793_v20 }
 0x3a3   : > { %10028 = vmatpush1.bf16.msra.mxu0 %v15530_v21  ;;  %10059 = vmatprep.mubr.bf16.mxu0 %v17795_v25  ;;  %v15625_v21 = vld [vmem:[#allocation7 + $0x150c] ss:$16 sps:$4 sm:$0xff]  }
 0x3a4   : > { %10989 = vmatpush1.bf16.msra.mxu1 %v15533_v22  ;;  %10029 = vmatprep.subr.bf16.mxu0 %v15538_v23  ;;  %v15620_v22 = vld [vmem:[#allocation7 + $0x15e0] ss:$16 sps:$4 sm:$0xff]   ;;  %v15623_v23 = vld [vmem:[#allocation7 + $0x1508] ss:$16 sps:$4 sm:$0xff]  }
 0x3a5   : > { %10990 = vmatprep.subr.bf16.mxu1 %v15541_v24  ;;  %v15628_v24 = vld [vmem:[#allocation7 + $0x1604] ss:$16 sps:$4 sm:$0xff]  }
 0x3a7   : > { %10030 = vmatpush1.bf16.msra.mxu0 %v15536_v26  ;;  %v15631_v26 = vld [vmem:[#allocation7 + $0x152c] ss:$16 sps:$4 sm:$0xff]  }
 0x3a8   : > { %10991 = vmatpush1.bf16.msra.mxu1 %v15539_v27  ;;  %10031 = vmatprep.subr.bf16.mxu0 %v15544_v28  ;;  %v520_v27 = vld [vmem:[%s17672_s12 + $0xb8] sm:$0xff] }
 0x3a9   : > { %10992 = vmatprep.subr.bf16.mxu1 %v15547_v29  ;;  %v15626_v29 = vld [vmem:[#allocation7 + $0x1600] ss:$16 sps:$4 sm:$0xff]  }
 0x3ab   : > { %10032 = vmatpush1.bf16.msra.mxu0 %v15542_v30  ;;  %v15629_v30 = vld [vmem:[#allocation7 + $0x1528] ss:$16 sps:$4 sm:$0xff]  }
 0x3ac   : > { %10993 = vmatpush1.bf16.msra.mxu1 %v15545_v31  ;;  %10033 = vmatprep.subr.bf16.mxu0 %v15550_v32  ;;  %v15634_v31 = vld [vmem:[#allocation7 + $0x1624] ss:$16 sps:$4 sm:$0xff]   ;;  %v15637_v32 = vld [vmem:[#allocation7 + $0x154c] ss:$16 sps:$4 sm:$0xff]  }
 0x3ad   : > { %10994 = vmatprep.subr.bf16.mxu1 %v15553_v34  ;;  %v17805_v34 = vpack.c.bf16 %v520_v27, %v520_v27  ;;  %v15713_v27 = vld [vmem:[#allocation7 + $0x16e8] ss:$16 sps:$4 sm:$0xff]  }
 0x3af   : > { %10034 = vmatpush1.bf16.msra.mxu0 %v15548_v35  ;;  %v15632_v35 = vld [vmem:[#allocation7 + $0x1620] ss:$16 sps:$4 sm:$0xff]  }
 0x3b0   : > { %10995 = vmatpush1.bf16.msra.mxu1 %v15551_v36  ;;  %10035 = vmatprep.subr.bf16.mxu0 %v15556_v37  ;;  %v15635_v36 = vld [vmem:[#allocation7 + $0x1548] ss:$16 sps:$4 sm:$0xff]   ;;  %v15640_v37 = vld [vmem:[#allocation7 + $0x1644] ss:$16 sps:$4 sm:$0xff]  }
 0x3b1   : > { %10996 = vmatprep.subr.bf16.mxu1 %v15559_v38  ;;  %v15643_v38 = vld [vmem:[#allocation7 + $0x156c] ss:$16 sps:$4 sm:$0xff]  }
 0x3b3   : > { %10036 = vmatpush1.bf16.msra.mxu0 %v15554_v39  ;;  %v15638_v39 = vld [vmem:[#allocation7 + $0x1640] ss:$16 sps:$4 sm:$0xff]  }
 0x3b4   : > { %10997 = vmatpush1.bf16.msra.mxu1 %v15557_v40  ;;  %10037 = vmatprep.subr.bf16.mxu0 %v15562_v41  ;;  %v15641_v40 = vld [vmem:[#allocation7 + $0x1568] ss:$16 sps:$4 sm:$0xff]   ;;  %v15646_v41 = vld [vmem:[#allocation7 + $0x1664] ss:$16 sps:$4 sm:$0xff]  }
 0x3b5   : > { %10998 = vmatprep.subr.bf16.mxu1 %v15565_v42  ;;  %v15649_v42 = vld [vmem:[#allocation7 + $0x158c] ss:$16 sps:$4 sm:$0xff]  }
 0x3b7   : > { %10038 = vmatpush1.bf16.msra.mxu0 %v15560_v43  ;;  %v15644_v43 = vld [vmem:[#allocation7 + $0x1660] ss:$16 sps:$4 sm:$0xff]  }
 0x3b8   : > { %10999 = vmatpush1.bf16.msra.mxu1 %v15563_v44  ;;  %10039 = vmatprep.subr.bf16.mxu0 %v15568_v45  ;;  %v15647_v44 = vld [vmem:[#allocation7 + $0x1588] ss:$16 sps:$4 sm:$0xff]   ;;  %v15652_v45 = vld [vmem:[#allocation7 + $0x1684] ss:$16 sps:$4 sm:$0xff]  }
 0x3b9   : > { %11000 = vmatprep.subr.bf16.mxu1 %v15571_v46  ;;  %v15655_v46 = vld [vmem:[#allocation7 + $0x15ac] ss:$16 sps:$4 sm:$0xff]  }
 0x3bb   : > { %10040 = vmatpush1.bf16.msra.mxu0 %v15566_v47  ;;  %v15650_v47 = vld [vmem:[#allocation7 + $0x1680] ss:$16 sps:$4 sm:$0xff]  }
 0x3bc   : > { %11001 = vmatpush1.bf16.msra.mxu1 %v15569_v48  ;;  %10041 = vmatprep.subr.bf16.mxu0 %v15574_v49  ;;  %v15653_v48 = vld [vmem:[#allocation7 + $0x15a8] ss:$16 sps:$4 sm:$0xff]   ;;  %v15658_v49 = vld [vmem:[#allocation7 + $0x16a4] ss:$16 sps:$4 sm:$0xff]  }
 0x3bd   : > { %11011 = vmatprep.subr.bf16.mxu1 %v15577_v50  ;;  %v15661_v50 = vld [vmem:[#allocation7 + $0x15cc] ss:$16 sps:$4 sm:$0xff]  }
 0x3bf   : > { %11003 = vmatmul.mubr.bf16.vlgmr.msra.gmra.mrb[4].mxu1 %v17793_v20  ;;  %10042 = vmatpush1.bf16.msra.mxu0 %v15572_v51  ;;  %v15622_v20 = vld [vmem:[#allocation7 + $0x15e4] ss:$16 sps:$4 sm:$0xff]   ;;  %v15656_v51 = vld [vmem:[#allocation7 + $0x16a0] ss:$16 sps:$4 sm:$0xff]  }
 0x3c0   : > { %11012 = vmatpush1.bf16.msra.mxu1 %v15575_v52  ;;  %10043 = vmatprep.subr.bf16.mxu0 %v15580_v53  ;;  %v15659_v52 = vld [vmem:[#allocation7 + $0x15c8] ss:$16 sps:$4 sm:$0xff]   ;;  %v15664_v53 = vld [vmem:[#allocation7 + $0x16c4] ss:$16 sps:$4 sm:$0xff]  }
 0x3c1   : > { %11013 = vmatprep.subr.bf16.mxu1 %v15583_v54  ;;  %11043 = vmatprep.mubr.bf16.mxu1 %v17795_v25  ;;  %v517_v25 = vld [vmem:[%s17672_s12 + $0xa0] sm:$0xff] }
 0x3c2   : > { %v17803_v28 = vpack.c.bf16 %v517_v25, %v517_v25  ;;  %v15667_v54 = vld [vmem:[#allocation7 + $0x15ec] ss:$16 sps:$4 sm:$0xff]  }
 0x3c3   : > { %10044 = vmatpush1.bf16.msra.mxu0 %v15578_v55  ;;  %v15662_v55 = vld [vmem:[#allocation7 + $0x16c0] ss:$16 sps:$4 sm:$0xff]   ;;  %v15715_v25 = vld [vmem:[#allocation7 + $0x16ec] ss:$16 sps:$4 sm:$0xff]  }
 0x3c4   : > { %11014 = vmatpush1.bf16.msra.mxu1 %v15581_v56  ;;  %10045 = vmatprep.subr.bf16.mxu0 %v15586_v57  ;;  %v15665_v56 = vld [vmem:[#allocation7 + $0x15e8] ss:$16 sps:$4 sm:$0xff]   ;;  %v15670_v57 = vld [vmem:[#allocation7 + $0x16e4] ss:$16 sps:$4 sm:$0xff]  }
 0x3c5   : > { %11015 = vmatprep.subr.bf16.mxu1 %v15589_v58  ;;  %v15673_v58 = vld [vmem:[#allocation7 + $0x160c] ss:$16 sps:$4 sm:$0xff]  }
 0x3c7   : > { %10046 = vmatpush1.bf16.msra.mxu0 %v15584_v59  ;;  %v15668_v59 = vld [vmem:[#allocation7 + $0x16e0] ss:$16 sps:$4 sm:$0xff]  }
 0x3c8   : > { %11016 = vmatpush1.bf16.msra.mxu1 %v15587_v60  ;;  %10047 = vmatprep.subr.bf16.mxu0 %v15592_v61  ;;  %v15671_v60 = vld [vmem:[#allocation7 + $0x1608] ss:$16 sps:$4 sm:$0xff]   ;;  %v15676_v61 = vld [vmem:[#allocation7 + $0x1704] ss:$16 sps:$4 sm:$0xff]  }
 0x3c9   : > { %11017 = vmatprep.subr.bf16.mxu1 %v15595_v62  ;;  %v15679_v62 = vld [vmem:[#allocation7 + $0x162c] ss:$16 sps:$4 sm:$0xff]  }
 0x3cb   : > { %10048 = vmatpush1.bf16.msra.mxu0 %v15590_v63  ;;  %v15674_v63 = vld [vmem:[#allocation7 + $0x1700] ss:$16 sps:$4 sm:$0xff]  }
 0x3cc   : > { %11018 = vmatpush1.bf16.msra.mxu1 %v15593_v0  ;;  %10049 = vmatprep.subr.bf16.mxu0 %v15598_v1  ;;  %v15677_v0 = vld [vmem:[#allocation7 + $0x1628] ss:$16 sps:$4 sm:$0xff]   ;;  %v15682_v1 = vld [vmem:[#allocation7 + $0x1724] ss:$16 sps:$4 sm:$0xff]  }
 0x3cd   : > { %11019 = vmatprep.subr.bf16.mxu1 %v15601_v3  ;;  %v15685_v3 = vld [vmem:[#allocation7 + $0x164c] ss:$16 sps:$4 sm:$0xff]  }
 0x3cf   : > { %10050 = vmatpush1.bf16.msra.mxu0 %v15596_v4  ;;  %v15680_v4 = vld [vmem:[#allocation7 + $0x1720] ss:$16 sps:$4 sm:$0xff]  }
 0x3d0   : > { %11020 = vmatpush1.bf16.msra.mxu1 %v15599_v5  ;;  %10051 = vmatprep.subr.bf16.mxu0 %v15604_v6  ;;  %v15683_v5 = vld [vmem:[#allocation7 + $0x1648] ss:$16 sps:$4 sm:$0xff]   ;;  %v15688_v6 = vld [vmem:[#allocation7 + $0x1744] ss:$16 sps:$4 sm:$0xff]  }
 0x3d1   : > { %11021 = vmatprep.subr.bf16.mxu1 %v15607_v7  ;;  %v15691_v7 = vld [vmem:[#allocation7 + $0x166c] ss:$16 sps:$4 sm:$0xff]  }
 0x3d3   : > { %10052 = vmatpush1.bf16.msra.mxu0 %v15602_v8  ;;  %v15686_v8 = vld [vmem:[#allocation7 + $0x1740] ss:$16 sps:$4 sm:$0xff]  }
 0x3d4   : > { %11022 = vmatpush1.bf16.msra.mxu1 %v15605_v9  ;;  %10053 = vmatprep.subr.bf16.mxu0 %v15610_v10  ;;  %v15689_v9 = vld [vmem:[#allocation7 + $0x1668] ss:$16 sps:$4 sm:$0xff]   ;;  %v15694_v10 = vld [vmem:[#allocation7 + $0x1764] ss:$16 sps:$4 sm:$0xff]  }
 0x3d5   : > { %11023 = vmatprep.subr.bf16.mxu1 %v15613_v11  ;;  %v15697_v11 = vld [vmem:[#allocation7 + $0x168c] ss:$16 sps:$4 sm:$0xff]  }
 0x3d7   : > { %10054 = vmatpush1.bf16.msra.mxu0 %v15608_v12  ;;  %v15692_v12 = vld [vmem:[#allocation7 + $0x1760] ss:$16 sps:$4 sm:$0xff]  }
 0x3d8   : > { %11024 = vmatpush1.bf16.msra.mxu1 %v15611_v13  ;;  %10055 = vmatprep.subr.bf16.mxu0 %v15616_v15  ;;  %v15695_v13 = vld [vmem:[#allocation7 + $0x1688] ss:$16 sps:$4 sm:$0xff]   ;;  %v15700_v15 = vld [vmem:[#allocation7 + $0x1784] ss:$16 sps:$4 sm:$0xff]  }
 0x3d9   : > { %11025 = vmatprep.subr.bf16.mxu1 %v15619_v17  ;;  %v15703_v17 = vld [vmem:[#allocation7 + $0x16ac] ss:$16 sps:$4 sm:$0xff]  }
 0x3db   : > { %10056 = vmatpush1.bf16.msra.mxu0 %v15614_v18  ;;  %v15698_v18 = vld [vmem:[#allocation7 + $0x1780] ss:$16 sps:$4 sm:$0xff]  }
 0x3dc   : > { %11026 = vmatpush1.bf16.msra.mxu1 %v15617_v19  ;;  %10057 = vmatprep.subr.bf16.mxu0 %v15622_v20  ;;  %v15701_v19 = vld [vmem:[#allocation7 + $0x16a8] ss:$16 sps:$4 sm:$0xff]   ;;  %v15706_v20 = vld [vmem:[#allocation7 + $0x17a4] ss:$16 sps:$4 sm:$0xff]  }
 0x3dd   : > { %11027 = vmatprep.subr.bf16.mxu1 %v15625_v21  ;;  %v15709_v21 = vld [vmem:[#allocation7 + $0x16cc] ss:$16 sps:$4 sm:$0xff]  }
 0x3df   : > { %10058 = vmatpush1.bf16.msra.mxu0 %v15620_v22  ;;  %v15704_v22 = vld [vmem:[#allocation7 + $0x17a0] ss:$16 sps:$4 sm:$0xff]  }
 0x3e0   : > { %11028 = vmatpush1.bf16.msra.mxu1 %v15623_v23  ;;  %10068 = vmatprep.subr.bf16.mxu0 %v15628_v24  ;;  %v15707_v23 = vld [vmem:[#allocation7 + $0x16c8] ss:$16 sps:$4 sm:$0xff]   ;;  %v15712_v24 = vld [vmem:[#allocation7 + $0x17c4] ss:$16 sps:$4 sm:$0xff]  }
 0x3e1   : > { %11029 = vmatprep.subr.bf16.mxu1 %v15631_v26  ;;  %v15710_v26 = vld [vmem:[#allocation7 + $0x17c0] ss:$16 sps:$4 sm:$0xff]  }
 0x3e2   : > { %10060 = vmatmul.mubr.bf16.vlgmr.msra.gmra.mrb[0].mxu0 %v17803_v28 }
 0x3e3   : > { %10069 = vmatpush1.bf16.msra.mxu0 %v15626_v29  ;;  %10100 = vmatprep.mubr.bf16.mxu0 %v17805_v34  ;;  %v15721_v29 = vld [vmem:[#allocation7 + $0x170c] ss:$16 sps:$4 sm:$0xff]  }
 0x3e4   : > { %11030 = vmatpush1.bf16.msra.mxu1 %v15629_v30  ;;  %10070 = vmatprep.subr.bf16.mxu0 %v15634_v31  ;;  %v15716_v30 = vld [vmem:[#allocation7 + $0x17e0] ss:$16 sps:$4 sm:$0xff]   ;;  %v15719_v31 = vld [vmem:[#allocation7 + $0x1708] ss:$16 sps:$4 sm:$0xff]  }
 0x3e5   : > { %11031 = vmatprep.subr.bf16.mxu1 %v15637_v32  ;;  %v15724_v32 = vld [vmem:[#allocation7 + $0x1804] ss:$16 sps:$4 sm:$0xff]  }
 0x3e7   : > { %10071 = vmatpush1.bf16.msra.mxu0 %v15632_v35  ;;  %v15727_v35 = vld [vmem:[#allocation7 + $0x172c] ss:$16 sps:$4 sm:$0xff]  }
 0x3e8   : > { %11032 = vmatpush1.bf16.msra.mxu1 %v15635_v36  ;;  %10072 = vmatprep.subr.bf16.mxu0 %v15640_v37  ;;  %v522_v36 = vld [vmem:[%s17672_s12 + $0xc8] sm:$0xff] }
 0x3e9   : > { %11033 = vmatprep.subr.bf16.mxu1 %v15643_v38  ;;  %v15722_v38 = vld [vmem:[#allocation7 + $0x1800] ss:$16 sps:$4 sm:$0xff]  }
 0x3eb   : > { %10073 = vmatpush1.bf16.msra.mxu0 %v15638_v39  ;;  %v15725_v39 = vld [vmem:[#allocation7 + $0x1728] ss:$16 sps:$4 sm:$0xff]  }
 0x3ec   : > { %11034 = vmatpush1.bf16.msra.mxu1 %v15641_v40  ;;  %10074 = vmatprep.subr.bf16.mxu0 %v15646_v41  ;;  %v15730_v40 = vld [vmem:[#allocation7 + $0x1824] ss:$16 sps:$4 sm:$0xff]   ;;  %v15733_v41 = vld [vmem:[#allocation7 + $0x174c] ss:$16 sps:$4 sm:$0xff]  }
 0x3ed   : > { %11035 = vmatprep.subr.bf16.mxu1 %v15649_v42  ;;  %v17815_v42 = vpack.c.bf16 %v522_v36, %v522_v36  ;;  %v15809_v36 = vld [vmem:[#allocation7 + $0x18e8] ss:$16 sps:$4 sm:$0xff]  }
 0x3ef   : > { %10075 = vmatpush1.bf16.msra.mxu0 %v15644_v43  ;;  %v15728_v43 = vld [vmem:[#allocation7 + $0x1820] ss:$16 sps:$4 sm:$0xff]  }
 0x3f0   : > { %11036 = vmatpush1.bf16.msra.mxu1 %v15647_v44  ;;  %10076 = vmatprep.subr.bf16.mxu0 %v15652_v45  ;;  %v15731_v44 = vld [vmem:[#allocation7 + $0x1748] ss:$16 sps:$4 sm:$0xff]   ;;  %v15736_v45 = vld [vmem:[#allocation7 + $0x1844] ss:$16 sps:$4 sm:$0xff]  }
 0x3f1   : > { %11037 = vmatprep.subr.bf16.mxu1 %v15655_v46  ;;  %v15739_v46 = vld [vmem:[#allocation7 + $0x176c] ss:$16 sps:$4 sm:$0xff]  }
 0x3f3   : > { %10077 = vmatpush1.bf16.msra.mxu0 %v15650_v47  ;;  %v15734_v47 = vld [vmem:[#allocation7 + $0x1840] ss:$16 sps:$4 sm:$0xff]  }
 0x3f4   : > { %11038 = vmatpush1.bf16.msra.mxu1 %v15653_v48  ;;  %10078 = vmatprep.subr.bf16.mxu0 %v15658_v49  ;;  %v15737_v48 = vld [vmem:[#allocation7 + $0x1768] ss:$16 sps:$4 sm:$0xff]   ;;  %v15742_v49 = vld [vmem:[#allocation7 + $0x1864] ss:$16 sps:$4 sm:$0xff]  }
 0x3f5   : > { %11039 = vmatprep.subr.bf16.mxu1 %v15661_v50  ;;  %v15745_v50 = vld [vmem:[#allocation7 + $0x178c] ss:$16 sps:$4 sm:$0xff]  }
 0x3f7   : > { %10079 = vmatpush1.bf16.msra.mxu0 %v15656_v51  ;;  %v15740_v51 = vld [vmem:[#allocation7 + $0x1860] ss:$16 sps:$4 sm:$0xff]  }
 0x3f8   : > { %11040 = vmatpush1.bf16.msra.mxu1 %v15659_v52  ;;  %10080 = vmatprep.subr.bf16.mxu0 %v15664_v53  ;;  %v15743_v52 = vld [vmem:[#allocation7 + $0x1788] ss:$16 sps:$4 sm:$0xff]   ;;  %v15748_v53 = vld [vmem:[#allocation7 + $0x1884] ss:$16 sps:$4 sm:$0xff]  }
 0x3f9   : > { %11041 = vmatprep.subr.bf16.mxu1 %v15667_v54  ;;  %v15751_v54 = vld [vmem:[#allocation7 + $0x17ac] ss:$16 sps:$4 sm:$0xff]  }
 0x3fb   : > { %10081 = vmatpush1.bf16.msra.mxu0 %v15662_v55  ;;  %v15746_v55 = vld [vmem:[#allocation7 + $0x1880] ss:$16 sps:$4 sm:$0xff]  }
 0x3fc   : > { %11042 = vmatpush1.bf16.msra.mxu1 %v15665_v56  ;;  %10082 = vmatprep.subr.bf16.mxu0 %v15670_v57  ;;  %v15749_v56 = vld [vmem:[#allocation7 + $0x17a8] ss:$16 sps:$4 sm:$0xff]   ;;  %v15754_v57 = vld [vmem:[#allocation7 + $0x18a4] ss:$16 sps:$4 sm:$0xff]  }
 0x3fd   : > { %11052 = vmatprep.subr.bf16.mxu1 %v15673_v58  ;;  %v15757_v58 = vld [vmem:[#allocation7 + $0x17cc] ss:$16 sps:$4 sm:$0xff]  }
 0x3ff   : > { %11044 = vmatmul.mubr.bf16.vlgmr.msra.gmra.mrb[4].mxu1 %v17803_v28  ;;  %10083 = vmatpush1.bf16.msra.mxu0 %v15668_v59  ;;  %v15718_v28 = vld [vmem:[#allocation7 + $0x17e4] ss:$16 sps:$4 sm:$0xff]   ;;  %v15752_v59 = vld [vmem:[#allocation7 + $0x18a0] ss:$16 sps:$4 sm:$0xff]  }
 0x400   : > { %11053 = vmatpush1.bf16.msra.mxu1 %v15671_v60  ;;  %10084 = vmatprep.subr.bf16.mxu0 %v15676_v61  ;;  %v15755_v60 = vld [vmem:[#allocation7 + $0x17c8] ss:$16 sps:$4 sm:$0xff]   ;;  %v15760_v61 = vld [vmem:[#allocation7 + $0x18c4] ss:$16 sps:$4 sm:$0xff]  }
 0x401   : > { %11054 = vmatprep.subr.bf16.mxu1 %v15679_v62  ;;  %11084 = vmatprep.mubr.bf16.mxu1 %v17805_v34  ;;  %v519_v34 = vld [vmem:[%s17672_s12 + $0xb0] sm:$0xff] }
 0x402   : > { %v17813_v37 = vpack.c.bf16 %v519_v34, %v519_v34  ;;  %v15763_v62 = vld [vmem:[#allocation7 + $0x17ec] ss:$16 sps:$4 sm:$0xff]  }
 0x403   : > { %10085 = vmatpush1.bf16.msra.mxu0 %v15674_v63  ;;  %v15758_v63 = vld [vmem:[#allocation7 + $0x18c0] ss:$16 sps:$4 sm:$0xff]   ;;  %v15811_v34 = vld [vmem:[#allocation7 + $0x18ec] ss:$16 sps:$4 sm:$0xff]  }
 0x404   : > { %11055 = vmatpush1.bf16.msra.mxu1 %v15677_v0  ;;  %10086 = vmatprep.subr.bf16.mxu0 %v15682_v1  ;;  %v15761_v0 = vld [vmem:[#allocation7 + $0x17e8] ss:$16 sps:$4 sm:$0xff]   ;;  %v15766_v1 = vld [vmem:[#allocation7 + $0x18e4] ss:$16 sps:$4 sm:$0xff]  }
 0x405   : > { %11056 = vmatprep.subr.bf16.mxu1 %v15685_v3  ;;  %v15769_v3 = vld [vmem:[#allocation7 + $0x180c] ss:$16 sps:$4 sm:$0xff]  }
 0x407   : > { %10087 = vmatpush1.bf16.msra.mxu0 %v15680_v4  ;;  %v15764_v4 = vld [vmem:[#allocation7 + $0x18e0] ss:$16 sps:$4 sm:$0xff]  }
 0x408   : > { %11057 = vmatpush1.bf16.msra.mxu1 %v15683_v5  ;;  %10088 = vmatprep.subr.bf16.mxu0 %v15688_v6  ;;  %v15767_v5 = vld [vmem:[#allocation7 + $0x1808] ss:$16 sps:$4 sm:$0xff]   ;;  %v15772_v6 = vld [vmem:[#allocation7 + $0x1904] ss:$16 sps:$4 sm:$0xff]  }
 0x409   : > { %11058 = vmatprep.subr.bf16.mxu1 %v15691_v7  ;;  %v15775_v7 = vld [vmem:[#allocation7 + $0x182c] ss:$16 sps:$4 sm:$0xff]  }
 0x40b   : > { %10089 = vmatpush1.bf16.msra.mxu0 %v15686_v8  ;;  %v15770_v8 = vld [vmem:[#allocation7 + $0x1900] ss:$16 sps:$4 sm:$0xff]  }
 0x40c   : > { %11059 = vmatpush1.bf16.msra.mxu1 %v15689_v9  ;;  %10090 = vmatprep.subr.bf16.mxu0 %v15694_v10  ;;  %v15773_v9 = vld [vmem:[#allocation7 + $0x1828] ss:$16 sps:$4 sm:$0xff]   ;;  %v15778_v10 = vld [vmem:[#allocation7 + $0x1924] ss:$16 sps:$4 sm:$0xff]  }
 0x40d   : > { %11060 = vmatprep.subr.bf16.mxu1 %v15697_v11  ;;  %v15781_v11 = vld [vmem:[#allocation7 + $0x184c] ss:$16 sps:$4 sm:$0xff]  }
 0x40f   : > { %10091 = vmatpush1.bf16.msra.mxu0 %v15692_v12  ;;  %v15776_v12 = vld [vmem:[#allocation7 + $0x1920] ss:$16 sps:$4 sm:$0xff]  }
 0x410   : > { %11061 = vmatpush1.bf16.msra.mxu1 %v15695_v13  ;;  %10092 = vmatprep.subr.bf16.mxu0 %v15700_v15  ;;  %v15779_v13 = vld [vmem:[#allocation7 + $0x1848] ss:$16 sps:$4 sm:$0xff]   ;;  %v15784_v15 = vld [vmem:[#allocation7 + $0x1944] ss:$16 sps:$4 sm:$0xff]  }
 0x411   : > { %11062 = vmatprep.subr.bf16.mxu1 %v15703_v17  ;;  %v15787_v17 = vld [vmem:[#allocation7 + $0x186c] ss:$16 sps:$4 sm:$0xff]  }
 0x413   : > { %10093 = vmatpush1.bf16.msra.mxu0 %v15698_v18  ;;  %v15782_v18 = vld [vmem:[#allocation7 + $0x1940] ss:$16 sps:$4 sm:$0xff]  }
 0x414   : > { %11063 = vmatpush1.bf16.msra.mxu1 %v15701_v19  ;;  %10094 = vmatprep.subr.bf16.mxu0 %v15706_v20  ;;  %v15785_v19 = vld [vmem:[#allocation7 + $0x1868] ss:$16 sps:$4 sm:$0xff]   ;;  %v15790_v20 = vld [vmem:[#allocation7 + $0x1964] ss:$16 sps:$4 sm:$0xff]  }
 0x415   : > { %11064 = vmatprep.subr.bf16.mxu1 %v15709_v21  ;;  %v15793_v21 = vld [vmem:[#allocation7 + $0x188c] ss:$16 sps:$4 sm:$0xff]  }
 0x417   : > { %10095 = vmatpush1.bf16.msra.mxu0 %v15704_v22  ;;  %v15788_v22 = vld [vmem:[#allocation7 + $0x1960] ss:$16 sps:$4 sm:$0xff]  }
 0x418   : > { %11065 = vmatpush1.bf16.msra.mxu1 %v15707_v23  ;;  %10096 = vmatprep.subr.bf16.mxu0 %v15712_v24  ;;  %v15791_v23 = vld [vmem:[#allocation7 + $0x1888] ss:$16 sps:$4 sm:$0xff]   ;;  %v15796_v24 = vld [vmem:[#allocation7 + $0x1984] ss:$16 sps:$4 sm:$0xff]  }
 0x419   : > { %11066 = vmatprep.subr.bf16.mxu1 %v15715_v25  ;;  %v15799_v25 = vld [vmem:[#allocation7 + $0x18ac] ss:$16 sps:$4 sm:$0xff]  }
 0x41b   : > { %10097 = vmatpush1.bf16.msra.mxu0 %v15710_v26  ;;  %v15794_v26 = vld [vmem:[#allocation7 + $0x1980] ss:$16 sps:$4 sm:$0xff]  }
 0x41c   : > { %11067 = vmatpush1.bf16.msra.mxu1 %v15713_v27  ;;  %10098 = vmatprep.subr.bf16.mxu0 %v15718_v28  ;;  %v15797_v27 = vld [vmem:[#allocation7 + $0x18a8] ss:$16 sps:$4 sm:$0xff]   ;;  %v15802_v28 = vld [vmem:[#allocation7 + $0x19a4] ss:$16 sps:$4 sm:$0xff]  }
 0x41d   : > { %11068 = vmatprep.subr.bf16.mxu1 %v15721_v29  ;;  %v15805_v29 = vld [vmem:[#allocation7 + $0x18cc] ss:$16 sps:$4 sm:$0xff]  }
 0x41f   : > { %10099 = vmatpush1.bf16.msra.mxu0 %v15716_v30  ;;  %v15800_v30 = vld [vmem:[#allocation7 + $0x19a0] ss:$16 sps:$4 sm:$0xff]  }
 0x420   : > { %11069 = vmatpush1.bf16.msra.mxu1 %v15719_v31  ;;  %10109 = vmatprep.subr.bf16.mxu0 %v15724_v32  ;;  %v15803_v31 = vld [vmem:[#allocation7 + $0x18c8] ss:$16 sps:$4 sm:$0xff]   ;;  %v15808_v32 = vld [vmem:[#allocation7 + $0x19c4] ss:$16 sps:$4 sm:$0xff]  }
 0x421   : > { %11070 = vmatprep.subr.bf16.mxu1 %v15727_v35  ;;  %v15806_v35 = vld [vmem:[#allocation7 + $0x19c0] ss:$16 sps:$4 sm:$0xff]  }
 0x422   : > { %10101 = vmatmul.mubr.bf16.vlgmr.msra.gmra.mrb[0].mxu0 %v17813_v37 }
 0x423   : > { %10110 = vmatpush1.bf16.msra.mxu0 %v15722_v38  ;;  %10141 = vmatprep.mubr.bf16.mxu0 %v17815_v42  ;;  %v15817_v38 = vld [vmem:[#allocation7 + $0x190c] ss:$16 sps:$4 sm:$0xff]  }
 0x424   : > { %11071 = vmatpush1.bf16.msra.mxu1 %v15725_v39  ;;  %10111 = vmatprep.subr.bf16.mxu0 %v15730_v40  ;;  %v15812_v39 = vld [vmem:[#allocation7 + $0x19e0] ss:$16 sps:$4 sm:$0xff]   ;;  %v15815_v40 = vld [vmem:[#allocation7 + $0x1908] ss:$16 sps:$4 sm:$0xff]  }
 0x425   : > { %11072 = vmatprep.subr.bf16.mxu1 %v15733_v41  ;;  %v15820_v41 = vld [vmem:[#allocation7 + $0x1a04] ss:$16 sps:$4 sm:$0xff]  }
 0x427   : > { %10112 = vmatpush1.bf16.msra.mxu0 %v15728_v43  ;;  %v15823_v43 = vld [vmem:[#allocation7 + $0x192c] ss:$16 sps:$4 sm:$0xff]  }
 0x428   : > { %11073 = vmatpush1.bf16.msra.mxu1 %v15731_v44  ;;  %10113 = vmatprep.subr.bf16.mxu0 %v15736_v45  ;;  %v524_v44 = vld [vmem:[%s17672_s12 + $0xd8] sm:$0xff] }
 0x429   : > { %11074 = vmatprep.subr.bf16.mxu1 %v15739_v46  ;;  %v15818_v46 = vld [vmem:[#allocation7 + $0x1a00] ss:$16 sps:$4 sm:$0xff]  }
 0x42b   : > { %10114 = vmatpush1.bf16.msra.mxu0 %v15734_v47  ;;  %v15821_v47 = vld [vmem:[#allocation7 + $0x1928] ss:$16 sps:$4 sm:$0xff]  }
 0x42c   : > { %11075 = vmatpush1.bf16.msra.mxu1 %v15737_v48  ;;  %10115 = vmatprep.subr.bf16.mxu0 %v15742_v49  ;;  %v15826_v48 = vld [vmem:[#allocation7 + $0x1a24] ss:$16 sps:$4 sm:$0xff]   ;;  %v15829_v49 = vld [vmem:[#allocation7 + $0x194c] ss:$16 sps:$4 sm:$0xff]  }
 0x42d   : > { %11076 = vmatprep.subr.bf16.mxu1 %v15745_v50  ;;  %v17825_v50 = vpack.c.bf16 %v524_v44, %v524_v44  ;;  %v15905_v44 = vld [vmem:[#allocation7 + $0x1ae8] ss:$16 sps:$4 sm:$0xff]  }
 0x42f   : > { %10116 = vmatpush1.bf16.msra.mxu0 %v15740_v51  ;;  %v15824_v51 = vld [vmem:[#allocation7 + $0x1a20] ss:$16 sps:$4 sm:$0xff]  }
 0x430   : > { %11077 = vmatpush1.bf16.msra.mxu1 %v15743_v52  ;;  %10117 = vmatprep.subr.bf16.mxu0 %v15748_v53  ;;  %v15827_v52 = vld [vmem:[#allocation7 + $0x1948] ss:$16 sps:$4 sm:$0xff]   ;;  %v15832_v53 = vld [vmem:[#allocation7 + $0x1a44] ss:$16 sps:$4 sm:$0xff]  }
 0x431   : > { %11078 = vmatprep.subr.bf16.mxu1 %v15751_v54  ;;  %v15835_v54 = vld [vmem:[#allocation7 + $0x196c] ss:$16 sps:$4 sm:$0xff]  }
 0x433   : > { %10118 = vmatpush1.bf16.msra.mxu0 %v15746_v55  ;;  %v15830_v55 = vld [vmem:[#allocation7 + $0x1a40] ss:$16 sps:$4 sm:$0xff]  }
 0x434   : > { %11079 = vmatpush1.bf16.msra.mxu1 %v15749_v56  ;;  %10119 = vmatprep.subr.bf16.mxu0 %v15754_v57  ;;  %v15833_v56 = vld [vmem:[#allocation7 + $0x1968] ss:$16 sps:$4 sm:$0xff]   ;;  %v15838_v57 = vld [vmem:[#allocation7 + $0x1a64] ss:$16 sps:$4 sm:$0xff]  }
 0x435   : > { %11080 = vmatprep.subr.bf16.mxu1 %v15757_v58  ;;  %v15841_v58 = vld [vmem:[#allocation7 + $0x198c] ss:$16 sps:$4 sm:$0xff]  }
 0x437   : > { %10120 = vmatpush1.bf16.msra.mxu0 %v15752_v59  ;;  %v15836_v59 = vld [vmem:[#allocation7 + $0x1a60] ss:$16 sps:$4 sm:$0xff]  }
 0x438   : > { %11081 = vmatpush1.bf16.msra.mxu1 %v15755_v60  ;;  %10121 = vmatprep.subr.bf16.mxu0 %v15760_v61  ;;  %v15839_v60 = vld [vmem:[#allocation7 + $0x1988] ss:$16 sps:$4 sm:$0xff]   ;;  %v15844_v61 = vld [vmem:[#allocation7 + $0x1a84] ss:$16 sps:$4 sm:$0xff]  }
 0x439   : > { %11082 = vmatprep.subr.bf16.mxu1 %v15763_v62  ;;  %v15847_v62 = vld [vmem:[#allocation7 + $0x19ac] ss:$16 sps:$4 sm:$0xff]  }
 0x43b   : > { %10122 = vmatpush1.bf16.msra.mxu0 %v15758_v63  ;;  %v15842_v63 = vld [vmem:[#allocation7 + $0x1a80] ss:$16 sps:$4 sm:$0xff]  }
 0x43c   : > { %11083 = vmatpush1.bf16.msra.mxu1 %v15761_v0  ;;  %10123 = vmatprep.subr.bf16.mxu0 %v15766_v1  ;;  %v15845_v0 = vld [vmem:[#allocation7 + $0x19a8] ss:$16 sps:$4 sm:$0xff]   ;;  %v15850_v1 = vld [vmem:[#allocation7 + $0x1aa4] ss:$16 sps:$4 sm:$0xff]  }
 0x43d   : > { %11093 = vmatprep.subr.bf16.mxu1 %v15769_v3  ;;  %v15853_v3 = vld [vmem:[#allocation7 + $0x19cc] ss:$16 sps:$4 sm:$0xff]  }
 0x43f   : > { %11085 = vmatmul.mubr.bf16.vlgmr.msra.gmra.mrb[4].mxu1 %v17813_v37  ;;  %10124 = vmatpush1.bf16.msra.mxu0 %v15764_v4  ;;  %v15814_v37 = vld [vmem:[#allocation7 + $0x19e4] ss:$16 sps:$4 sm:$0xff]   ;;  %v15848_v4 = vld [vmem:[#allocation7 + $0x1aa0] ss:$16 sps:$4 sm:$0xff]  }
 0x440   : > { %11094 = vmatpush1.bf16.msra.mxu1 %v15767_v5  ;;  %10125 = vmatprep.subr.bf16.mxu0 %v15772_v6  ;;  %v15851_v5 = vld [vmem:[#allocation7 + $0x19c8] ss:$16 sps:$4 sm:$0xff]   ;;  %v15856_v6 = vld [vmem:[#allocation7 + $0x1ac4] ss:$16 sps:$4 sm:$0xff]  }
 0x441   : > { %11095 = vmatprep.subr.bf16.mxu1 %v15775_v7  ;;  %11125 = vmatprep.mubr.bf16.mxu1 %v17815_v42  ;;  %v521_v42 = vld [vmem:[%s17672_s12 + $0xc0] sm:$0xff] }
 0x442   : > { %v17823_v45 = vpack.c.bf16 %v521_v42, %v521_v42  ;;  %v15859_v7 = vld [vmem:[#allocation7 + $0x19ec] ss:$16 sps:$4 sm:$0xff]  }
 0x443   : > { %10126 = vmatpush1.bf16.msra.mxu0 %v15770_v8  ;;  %v15854_v8 = vld [vmem:[#allocation7 + $0x1ac0] ss:$16 sps:$4 sm:$0xff]   ;;  %v15907_v42 = vld [vmem:[#allocation7 + $0x1aec] ss:$16 sps:$4 sm:$0xff]  }
 0x444   : > { %11096 = vmatpush1.bf16.msra.mxu1 %v15773_v9  ;;  %10127 = vmatprep.subr.bf16.mxu0 %v15778_v10  ;;  %v15857_v9 = vld [vmem:[#allocation7 + $0x19e8] ss:$16 sps:$4 sm:$0xff]   ;;  %v15862_v10 = vld [vmem:[#allocation7 + $0x1ae4] ss:$16 sps:$4 sm:$0xff]  }
 0x445   : > { %11097 = vmatprep.subr.bf16.mxu1 %v15781_v11  ;;  %v15865_v11 = vld [vmem:[#allocation7 + $0x1a0c] ss:$16 sps:$4 sm:$0xff]  }
 0x447   : > { %10128 = vmatpush1.bf16.msra.mxu0 %v15776_v12  ;;  %v15860_v12 = vld [vmem:[#allocation7 + $0x1ae0] ss:$16 sps:$4 sm:$0xff]  }
 0x448   : > { %11098 = vmatpush1.bf16.msra.mxu1 %v15779_v13  ;;  %10129 = vmatprep.subr.bf16.mxu0 %v15784_v15  ;;  %v15863_v13 = vld [vmem:[#allocation7 + $0x1a08] ss:$16 sps:$4 sm:$0xff]   ;;  %v15868_v15 = vld [vmem:[#allocation7 + $0x1b04] ss:$16 sps:$4 sm:$0xff]  }
 0x449   : > { %11099 = vmatprep.subr.bf16.mxu1 %v15787_v17  ;;  %v15871_v17 = vld [vmem:[#allocation7 + $0x1a2c] ss:$16 sps:$4 sm:$0xff]  }
 0x44b   : > { %10130 = vmatpush1.bf16.msra.mxu0 %v15782_v18  ;;  %v15866_v18 = vld [vmem:[#allocation7 + $0x1b00] ss:$16 sps:$4 sm:$0xff]  }
 0x44c   : > { %11100 = vmatpush1.bf16.msra.mxu1 %v15785_v19  ;;  %10131 = vmatprep.subr.bf16.mxu0 %v15790_v20  ;;  %v15869_v19 = vld [vmem:[#allocation7 + $0x1a28] ss:$16 sps:$4 sm:$0xff]   ;;  %v15874_v20 = vld [vmem:[#allocation7 + $0x1b24] ss:$16 sps:$4 sm:$0xff]  }
 0x44d   : > { %11101 = vmatprep.subr.bf16.mxu1 %v15793_v21  ;;  %v15877_v21 = vld [vmem:[#allocation7 + $0x1a4c] ss:$16 sps:$4 sm:$0xff]  }
 0x44f   : > { %10132 = vmatpush1.bf16.msra.mxu0 %v15788_v22  ;;  %v15872_v22 = vld [vmem:[#allocation7 + $0x1b20] ss:$16 sps:$4 sm:$0xff]  }
 0x450   : > { %11102 = vmatpush1.bf16.msra.mxu1 %v15791_v23  ;;  %10133 = vmatprep.subr.bf16.mxu0 %v15796_v24  ;;  %v15875_v23 = vld [vmem:[#allocation7 + $0x1a48] ss:$16 sps:$4 sm:$0xff]   ;;  %v15880_v24 = vld [vmem:[#allocation7 + $0x1b44] ss:$16 sps:$4 sm:$0xff]  }
 0x451   : > { %11103 = vmatprep.subr.bf16.mxu1 %v15799_v25  ;;  %v15883_v25 = vld [vmem:[#allocation7 + $0x1a6c] ss:$16 sps:$4 sm:$0xff]  }
 0x453   : > { %10134 = vmatpush1.bf16.msra.mxu0 %v15794_v26  ;;  %v15878_v26 = vld [vmem:[#allocation7 + $0x1b40] ss:$16 sps:$4 sm:$0xff]  }
 0x454   : > { %11104 = vmatpush1.bf16.msra.mxu1 %v15797_v27  ;;  %10135 = vmatprep.subr.bf16.mxu0 %v15802_v28  ;;  %v15881_v27 = vld [vmem:[#allocation7 + $0x1a68] ss:$16 sps:$4 sm:$0xff]   ;;  %v15886_v28 = vld [vmem:[#allocation7 + $0x1b64] ss:$16 sps:$4 sm:$0xff]  }
 0x455   : > { %11105 = vmatprep.subr.bf16.mxu1 %v15805_v29  ;;  %v15889_v29 = vld [vmem:[#allocation7 + $0x1a8c] ss:$16 sps:$4 sm:$0xff]  }
 0x457   : > { %10136 = vmatpush1.bf16.msra.mxu0 %v15800_v30  ;;  %v15884_v30 = vld [vmem:[#allocation7 + $0x1b60] ss:$16 sps:$4 sm:$0xff]  }
 0x458   : > { %11106 = vmatpush1.bf16.msra.mxu1 %v15803_v31  ;;  %10137 = vmatprep.subr.bf16.mxu0 %v15808_v32  ;;  %v15887_v31 = vld [vmem:[#allocation7 + $0x1a88] ss:$16 sps:$4 sm:$0xff]   ;;  %v15892_v32 = vld [vmem:[#allocation7 + $0x1b84] ss:$16 sps:$4 sm:$0xff]  }
 0x459   : > { %11107 = vmatprep.subr.bf16.mxu1 %v15811_v34  ;;  %v15895_v34 = vld [vmem:[#allocation7 + $0x1aac] ss:$16 sps:$4 sm:$0xff]  }
 0x45b   : > { %10138 = vmatpush1.bf16.msra.mxu0 %v15806_v35  ;;  %v15890_v35 = vld [vmem:[#allocation7 + $0x1b80] ss:$16 sps:$4 sm:$0xff]  }
 0x45c   : > { %11108 = vmatpush1.bf16.msra.mxu1 %v15809_v36  ;;  %10139 = vmatprep.subr.bf16.mxu0 %v15814_v37  ;;  %v15893_v36 = vld [vmem:[#allocation7 + $0x1aa8] ss:$16 sps:$4 sm:$0xff]   ;;  %v15898_v37 = vld [vmem:[#allocation7 + $0x1ba4] ss:$16 sps:$4 sm:$0xff]  }
 0x45d   : > { %11109 = vmatprep.subr.bf16.mxu1 %v15817_v38  ;;  %v15901_v38 = vld [vmem:[#allocation7 + $0x1acc] ss:$16 sps:$4 sm:$0xff]  }
 0x45f   : > { %10140 = vmatpush1.bf16.msra.mxu0 %v15812_v39  ;;  %v15896_v39 = vld [vmem:[#allocation7 + $0x1ba0] ss:$16 sps:$4 sm:$0xff]  }
 0x460   : > { %11110 = vmatpush1.bf16.msra.mxu1 %v15815_v40  ;;  %10150 = vmatprep.subr.bf16.mxu0 %v15820_v41  ;;  %v15899_v40 = vld [vmem:[#allocation7 + $0x1ac8] ss:$16 sps:$4 sm:$0xff]   ;;  %v15904_v41 = vld [vmem:[#allocation7 + $0x1bc4] ss:$16 sps:$4 sm:$0xff]  }
 0x461   : > { %11111 = vmatprep.subr.bf16.mxu1 %v15823_v43  ;;  %v15902_v43 = vld [vmem:[#allocation7 + $0x1bc0] ss:$16 sps:$4 sm:$0xff]  }
 0x462   : > { %10142 = vmatmul.mubr.bf16.vlgmr.msra.gmra.mrb[0].mxu0 %v17823_v45 }
 0x463   : > { %10151 = vmatpush1.bf16.msra.mxu0 %v15818_v46  ;;  %10182 = vmatprep.mubr.bf16.mxu0 %v17825_v50  ;;  %v15913_v46 = vld [vmem:[#allocation7 + $0x1b0c] ss:$16 sps:$4 sm:$0xff]  }
 0x464   : > { %11112 = vmatpush1.bf16.msra.mxu1 %v15821_v47  ;;  %10152 = vmatprep.subr.bf16.mxu0 %v15826_v48  ;;  %v15908_v47 = vld [vmem:[#allocation7 + $0x1be0] ss:$16 sps:$4 sm:$0xff]   ;;  %v15911_v48 = vld [vmem:[#allocation7 + $0x1b08] ss:$16 sps:$4 sm:$0xff]  }
 0x465   : > { %11113 = vmatprep.subr.bf16.mxu1 %v15829_v49  ;;  %v523_v49 = vld [vmem:[%s17672_s12 + $0xd0] sm:$0xff] }
 0x467   : > { %10153 = vmatpush1.bf16.msra.mxu0 %v15824_v51  ;;  %v15919_v51 = vld [vmem:[#allocation7 + $0x1b2c] ss:$16 sps:$4 sm:$0xff]  }
 0x468   : > { %11114 = vmatpush1.bf16.msra.mxu1 %v15827_v52  ;;  %10154 = vmatprep.subr.bf16.mxu0 %v15832_v53  ;;  %v17832_v52 = vpack.c.bf16 %v523_v49, %v523_v49  ;;  %v526_v53 = vld [vmem:[%s17672_s12 + $0xe8] sm:$0xff] }
 0x469   : > { %11115 = vmatprep.subr.bf16.mxu1 %v15835_v54  ;;  %v15914_v54 = vld [vmem:[#allocation7 + $0x1c00] ss:$16 sps:$4 sm:$0xff]   ;;  %v16000_v49 = vld [vmem:[#allocation7 + $0x1dc4] ss:$16 sps:$4 sm:$0xff]  }
 0x46b   : > { %10155 = vmatpush1.bf16.msra.mxu0 %v15830_v55  ;;  %v15917_v55 = vld [vmem:[#allocation7 + $0x1b28] ss:$16 sps:$4 sm:$0xff]  }
 0x46c   : > { %11116 = vmatpush1.bf16.msra.mxu1 %v15833_v56  ;;  %10156 = vmatprep.subr.bf16.mxu0 %v15838_v57  ;;  %v15922_v56 = vld [vmem:[#allocation7 + $0x1c24] ss:$16 sps:$4 sm:$0xff]   ;;  %v15925_v57 = vld [vmem:[#allocation7 + $0x1b4c] ss:$16 sps:$4 sm:$0xff]  }
 0x46d   : > { %11117 = vmatprep.subr.bf16.mxu1 %v15841_v58  ;;  %v17835_v58 = vpack.c.bf16 %v526_v53, %v526_v53  ;;  %v16006_v53 = vld [vmem:[#allocation7 + $0x1de4] ss:$16 sps:$4 sm:$0xff]  }
 0x46f   : > { %10157 = vmatpush1.bf16.msra.mxu0 %v15836_v59  ;;  %v15920_v59 = vld [vmem:[#allocation7 + $0x1c20] ss:$16 sps:$4 sm:$0xff]  }
 0x470   : > { %11118 = vmatpush1.bf16.msra.mxu1 %v15839_v60  ;;  %10158 = vmatprep.subr.bf16.mxu0 %v15844_v61  ;;  %v15923_v60 = vld [vmem:[#allocation7 + $0x1b48] ss:$16 sps:$4 sm:$0xff]   ;;  %v15928_v61 = vld [vmem:[#allocation7 + $0x1c44] ss:$16 sps:$4 sm:$0xff]  }
 0x471   : > { %11119 = vmatprep.subr.bf16.mxu1 %v15847_v62  ;;  %v15931_v62 = vld [vmem:[#allocation7 + $0x1b6c] ss:$16 sps:$4 sm:$0xff]  }
 0x473   : > { %10159 = vmatpush1.bf16.msra.mxu0 %v15842_v63  ;;  %v15926_v63 = vld [vmem:[#allocation7 + $0x1c40] ss:$16 sps:$4 sm:$0xff]  }
 0x474   : > { %11120 = vmatpush1.bf16.msra.mxu1 %v15845_v0  ;;  %10160 = vmatprep.subr.bf16.mxu0 %v15850_v1  ;;  %v15929_v0 = vld [vmem:[#allocation7 + $0x1b68] ss:$16 sps:$4 sm:$0xff]   ;;  %v15934_v1 = vld [vmem:[#allocation7 + $0x1c64] ss:$16 sps:$4 sm:$0xff]  }
 0x475   : > { %11121 = vmatprep.subr.bf16.mxu1 %v15853_v3  ;;  %v15937_v3 = vld [vmem:[#allocation7 + $0x1b8c] ss:$16 sps:$4 sm:$0xff]  }
 0x477   : > { %10161 = vmatpush1.bf16.msra.mxu0 %v15848_v4  ;;  %v15932_v4 = vld [vmem:[#allocation7 + $0x1c60] ss:$16 sps:$4 sm:$0xff]  }
 0x478   : > { %11122 = vmatpush1.bf16.msra.mxu1 %v15851_v5  ;;  %10162 = vmatprep.subr.bf16.mxu0 %v15856_v6  ;;  %v15935_v5 = vld [vmem:[#allocation7 + $0x1b88] ss:$16 sps:$4 sm:$0xff]   ;;  %v15940_v6 = vld [vmem:[#allocation7 + $0x1c84] ss:$16 sps:$4 sm:$0xff]  }
 0x479   : > { %11123 = vmatprep.subr.bf16.mxu1 %v15859_v7  ;;  %v15943_v7 = vld [vmem:[#allocation7 + $0x1bac] ss:$16 sps:$4 sm:$0xff]  }
 0x47b   : > { %10163 = vmatpush1.bf16.msra.mxu0 %v15854_v8  ;;  %v15938_v8 = vld [vmem:[#allocation7 + $0x1c80] ss:$16 sps:$4 sm:$0xff]  }
 0x47c   : > { %11124 = vmatpush1.bf16.msra.mxu1 %v15857_v9  ;;  %10164 = vmatprep.subr.bf16.mxu0 %v15862_v10  ;;  %v15941_v9 = vld [vmem:[#allocation7 + $0x1ba8] ss:$16 sps:$4 sm:$0xff]   ;;  %v15946_v10 = vld [vmem:[#allocation7 + $0x1ca4] ss:$16 sps:$4 sm:$0xff]  }
 0x47d   : > { %11134 = vmatprep.subr.bf16.mxu1 %v15865_v11  ;;  %v15949_v11 = vld [vmem:[#allocation7 + $0x1bcc] ss:$16 sps:$4 sm:$0xff]  }
 0x47f   : > { %11126 = vmatmul.mubr.bf16.vlgmr.msra.gmra.mrb[4].mxu1 %v17823_v45  ;;  %10165 = vmatpush1.bf16.msra.mxu0 %v15860_v12  ;;  %v15910_v45 = vld [vmem:[#allocation7 + $0x1be4] ss:$16 sps:$4 sm:$0xff]   ;;  %v15944_v12 = vld [vmem:[#allocation7 + $0x1ca0] ss:$16 sps:$4 sm:$0xff]  }
 0x480   : > { %11135 = vmatpush1.bf16.msra.mxu1 %v15863_v13  ;;  %10166 = vmatprep.subr.bf16.mxu0 %v15868_v15  ;;  %v15947_v13 = vld [vmem:[#allocation7 + $0x1bc8] ss:$16 sps:$4 sm:$0xff]   ;;  %v15952_v15 = vld [vmem:[#allocation7 + $0x1cc4] ss:$16 sps:$4 sm:$0xff]  }
 0x481   : > { %11136 = vmatprep.subr.bf16.mxu1 %v15871_v17  ;;  %11166 = vmatprep.mubr.bf16.mxu1 %v17825_v50  ;;  %v15916_v50 = vld [vmem:[#allocation7 + $0x1c04] ss:$16 sps:$4 sm:$0xff]   ;;  %v15955_v17 = vld [vmem:[#allocation7 + $0x1bec] ss:$16 sps:$4 sm:$0xff]  }
 0x483   : > { %10167 = vmatpush1.bf16.msra.mxu0 %v15866_v18  ;;  %v15950_v18 = vld [vmem:[#allocation7 + $0x1cc0] ss:$16 sps:$4 sm:$0xff]  }
 0x484   : > { %11137 = vmatpush1.bf16.msra.mxu1 %v15869_v19  ;;  %10168 = vmatprep.subr.bf16.mxu0 %v15874_v20  ;;  %v15953_v19 = vld [vmem:[#allocation7 + $0x1be8] ss:$16 sps:$4 sm:$0xff]   ;;  %v15958_v20 = vld [vmem:[#allocation7 + $0x1ce4] ss:$16 sps:$4 sm:$0xff]  }
 0x485   : > { %11138 = vmatprep.subr.bf16.mxu1 %v15877_v21  ;;  %v15961_v21 = vld [vmem:[#allocation7 + $0x1c0c] ss:$16 sps:$4 sm:$0xff]  }
 0x487   : > { %10169 = vmatpush1.bf16.msra.mxu0 %v15872_v22  ;;  %v15956_v22 = vld [vmem:[#allocation7 + $0x1ce0] ss:$16 sps:$4 sm:$0xff]  }
 0x488   : > { %11139 = vmatpush1.bf16.msra.mxu1 %v15875_v23  ;;  %10170 = vmatprep.subr.bf16.mxu0 %v15880_v24  ;;  %v15959_v23 = vld [vmem:[#allocation7 + $0x1c08] ss:$16 sps:$4 sm:$0xff]   ;;  %v15964_v24 = vld [vmem:[#allocation7 + $0x1d04] ss:$16 sps:$4 sm:$0xff]  }
 0x489   : > { %11140 = vmatprep.subr.bf16.mxu1 %v15883_v25  ;;  %v15967_v25 = vld [vmem:[#allocation7 + $0x1c2c] ss:$16 sps:$4 sm:$0xff]  }
 0x48b   : > { %10171 = vmatpush1.bf16.msra.mxu0 %v15878_v26  ;;  %v15962_v26 = vld [vmem:[#allocation7 + $0x1d00] ss:$16 sps:$4 sm:$0xff]  }
 0x48c   : > { %11141 = vmatpush1.bf16.msra.mxu1 %v15881_v27  ;;  %10172 = vmatprep.subr.bf16.mxu0 %v15886_v28  ;;  %v15965_v27 = vld [vmem:[#allocation7 + $0x1c28] ss:$16 sps:$4 sm:$0xff]   ;;  %v15970_v28 = vld [vmem:[#allocation7 + $0x1d24] ss:$16 sps:$4 sm:$0xff]  }
 0x48d   : > { %11142 = vmatprep.subr.bf16.mxu1 %v15889_v29  ;;  %v15973_v29 = vld [vmem:[#allocation7 + $0x1c4c] ss:$16 sps:$4 sm:$0xff]  }
 0x48f   : > { %10173 = vmatpush1.bf16.msra.mxu0 %v15884_v30  ;;  %v15968_v30 = vld [vmem:[#allocation7 + $0x1d20] ss:$16 sps:$4 sm:$0xff]  }
 0x490   : > { %11143 = vmatpush1.bf16.msra.mxu1 %v15887_v31  ;;  %10174 = vmatprep.subr.bf16.mxu0 %v15892_v32  ;;  %v15971_v31 = vld [vmem:[#allocation7 + $0x1c48] ss:$16 sps:$4 sm:$0xff]   ;;  %v15976_v32 = vld [vmem:[#allocation7 + $0x1d44] ss:$16 sps:$4 sm:$0xff]  }
 0x491   : > { %11144 = vmatprep.subr.bf16.mxu1 %v15895_v34  ;;  %v15979_v34 = vld [vmem:[#allocation7 + $0x1c6c] ss:$16 sps:$4 sm:$0xff]  }
 0x493   : > { %10175 = vmatpush1.bf16.msra.mxu0 %v15890_v35  ;;  %v15974_v35 = vld [vmem:[#allocation7 + $0x1d40] ss:$16 sps:$4 sm:$0xff]  }
 0x494   : > { %11145 = vmatpush1.bf16.msra.mxu1 %v15893_v36  ;;  %10176 = vmatprep.subr.bf16.mxu0 %v15898_v37  ;;  %v15977_v36 = vld [vmem:[#allocation7 + $0x1c68] ss:$16 sps:$4 sm:$0xff]   ;;  %v15982_v37 = vld [vmem:[#allocation7 + $0x1d64] ss:$16 sps:$4 sm:$0xff]  }
 0x495   : > { %11146 = vmatprep.subr.bf16.mxu1 %v15901_v38  ;;  %v15985_v38 = vld [vmem:[#allocation7 + $0x1c8c] ss:$16 sps:$4 sm:$0xff]  }
 0x497   : > { %10177 = vmatpush1.bf16.msra.mxu0 %v15896_v39  ;;  %v15980_v39 = vld [vmem:[#allocation7 + $0x1d60] ss:$16 sps:$4 sm:$0xff]  }
 0x498   : > { %11147 = vmatpush1.bf16.msra.mxu1 %v15899_v40  ;;  %10178 = vmatprep.subr.bf16.mxu0 %v15904_v41  ;;  %v15983_v40 = vld [vmem:[#allocation7 + $0x1c88] ss:$16 sps:$4 sm:$0xff]   ;;  %v15988_v41 = vld [vmem:[#allocation7 + $0x1d84] ss:$16 sps:$4 sm:$0xff]  }
 0x499   : > { %11148 = vmatprep.subr.bf16.mxu1 %v15907_v42  ;;  %v15991_v42 = vld [vmem:[#allocation7 + $0x1cac] ss:$16 sps:$4 sm:$0xff]  }
 0x49b   : > { %10179 = vmatpush1.bf16.msra.mxu0 %v15902_v43  ;;  %v15986_v43 = vld [vmem:[#allocation7 + $0x1d80] ss:$16 sps:$4 sm:$0xff]  }
 0x49c   : > { %11149 = vmatpush1.bf16.msra.mxu1 %v15905_v44  ;;  %10180 = vmatprep.subr.bf16.mxu0 %v15910_v45  ;;  %v15989_v44 = vld [vmem:[#allocation7 + $0x1ca8] ss:$16 sps:$4 sm:$0xff]   ;;  %v15994_v45 = vld [vmem:[#allocation7 + $0x1da4] ss:$16 sps:$4 sm:$0xff]  }
 0x49d   : > { %11150 = vmatprep.subr.bf16.mxu1 %v15913_v46  ;;  %v15997_v46 = vld [vmem:[#allocation7 + $0x1ccc] ss:$16 sps:$4 sm:$0xff]  }
 0x49f   : > { %10181 = vmatpush1.bf16.msra.mxu0 %v15908_v47  ;;  %v15992_v47 = vld [vmem:[#allocation7 + $0x1da0] ss:$16 sps:$4 sm:$0xff]  }
 0x4a0   : > { %11151 = vmatpush1.bf16.msra.mxu1 %v15911_v48  ;;  %10191 = vmatprep.subr.bf16.mxu0 %v15916_v50  ;;  %v15995_v48 = vld [vmem:[#allocation7 + $0x1cc8] ss:$16 sps:$4 sm:$0xff]   ;;  %v16003_v50 = vld [vmem:[#allocation7 + $0x1cec] ss:$16 sps:$4 sm:$0xff]  }
 0x4a1   : > { %11152 = vmatprep.subr.bf16.mxu1 %v15919_v51  ;;  %v15998_v51 = vld [vmem:[#allocation7 + $0x1dc0] ss:$16 sps:$4 sm:$0xff]  }
 0x4a2   : > { %10183 = vmatmul.mubr.bf16.vlgmr.msra.gmra.mrb[0].mxu0 %v17832_v52 }
 0x4a3   : > { %10192 = vmatpush1.bf16.msra.mxu0 %v15914_v54  ;;  %10223 = vmatprep.mubr.bf16.mxu0 %v17835_v58  ;;  %v16009_v54 = vld [vmem:[#allocation7 + $0x1d0c] ss:$16 sps:$4 sm:$0xff]  }
 0x4a4   : > { %11153 = vmatpush1.bf16.msra.mxu1 %v15917_v55  ;;  %10193 = vmatprep.subr.bf16.mxu0 %v15922_v56  ;;  %v16004_v55 = vld [vmem:[#allocation7 + $0x1de0] ss:$16 sps:$4 sm:$0xff]   ;;  %v16007_v56 = vld [vmem:[#allocation7 + $0x1d08] ss:$16 sps:$4 sm:$0xff]  }
 0x4a5   : > { %11154 = vmatprep.subr.bf16.mxu1 %v15925_v57  ;;  %v525_v57 = vld [vmem:[%s17672_s12 + $0xe0] sm:$0xff] }
 0x4a7   : > { %10194 = vmatpush1.bf16.msra.mxu0 %v15920_v59  ;;  %v16015_v59 = vld [vmem:[#allocation7 + $0x1d2c] ss:$16 sps:$4 sm:$0xff]  }
 0x4a8   : > { %11155 = vmatpush1.bf16.msra.mxu1 %v15923_v60  ;;  %10195 = vmatprep.subr.bf16.mxu0 %v15928_v61  ;;  %v17842_v60 = vpack.c.bf16 %v525_v57, %v525_v57  ;;  %v528_v61 = vld [vmem:[%s17672_s12 + $0xf8] sm:$0xff] }
 0x4a9   : > { %11156 = vmatprep.subr.bf16.mxu1 %v15931_v62  ;;  %v16010_v62 = vld [vmem:[#allocation7 + $0x1e00] ss:$16 sps:$4 sm:$0xff]   ;;  %v16096_v57 = vld [vmem:[#allocation7 + $0x1fc4] ss:$16 sps:$4 sm:$0xff]  }
 0x4ab   : > { %10196 = vmatpush1.bf16.msra.mxu0 %v15926_v63  ;;  %v16013_v63 = vld [vmem:[#allocation7 + $0x1d28] ss:$16 sps:$4 sm:$0xff]  }
 0x4ac   : > { %11157 = vmatpush1.bf16.msra.mxu1 %v15929_v0  ;;  %10197 = vmatprep.subr.bf16.mxu0 %v15934_v1  ;;  %v16018_v0 = vld [vmem:[#allocation7 + $0x1e24] ss:$16 sps:$4 sm:$0xff]   ;;  %v16021_v1 = vld [vmem:[#allocation7 + $0x1d4c] ss:$16 sps:$4 sm:$0xff]  }
 0x4ad   : > { %11158 = vmatprep.subr.bf16.mxu1 %v15937_v3  ;;  %v17845_v3 = vpack.c.bf16 %v528_v61, %v528_v61  ;;  %v16102_v61 = vld [vmem:[#allocation7 + $0x1fe4] ss:$16 sps:$4 sm:$0xff]  }
 0x4af   : > { %10198 = vmatpush1.bf16.msra.mxu0 %v15932_v4  ;;  %v16016_v4 = vld [vmem:[#allocation7 + $0x1e20] ss:$16 sps:$4 sm:$0xff]  }
 0x4b0   : > { %11159 = vmatpush1.bf16.msra.mxu1 %v15935_v5  ;;  %10199 = vmatprep.subr.bf16.mxu0 %v15940_v6  ;;  %v16019_v5 = vld [vmem:[#allocation7 + $0x1d48] ss:$16 sps:$4 sm:$0xff]   ;;  %v16024_v6 = vld [vmem:[#allocation7 + $0x1e44] ss:$16 sps:$4 sm:$0xff]  }
 0x4b1   : > { %11160 = vmatprep.subr.bf16.mxu1 %v15943_v7  ;;  %v16027_v7 = vld [vmem:[#allocation7 + $0x1d6c] ss:$16 sps:$4 sm:$0xff]  }
 0x4b3   : > { %10200 = vmatpush1.bf16.msra.mxu0 %v15938_v8  ;;  %v16022_v8 = vld [vmem:[#allocation7 + $0x1e40] ss:$16 sps:$4 sm:$0xff]  }
 0x4b4   : > { %11161 = vmatpush1.bf16.msra.mxu1 %v15941_v9  ;;  %10201 = vmatprep.subr.bf16.mxu0 %v15946_v10  ;;  %v16025_v9 = vld [vmem:[#allocation7 + $0x1d68] ss:$16 sps:$4 sm:$0xff]   ;;  %v16030_v10 = vld [vmem:[#allocation7 + $0x1e64] ss:$16 sps:$4 sm:$0xff]  }
 0x4b5   : > { %11162 = vmatprep.subr.bf16.mxu1 %v15949_v11  ;;  %v16033_v11 = vld [vmem:[#allocation7 + $0x1d8c] ss:$16 sps:$4 sm:$0xff]  }
 0x4b7   : > { %10202 = vmatpush1.bf16.msra.mxu0 %v15944_v12  ;;  %v16028_v12 = vld [vmem:[#allocation7 + $0x1e60] ss:$16 sps:$4 sm:$0xff]  }
 0x4b8   : > { %11163 = vmatpush1.bf16.msra.mxu1 %v15947_v13  ;;  %10203 = vmatprep.subr.bf16.mxu0 %v15952_v15  ;;  %v16031_v13 = vld [vmem:[#allocation7 + $0x1d88] ss:$16 sps:$4 sm:$0xff]   ;;  %v16036_v15 = vld [vmem:[#allocation7 + $0x1e84] ss:$16 sps:$4 sm:$0xff]  }
 0x4b9   : > { %11164 = vmatprep.subr.bf16.mxu1 %v15955_v17  ;;  %v16039_v17 = vld [vmem:[#allocation7 + $0x1dac] ss:$16 sps:$4 sm:$0xff]  }
 0x4bb   : > { %10204 = vmatpush1.bf16.msra.mxu0 %v15950_v18  ;;  %v16034_v18 = vld [vmem:[#allocation7 + $0x1e80] ss:$16 sps:$4 sm:$0xff]  }
 0x4bc   : > { %11165 = vmatpush1.bf16.msra.mxu1 %v15953_v19  ;;  %10205 = vmatprep.subr.bf16.mxu0 %v15958_v20  ;;  %v16037_v19 = vld [vmem:[#allocation7 + $0x1da8] ss:$16 sps:$4 sm:$0xff]   ;;  %v16042_v20 = vld [vmem:[#allocation7 + $0x1ea4] ss:$16 sps:$4 sm:$0xff]  }
 0x4bd   : > { %11175 = vmatprep.subr.bf16.mxu1 %v15961_v21  ;;  %v16045_v21 = vld [vmem:[#allocation7 + $0x1dcc] ss:$16 sps:$4 sm:$0xff]  }
 0x4bf   : > { %11167 = vmatmul.mubr.bf16.vlgmr.msra.gmra.mrb[4].mxu1 %v17832_v52  ;;  %10206 = vmatpush1.bf16.msra.mxu0 %v15956_v22  ;;  %v16001_v52 = vld [vmem:[#allocation7 + $0x1ce8] ss:$16 sps:$4 sm:$0xff]   ;;  %v16040_v22 = vld [vmem:[#allocation7 + $0x1ea0] ss:$16 sps:$4 sm:$0xff]  }
 0x4c0   : > { %11176 = vmatpush1.bf16.msra.mxu1 %v15959_v23  ;;  %10207 = vmatprep.subr.bf16.mxu0 %v15964_v24  ;;  %v16043_v23 = vld [vmem:[#allocation7 + $0x1dc8] ss:$16 sps:$4 sm:$0xff]   ;;  %v16048_v24 = vld [vmem:[#allocation7 + $0x1ec4] ss:$16 sps:$4 sm:$0xff]  }
 0x4c1   : > { %11177 = vmatprep.subr.bf16.mxu1 %v15967_v25  ;;  %11207 = vmatprep.mubr.bf16.mxu1 %v17835_v58  ;;  %v16012_v58 = vld [vmem:[#allocation7 + $0x1e04] ss:$16 sps:$4 sm:$0xff]   ;;  %v16051_v25 = vld [vmem:[#allocation7 + $0x1dec] ss:$16 sps:$4 sm:$0xff]  }
 0x4c3   : > { %10208 = vmatpush1.bf16.msra.mxu0 %v15962_v26  ;;  %v16046_v26 = vld [vmem:[#allocation7 + $0x1ec0] ss:$16 sps:$4 sm:$0xff]  }
 0x4c4   : > { %11178 = vmatpush1.bf16.msra.mxu1 %v15965_v27  ;;  %10209 = vmatprep.subr.bf16.mxu0 %v15970_v28  ;;  %v16049_v27 = vld [vmem:[#allocation7 + $0x1de8] ss:$16 sps:$4 sm:$0xff]   ;;  %v16054_v28 = vld [vmem:[#allocation7 + $0x1ee4] ss:$16 sps:$4 sm:$0xff]  }
 0x4c5   : > { %11179 = vmatprep.subr.bf16.mxu1 %v15973_v29  ;;  %v16057_v29 = vld [vmem:[#allocation7 + $0x1e0c] ss:$16 sps:$4 sm:$0xff]  }
 0x4c7   : > { %10210 = vmatpush1.bf16.msra.mxu0 %v15968_v30  ;;  %v16052_v30 = vld [vmem:[#allocation7 + $0x1ee0] ss:$16 sps:$4 sm:$0xff]  }
 0x4c8   : > { %11180 = vmatpush1.bf16.msra.mxu1 %v15971_v31  ;;  %10211 = vmatprep.subr.bf16.mxu0 %v15976_v32  ;;  %v16055_v31 = vld [vmem:[#allocation7 + $0x1e08] ss:$16 sps:$4 sm:$0xff]   ;;  %v16060_v32 = vld [vmem:[#allocation7 + $0x1f04] ss:$16 sps:$4 sm:$0xff]  }
 0x4c9   : > { %11181 = vmatprep.subr.bf16.mxu1 %v15979_v34  ;;  %v16063_v34 = vld [vmem:[#allocation7 + $0x1e2c] ss:$16 sps:$4 sm:$0xff]  }
 0x4cb   : > { %10212 = vmatpush1.bf16.msra.mxu0 %v15974_v35  ;;  %v16058_v35 = vld [vmem:[#allocation7 + $0x1f00] ss:$16 sps:$4 sm:$0xff]  }
 0x4cc   : > { %11182 = vmatpush1.bf16.msra.mxu1 %v15977_v36  ;;  %10213 = vmatprep.subr.bf16.mxu0 %v15982_v37  ;;  %v16061_v36 = vld [vmem:[#allocation7 + $0x1e28] ss:$16 sps:$4 sm:$0xff]   ;;  %v16066_v37 = vld [vmem:[#allocation7 + $0x1f24] ss:$16 sps:$4 sm:$0xff]  }
 0x4cd   : > { %11183 = vmatprep.subr.bf16.mxu1 %v15985_v38  ;;  %v16069_v38 = vld [vmem:[#allocation7 + $0x1e4c] ss:$16 sps:$4 sm:$0xff]  }
 0x4cf   : > { %10214 = vmatpush1.bf16.msra.mxu0 %v15980_v39  ;;  %v16064_v39 = vld [vmem:[#allocation7 + $0x1f20] ss:$16 sps:$4 sm:$0xff]  }
 0x4d0   : > { %11184 = vmatpush1.bf16.msra.mxu1 %v15983_v40  ;;  %10215 = vmatprep.subr.bf16.mxu0 %v15988_v41  ;;  %v16067_v40 = vld [vmem:[#allocation7 + $0x1e48] ss:$16 sps:$4 sm:$0xff]   ;;  %v16072_v41 = vld [vmem:[#allocation7 + $0x1f44] ss:$16 sps:$4 sm:$0xff]  }
 0x4d1   : > { %11185 = vmatprep.subr.bf16.mxu1 %v15991_v42  ;;  %v16075_v42 = vld [vmem:[#allocation7 + $0x1e6c] ss:$16 sps:$4 sm:$0xff]  }
 0x4d3   : > { %10216 = vmatpush1.bf16.msra.mxu0 %v15986_v43  ;;  %v16070_v43 = vld [vmem:[#allocation7 + $0x1f40] ss:$16 sps:$4 sm:$0xff]  }
 0x4d4   : > { %11186 = vmatpush1.bf16.msra.mxu1 %v15989_v44  ;;  %10217 = vmatprep.subr.bf16.mxu0 %v15994_v45  ;;  %v16073_v44 = vld [vmem:[#allocation7 + $0x1e68] ss:$16 sps:$4 sm:$0xff]   ;;  %v16078_v45 = vld [vmem:[#allocation7 + $0x1f64] ss:$16 sps:$4 sm:$0xff]  }
 0x4d5   : > { %11187 = vmatprep.subr.bf16.mxu1 %v15997_v46  ;;  %v16081_v46 = vld [vmem:[#allocation7 + $0x1e8c] ss:$16 sps:$4 sm:$0xff]  }
 0x4d7   : > { %10218 = vmatpush1.bf16.msra.mxu0 %v15992_v47  ;;  %v16076_v47 = vld [vmem:[#allocation7 + $0x1f60] ss:$16 sps:$4 sm:$0xff]  }
 0x4d8   : > { %11188 = vmatpush1.bf16.msra.mxu1 %v15995_v48  ;;  %10219 = vmatprep.subr.bf16.mxu0 %v16000_v49  ;;  %v16079_v48 = vld [vmem:[#allocation7 + $0x1e88] ss:$16 sps:$4 sm:$0xff]   ;;  %v16084_v49 = vld [vmem:[#allocation7 + $0x1f84] ss:$16 sps:$4 sm:$0xff]  }
 0x4d9   : > { %11189 = vmatprep.subr.bf16.mxu1 %v16003_v50  ;;  %v16087_v50 = vld [vmem:[#allocation7 + $0x1eac] ss:$16 sps:$4 sm:$0xff]  }
 0x4db   : > { %10220 = vmatpush1.bf16.msra.mxu0 %v15998_v51  ;;  %v16082_v51 = vld [vmem:[#allocation7 + $0x1f80] ss:$16 sps:$4 sm:$0xff]  }
 0x4dc   : > { %11190 = vmatpush1.bf16.msra.mxu1 %v16001_v52  ;;  %10221 = vmatprep.subr.bf16.mxu0 %v16006_v53  ;;  %v16085_v52 = vld [vmem:[#allocation7 + $0x1ea8] ss:$16 sps:$4 sm:$0xff]   ;;  %v16090_v53 = vld [vmem:[#allocation7 + $0x1fa4] ss:$16 sps:$4 sm:$0xff]  }
 0x4dd   : > { %11191 = vmatprep.subr.bf16.mxu1 %v16009_v54  ;;  %v16093_v54 = vld [vmem:[#allocation7 + $0x1ecc] ss:$16 sps:$4 sm:$0xff]  }
 0x4df   : > { %10222 = vmatpush1.bf16.msra.mxu0 %v16004_v55  ;;  %v16088_v55 = vld [vmem:[#allocation7 + $0x1fa0] ss:$16 sps:$4 sm:$0xff]  }
 0x4e0   : > { %11192 = vmatpush1.bf16.msra.mxu1 %v16007_v56  ;;  %10232 = vmatprep.subr.bf16.mxu0 %v16012_v58  ;;  %v16091_v56 = vld [vmem:[#allocation7 + $0x1ec8] ss:$16 sps:$4 sm:$0xff]   ;;  %v16099_v58 = vld [vmem:[#allocation7 + $0x1eec] ss:$16 sps:$4 sm:$0xff]  }
 0x4e1   : > { %11193 = vmatprep.subr.bf16.mxu1 %v16015_v59  ;;  %v16094_v59 = vld [vmem:[#allocation7 + $0x1fc0] ss:$16 sps:$4 sm:$0xff]  }
 0x4e2   : > { %10224 = vmatmul.mubr.bf16.vlgmr.msra.gmra.mrb[0].mxu0 %v17842_v60 }
 0x4e3   : > { %10233 = vmatpush1.bf16.msra.mxu0 %v16010_v62  ;;  %10264 = vmatprep.mubr.bf16.mxu0 %v17845_v3  ;;  %v16105_v62 = vld [vmem:[#allocation7 + $0x1f0c] ss:$16 sps:$4 sm:$0xff]  }
 0x4e4   : > { %11194 = vmatpush1.bf16.msra.mxu1 %v16013_v63  ;;  %10234 = vmatprep.subr.bf16.mxu0 %v16018_v0  ;;  %v16100_v63 = vld [vmem:[#allocation7 + $0x1fe0] ss:$16 sps:$4 sm:$0xff]   ;;  %v16103_v0 = vld [vmem:[#allocation7 + $0x1f08] ss:$16 sps:$4 sm:$0xff]  }
 0x4e5   : > { %11195 = vmatprep.subr.bf16.mxu1 %v16021_v1  ;;  %v527_v1 = vld [vmem:[%s17672_s12 + $0xf0] sm:$0xff] }
 0x4e7   : > { %10235 = vmatpush1.bf16.msra.mxu0 %v16016_v4  ;;  %v16111_v4 = vld [vmem:[#allocation7 + $0x1f2c] ss:$16 sps:$4 sm:$0xff]  }
 0x4e8   : > { %11196 = vmatpush1.bf16.msra.mxu1 %v16019_v5  ;;  %10236 = vmatprep.subr.bf16.mxu0 %v16024_v6  ;;  %v17852_v5 = vpack.c.bf16 %v527_v1, %v527_v1  ;;  %v530_v6 = vld [vmem:[%s17672_s12 + $0x108] sm:$0xff] }
 0x4e9   : > { %11197 = vmatprep.subr.bf16.mxu1 %v16027_v7  ;;  %v16106_v7 = vld [vmem:[#allocation7 + $0x2000] ss:$16 sps:$4 sm:$0xff]   ;;  %v16192_v1 = vld [vmem:[#allocation7 + $0x21c4] ss:$16 sps:$4 sm:$0xff]  }
 0x4eb   : > { %10237 = vmatpush1.bf16.msra.mxu0 %v16022_v8  ;;  %v16109_v8 = vld [vmem:[#allocation7 + $0x1f28] ss:$16 sps:$4 sm:$0xff]  }
 0x4ec   : > { %11198 = vmatpush1.bf16.msra.mxu1 %v16025_v9  ;;  %10238 = vmatprep.subr.bf16.mxu0 %v16030_v10  ;;  %v16114_v9 = vld [vmem:[#allocation7 + $0x2024] ss:$16 sps:$4 sm:$0xff]   ;;  %v16117_v10 = vld [vmem:[#allocation7 + $0x1f4c] ss:$16 sps:$4 sm:$0xff]  }
 0x4ed   : > { %11199 = vmatprep.subr.bf16.mxu1 %v16033_v11  ;;  %v17855_v11 = vpack.c.bf16 %v530_v6, %v530_v6  ;;  %v16198_v6 = vld [vmem:[#allocation7 + $0x21e4] ss:$16 sps:$4 sm:$0xff]  }
 0x4ef   : > { %10239 = vmatpush1.bf16.msra.mxu0 %v16028_v12  ;;  %v16112_v12 = vld [vmem:[#allocation7 + $0x2020] ss:$16 sps:$4 sm:$0xff]  }
 0x4f0   : > { %11200 = vmatpush1.bf16.msra.mxu1 %v16031_v13  ;;  %10240 = vmatprep.subr.bf16.mxu0 %v16036_v15  ;;  %v16115_v13 = vld [vmem:[#allocation7 + $0x1f48] ss:$16 sps:$4 sm:$0xff]   ;;  %v16120_v15 = vld [vmem:[#allocation7 + $0x2044] ss:$16 sps:$4 sm:$0xff]  }
 0x4f1   : > { %11201 = vmatprep.subr.bf16.mxu1 %v16039_v17  ;;  %v16123_v17 = vld [vmem:[#allocation7 + $0x1f6c] ss:$16 sps:$4 sm:$0xff]  }
 0x4f3   : > { %10241 = vmatpush1.bf16.msra.mxu0 %v16034_v18  ;;  %v16118_v18 = vld [vmem:[#allocation7 + $0x2040] ss:$16 sps:$4 sm:$0xff]  }
 0x4f4   : > { %11202 = vmatpush1.bf16.msra.mxu1 %v16037_v19  ;;  %10242 = vmatprep.subr.bf16.mxu0 %v16042_v20  ;;  %v16121_v19 = vld [vmem:[#allocation7 + $0x1f68] ss:$16 sps:$4 sm:$0xff]   ;;  %v16126_v20 = vld [vmem:[#allocation7 + $0x2064] ss:$16 sps:$4 sm:$0xff]  }
 0x4f5   : > { %11203 = vmatprep.subr.bf16.mxu1 %v16045_v21  ;;  %v16129_v21 = vld [vmem:[#allocation7 + $0x1f8c] ss:$16 sps:$4 sm:$0xff]  }
 0x4f7   : > { %10243 = vmatpush1.bf16.msra.mxu0 %v16040_v22  ;;  %v16124_v22 = vld [vmem:[#allocation7 + $0x2060] ss:$16 sps:$4 sm:$0xff]  }
 0x4f8   : > { %11204 = vmatpush1.bf16.msra.mxu1 %v16043_v23  ;;  %10244 = vmatprep.subr.bf16.mxu0 %v16048_v24  ;;  %v16127_v23 = vld [vmem:[#allocation7 + $0x1f88] ss:$16 sps:$4 sm:$0xff]   ;;  %v16132_v24 = vld [vmem:[#allocation7 + $0x2084] ss:$16 sps:$4 sm:$0xff]  }
 0x4f9   : > { %11205 = vmatprep.subr.bf16.mxu1 %v16051_v25  ;;  %v16135_v25 = vld [vmem:[#allocation7 + $0x1fac] ss:$16 sps:$4 sm:$0xff]  }
 0x4fb   : > { %10245 = vmatpush1.bf16.msra.mxu0 %v16046_v26  ;;  %v16130_v26 = vld [vmem:[#allocation7 + $0x2080] ss:$16 sps:$4 sm:$0xff]  }
 0x4fc   : > { %11206 = vmatpush1.bf16.msra.mxu1 %v16049_v27  ;;  %10246 = vmatprep.subr.bf16.mxu0 %v16054_v28  ;;  %v16133_v27 = vld [vmem:[#allocation7 + $0x1fa8] ss:$16 sps:$4 sm:$0xff]   ;;  %v16138_v28 = vld [vmem:[#allocation7 + $0x20a4] ss:$16 sps:$4 sm:$0xff]  }
 0x4fd   : > { %11216 = vmatprep.subr.bf16.mxu1 %v16057_v29  ;;  %v16141_v29 = vld [vmem:[#allocation7 + $0x1fcc] ss:$16 sps:$4 sm:$0xff]  }
 0x4ff   : > { %11208 = vmatmul.mubr.bf16.vlgmr.msra.gmra.mrb[4].mxu1 %v17842_v60  ;;  %10247 = vmatpush1.bf16.msra.mxu0 %v16052_v30  ;;  %v16097_v60 = vld [vmem:[#allocation7 + $0x1ee8] ss:$16 sps:$4 sm:$0xff]   ;;  %v16136_v30 = vld [vmem:[#allocation7 + $0x20a0] ss:$16 sps:$4 sm:$0xff]  }
 0x500   : > { %11217 = vmatpush1.bf16.msra.mxu1 %v16055_v31  ;;  %10248 = vmatprep.subr.bf16.mxu0 %v16060_v32  ;;  %v16139_v31 = vld [vmem:[#allocation7 + $0x1fc8] ss:$16 sps:$4 sm:$0xff]   ;;  %v16144_v32 = vld [vmem:[#allocation7 + $0x20c4] ss:$16 sps:$4 sm:$0xff]  }
 0x501   : > { %11218 = vmatprep.subr.bf16.mxu1 %v16063_v34  ;;  %11248 = vmatprep.mubr.bf16.mxu1 %v17845_v3  ;;  %v16108_v3 = vld [vmem:[#allocation7 + $0x2004] ss:$16 sps:$4 sm:$0xff]   ;;  %v16147_v34 = vld [vmem:[#allocation7 + $0x1fec] ss:$16 sps:$4 sm:$0xff]  }
 0x503   : > { %10249 = vmatpush1.bf16.msra.mxu0 %v16058_v35  ;;  %v16142_v35 = vld [vmem:[#allocation7 + $0x20c0] ss:$16 sps:$4 sm:$0xff]  }
 0x504   : > { %11219 = vmatpush1.bf16.msra.mxu1 %v16061_v36  ;;  %10250 = vmatprep.subr.bf16.mxu0 %v16066_v37  ;;  %v16145_v36 = vld [vmem:[#allocation7 + $0x1fe8] ss:$16 sps:$4 sm:$0xff]   ;;  %v16150_v37 = vld [vmem:[#allocation7 + $0x20e4] ss:$16 sps:$4 sm:$0xff]  }
 0x505   : > { %11220 = vmatprep.subr.bf16.mxu1 %v16069_v38  ;;  %v16153_v38 = vld [vmem:[#allocation7 + $0x200c] ss:$16 sps:$4 sm:$0xff]  }
 0x507   : > { %10251 = vmatpush1.bf16.msra.mxu0 %v16064_v39  ;;  %v16148_v39 = vld [vmem:[#allocation7 + $0x20e0] ss:$16 sps:$4 sm:$0xff]  }
 0x508   : > { %11221 = vmatpush1.bf16.msra.mxu1 %v16067_v40  ;;  %10252 = vmatprep.subr.bf16.mxu0 %v16072_v41  ;;  %v16151_v40 = vld [vmem:[#allocation7 + $0x2008] ss:$16 sps:$4 sm:$0xff]   ;;  %v16156_v41 = vld [vmem:[#allocation7 + $0x2104] ss:$16 sps:$4 sm:$0xff]  }
 0x509   : > { %11222 = vmatprep.subr.bf16.mxu1 %v16075_v42  ;;  %v16159_v42 = vld [vmem:[#allocation7 + $0x202c] ss:$16 sps:$4 sm:$0xff]  }
 0x50b   : > { %10253 = vmatpush1.bf16.msra.mxu0 %v16070_v43  ;;  %v16154_v43 = vld [vmem:[#allocation7 + $0x2100] ss:$16 sps:$4 sm:$0xff]  }
 0x50c   : > { %11223 = vmatpush1.bf16.msra.mxu1 %v16073_v44  ;;  %10254 = vmatprep.subr.bf16.mxu0 %v16078_v45  ;;  %v16157_v44 = vld [vmem:[#allocation7 + $0x2028] ss:$16 sps:$4 sm:$0xff]   ;;  %v16162_v45 = vld [vmem:[#allocation7 + $0x2124] ss:$16 sps:$4 sm:$0xff]  }
 0x50d   : > { %11224 = vmatprep.subr.bf16.mxu1 %v16081_v46  ;;  %v16165_v46 = vld [vmem:[#allocation7 + $0x204c] ss:$16 sps:$4 sm:$0xff]  }
 0x50f   : > { %10255 = vmatpush1.bf16.msra.mxu0 %v16076_v47  ;;  %v16160_v47 = vld [vmem:[#allocation7 + $0x2120] ss:$16 sps:$4 sm:$0xff]  }
 0x510   : > { %11225 = vmatpush1.bf16.msra.mxu1 %v16079_v48  ;;  %10256 = vmatprep.subr.bf16.mxu0 %v16084_v49  ;;  %v16163_v48 = vld [vmem:[#allocation7 + $0x2048] ss:$16 sps:$4 sm:$0xff]   ;;  %v16168_v49 = vld [vmem:[#allocation7 + $0x2144] ss:$16 sps:$4 sm:$0xff]  }
 0x511   : > { %11226 = vmatprep.subr.bf16.mxu1 %v16087_v50  ;;  %v16171_v50 = vld [vmem:[#allocation7 + $0x206c] ss:$16 sps:$4 sm:$0xff]  }
 0x513   : > { %10257 = vmatpush1.bf16.msra.mxu0 %v16082_v51  ;;  %v16166_v51 = vld [vmem:[#allocation7 + $0x2140] ss:$16 sps:$4 sm:$0xff]  }
 0x514   : > { %11227 = vmatpush1.bf16.msra.mxu1 %v16085_v52  ;;  %10258 = vmatprep.subr.bf16.mxu0 %v16090_v53  ;;  %v16169_v52 = vld [vmem:[#allocation7 + $0x2068] ss:$16 sps:$4 sm:$0xff]   ;;  %v16174_v53 = vld [vmem:[#allocation7 + $0x2164] ss:$16 sps:$4 sm:$0xff]  }
 0x515   : > { %11228 = vmatprep.subr.bf16.mxu1 %v16093_v54  ;;  %v16177_v54 = vld [vmem:[#allocation7 + $0x208c] ss:$16 sps:$4 sm:$0xff]  }
 0x517   : > { %10259 = vmatpush1.bf16.msra.mxu0 %v16088_v55  ;;  %v16172_v55 = vld [vmem:[#allocation7 + $0x2160] ss:$16 sps:$4 sm:$0xff]  }
 0x518   : > { %11229 = vmatpush1.bf16.msra.mxu1 %v16091_v56  ;;  %10260 = vmatprep.subr.bf16.mxu0 %v16096_v57  ;;  %v16175_v56 = vld [vmem:[#allocation7 + $0x2088] ss:$16 sps:$4 sm:$0xff]   ;;  %v16180_v57 = vld [vmem:[#allocation7 + $0x2184] ss:$16 sps:$4 sm:$0xff]  }
 0x519   : > { %11230 = vmatprep.subr.bf16.mxu1 %v16099_v58  ;;  %v16183_v58 = vld [vmem:[#allocation7 + $0x20ac] ss:$16 sps:$4 sm:$0xff]  }
 0x51b   : > { %10261 = vmatpush1.bf16.msra.mxu0 %v16094_v59  ;;  %v16178_v59 = vld [vmem:[#allocation7 + $0x2180] ss:$16 sps:$4 sm:$0xff]  }
 0x51c   : > { %11231 = vmatpush1.bf16.msra.mxu1 %v16097_v60  ;;  %10262 = vmatprep.subr.bf16.mxu0 %v16102_v61  ;;  %v16181_v60 = vld [vmem:[#allocation7 + $0x20a8] ss:$16 sps:$4 sm:$0xff]   ;;  %v16186_v61 = vld [vmem:[#allocation7 + $0x21a4] ss:$16 sps:$4 sm:$0xff]  }
 0x51d   : > { %11232 = vmatprep.subr.bf16.mxu1 %v16105_v62  ;;  %v16189_v62 = vld [vmem:[#allocation7 + $0x20cc] ss:$16 sps:$4 sm:$0xff]  }
 0x51f   : > { %10263 = vmatpush1.bf16.msra.mxu0 %v16100_v63  ;;  %v16184_v63 = vld [vmem:[#allocation7 + $0x21a0] ss:$16 sps:$4 sm:$0xff]  }
 0x520   : > { %11233 = vmatpush1.bf16.msra.mxu1 %v16103_v0  ;;  %10273 = vmatprep.subr.bf16.mxu0 %v16108_v3  ;;  %v16187_v0 = vld [vmem:[#allocation7 + $0x20c8] ss:$16 sps:$4 sm:$0xff]   ;;  %v16195_v3 = vld [vmem:[#allocation7 + $0x20ec] ss:$16 sps:$4 sm:$0xff]  }
 0x521   : > { %11234 = vmatprep.subr.bf16.mxu1 %v16111_v4  ;;  %v16190_v4 = vld [vmem:[#allocation7 + $0x21c0] ss:$16 sps:$4 sm:$0xff]  }
 0x522   : > { %10265 = vmatmul.mubr.bf16.vlgmr.msra.gmra.mrb[0].mxu0 %v17852_v5 }
 0x523   : > { %10274 = vmatpush1.bf16.msra.mxu0 %v16106_v7  ;;  %10305 = vmatprep.mubr.bf16.mxu0 %v17855_v11  ;;  %v16201_v7 = vld [vmem:[#allocation7 + $0x210c] ss:$16 sps:$4 sm:$0xff]  }
 0x524   : > { %11235 = vmatpush1.bf16.msra.mxu1 %v16109_v8  ;;  %10275 = vmatprep.subr.bf16.mxu0 %v16114_v9  ;;  %v16196_v8 = vld [vmem:[#allocation7 + $0x21e0] ss:$16 sps:$4 sm:$0xff]   ;;  %v16199_v9 = vld [vmem:[#allocation7 + $0x2108] ss:$16 sps:$4 sm:$0xff]  }
 0x525   : > { %11236 = vmatprep.subr.bf16.mxu1 %v16117_v10  ;;  %v529_v10 = vld [vmem:[%s17672_s12 + $0x100] sm:$0xff] }
 0x527   : > { %10276 = vmatpush1.bf16.msra.mxu0 %v16112_v12  ;;  %v16207_v12 = vld [vmem:[#allocation7 + $0x212c] ss:$16 sps:$4 sm:$0xff]  }
 0x528   : > { %11237 = vmatpush1.bf16.msra.mxu1 %v16115_v13  ;;  %10277 = vmatprep.subr.bf16.mxu0 %v16120_v15  ;;  %v17862_v13 = vpack.c.bf16 %v529_v10, %v529_v10  ;;  %v532_v15 = vld [vmem:[%s17672_s12 + $0x118] sm:$0xff] }
 0x529   : > { %11238 = vmatprep.subr.bf16.mxu1 %v16123_v17  ;;  %v16202_v17 = vld [vmem:[#allocation7 + $0x2200] ss:$16 sps:$4 sm:$0xff]   ;;  %v16288_v10 = vld [vmem:[#allocation7 + $0x23c4] ss:$16 sps:$4 sm:$0xff]  }
 0x52b   : > { %10278 = vmatpush1.bf16.msra.mxu0 %v16118_v18  ;;  %v16205_v18 = vld [vmem:[#allocation7 + $0x2128] ss:$16 sps:$4 sm:$0xff]  }
 0x52c   : > { %11239 = vmatpush1.bf16.msra.mxu1 %v16121_v19  ;;  %10279 = vmatprep.subr.bf16.mxu0 %v16126_v20  ;;  %v16210_v19 = vld [vmem:[#allocation7 + $0x2224] ss:$16 sps:$4 sm:$0xff]   ;;  %v16213_v20 = vld [vmem:[#allocation7 + $0x214c] ss:$16 sps:$4 sm:$0xff]  }
 0x52d   : > { %11240 = vmatprep.subr.bf16.mxu1 %v16129_v21  ;;  %v17865_v21 = vpack.c.bf16 %v532_v15, %v532_v15  ;;  %v16294_v15 = vld [vmem:[#allocation7 + $0x23e4] ss:$16 sps:$4 sm:$0xff]  }
 0x52f   : > { %10280 = vmatpush1.bf16.msra.mxu0 %v16124_v22  ;;  %v16208_v22 = vld [vmem:[#allocation7 + $0x2220] ss:$16 sps:$4 sm:$0xff]  }
 0x530   : > { %11241 = vmatpush1.bf16.msra.mxu1 %v16127_v23  ;;  %10281 = vmatprep.subr.bf16.mxu0 %v16132_v24  ;;  %v16211_v23 = vld [vmem:[#allocation7 + $0x2148] ss:$16 sps:$4 sm:$0xff]   ;;  %v16216_v24 = vld [vmem:[#allocation7 + $0x2244] ss:$16 sps:$4 sm:$0xff]  }
 0x531   : > { %11242 = vmatprep.subr.bf16.mxu1 %v16135_v25  ;;  %v16219_v25 = vld [vmem:[#allocation7 + $0x216c] ss:$16 sps:$4 sm:$0xff]  }
 0x533   : > { %10282 = vmatpush1.bf16.msra.mxu0 %v16130_v26  ;;  %v16214_v26 = vld [vmem:[#allocation7 + $0x2240] ss:$16 sps:$4 sm:$0xff]  }
 0x534   : > { %11243 = vmatpush1.bf16.msra.mxu1 %v16133_v27  ;;  %10283 = vmatprep.subr.bf16.mxu0 %v16138_v28  ;;  %v16217_v27 = vld [vmem:[#allocation7 + $0x2168] ss:$16 sps:$4 sm:$0xff]   ;;  %v16222_v28 = vld [vmem:[#allocation7 + $0x2264] ss:$16 sps:$4 sm:$0xff]  }
 0x535   : > { %11244 = vmatprep.subr.bf16.mxu1 %v16141_v29  ;;  %v16225_v29 = vld [vmem:[#allocation7 + $0x218c] ss:$16 sps:$4 sm:$0xff]  }
 0x537   : > { %10284 = vmatpush1.bf16.msra.mxu0 %v16136_v30  ;;  %v16220_v30 = vld [vmem:[#allocation7 + $0x2260] ss:$16 sps:$4 sm:$0xff]  }
 0x538   : > { %11245 = vmatpush1.bf16.msra.mxu1 %v16139_v31  ;;  %10285 = vmatprep.subr.bf16.mxu0 %v16144_v32  ;;  %v16223_v31 = vld [vmem:[#allocation7 + $0x2188] ss:$16 sps:$4 sm:$0xff]   ;;  %v16228_v32 = vld [vmem:[#allocation7 + $0x2284] ss:$16 sps:$4 sm:$0xff]  }
 0x539   : > { %11246 = vmatprep.subr.bf16.mxu1 %v16147_v34  ;;  %v16231_v34 = vld [vmem:[#allocation7 + $0x21ac] ss:$16 sps:$4 sm:$0xff]  }
 0x53b   : > { %10286 = vmatpush1.bf16.msra.mxu0 %v16142_v35  ;;  %v16226_v35 = vld [vmem:[#allocation7 + $0x2280] ss:$16 sps:$4 sm:$0xff]  }
 0x53c   : > { %11247 = vmatpush1.bf16.msra.mxu1 %v16145_v36  ;;  %10287 = vmatprep.subr.bf16.mxu0 %v16150_v37  ;;  %v16229_v36 = vld [vmem:[#allocation7 + $0x21a8] ss:$16 sps:$4 sm:$0xff]   ;;  %v16234_v37 = vld [vmem:[#allocation7 + $0x22a4] ss:$16 sps:$4 sm:$0xff]  }
 0x53d   : > { %11257 = vmatprep.subr.bf16.mxu1 %v16153_v38  ;;  %v16237_v38 = vld [vmem:[#allocation7 + $0x21cc] ss:$16 sps:$4 sm:$0xff]  }
 0x53f   : > { %11249 = vmatmul.mubr.bf16.vlgmr.msra.gmra.mrb[4].mxu1 %v17852_v5  ;;  %10288 = vmatpush1.bf16.msra.mxu0 %v16148_v39  ;;  %v16193_v5 = vld [vmem:[#allocation7 + $0x20e8] ss:$16 sps:$4 sm:$0xff]   ;;  %v16232_v39 = vld [vmem:[#allocation7 + $0x22a0] ss:$16 sps:$4 sm:$0xff]  }
 0x540   : > { %11258 = vmatpush1.bf16.msra.mxu1 %v16151_v40  ;;  %10289 = vmatprep.subr.bf16.mxu0 %v16156_v41  ;;  %v16235_v40 = vld [vmem:[#allocation7 + $0x21c8] ss:$16 sps:$4 sm:$0xff]   ;;  %v16240_v41 = vld [vmem:[#allocation7 + $0x22c4] ss:$16 sps:$4 sm:$0xff]  }
 0x541   : > { %11259 = vmatprep.subr.bf16.mxu1 %v16159_v42  ;;  %11289 = vmatprep.mubr.bf16.mxu1 %v17855_v11  ;;  %v16204_v11 = vld [vmem:[#allocation7 + $0x2204] ss:$16 sps:$4 sm:$0xff]   ;;  %v16243_v42 = vld [vmem:[#allocation7 + $0x21ec] ss:$16 sps:$4 sm:$0xff]  }
 0x543   : > { %10290 = vmatpush1.bf16.msra.mxu0 %v16154_v43  ;;  %v16238_v43 = vld [vmem:[#allocation7 + $0x22c0] ss:$16 sps:$4 sm:$0xff]  }
 0x544   : > { %11260 = vmatpush1.bf16.msra.mxu1 %v16157_v44  ;;  %10291 = vmatprep.subr.bf16.mxu0 %v16162_v45  ;;  %v16241_v44 = vld [vmem:[#allocation7 + $0x21e8] ss:$16 sps:$4 sm:$0xff]   ;;  %v16246_v45 = vld [vmem:[#allocation7 + $0x22e4] ss:$16 sps:$4 sm:$0xff]  }
 0x545   : > { %11261 = vmatprep.subr.bf16.mxu1 %v16165_v46  ;;  %v16249_v46 = vld [vmem:[#allocation7 + $0x220c] ss:$16 sps:$4 sm:$0xff]  }
 0x547   : > { %10292 = vmatpush1.bf16.msra.mxu0 %v16160_v47  ;;  %v16244_v47 = vld [vmem:[#allocation7 + $0x22e0] ss:$16 sps:$4 sm:$0xff]  }
 0x548   : > { %11262 = vmatpush1.bf16.msra.mxu1 %v16163_v48  ;;  %10293 = vmatprep.subr.bf16.mxu0 %v16168_v49  ;;  %v16247_v48 = vld [vmem:[#allocation7 + $0x2208] ss:$16 sps:$4 sm:$0xff]   ;;  %v16252_v49 = vld [vmem:[#allocation7 + $0x2304] ss:$16 sps:$4 sm:$0xff]  }
 0x549   : > { %11263 = vmatprep.subr.bf16.mxu1 %v16171_v50  ;;  %v16255_v50 = vld [vmem:[#allocation7 + $0x222c] ss:$16 sps:$4 sm:$0xff]  }
 0x54b   : > { %10294 = vmatpush1.bf16.msra.mxu0 %v16166_v51  ;;  %v16250_v51 = vld [vmem:[#allocation7 + $0x2300] ss:$16 sps:$4 sm:$0xff]  }
 0x54c   : > { %11264 = vmatpush1.bf16.msra.mxu1 %v16169_v52  ;;  %10295 = vmatprep.subr.bf16.mxu0 %v16174_v53  ;;  %v16253_v52 = vld [vmem:[#allocation7 + $0x2228] ss:$16 sps:$4 sm:$0xff]   ;;  %v16258_v53 = vld [vmem:[#allocation7 + $0x2324] ss:$16 sps:$4 sm:$0xff]  }
 0x54d   : > { %11265 = vmatprep.subr.bf16.mxu1 %v16177_v54  ;;  %v16261_v54 = vld [vmem:[#allocation7 + $0x224c] ss:$16 sps:$4 sm:$0xff]  }
 0x54f   : > { %10296 = vmatpush1.bf16.msra.mxu0 %v16172_v55  ;;  %v16256_v55 = vld [vmem:[#allocation7 + $0x2320] ss:$16 sps:$4 sm:$0xff]  }
 0x550   : > { %11266 = vmatpush1.bf16.msra.mxu1 %v16175_v56  ;;  %10297 = vmatprep.subr.bf16.mxu0 %v16180_v57  ;;  %v16259_v56 = vld [vmem:[#allocation7 + $0x2248] ss:$16 sps:$4 sm:$0xff]   ;;  %v16264_v57 = vld [vmem:[#allocation7 + $0x2344] ss:$16 sps:$4 sm:$0xff]  }
 0x551   : > { %11267 = vmatprep.subr.bf16.mxu1 %v16183_v58  ;;  %v16267_v58 = vld [vmem:[#allocation7 + $0x226c] ss:$16 sps:$4 sm:$0xff]  }
 0x553   : > { %10298 = vmatpush1.bf16.msra.mxu0 %v16178_v59  ;;  %v16262_v59 = vld [vmem:[#allocation7 + $0x2340] ss:$16 sps:$4 sm:$0xff]  }
 0x554   : > { %11268 = vmatpush1.bf16.msra.mxu1 %v16181_v60  ;;  %10299 = vmatprep.subr.bf16.mxu0 %v16186_v61  ;;  %v16265_v60 = vld [vmem:[#allocation7 + $0x2268] ss:$16 sps:$4 sm:$0xff]   ;;  %v16270_v61 = vld [vmem:[#allocation7 + $0x2364] ss:$16 sps:$4 sm:$0xff]  }
 0x555   : > { %11269 = vmatprep.subr.bf16.mxu1 %v16189_v62  ;;  %v16273_v62 = vld [vmem:[#allocation7 + $0x228c] ss:$16 sps:$4 sm:$0xff]  }
 0x557   : > { %10300 = vmatpush1.bf16.msra.mxu0 %v16184_v63  ;;  %v16268_v63 = vld [vmem:[#allocation7 + $0x2360] ss:$16 sps:$4 sm:$0xff]  }
 0x558   : > { %11270 = vmatpush1.bf16.msra.mxu1 %v16187_v0  ;;  %10301 = vmatprep.subr.bf16.mxu0 %v16192_v1  ;;  %v16271_v0 = vld [vmem:[#allocation7 + $0x2288] ss:$16 sps:$4 sm:$0xff]   ;;  %v16276_v1 = vld [vmem:[#allocation7 + $0x2384] ss:$16 sps:$4 sm:$0xff]  }
 0x559   : > { %11271 = vmatprep.subr.bf16.mxu1 %v16195_v3  ;;  %v16279_v3 = vld [vmem:[#allocation7 + $0x22ac] ss:$16 sps:$4 sm:$0xff]  }
 0x55b   : > { %10302 = vmatpush1.bf16.msra.mxu0 %v16190_v4  ;;  %v16274_v4 = vld [vmem:[#allocation7 + $0x2380] ss:$16 sps:$4 sm:$0xff]  }
 0x55c   : > { %11272 = vmatpush1.bf16.msra.mxu1 %v16193_v5  ;;  %10303 = vmatprep.subr.bf16.mxu0 %v16198_v6  ;;  %v16277_v5 = vld [vmem:[#allocation7 + $0x22a8] ss:$16 sps:$4 sm:$0xff]   ;;  %v16282_v6 = vld [vmem:[#allocation7 + $0x23a4] ss:$16 sps:$4 sm:$0xff]  }
 0x55d   : > { %11273 = vmatprep.subr.bf16.mxu1 %v16201_v7  ;;  %v16285_v7 = vld [vmem:[#allocation7 + $0x22cc] ss:$16 sps:$4 sm:$0xff]  }
 0x55f   : > { %10304 = vmatpush1.bf16.msra.mxu0 %v16196_v8  ;;  %v16280_v8 = vld [vmem:[#allocation7 + $0x23a0] ss:$16 sps:$4 sm:$0xff]  }
 0x560   : > { %11274 = vmatpush1.bf16.msra.mxu1 %v16199_v9  ;;  %10314 = vmatprep.subr.bf16.mxu0 %v16204_v11  ;;  %v16283_v9 = vld [vmem:[#allocation7 + $0x22c8] ss:$16 sps:$4 sm:$0xff]   ;;  %v16291_v11 = vld [vmem:[#allocation7 + $0x22ec] ss:$16 sps:$4 sm:$0xff]  }
 0x561   : > { %11275 = vmatprep.subr.bf16.mxu1 %v16207_v12  ;;  %v16286_v12 = vld [vmem:[#allocation7 + $0x23c0] ss:$16 sps:$4 sm:$0xff]  }
 0x562   : > { %10306 = vmatmul.mubr.bf16.vlgmr.msra.gmra.mrb[0].mxu0 %v17862_v13 }
 0x563   : > { %10315 = vmatpush1.bf16.msra.mxu0 %v16202_v17  ;;  %10346 = vmatprep.mubr.bf16.mxu0 %v17865_v21  ;;  %v16297_v17 = vld [vmem:[#allocation7 + $0x230c] ss:$16 sps:$4 sm:$0xff]  }
 0x564   : > { %11276 = vmatpush1.bf16.msra.mxu1 %v16205_v18  ;;  %10316 = vmatprep.subr.bf16.mxu0 %v16210_v19  ;;  %v16292_v18 = vld [vmem:[#allocation7 + $0x23e0] ss:$16 sps:$4 sm:$0xff]   ;;  %v16295_v19 = vld [vmem:[#allocation7 + $0x2308] ss:$16 sps:$4 sm:$0xff]  }
 0x565   : > { %11277 = vmatprep.subr.bf16.mxu1 %v16213_v20  ;;  %v531_v20 = vld [vmem:[%s17672_s12 + $0x110] sm:$0xff] }
 0x567   : > { %10317 = vmatpush1.bf16.msra.mxu0 %v16208_v22  ;;  %v16303_v22 = vld [vmem:[#allocation7 + $0x232c] ss:$16 sps:$4 sm:$0xff]  }
 0x568   : > { %11278 = vmatpush1.bf16.msra.mxu1 %v16211_v23  ;;  %10318 = vmatprep.subr.bf16.mxu0 %v16216_v24  ;;  %v17872_v23 = vpack.c.bf16 %v531_v20, %v531_v20  ;;  %v534_v24 = vld [vmem:[%s17672_s12 + $0x128] sm:$0xff] }
 0x569   : > { %11279 = vmatprep.subr.bf16.mxu1 %v16219_v25  ;;  %v16298_v25 = vld [vmem:[#allocation7 + $0x2400] ss:$16 sps:$4 sm:$0xff]   ;;  %v16384_v20 = vld [vmem:[#allocation7 + $0x25c4] ss:$16 sps:$4 sm:$0xff]  }
 0x56b   : > { %10319 = vmatpush1.bf16.msra.mxu0 %v16214_v26  ;;  %v16301_v26 = vld [vmem:[#allocation7 + $0x2328] ss:$16 sps:$4 sm:$0xff]  }
 0x56c   : > { %11280 = vmatpush1.bf16.msra.mxu1 %v16217_v27  ;;  %10320 = vmatprep.subr.bf16.mxu0 %v16222_v28  ;;  %v16306_v27 = vld [vmem:[#allocation7 + $0x2424] ss:$16 sps:$4 sm:$0xff]   ;;  %v16309_v28 = vld [vmem:[#allocation7 + $0x234c] ss:$16 sps:$4 sm:$0xff]  }
 0x56d   : > { %11281 = vmatprep.subr.bf16.mxu1 %v16225_v29  ;;  %v17875_v29 = vpack.c.bf16 %v534_v24, %v534_v24  ;;  %v16390_v24 = vld [vmem:[#allocation7 + $0x25e4] ss:$16 sps:$4 sm:$0xff]  }
 0x56f   : > { %10321 = vmatpush1.bf16.msra.mxu0 %v16220_v30  ;;  %v16304_v30 = vld [vmem:[#allocation7 + $0x2420] ss:$16 sps:$4 sm:$0xff]  }
 0x570   : > { %11282 = vmatpush1.bf16.msra.mxu1 %v16223_v31  ;;  %10322 = vmatprep.subr.bf16.mxu0 %v16228_v32  ;;  %v16307_v31 = vld [vmem:[#allocation7 + $0x2348] ss:$16 sps:$4 sm:$0xff]   ;;  %v16312_v32 = vld [vmem:[#allocation7 + $0x2444] ss:$16 sps:$4 sm:$0xff]  }
 0x571   : > { %11283 = vmatprep.subr.bf16.mxu1 %v16231_v34  ;;  %v16315_v34 = vld [vmem:[#allocation7 + $0x236c] ss:$16 sps:$4 sm:$0xff]  }
 0x573   : > { %10323 = vmatpush1.bf16.msra.mxu0 %v16226_v35  ;;  %v16310_v35 = vld [vmem:[#allocation7 + $0x2440] ss:$16 sps:$4 sm:$0xff]  }
 0x574   : > { %11284 = vmatpush1.bf16.msra.mxu1 %v16229_v36  ;;  %10324 = vmatprep.subr.bf16.mxu0 %v16234_v37  ;;  %v16313_v36 = vld [vmem:[#allocation7 + $0x2368] ss:$16 sps:$4 sm:$0xff]   ;;  %v16318_v37 = vld [vmem:[#allocation7 + $0x2464] ss:$16 sps:$4 sm:$0xff]  }
 0x575   : > { %11285 = vmatprep.subr.bf16.mxu1 %v16237_v38  ;;  %v16321_v38 = vld [vmem:[#allocation7 + $0x238c] ss:$16 sps:$4 sm:$0xff]  }
 0x577   : > { %10325 = vmatpush1.bf16.msra.mxu0 %v16232_v39  ;;  %v16316_v39 = vld [vmem:[#allocation7 + $0x2460] ss:$16 sps:$4 sm:$0xff]  }
 0x578   : > { %11286 = vmatpush1.bf16.msra.mxu1 %v16235_v40  ;;  %10326 = vmatprep.subr.bf16.mxu0 %v16240_v41  ;;  %v16319_v40 = vld [vmem:[#allocation7 + $0x2388] ss:$16 sps:$4 sm:$0xff]   ;;  %v16324_v41 = vld [vmem:[#allocation7 + $0x2484] ss:$16 sps:$4 sm:$0xff]  }
 0x579   : > { %11287 = vmatprep.subr.bf16.mxu1 %v16243_v42  ;;  %v16327_v42 = vld [vmem:[#allocation7 + $0x23ac] ss:$16 sps:$4 sm:$0xff]  }
 0x57b   : > { %10327 = vmatpush1.bf16.msra.mxu0 %v16238_v43  ;;  %v16322_v43 = vld [vmem:[#allocation7 + $0x2480] ss:$16 sps:$4 sm:$0xff]  }
 0x57c   : > { %11288 = vmatpush1.bf16.msra.mxu1 %v16241_v44  ;;  %10328 = vmatprep.subr.bf16.mxu0 %v16246_v45  ;;  %v16325_v44 = vld [vmem:[#allocation7 + $0x23a8] ss:$16 sps:$4 sm:$0xff]   ;;  %v16330_v45 = vld [vmem:[#allocation7 + $0x24a4] ss:$16 sps:$4 sm:$0xff]  }
 0x57d   : > { %11298 = vmatprep.subr.bf16.mxu1 %v16249_v46  ;;  %v16333_v46 = vld [vmem:[#allocation7 + $0x23cc] ss:$16 sps:$4 sm:$0xff]  }
 0x57f   : > { %11290 = vmatmul.mubr.bf16.vlgmr.msra.gmra.mrb[4].mxu1 %v17862_v13  ;;  %10329 = vmatpush1.bf16.msra.mxu0 %v16244_v47  ;;  %v16289_v13 = vld [vmem:[#allocation7 + $0x22e8] ss:$16 sps:$4 sm:$0xff]   ;;  %v16328_v47 = vld [vmem:[#allocation7 + $0x24a0] ss:$16 sps:$4 sm:$0xff]  }
 0x580   : > { %11299 = vmatpush1.bf16.msra.mxu1 %v16247_v48  ;;  %10330 = vmatprep.subr.bf16.mxu0 %v16252_v49  ;;  %v16331_v48 = vld [vmem:[#allocation7 + $0x23c8] ss:$16 sps:$4 sm:$0xff]   ;;  %v16336_v49 = vld [vmem:[#allocation7 + $0x24c4] ss:$16 sps:$4 sm:$0xff]  }
 0x581   : > { %11300 = vmatprep.subr.bf16.mxu1 %v16255_v50  ;;  %11330 = vmatprep.mubr.bf16.mxu1 %v17865_v21  ;;  %v16300_v21 = vld [vmem:[#allocation7 + $0x2404] ss:$16 sps:$4 sm:$0xff]   ;;  %v16339_v50 = vld [vmem:[#allocation7 + $0x23ec] ss:$16 sps:$4 sm:$0xff]  }
 0x583   : > { %10331 = vmatpush1.bf16.msra.mxu0 %v16250_v51  ;;  %v16334_v51 = vld [vmem:[#allocation7 + $0x24c0] ss:$16 sps:$4 sm:$0xff]  }
 0x584   : > { %11301 = vmatpush1.bf16.msra.mxu1 %v16253_v52  ;;  %10332 = vmatprep.subr.bf16.mxu0 %v16258_v53  ;;  %v16337_v52 = vld [vmem:[#allocation7 + $0x23e8] ss:$16 sps:$4 sm:$0xff]   ;;  %v16342_v53 = vld [vmem:[#allocation7 + $0x24e4] ss:$16 sps:$4 sm:$0xff]  }
 0x585   : > { %11302 = vmatprep.subr.bf16.mxu1 %v16261_v54  ;;  %v16345_v54 = vld [vmem:[#allocation7 + $0x240c] ss:$16 sps:$4 sm:$0xff]  }
 0x587   : > { %10333 = vmatpush1.bf16.msra.mxu0 %v16256_v55  ;;  %v16340_v55 = vld [vmem:[#allocation7 + $0x24e0] ss:$16 sps:$4 sm:$0xff]  }
 0x588   : > { %11303 = vmatpush1.bf16.msra.mxu1 %v16259_v56  ;;  %10334 = vmatprep.subr.bf16.mxu0 %v16264_v57  ;;  %v16343_v56 = vld [vmem:[#allocation7 + $0x2408] ss:$16 sps:$4 sm:$0xff]   ;;  %v16348_v57 = vld [vmem:[#allocation7 + $0x2504] ss:$16 sps:$4 sm:$0xff]  }
 0x589   : > { %11304 = vmatprep.subr.bf16.mxu1 %v16267_v58  ;;  %v16351_v58 = vld [vmem:[#allocation7 + $0x242c] ss:$16 sps:$4 sm:$0xff]  }
 0x58b   : > { %10335 = vmatpush1.bf16.msra.mxu0 %v16262_v59  ;;  %v16346_v59 = vld [vmem:[#allocation7 + $0x2500] ss:$16 sps:$4 sm:$0xff]  }
 0x58c   : > { %11305 = vmatpush1.bf16.msra.mxu1 %v16265_v60  ;;  %10336 = vmatprep.subr.bf16.mxu0 %v16270_v61  ;;  %v16349_v60 = vld [vmem:[#allocation7 + $0x2428] ss:$16 sps:$4 sm:$0xff]   ;;  %v16354_v61 = vld [vmem:[#allocation7 + $0x2524] ss:$16 sps:$4 sm:$0xff]  }
 0x58d   : > { %11306 = vmatprep.subr.bf16.mxu1 %v16273_v62  ;;  %v16357_v62 = vld [vmem:[#allocation7 + $0x244c] ss:$16 sps:$4 sm:$0xff]  }
 0x58f   : > { %10337 = vmatpush1.bf16.msra.mxu0 %v16268_v63  ;;  %v16352_v63 = vld [vmem:[#allocation7 + $0x2520] ss:$16 sps:$4 sm:$0xff]  }
 0x590   : > { %11307 = vmatpush1.bf16.msra.mxu1 %v16271_v0  ;;  %10338 = vmatprep.subr.bf16.mxu0 %v16276_v1  ;;  %v16355_v0 = vld [vmem:[#allocation7 + $0x2448] ss:$16 sps:$4 sm:$0xff]   ;;  %v16360_v1 = vld [vmem:[#allocation7 + $0x2544] ss:$16 sps:$4 sm:$0xff]  }
 0x591   : > { %11308 = vmatprep.subr.bf16.mxu1 %v16279_v3  ;;  %v16363_v3 = vld [vmem:[#allocation7 + $0x246c] ss:$16 sps:$4 sm:$0xff]  }
 0x593   : > { %10339 = vmatpush1.bf16.msra.mxu0 %v16274_v4  ;;  %v16358_v4 = vld [vmem:[#allocation7 + $0x2540] ss:$16 sps:$4 sm:$0xff]  }
 0x594   : > { %11309 = vmatpush1.bf16.msra.mxu1 %v16277_v5  ;;  %10340 = vmatprep.subr.bf16.mxu0 %v16282_v6  ;;  %v16361_v5 = vld [vmem:[#allocation7 + $0x2468] ss:$16 sps:$4 sm:$0xff]   ;;  %v16366_v6 = vld [vmem:[#allocation7 + $0x2564] ss:$16 sps:$4 sm:$0xff]  }
 0x595   : > { %11310 = vmatprep.subr.bf16.mxu1 %v16285_v7  ;;  %v16369_v7 = vld [vmem:[#allocation7 + $0x248c] ss:$16 sps:$4 sm:$0xff]  }
 0x597   : > { %10341 = vmatpush1.bf16.msra.mxu0 %v16280_v8  ;;  %v16364_v8 = vld [vmem:[#allocation7 + $0x2560] ss:$16 sps:$4 sm:$0xff]  }
 0x598   : > { %11311 = vmatpush1.bf16.msra.mxu1 %v16283_v9  ;;  %10342 = vmatprep.subr.bf16.mxu0 %v16288_v10  ;;  %v16367_v9 = vld [vmem:[#allocation7 + $0x2488] ss:$16 sps:$4 sm:$0xff]   ;;  %v16372_v10 = vld [vmem:[#allocation7 + $0x2584] ss:$16 sps:$4 sm:$0xff]  }
 0x599   : > { %11312 = vmatprep.subr.bf16.mxu1 %v16291_v11  ;;  %v16375_v11 = vld [vmem:[#allocation7 + $0x24ac] ss:$16 sps:$4 sm:$0xff]  }
 0x59b   : > { %10343 = vmatpush1.bf16.msra.mxu0 %v16286_v12  ;;  %v16370_v12 = vld [vmem:[#allocation7 + $0x2580] ss:$16 sps:$4 sm:$0xff]  }
 0x59c   : > { %11313 = vmatpush1.bf16.msra.mxu1 %v16289_v13  ;;  %10344 = vmatprep.subr.bf16.mxu0 %v16294_v15  ;;  %v16373_v13 = vld [vmem:[#allocation7 + $0x24a8] ss:$16 sps:$4 sm:$0xff]   ;;  %v16378_v15 = vld [vmem:[#allocation7 + $0x25a4] ss:$16 sps:$4 sm:$0xff]  }
 0x59d   : > { %11314 = vmatprep.subr.bf16.mxu1 %v16297_v17  ;;  %v16381_v17 = vld [vmem:[#allocation7 + $0x24cc] ss:$16 sps:$4 sm:$0xff]  }
 0x59f   : > { %10345 = vmatpush1.bf16.msra.mxu0 %v16292_v18  ;;  %v16376_v18 = vld [vmem:[#allocation7 + $0x25a0] ss:$16 sps:$4 sm:$0xff]  }
 0x5a0   : > { %11315 = vmatpush1.bf16.msra.mxu1 %v16295_v19  ;;  %10355 = vmatprep.subr.bf16.mxu0 %v16300_v21  ;;  %v16379_v19 = vld [vmem:[#allocation7 + $0x24c8] ss:$16 sps:$4 sm:$0xff]   ;;  %v16387_v21 = vld [vmem:[#allocation7 + $0x24ec] ss:$16 sps:$4 sm:$0xff]  }
 0x5a1   : > { %11316 = vmatprep.subr.bf16.mxu1 %v16303_v22  ;;  %v16382_v22 = vld [vmem:[#allocation7 + $0x25c0] ss:$16 sps:$4 sm:$0xff]  }
 0x5a2   : > { %10347 = vmatmul.mubr.bf16.vlgmr.msra.gmra.mrb[0].mxu0 %v17872_v23 }
 0x5a3   : > { %10356 = vmatpush1.bf16.msra.mxu0 %v16298_v25  ;;  %10387 = vmatprep.mubr.bf16.mxu0 %v17875_v29  ;;  %v16393_v25 = vld [vmem:[#allocation7 + $0x250c] ss:$16 sps:$4 sm:$0xff]  }
 0x5a4   : > { %11317 = vmatpush1.bf16.msra.mxu1 %v16301_v26  ;;  %10357 = vmatprep.subr.bf16.mxu0 %v16306_v27  ;;  %v16388_v26 = vld [vmem:[#allocation7 + $0x25e0] ss:$16 sps:$4 sm:$0xff]   ;;  %v16391_v27 = vld [vmem:[#allocation7 + $0x2508] ss:$16 sps:$4 sm:$0xff]  }
 0x5a5   : > { %11318 = vmatprep.subr.bf16.mxu1 %v16309_v28  ;;  %v533_v28 = vld [vmem:[%s17672_s12 + $0x120] sm:$0xff] }
 0x5a7   : > { %10358 = vmatpush1.bf16.msra.mxu0 %v16304_v30  ;;  %v16399_v30 = vld [vmem:[#allocation7 + $0x252c] ss:$16 sps:$4 sm:$0xff]  }
 0x5a8   : > { %11319 = vmatpush1.bf16.msra.mxu1 %v16307_v31  ;;  %10359 = vmatprep.subr.bf16.mxu0 %v16312_v32  ;;  %v17882_v31 = vpack.c.bf16 %v533_v28, %v533_v28  ;;  %v536_v32 = vld [vmem:[%s17672_s12 + $0x138] sm:$0xff] }
 0x5a9   : > { %11320 = vmatprep.subr.bf16.mxu1 %v16315_v34  ;;  %v16394_v34 = vld [vmem:[#allocation7 + $0x2600] ss:$16 sps:$4 sm:$0xff]   ;;  %v16480_v28 = vld [vmem:[#allocation7 + $0x27c4] ss:$16 sps:$4 sm:$0xff]  }
 0x5ab   : > { %10360 = vmatpush1.bf16.msra.mxu0 %v16310_v35  ;;  %v16397_v35 = vld [vmem:[#allocation7 + $0x2528] ss:$16 sps:$4 sm:$0xff]  }
 0x5ac   : > { %11321 = vmatpush1.bf16.msra.mxu1 %v16313_v36  ;;  %10361 = vmatprep.subr.bf16.mxu0 %v16318_v37  ;;  %v16402_v36 = vld [vmem:[#allocation7 + $0x2624] ss:$16 sps:$4 sm:$0xff]   ;;  %v16405_v37 = vld [vmem:[#allocation7 + $0x254c] ss:$16 sps:$4 sm:$0xff]  }
 0x5ad   : > { %11322 = vmatprep.subr.bf16.mxu1 %v16321_v38  ;;  %v17885_v38 = vpack.c.bf16 %v536_v32, %v536_v32  ;;  %v16486_v32 = vld [vmem:[#allocation7 + $0x27e4] ss:$16 sps:$4 sm:$0xff]  }
 0x5af   : > { %10362 = vmatpush1.bf16.msra.mxu0 %v16316_v39  ;;  %v16400_v39 = vld [vmem:[#allocation7 + $0x2620] ss:$16 sps:$4 sm:$0xff]  }
 0x5b0   : > { %11323 = vmatpush1.bf16.msra.mxu1 %v16319_v40  ;;  %10363 = vmatprep.subr.bf16.mxu0 %v16324_v41  ;;  %v16403_v40 = vld [vmem:[#allocation7 + $0x2548] ss:$16 sps:$4 sm:$0xff]   ;;  %v16408_v41 = vld [vmem:[#allocation7 + $0x2644] ss:$16 sps:$4 sm:$0xff]  }
 0x5b1   : > { %11324 = vmatprep.subr.bf16.mxu1 %v16327_v42  ;;  %v16411_v42 = vld [vmem:[#allocation7 + $0x256c] ss:$16 sps:$4 sm:$0xff]  }
 0x5b3   : > { %10364 = vmatpush1.bf16.msra.mxu0 %v16322_v43  ;;  %v16406_v43 = vld [vmem:[#allocation7 + $0x2640] ss:$16 sps:$4 sm:$0xff]  }
 0x5b4   : > { %11325 = vmatpush1.bf16.msra.mxu1 %v16325_v44  ;;  %10365 = vmatprep.subr.bf16.mxu0 %v16330_v45  ;;  %v16409_v44 = vld [vmem:[#allocation7 + $0x2568] ss:$16 sps:$4 sm:$0xff]   ;;  %v16414_v45 = vld [vmem:[#allocation7 + $0x2664] ss:$16 sps:$4 sm:$0xff]  }
 0x5b5   : > { %11326 = vmatprep.subr.bf16.mxu1 %v16333_v46  ;;  %v16417_v46 = vld [vmem:[#allocation7 + $0x258c] ss:$16 sps:$4 sm:$0xff]  }
 0x5b7   : > { %10366 = vmatpush1.bf16.msra.mxu0 %v16328_v47  ;;  %v16412_v47 = vld [vmem:[#allocation7 + $0x2660] ss:$16 sps:$4 sm:$0xff]  }
 0x5b8   : > { %11327 = vmatpush1.bf16.msra.mxu1 %v16331_v48  ;;  %10367 = vmatprep.subr.bf16.mxu0 %v16336_v49  ;;  %v16415_v48 = vld [vmem:[#allocation7 + $0x2588] ss:$16 sps:$4 sm:$0xff]   ;;  %v16420_v49 = vld [vmem:[#allocation7 + $0x2684] ss:$16 sps:$4 sm:$0xff]  }
 0x5b9   : > { %11328 = vmatprep.subr.bf16.mxu1 %v16339_v50  ;;  %v16423_v50 = vld [vmem:[#allocation7 + $0x25ac] ss:$16 sps:$4 sm:$0xff]  }
 0x5bb   : > { %10368 = vmatpush1.bf16.msra.mxu0 %v16334_v51  ;;  %v16418_v51 = vld [vmem:[#allocation7 + $0x2680] ss:$16 sps:$4 sm:$0xff]  }
 0x5bc   : > { %11329 = vmatpush1.bf16.msra.mxu1 %v16337_v52  ;;  %10369 = vmatprep.subr.bf16.mxu0 %v16342_v53  ;;  %v16421_v52 = vld [vmem:[#allocation7 + $0x25a8] ss:$16 sps:$4 sm:$0xff]   ;;  %v16426_v53 = vld [vmem:[#allocation7 + $0x26a4] ss:$16 sps:$4 sm:$0xff]  }
 0x5bd   : > { %11339 = vmatprep.subr.bf16.mxu1 %v16345_v54  ;;  %v16429_v54 = vld [vmem:[#allocation7 + $0x25cc] ss:$16 sps:$4 sm:$0xff]  }
 0x5bf   : > { %11331 = vmatmul.mubr.bf16.vlgmr.msra.gmra.mrb[4].mxu1 %v17872_v23  ;;  %10370 = vmatpush1.bf16.msra.mxu0 %v16340_v55  ;;  %v16385_v23 = vld [vmem:[#allocation7 + $0x24e8] ss:$16 sps:$4 sm:$0xff]   ;;  %v16424_v55 = vld [vmem:[#allocation7 + $0x26a0] ss:$16 sps:$4 sm:$0xff]  }
 0x5c0   : > { %11340 = vmatpush1.bf16.msra.mxu1 %v16343_v56  ;;  %10371 = vmatprep.subr.bf16.mxu0 %v16348_v57  ;;  %v16427_v56 = vld [vmem:[#allocation7 + $0x25c8] ss:$16 sps:$4 sm:$0xff]   ;;  %v16432_v57 = vld [vmem:[#allocation7 + $0x26c4] ss:$16 sps:$4 sm:$0xff]  }
 0x5c1   : > { %11341 = vmatprep.subr.bf16.mxu1 %v16351_v58  ;;  %11371 = vmatprep.mubr.bf16.mxu1 %v17875_v29  ;;  %v16396_v29 = vld [vmem:[#allocation7 + $0x2604] ss:$16 sps:$4 sm:$0xff]   ;;  %v16435_v58 = vld [vmem:[#allocation7 + $0x25ec] ss:$16 sps:$4 sm:$0xff]  }
 0x5c3   : > { %10372 = vmatpush1.bf16.msra.mxu0 %v16346_v59  ;;  %v16430_v59 = vld [vmem:[#allocation7 + $0x26c0] ss:$16 sps:$4 sm:$0xff]  }
 0x5c4   : > { %11342 = vmatpush1.bf16.msra.mxu1 %v16349_v60  ;;  %10373 = vmatprep.subr.bf16.mxu0 %v16354_v61  ;;  %v16433_v60 = vld [vmem:[#allocation7 + $0x25e8] ss:$16 sps:$4 sm:$0xff]   ;;  %v16438_v61 = vld [vmem:[#allocation7 + $0x26e4] ss:$16 sps:$4 sm:$0xff]  }
 0x5c5   : > { %11343 = vmatprep.subr.bf16.mxu1 %v16357_v62  ;;  %v16441_v62 = vld [vmem:[#allocation7 + $0x260c] ss:$16 sps:$4 sm:$0xff]  }
 0x5c7   : > { %10374 = vmatpush1.bf16.msra.mxu0 %v16352_v63  ;;  %v16436_v63 = vld [vmem:[#allocation7 + $0x26e0] ss:$16 sps:$4 sm:$0xff]  }
 0x5c8   : > { %11344 = vmatpush1.bf16.msra.mxu1 %v16355_v0  ;;  %10375 = vmatprep.subr.bf16.mxu0 %v16360_v1  ;;  %v16439_v0 = vld [vmem:[#allocation7 + $0x2608] ss:$16 sps:$4 sm:$0xff]   ;;  %v16444_v1 = vld [vmem:[#allocation7 + $0x2704] ss:$16 sps:$4 sm:$0xff]  }
 0x5c9   : > { %11345 = vmatprep.subr.bf16.mxu1 %v16363_v3  ;;  %v16447_v3 = vld [vmem:[#allocation7 + $0x262c] ss:$16 sps:$4 sm:$0xff]  }
 0x5cb   : > { %10376 = vmatpush1.bf16.msra.mxu0 %v16358_v4  ;;  %v16442_v4 = vld [vmem:[#allocation7 + $0x2700] ss:$16 sps:$4 sm:$0xff]  }
 0x5cc   : > { %11346 = vmatpush1.bf16.msra.mxu1 %v16361_v5  ;;  %10377 = vmatprep.subr.bf16.mxu0 %v16366_v6  ;;  %v16445_v5 = vld [vmem:[#allocation7 + $0x2628] ss:$16 sps:$4 sm:$0xff]   ;;  %v16450_v6 = vld [vmem:[#allocation7 + $0x2724] ss:$16 sps:$4 sm:$0xff]  }
 0x5cd   : > { %11347 = vmatprep.subr.bf16.mxu1 %v16369_v7  ;;  %v16453_v7 = vld [vmem:[#allocation7 + $0x264c] ss:$16 sps:$4 sm:$0xff]  }
 0x5cf   : > { %10378 = vmatpush1.bf16.msra.mxu0 %v16364_v8  ;;  %v16448_v8 = vld [vmem:[#allocation7 + $0x2720] ss:$16 sps:$4 sm:$0xff]  }
 0x5d0   : > { %11348 = vmatpush1.bf16.msra.mxu1 %v16367_v9  ;;  %10379 = vmatprep.subr.bf16.mxu0 %v16372_v10  ;;  %v16451_v9 = vld [vmem:[#allocation7 + $0x2648] ss:$16 sps:$4 sm:$0xff]   ;;  %v16456_v10 = vld [vmem:[#allocation7 + $0x2744] ss:$16 sps:$4 sm:$0xff]  }
 0x5d1   : > { %11349 = vmatprep.subr.bf16.mxu1 %v16375_v11  ;;  %v16459_v11 = vld [vmem:[#allocation7 + $0x266c] ss:$16 sps:$4 sm:$0xff]  }
 0x5d3   : > { %10380 = vmatpush1.bf16.msra.mxu0 %v16370_v12  ;;  %v16454_v12 = vld [vmem:[#allocation7 + $0x2740] ss:$16 sps:$4 sm:$0xff]  }
 0x5d4   : > { %11350 = vmatpush1.bf16.msra.mxu1 %v16373_v13  ;;  %10381 = vmatprep.subr.bf16.mxu0 %v16378_v15  ;;  %v16457_v13 = vld [vmem:[#allocation7 + $0x2668] ss:$16 sps:$4 sm:$0xff]   ;;  %v16462_v15 = vld [vmem:[#allocation7 + $0x2764] ss:$16 sps:$4 sm:$0xff]  }
 0x5d5   : > { %11351 = vmatprep.subr.bf16.mxu1 %v16381_v17  ;;  %v16465_v17 = vld [vmem:[#allocation7 + $0x268c] ss:$16 sps:$4 sm:$0xff]  }
 0x5d7   : > { %10382 = vmatpush1.bf16.msra.mxu0 %v16376_v18  ;;  %v16460_v18 = vld [vmem:[#allocation7 + $0x2760] ss:$16 sps:$4 sm:$0xff]  }
 0x5d8   : > { %11352 = vmatpush1.bf16.msra.mxu1 %v16379_v19  ;;  %10383 = vmatprep.subr.bf16.mxu0 %v16384_v20  ;;  %v16463_v19 = vld [vmem:[#allocation7 + $0x2688] ss:$16 sps:$4 sm:$0xff]   ;;  %v16468_v20 = vld [vmem:[#allocation7 + $0x2784] ss:$16 sps:$4 sm:$0xff]  }
 0x5d9   : > { %11353 = vmatprep.subr.bf16.mxu1 %v16387_v21  ;;  %v16471_v21 = vld [vmem:[#allocation7 + $0x26ac] ss:$16 sps:$4 sm:$0xff]  }
 0x5db   : > { %10384 = vmatpush1.bf16.msra.mxu0 %v16382_v22  ;;  %v16466_v22 = vld [vmem:[#allocation7 + $0x2780] ss:$16 sps:$4 sm:$0xff]  }
 0x5dc   : > { %11354 = vmatpush1.bf16.msra.mxu1 %v16385_v23  ;;  %10385 = vmatprep.subr.bf16.mxu0 %v16390_v24  ;;  %v16469_v23 = vld [vmem:[#allocation7 + $0x26a8] ss:$16 sps:$4 sm:$0xff]   ;;  %v16474_v24 = vld [vmem:[#allocation7 + $0x27a4] ss:$16 sps:$4 sm:$0xff]  }
 0x5dd   : > { %11355 = vmatprep.subr.bf16.mxu1 %v16393_v25  ;;  %v16477_v25 = vld [vmem:[#allocation7 + $0x26cc] ss:$16 sps:$4 sm:$0xff]  }
 0x5df   : > { %10386 = vmatpush1.bf16.msra.mxu0 %v16388_v26  ;;  %v16472_v26 = vld [vmem:[#allocation7 + $0x27a0] ss:$16 sps:$4 sm:$0xff]  }
 0x5e0   : > { %11356 = vmatpush1.bf16.msra.mxu1 %v16391_v27  ;;  %10396 = vmatprep.subr.bf16.mxu0 %v16396_v29  ;;  %v16475_v27 = vld [vmem:[#allocation7 + $0x26c8] ss:$16 sps:$4 sm:$0xff]   ;;  %v16483_v29 = vld [vmem:[#allocation7 + $0x26ec] ss:$16 sps:$4 sm:$0xff]  }
 0x5e1   : > { %11357 = vmatprep.subr.bf16.mxu1 %v16399_v30  ;;  %v16478_v30 = vld [vmem:[#allocation7 + $0x27c0] ss:$16 sps:$4 sm:$0xff]  }
 0x5e2   : > { %10388 = vmatmul.mubr.bf16.vlgmr.msra.gmra.mrb[0].mxu0 %v17882_v31 }
 0x5e3   : > { %10397 = vmatpush1.bf16.msra.mxu0 %v16394_v34  ;;  %10428 = vmatprep.mubr.bf16.mxu0 %v17885_v38  ;;  %v16489_v34 = vld [vmem:[#allocation7 + $0x270c] ss:$16 sps:$4 sm:$0xff]  }
 0x5e4   : > { %11358 = vmatpush1.bf16.msra.mxu1 %v16397_v35  ;;  %10398 = vmatprep.subr.bf16.mxu0 %v16402_v36  ;;  %v16484_v35 = vld [vmem:[#allocation7 + $0x27e0] ss:$16 sps:$4 sm:$0xff]   ;;  %v16487_v36 = vld [vmem:[#allocation7 + $0x2708] ss:$16 sps:$4 sm:$0xff]  }
 0x5e5   : > { %11359 = vmatprep.subr.bf16.mxu1 %v16405_v37  ;;  %v535_v37 = vld [vmem:[%s17672_s12 + $0x130] sm:$0xff] }
 0x5e7   : > { %10399 = vmatpush1.bf16.msra.mxu0 %v16400_v39  ;;  %v16495_v39 = vld [vmem:[#allocation7 + $0x272c] ss:$16 sps:$4 sm:$0xff]  }
 0x5e8   : > { %11360 = vmatpush1.bf16.msra.mxu1 %v16403_v40  ;;  %10400 = vmatprep.subr.bf16.mxu0 %v16408_v41  ;;  %v17892_v40 = vpack.c.bf16 %v535_v37, %v535_v37  ;;  %v538_v41 = vld [vmem:[%s17672_s12 + $0x148] sm:$0xff] }
 0x5e9   : > { %11361 = vmatprep.subr.bf16.mxu1 %v16411_v42  ;;  %v16490_v42 = vld [vmem:[#allocation7 + $0x2800] ss:$16 sps:$4 sm:$0xff]   ;;  %v16576_v37 = vld [vmem:[#allocation7 + $0x29c4] ss:$16 sps:$4 sm:$0xff]  }
 0x5eb   : > { %10401 = vmatpush1.bf16.msra.mxu0 %v16406_v43  ;;  %v16493_v43 = vld [vmem:[#allocation7 + $0x2728] ss:$16 sps:$4 sm:$0xff]  }
 0x5ec   : > { %11362 = vmatpush1.bf16.msra.mxu1 %v16409_v44  ;;  %10402 = vmatprep.subr.bf16.mxu0 %v16414_v45  ;;  %v16498_v44 = vld [vmem:[#allocation7 + $0x2824] ss:$16 sps:$4 sm:$0xff]   ;;  %v16501_v45 = vld [vmem:[#allocation7 + $0x274c] ss:$16 sps:$4 sm:$0xff]  }
 0x5ed   : > { %11363 = vmatprep.subr.bf16.mxu1 %v16417_v46  ;;  %v17895_v46 = vpack.c.bf16 %v538_v41, %v538_v41  ;;  %v16582_v41 = vld [vmem:[#allocation7 + $0x29e4] ss:$16 sps:$4 sm:$0xff]  }
 0x5ef   : > { %10403 = vmatpush1.bf16.msra.mxu0 %v16412_v47  ;;  %v16496_v47 = vld [vmem:[#allocation7 + $0x2820] ss:$16 sps:$4 sm:$0xff]  }
 0x5f0   : > { %11364 = vmatpush1.bf16.msra.mxu1 %v16415_v48  ;;  %10404 = vmatprep.subr.bf16.mxu0 %v16420_v49  ;;  %v16499_v48 = vld [vmem:[#allocation7 + $0x2748] ss:$16 sps:$4 sm:$0xff]   ;;  %v16504_v49 = vld [vmem:[#allocation7 + $0x2844] ss:$16 sps:$4 sm:$0xff]  }
 0x5f1   : > { %11365 = vmatprep.subr.bf16.mxu1 %v16423_v50  ;;  %v16507_v50 = vld [vmem:[#allocation7 + $0x276c] ss:$16 sps:$4 sm:$0xff]  }
 0x5f3   : > { %10405 = vmatpush1.bf16.msra.mxu0 %v16418_v51  ;;  %v16502_v51 = vld [vmem:[#allocation7 + $0x2840] ss:$16 sps:$4 sm:$0xff]  }
 0x5f4   : > { %11366 = vmatpush1.bf16.msra.mxu1 %v16421_v52  ;;  %10406 = vmatprep.subr.bf16.mxu0 %v16426_v53  ;;  %v16505_v52 = vld [vmem:[#allocation7 + $0x2768] ss:$16 sps:$4 sm:$0xff]   ;;  %v16510_v53 = vld [vmem:[#allocation7 + $0x2864] ss:$16 sps:$4 sm:$0xff]  }
 0x5f5   : > { %11367 = vmatprep.subr.bf16.mxu1 %v16429_v54  ;;  %v16513_v54 = vld [vmem:[#allocation7 + $0x278c] ss:$16 sps:$4 sm:$0xff]  }
 0x5f7   : > { %10407 = vmatpush1.bf16.msra.mxu0 %v16424_v55  ;;  %v16508_v55 = vld [vmem:[#allocation7 + $0x2860] ss:$16 sps:$4 sm:$0xff]  }
 0x5f8   : > { %11368 = vmatpush1.bf16.msra.mxu1 %v16427_v56  ;;  %10408 = vmatprep.subr.bf16.mxu0 %v16432_v57  ;;  %v16511_v56 = vld [vmem:[#allocation7 + $0x2788] ss:$16 sps:$4 sm:$0xff]   ;;  %v16516_v57 = vld [vmem:[#allocation7 + $0x2884] ss:$16 sps:$4 sm:$0xff]  }
 0x5f9   : > { %11369 = vmatprep.subr.bf16.mxu1 %v16435_v58  ;;  %v16519_v58 = vld [vmem:[#allocation7 + $0x27ac] ss:$16 sps:$4 sm:$0xff]  }
 0x5fb   : > { %10409 = vmatpush1.bf16.msra.mxu0 %v16430_v59  ;;  %v16514_v59 = vld [vmem:[#allocation7 + $0x2880] ss:$16 sps:$4 sm:$0xff]  }
 0x5fc   : > { %11370 = vmatpush1.bf16.msra.mxu1 %v16433_v60  ;;  %10410 = vmatprep.subr.bf16.mxu0 %v16438_v61  ;;  %v16517_v60 = vld [vmem:[#allocation7 + $0x27a8] ss:$16 sps:$4 sm:$0xff]   ;;  %v16522_v61 = vld [vmem:[#allocation7 + $0x28a4] ss:$16 sps:$4 sm:$0xff]  }
 0x5fd   : > { %11380 = vmatprep.subr.bf16.mxu1 %v16441_v62  ;;  %v16525_v62 = vld [vmem:[#allocation7 + $0x27cc] ss:$16 sps:$4 sm:$0xff]  }
 0x5ff   : > { %11372 = vmatmul.mubr.bf16.vlgmr.msra.gmra.mrb[4].mxu1 %v17882_v31  ;;  %10411 = vmatpush1.bf16.msra.mxu0 %v16436_v63  ;;  %v16481_v31 = vld [vmem:[#allocation7 + $0x26e8] ss:$16 sps:$4 sm:$0xff]   ;;  %v16520_v63 = vld [vmem:[#allocation7 + $0x28a0] ss:$16 sps:$4 sm:$0xff]  }
 0x600   : > { %11381 = vmatpush1.bf16.msra.mxu1 %v16439_v0  ;;  %10412 = vmatprep.subr.bf16.mxu0 %v16444_v1  ;;  %v16523_v0 = vld [vmem:[#allocation7 + $0x27c8] ss:$16 sps:$4 sm:$0xff]   ;;  %v16528_v1 = vld [vmem:[#allocation7 + $0x28c4] ss:$16 sps:$4 sm:$0xff]  }
 0x601   : > { %11382 = vmatprep.subr.bf16.mxu1 %v16447_v3  ;;  %11412 = vmatprep.mubr.bf16.mxu1 %v17885_v38  ;;  %v16492_v38 = vld [vmem:[#allocation7 + $0x2804] ss:$16 sps:$4 sm:$0xff]   ;;  %v16531_v3 = vld [vmem:[#allocation7 + $0x27ec] ss:$16 sps:$4 sm:$0xff]  }
 0x603   : > { %10413 = vmatpush1.bf16.msra.mxu0 %v16442_v4  ;;  %v16526_v4 = vld [vmem:[#allocation7 + $0x28c0] ss:$16 sps:$4 sm:$0xff]  }
 0x604   : > { %11383 = vmatpush1.bf16.msra.mxu1 %v16445_v5  ;;  %10414 = vmatprep.subr.bf16.mxu0 %v16450_v6  ;;  %v16529_v5 = vld [vmem:[#allocation7 + $0x27e8] ss:$16 sps:$4 sm:$0xff]   ;;  %v16534_v6 = vld [vmem:[#allocation7 + $0x28e4] ss:$16 sps:$4 sm:$0xff]  }
 0x605   : > { %11384 = vmatprep.subr.bf16.mxu1 %v16453_v7  ;;  %v16537_v7 = vld [vmem:[#allocation7 + $0x280c] ss:$16 sps:$4 sm:$0xff]  }
 0x607   : > { %10415 = vmatpush1.bf16.msra.mxu0 %v16448_v8  ;;  %v16532_v8 = vld [vmem:[#allocation7 + $0x28e0] ss:$16 sps:$4 sm:$0xff]  }
 0x608   : > { %11385 = vmatpush1.bf16.msra.mxu1 %v16451_v9  ;;  %10416 = vmatprep.subr.bf16.mxu0 %v16456_v10  ;;  %v16535_v9 = vld [vmem:[#allocation7 + $0x2808] ss:$16 sps:$4 sm:$0xff]   ;;  %v16540_v10 = vld [vmem:[#allocation7 + $0x2904] ss:$16 sps:$4 sm:$0xff]  }
 0x609   : > { %11386 = vmatprep.subr.bf16.mxu1 %v16459_v11  ;;  %v16543_v11 = vld [vmem:[#allocation7 + $0x282c] ss:$16 sps:$4 sm:$0xff]  }
 0x60b   : > { %10417 = vmatpush1.bf16.msra.mxu0 %v16454_v12  ;;  %v16538_v12 = vld [vmem:[#allocation7 + $0x2900] ss:$16 sps:$4 sm:$0xff]  }
 0x60c   : > { %11387 = vmatpush1.bf16.msra.mxu1 %v16457_v13  ;;  %10418 = vmatprep.subr.bf16.mxu0 %v16462_v15  ;;  %v16541_v13 = vld [vmem:[#allocation7 + $0x2828] ss:$16 sps:$4 sm:$0xff]   ;;  %v16546_v15 = vld [vmem:[#allocation7 + $0x2924] ss:$16 sps:$4 sm:$0xff]  }
 0x60d   : > { %11388 = vmatprep.subr.bf16.mxu1 %v16465_v17  ;;  %v16549_v17 = vld [vmem:[#allocation7 + $0x284c] ss:$16 sps:$4 sm:$0xff]  }
 0x60f   : > { %10419 = vmatpush1.bf16.msra.mxu0 %v16460_v18  ;;  %v16544_v18 = vld [vmem:[#allocation7 + $0x2920] ss:$16 sps:$4 sm:$0xff]  }
 0x610   : > { %11389 = vmatpush1.bf16.msra.mxu1 %v16463_v19  ;;  %10420 = vmatprep.subr.bf16.mxu0 %v16468_v20  ;;  %v16547_v19 = vld [vmem:[#allocation7 + $0x2848] ss:$16 sps:$4 sm:$0xff]   ;;  %v16552_v20 = vld [vmem:[#allocation7 + $0x2944] ss:$16 sps:$4 sm:$0xff]  }
 0x611   : > { %11390 = vmatprep.subr.bf16.mxu1 %v16471_v21  ;;  %v16555_v21 = vld [vmem:[#allocation7 + $0x286c] ss:$16 sps:$4 sm:$0xff]  }
 0x613   : > { %10421 = vmatpush1.bf16.msra.mxu0 %v16466_v22  ;;  %v16550_v22 = vld [vmem:[#allocation7 + $0x2940] ss:$16 sps:$4 sm:$0xff]  }
 0x614   : > { %11391 = vmatpush1.bf16.msra.mxu1 %v16469_v23  ;;  %10422 = vmatprep.subr.bf16.mxu0 %v16474_v24  ;;  %v16553_v23 = vld [vmem:[#allocation7 + $0x2868] ss:$16 sps:$4 sm:$0xff]   ;;  %v16558_v24 = vld [vmem:[#allocation7 + $0x2964] ss:$16 sps:$4 sm:$0xff]  }
 0x615   : > { %11392 = vmatprep.subr.bf16.mxu1 %v16477_v25  ;;  %v16561_v25 = vld [vmem:[#allocation7 + $0x288c] ss:$16 sps:$4 sm:$0xff]  }
 0x617   : > { %10423 = vmatpush1.bf16.msra.mxu0 %v16472_v26  ;;  %v16556_v26 = vld [vmem:[#allocation7 + $0x2960] ss:$16 sps:$4 sm:$0xff]  }
 0x618   : > { %11393 = vmatpush1.bf16.msra.mxu1 %v16475_v27  ;;  %10424 = vmatprep.subr.bf16.mxu0 %v16480_v28  ;;  %v16559_v27 = vld [vmem:[#allocation7 + $0x2888] ss:$16 sps:$4 sm:$0xff]   ;;  %v16564_v28 = vld [vmem:[#allocation7 + $0x2984] ss:$16 sps:$4 sm:$0xff]  }
 0x619   : > { %11394 = vmatprep.subr.bf16.mxu1 %v16483_v29  ;;  %v16567_v29 = vld [vmem:[#allocation7 + $0x28ac] ss:$16 sps:$4 sm:$0xff]  }
 0x61b   : > { %10425 = vmatpush1.bf16.msra.mxu0 %v16478_v30  ;;  %v16562_v30 = vld [vmem:[#allocation7 + $0x2980] ss:$16 sps:$4 sm:$0xff]  }
 0x61c   : > { %11395 = vmatpush1.bf16.msra.mxu1 %v16481_v31  ;;  %10426 = vmatprep.subr.bf16.mxu0 %v16486_v32  ;;  %v16565_v31 = vld [vmem:[#allocation7 + $0x28a8] ss:$16 sps:$4 sm:$0xff]   ;;  %v16570_v32 = vld [vmem:[#allocation7 + $0x29a4] ss:$16 sps:$4 sm:$0xff]  }
 0x61d   : > { %11396 = vmatprep.subr.bf16.mxu1 %v16489_v34  ;;  %v16573_v34 = vld [vmem:[#allocation7 + $0x28cc] ss:$16 sps:$4 sm:$0xff]  }
 0x61f   : > { %10427 = vmatpush1.bf16.msra.mxu0 %v16484_v35  ;;  %v16568_v35 = vld [vmem:[#allocation7 + $0x29a0] ss:$16 sps:$4 sm:$0xff]  }
 0x620   : > { %11397 = vmatpush1.bf16.msra.mxu1 %v16487_v36  ;;  %10437 = vmatprep.subr.bf16.mxu0 %v16492_v38  ;;  %v16571_v36 = vld [vmem:[#allocation7 + $0x28c8] ss:$16 sps:$4 sm:$0xff]   ;;  %v16579_v38 = vld [vmem:[#allocation7 + $0x28ec] ss:$16 sps:$4 sm:$0xff]  }
 0x621   : > { %11398 = vmatprep.subr.bf16.mxu1 %v16495_v39  ;;  %v16574_v39 = vld [vmem:[#allocation7 + $0x29c0] ss:$16 sps:$4 sm:$0xff]  }
 0x622   : > { %10429 = vmatmul.mubr.bf16.vlgmr.msra.gmra.mrb[0].mxu0 %v17892_v40 }
 0x623   : > { %10438 = vmatpush1.bf16.msra.mxu0 %v16490_v42  ;;  %10469 = vmatprep.mubr.bf16.mxu0 %v17895_v46  ;;  %v16585_v42 = vld [vmem:[#allocation7 + $0x290c] ss:$16 sps:$4 sm:$0xff]  }
 0x624   : > { %11399 = vmatpush1.bf16.msra.mxu1 %v16493_v43  ;;  %10439 = vmatprep.subr.bf16.mxu0 %v16498_v44  ;;  %v16580_v43 = vld [vmem:[#allocation7 + $0x29e0] ss:$16 sps:$4 sm:$0xff]   ;;  %v16583_v44 = vld [vmem:[#allocation7 + $0x2908] ss:$16 sps:$4 sm:$0xff]  }
 0x625   : > { %11400 = vmatprep.subr.bf16.mxu1 %v16501_v45  ;;  %v537_v45 = vld [vmem:[%s17672_s12 + $0x140] sm:$0xff] }
 0x627   : > { %10440 = vmatpush1.bf16.msra.mxu0 %v16496_v47  ;;  %v16591_v47 = vld [vmem:[#allocation7 + $0x292c] ss:$16 sps:$4 sm:$0xff]  }
 0x628   : > { %11401 = vmatpush1.bf16.msra.mxu1 %v16499_v48  ;;  %10441 = vmatprep.subr.bf16.mxu0 %v16504_v49  ;;  %v17902_v48 = vpack.c.bf16 %v537_v45, %v537_v45  ;;  %v540_v49 = vld [vmem:[%s17672_s12 + $0x158] sm:$0xff] }
 0x629   : > { %11402 = vmatprep.subr.bf16.mxu1 %v16507_v50  ;;  %v16586_v50 = vld [vmem:[#allocation7 + $0x2a00] ss:$16 sps:$4 sm:$0xff]   ;;  %v16672_v45 = vld [vmem:[#allocation7 + $0x2bc4] ss:$16 sps:$4 sm:$0xff]  }
 0x62b   : > { %10442 = vmatpush1.bf16.msra.mxu0 %v16502_v51  ;;  %v16589_v51 = vld [vmem:[#allocation7 + $0x2928] ss:$16 sps:$4 sm:$0xff]  }
 0x62c   : > { %11403 = vmatpush1.bf16.msra.mxu1 %v16505_v52  ;;  %10443 = vmatprep.subr.bf16.mxu0 %v16510_v53  ;;  %v16594_v52 = vld [vmem:[#allocation7 + $0x2a24] ss:$16 sps:$4 sm:$0xff]   ;;  %v16597_v53 = vld [vmem:[#allocation7 + $0x294c] ss:$16 sps:$4 sm:$0xff]  }
 0x62d   : > { %11404 = vmatprep.subr.bf16.mxu1 %v16513_v54  ;;  %v17905_v54 = vpack.c.bf16 %v540_v49, %v540_v49  ;;  %v16678_v49 = vld [vmem:[#allocation7 + $0x2be4] ss:$16 sps:$4 sm:$0xff]  }
 0x62f   : > { %10444 = vmatpush1.bf16.msra.mxu0 %v16508_v55  ;;  %v16592_v55 = vld [vmem:[#allocation7 + $0x2a20] ss:$16 sps:$4 sm:$0xff]  }
 0x630   : > { %11405 = vmatpush1.bf16.msra.mxu1 %v16511_v56  ;;  %10445 = vmatprep.subr.bf16.mxu0 %v16516_v57  ;;  %v16595_v56 = vld [vmem:[#allocation7 + $0x2948] ss:$16 sps:$4 sm:$0xff]   ;;  %v16600_v57 = vld [vmem:[#allocation7 + $0x2a44] ss:$16 sps:$4 sm:$0xff]  }
 0x631   : > { %11406 = vmatprep.subr.bf16.mxu1 %v16519_v58  ;;  %v16603_v58 = vld [vmem:[#allocation7 + $0x296c] ss:$16 sps:$4 sm:$0xff]  }
 0x633   : > { %10446 = vmatpush1.bf16.msra.mxu0 %v16514_v59  ;;  %v16598_v59 = vld [vmem:[#allocation7 + $0x2a40] ss:$16 sps:$4 sm:$0xff]  }
 0x634   : > { %11407 = vmatpush1.bf16.msra.mxu1 %v16517_v60  ;;  %10447 = vmatprep.subr.bf16.mxu0 %v16522_v61  ;;  %v16601_v60 = vld [vmem:[#allocation7 + $0x2968] ss:$16 sps:$4 sm:$0xff]   ;;  %v16606_v61 = vld [vmem:[#allocation7 + $0x2a64] ss:$16 sps:$4 sm:$0xff]  }
 0x635   : > { %11408 = vmatprep.subr.bf16.mxu1 %v16525_v62  ;;  %v16609_v62 = vld [vmem:[#allocation7 + $0x298c] ss:$16 sps:$4 sm:$0xff]  }
 0x637   : > { %10448 = vmatpush1.bf16.msra.mxu0 %v16520_v63  ;;  %v16604_v63 = vld [vmem:[#allocation7 + $0x2a60] ss:$16 sps:$4 sm:$0xff]  }
 0x638   : > { %11409 = vmatpush1.bf16.msra.mxu1 %v16523_v0  ;;  %10449 = vmatprep.subr.bf16.mxu0 %v16528_v1  ;;  %v16607_v0 = vld [vmem:[#allocation7 + $0x2988] ss:$16 sps:$4 sm:$0xff]   ;;  %v16612_v1 = vld [vmem:[#allocation7 + $0x2a84] ss:$16 sps:$4 sm:$0xff]  }
 0x639   : > { %11410 = vmatprep.subr.bf16.mxu1 %v16531_v3  ;;  %v16615_v3 = vld [vmem:[#allocation7 + $0x29ac] ss:$16 sps:$4 sm:$0xff]  }
 0x63b   : > { %10450 = vmatpush1.bf16.msra.mxu0 %v16526_v4  ;;  %v16610_v4 = vld [vmem:[#allocation7 + $0x2a80] ss:$16 sps:$4 sm:$0xff]  }
 0x63c   : > { %11411 = vmatpush1.bf16.msra.mxu1 %v16529_v5  ;;  %10451 = vmatprep.subr.bf16.mxu0 %v16534_v6  ;;  %v16613_v5 = vld [vmem:[#allocation7 + $0x29a8] ss:$16 sps:$4 sm:$0xff]   ;;  %v16618_v6 = vld [vmem:[#allocation7 + $0x2aa4] ss:$16 sps:$4 sm:$0xff]  }
 0x63d   : > { %11421 = vmatprep.subr.bf16.mxu1 %v16537_v7  ;;  %v16621_v7 = vld [vmem:[#allocation7 + $0x29cc] ss:$16 sps:$4 sm:$0xff]  }
 0x63f   : > { %11413 = vmatmul.mubr.bf16.vlgmr.msra.gmra.mrb[4].mxu1 %v17892_v40  ;;  %10452 = vmatpush1.bf16.msra.mxu0 %v16532_v8  ;;  %v16577_v40 = vld [vmem:[#allocation7 + $0x28e8] ss:$16 sps:$4 sm:$0xff]   ;;  %v16616_v8 = vld [vmem:[#allocation7 + $0x2aa0] ss:$16 sps:$4 sm:$0xff]  }
 0x640   : > { %11422 = vmatpush1.bf16.msra.mxu1 %v16535_v9  ;;  %10453 = vmatprep.subr.bf16.mxu0 %v16540_v10  ;;  %v16619_v9 = vld [vmem:[#allocation7 + $0x29c8] ss:$16 sps:$4 sm:$0xff]   ;;  %v16624_v10 = vld [vmem:[#allocation7 + $0x2ac4] ss:$16 sps:$4 sm:$0xff]  }
 0x641   : > { %11423 = vmatprep.subr.bf16.mxu1 %v16543_v11  ;;  %11453 = vmatprep.mubr.bf16.mxu1 %v17895_v46  ;;  %v16588_v46 = vld [vmem:[#allocation7 + $0x2a04] ss:$16 sps:$4 sm:$0xff]   ;;  %v16627_v11 = vld [vmem:[#allocation7 + $0x29ec] ss:$16 sps:$4 sm:$0xff]  }
 0x643   : > { %10454 = vmatpush1.bf16.msra.mxu0 %v16538_v12  ;;  %v16622_v12 = vld [vmem:[#allocation7 + $0x2ac0] ss:$16 sps:$4 sm:$0xff]  }
 0x644   : > { %11424 = vmatpush1.bf16.msra.mxu1 %v16541_v13  ;;  %10455 = vmatprep.subr.bf16.mxu0 %v16546_v15  ;;  %v16625_v13 = vld [vmem:[#allocation7 + $0x29e8] ss:$16 sps:$4 sm:$0xff]   ;;  %v16630_v15 = vld [vmem:[#allocation7 + $0x2ae4] ss:$16 sps:$4 sm:$0xff]  }
 0x645   : > { %11425 = vmatprep.subr.bf16.mxu1 %v16549_v17  ;;  %v16633_v17 = vld [vmem:[#allocation7 + $0x2a0c] ss:$16 sps:$4 sm:$0xff]  }
 0x647   : > { %10456 = vmatpush1.bf16.msra.mxu0 %v16544_v18  ;;  %v16628_v18 = vld [vmem:[#allocation7 + $0x2ae0] ss:$16 sps:$4 sm:$0xff]  }
 0x648   : > { %11426 = vmatpush1.bf16.msra.mxu1 %v16547_v19  ;;  %10457 = vmatprep.subr.bf16.mxu0 %v16552_v20  ;;  %v16631_v19 = vld [vmem:[#allocation7 + $0x2a08] ss:$16 sps:$4 sm:$0xff]   ;;  %v16636_v20 = vld [vmem:[#allocation7 + $0x2b04] ss:$16 sps:$4 sm:$0xff]  }
 0x649   : > { %11427 = vmatprep.subr.bf16.mxu1 %v16555_v21  ;;  %v16639_v21 = vld [vmem:[#allocation7 + $0x2a2c] ss:$16 sps:$4 sm:$0xff]  }
 0x64b   : > { %10458 = vmatpush1.bf16.msra.mxu0 %v16550_v22  ;;  %v16634_v22 = vld [vmem:[#allocation7 + $0x2b00] ss:$16 sps:$4 sm:$0xff]  }
 0x64c   : > { %11428 = vmatpush1.bf16.msra.mxu1 %v16553_v23  ;;  %10459 = vmatprep.subr.bf16.mxu0 %v16558_v24  ;;  %v16637_v23 = vld [vmem:[#allocation7 + $0x2a28] ss:$16 sps:$4 sm:$0xff]   ;;  %v16642_v24 = vld [vmem:[#allocation7 + $0x2b24] ss:$16 sps:$4 sm:$0xff]  }
 0x64d   : > { %11429 = vmatprep.subr.bf16.mxu1 %v16561_v25  ;;  %v16645_v25 = vld [vmem:[#allocation7 + $0x2a4c] ss:$16 sps:$4 sm:$0xff]  }
 0x64f   : > { %10460 = vmatpush1.bf16.msra.mxu0 %v16556_v26  ;;  %v16640_v26 = vld [vmem:[#allocation7 + $0x2b20] ss:$16 sps:$4 sm:$0xff]  }
 0x650   : > { %11430 = vmatpush1.bf16.msra.mxu1 %v16559_v27  ;;  %10461 = vmatprep.subr.bf16.mxu0 %v16564_v28  ;;  %v16643_v27 = vld [vmem:[#allocation7 + $0x2a48] ss:$16 sps:$4 sm:$0xff]   ;;  %v16648_v28 = vld [vmem:[#allocation7 + $0x2b44] ss:$16 sps:$4 sm:$0xff]  }
 0x651   : > { %11431 = vmatprep.subr.bf16.mxu1 %v16567_v29  ;;  %v16651_v29 = vld [vmem:[#allocation7 + $0x2a6c] ss:$16 sps:$4 sm:$0xff]  }
 0x653   : > { %10462 = vmatpush1.bf16.msra.mxu0 %v16562_v30  ;;  %v16646_v30 = vld [vmem:[#allocation7 + $0x2b40] ss:$16 sps:$4 sm:$0xff]  }
 0x654   : > { %11432 = vmatpush1.bf16.msra.mxu1 %v16565_v31  ;;  %10463 = vmatprep.subr.bf16.mxu0 %v16570_v32  ;;  %v16649_v31 = vld [vmem:[#allocation7 + $0x2a68] ss:$16 sps:$4 sm:$0xff]   ;;  %v16654_v32 = vld [vmem:[#allocation7 + $0x2b64] ss:$16 sps:$4 sm:$0xff]  }
 0x655   : > { %11433 = vmatprep.subr.bf16.mxu1 %v16573_v34  ;;  %v16657_v34 = vld [vmem:[#allocation7 + $0x2a8c] ss:$16 sps:$4 sm:$0xff]  }
 0x657   : > { %10464 = vmatpush1.bf16.msra.mxu0 %v16568_v35  ;;  %v16652_v35 = vld [vmem:[#allocation7 + $0x2b60] ss:$16 sps:$4 sm:$0xff]  }
 0x658   : > { %11434 = vmatpush1.bf16.msra.mxu1 %v16571_v36  ;;  %10465 = vmatprep.subr.bf16.mxu0 %v16576_v37  ;;  %v16655_v36 = vld [vmem:[#allocation7 + $0x2a88] ss:$16 sps:$4 sm:$0xff]   ;;  %v16660_v37 = vld [vmem:[#allocation7 + $0x2b84] ss:$16 sps:$4 sm:$0xff]  }
 0x659   : > { %11435 = vmatprep.subr.bf16.mxu1 %v16579_v38  ;;  %v16663_v38 = vld [vmem:[#allocation7 + $0x2aac] ss:$16 sps:$4 sm:$0xff]  }
 0x65b   : > { %10466 = vmatpush1.bf16.msra.mxu0 %v16574_v39  ;;  %v16658_v39 = vld [vmem:[#allocation7 + $0x2b80] ss:$16 sps:$4 sm:$0xff]  }
 0x65c   : > { %11436 = vmatpush1.bf16.msra.mxu1 %v16577_v40  ;;  %10467 = vmatprep.subr.bf16.mxu0 %v16582_v41  ;;  %v16661_v40 = vld [vmem:[#allocation7 + $0x2aa8] ss:$16 sps:$4 sm:$0xff]   ;;  %v16666_v41 = vld [vmem:[#allocation7 + $0x2ba4] ss:$16 sps:$4 sm:$0xff]  }
 0x65d   : > { %11437 = vmatprep.subr.bf16.mxu1 %v16585_v42  ;;  %v16669_v42 = vld [vmem:[#allocation7 + $0x2acc] ss:$16 sps:$4 sm:$0xff]  }
 0x65f   : > { %10468 = vmatpush1.bf16.msra.mxu0 %v16580_v43  ;;  %v16664_v43 = vld [vmem:[#allocation7 + $0x2ba0] ss:$16 sps:$4 sm:$0xff]  }
 0x660   : > { %11438 = vmatpush1.bf16.msra.mxu1 %v16583_v44  ;;  %10478 = vmatprep.subr.bf16.mxu0 %v16588_v46  ;;  %v16667_v44 = vld [vmem:[#allocation7 + $0x2ac8] ss:$16 sps:$4 sm:$0xff]   ;;  %v16675_v46 = vld [vmem:[#allocation7 + $0x2aec] ss:$16 sps:$4 sm:$0xff]  }
 0x661   : > { %11439 = vmatprep.subr.bf16.mxu1 %v16591_v47  ;;  %v16670_v47 = vld [vmem:[#allocation7 + $0x2bc0] ss:$16 sps:$4 sm:$0xff]  }
 0x662   : > { %10470 = vmatmul.mubr.bf16.vlgmr.msra.gmra.mrb[0].mxu0 %v17902_v48 }
 0x663   : > { %10479 = vmatpush1.bf16.msra.mxu0 %v16586_v50  ;;  %10510 = vmatprep.mubr.bf16.mxu0 %v17905_v54  ;;  %v16681_v50 = vld [vmem:[#allocation7 + $0x2b0c] ss:$16 sps:$4 sm:$0xff]  }
 0x664   : > { %11440 = vmatpush1.bf16.msra.mxu1 %v16589_v51  ;;  %10480 = vmatprep.subr.bf16.mxu0 %v16594_v52  ;;  %v16676_v51 = vld [vmem:[#allocation7 + $0x2be0] ss:$16 sps:$4 sm:$0xff]   ;;  %v16679_v52 = vld [vmem:[#allocation7 + $0x2b08] ss:$16 sps:$4 sm:$0xff]  }
 0x665   : > { %11441 = vmatprep.subr.bf16.mxu1 %v16597_v53  ;;  %v539_v53 = vld [vmem:[%s17672_s12 + $0x150] sm:$0xff] }
 0x667   : > { %10481 = vmatpush1.bf16.msra.mxu0 %v16592_v55  ;;  %v16687_v55 = vld [vmem:[#allocation7 + $0x2b2c] ss:$16 sps:$4 sm:$0xff]  }
 0x668   : > { %11442 = vmatpush1.bf16.msra.mxu1 %v16595_v56  ;;  %10482 = vmatprep.subr.bf16.mxu0 %v16600_v57  ;;  %v17912_v56 = vpack.c.bf16 %v539_v53, %v539_v53  ;;  %v542_v57 = vld [vmem:[%s17672_s12 + $0x168] sm:$0xff] }
 0x669   : > { %11443 = vmatprep.subr.bf16.mxu1 %v16603_v58  ;;  %v16682_v58 = vld [vmem:[#allocation7 + $0x2c00] ss:$16 sps:$4 sm:$0xff]   ;;  %v16768_v53 = vld [vmem:[#allocation7 + $0x2dc4] ss:$16 sps:$4 sm:$0xff]  }
 0x66b   : > { %10483 = vmatpush1.bf16.msra.mxu0 %v16598_v59  ;;  %v16685_v59 = vld [vmem:[#allocation7 + $0x2b28] ss:$16 sps:$4 sm:$0xff]  }
 0x66c   : > { %11444 = vmatpush1.bf16.msra.mxu1 %v16601_v60  ;;  %10484 = vmatprep.subr.bf16.mxu0 %v16606_v61  ;;  %v16690_v60 = vld [vmem:[#allocation7 + $0x2c24] ss:$16 sps:$4 sm:$0xff]   ;;  %v16693_v61 = vld [vmem:[#allocation7 + $0x2b4c] ss:$16 sps:$4 sm:$0xff]  }
 0x66d   : > { %11445 = vmatprep.subr.bf16.mxu1 %v16609_v62  ;;  %v17915_v62 = vpack.c.bf16 %v542_v57, %v542_v57  ;;  %v16774_v57 = vld [vmem:[#allocation7 + $0x2de4] ss:$16 sps:$4 sm:$0xff]  }
 0x66f   : > { %10485 = vmatpush1.bf16.msra.mxu0 %v16604_v63  ;;  %v16688_v63 = vld [vmem:[#allocation7 + $0x2c20] ss:$16 sps:$4 sm:$0xff]  }
 0x670   : > { %11446 = vmatpush1.bf16.msra.mxu1 %v16607_v0  ;;  %10486 = vmatprep.subr.bf16.mxu0 %v16612_v1  ;;  %v16691_v0 = vld [vmem:[#allocation7 + $0x2b48] ss:$16 sps:$4 sm:$0xff]   ;;  %v16696_v1 = vld [vmem:[#allocation7 + $0x2c44] ss:$16 sps:$4 sm:$0xff]  }
 0x671   : > { %11447 = vmatprep.subr.bf16.mxu1 %v16615_v3  ;;  %v16699_v3 = vld [vmem:[#allocation7 + $0x2b6c] ss:$16 sps:$4 sm:$0xff]  }
 0x673   : > { %10487 = vmatpush1.bf16.msra.mxu0 %v16610_v4  ;;  %v16694_v4 = vld [vmem:[#allocation7 + $0x2c40] ss:$16 sps:$4 sm:$0xff]  }
 0x674   : > { %11448 = vmatpush1.bf16.msra.mxu1 %v16613_v5  ;;  %10488 = vmatprep.subr.bf16.mxu0 %v16618_v6  ;;  %v16697_v5 = vld [vmem:[#allocation7 + $0x2b68] ss:$16 sps:$4 sm:$0xff]   ;;  %v16702_v6 = vld [vmem:[#allocation7 + $0x2c64] ss:$16 sps:$4 sm:$0xff]  }
 0x675   : > { %11449 = vmatprep.subr.bf16.mxu1 %v16621_v7  ;;  %v16705_v7 = vld [vmem:[#allocation7 + $0x2b8c] ss:$16 sps:$4 sm:$0xff]  }
 0x677   : > { %10489 = vmatpush1.bf16.msra.mxu0 %v16616_v8  ;;  %v16700_v8 = vld [vmem:[#allocation7 + $0x2c60] ss:$16 sps:$4 sm:$0xff]  }
 0x678   : > { %11450 = vmatpush1.bf16.msra.mxu1 %v16619_v9  ;;  %10490 = vmatprep.subr.bf16.mxu0 %v16624_v10  ;;  %v16703_v9 = vld [vmem:[#allocation7 + $0x2b88] ss:$16 sps:$4 sm:$0xff]   ;;  %v16708_v10 = vld [vmem:[#allocation7 + $0x2c84] ss:$16 sps:$4 sm:$0xff]  }
 0x679   : > { %11451 = vmatprep.subr.bf16.mxu1 %v16627_v11  ;;  %v16711_v11 = vld [vmem:[#allocation7 + $0x2bac] ss:$16 sps:$4 sm:$0xff]  }
 0x67b   : > { %10491 = vmatpush1.bf16.msra.mxu0 %v16622_v12  ;;  %v16706_v12 = vld [vmem:[#allocation7 + $0x2c80] ss:$16 sps:$4 sm:$0xff]  }
 0x67c   : > { %11452 = vmatpush1.bf16.msra.mxu1 %v16625_v13  ;;  %10492 = vmatprep.subr.bf16.mxu0 %v16630_v15  ;;  %v16709_v13 = vld [vmem:[#allocation7 + $0x2ba8] ss:$16 sps:$4 sm:$0xff]   ;;  %v16714_v15 = vld [vmem:[#allocation7 + $0x2ca4] ss:$16 sps:$4 sm:$0xff]  }
 0x67d   : > { %11462 = vmatprep.subr.bf16.mxu1 %v16633_v17  ;;  %v16717_v17 = vld [vmem:[#allocation7 + $0x2bcc] ss:$16 sps:$4 sm:$0xff]  }
 0x67f   : > { %11454 = vmatmul.mubr.bf16.vlgmr.msra.gmra.mrb[4].mxu1 %v17902_v48  ;;  %10493 = vmatpush1.bf16.msra.mxu0 %v16628_v18  ;;  %v16673_v48 = vld [vmem:[#allocation7 + $0x2ae8] ss:$16 sps:$4 sm:$0xff]   ;;  %v16712_v18 = vld [vmem:[#allocation7 + $0x2ca0] ss:$16 sps:$4 sm:$0xff]  }
 0x680   : > { %11463 = vmatpush1.bf16.msra.mxu1 %v16631_v19  ;;  %10494 = vmatprep.subr.bf16.mxu0 %v16636_v20  ;;  %v16715_v19 = vld [vmem:[#allocation7 + $0x2bc8] ss:$16 sps:$4 sm:$0xff]   ;;  %v16720_v20 = vld [vmem:[#allocation7 + $0x2cc4] ss:$16 sps:$4 sm:$0xff]  }
 0x681   : > { %11464 = vmatprep.subr.bf16.mxu1 %v16639_v21  ;;  %11494 = vmatprep.mubr.bf16.mxu1 %v17905_v54  ;;  %v16684_v54 = vld [vmem:[#allocation7 + $0x2c04] ss:$16 sps:$4 sm:$0xff]   ;;  %v16723_v21 = vld [vmem:[#allocation7 + $0x2bec] ss:$16 sps:$4 sm:$0xff]  }
 0x683   : > { %10495 = vmatpush1.bf16.msra.mxu0 %v16634_v22  ;;  %v16718_v22 = vld [vmem:[#allocation7 + $0x2cc0] ss:$16 sps:$4 sm:$0xff]  }
 0x684   : > { %11465 = vmatpush1.bf16.msra.mxu1 %v16637_v23  ;;  %10496 = vmatprep.subr.bf16.mxu0 %v16642_v24  ;;  %v16721_v23 = vld [vmem:[#allocation7 + $0x2be8] ss:$16 sps:$4 sm:$0xff]   ;;  %v16726_v24 = vld [vmem:[#allocation7 + $0x2ce4] ss:$16 sps:$4 sm:$0xff]  }
 0x685   : > { %11466 = vmatprep.subr.bf16.mxu1 %v16645_v25  ;;  %v16729_v25 = vld [vmem:[#allocation7 + $0x2c0c] ss:$16 sps:$4 sm:$0xff]  }
 0x687   : > { %10497 = vmatpush1.bf16.msra.mxu0 %v16640_v26  ;;  %v16724_v26 = vld [vmem:[#allocation7 + $0x2ce0] ss:$16 sps:$4 sm:$0xff]  }
 0x688   : > { %11467 = vmatpush1.bf16.msra.mxu1 %v16643_v27  ;;  %10498 = vmatprep.subr.bf16.mxu0 %v16648_v28  ;;  %v16727_v27 = vld [vmem:[#allocation7 + $0x2c08] ss:$16 sps:$4 sm:$0xff]   ;;  %v16732_v28 = vld [vmem:[#allocation7 + $0x2d04] ss:$16 sps:$4 sm:$0xff]  }
 0x689   : > { %11468 = vmatprep.subr.bf16.mxu1 %v16651_v29  ;;  %v16735_v29 = vld [vmem:[#allocation7 + $0x2c2c] ss:$16 sps:$4 sm:$0xff]  }
 0x68b   : > { %10499 = vmatpush1.bf16.msra.mxu0 %v16646_v30  ;;  %v16730_v30 = vld [vmem:[#allocation7 + $0x2d00] ss:$16 sps:$4 sm:$0xff]  }
 0x68c   : > { %11469 = vmatpush1.bf16.msra.mxu1 %v16649_v31  ;;  %10500 = vmatprep.subr.bf16.mxu0 %v16654_v32  ;;  %v16733_v31 = vld [vmem:[#allocation7 + $0x2c28] ss:$16 sps:$4 sm:$0xff]   ;;  %v16738_v32 = vld [vmem:[#allocation7 + $0x2d24] ss:$16 sps:$4 sm:$0xff]  }
 0x68d   : > { %11470 = vmatprep.subr.bf16.mxu1 %v16657_v34  ;;  %v16741_v34 = vld [vmem:[#allocation7 + $0x2c4c] ss:$16 sps:$4 sm:$0xff]  }
 0x68f   : > { %10501 = vmatpush1.bf16.msra.mxu0 %v16652_v35  ;;  %v16736_v35 = vld [vmem:[#allocation7 + $0x2d20] ss:$16 sps:$4 sm:$0xff]  }
 0x690   : > { %11471 = vmatpush1.bf16.msra.mxu1 %v16655_v36  ;;  %10502 = vmatprep.subr.bf16.mxu0 %v16660_v37  ;;  %v16739_v36 = vld [vmem:[#allocation7 + $0x2c48] ss:$16 sps:$4 sm:$0xff]   ;;  %v16744_v37 = vld [vmem:[#allocation7 + $0x2d44] ss:$16 sps:$4 sm:$0xff]  }
 0x691   : > { %11472 = vmatprep.subr.bf16.mxu1 %v16663_v38  ;;  %v16747_v38 = vld [vmem:[#allocation7 + $0x2c6c] ss:$16 sps:$4 sm:$0xff]  }
 0x693   : > { %10503 = vmatpush1.bf16.msra.mxu0 %v16658_v39  ;;  %v16742_v39 = vld [vmem:[#allocation7 + $0x2d40] ss:$16 sps:$4 sm:$0xff]  }
 0x694   : > { %11473 = vmatpush1.bf16.msra.mxu1 %v16661_v40  ;;  %10504 = vmatprep.subr.bf16.mxu0 %v16666_v41  ;;  %v16745_v40 = vld [vmem:[#allocation7 + $0x2c68] ss:$16 sps:$4 sm:$0xff]   ;;  %v16750_v41 = vld [vmem:[#allocation7 + $0x2d64] ss:$16 sps:$4 sm:$0xff]  }
 0x695   : > { %11474 = vmatprep.subr.bf16.mxu1 %v16669_v42  ;;  %v16753_v42 = vld [vmem:[#allocation7 + $0x2c8c] ss:$16 sps:$4 sm:$0xff]  }
 0x697   : > { %10505 = vmatpush1.bf16.msra.mxu0 %v16664_v43  ;;  %v16748_v43 = vld [vmem:[#allocation7 + $0x2d60] ss:$16 sps:$4 sm:$0xff]  }
 0x698   : > { %11475 = vmatpush1.bf16.msra.mxu1 %v16667_v44  ;;  %10506 = vmatprep.subr.bf16.mxu0 %v16672_v45  ;;  %v16751_v44 = vld [vmem:[#allocation7 + $0x2c88] ss:$16 sps:$4 sm:$0xff]   ;;  %v16756_v45 = vld [vmem:[#allocation7 + $0x2d84] ss:$16 sps:$4 sm:$0xff]  }
 0x699   : > { %11476 = vmatprep.subr.bf16.mxu1 %v16675_v46  ;;  %v16759_v46 = vld [vmem:[#allocation7 + $0x2cac] ss:$16 sps:$4 sm:$0xff]  }
 0x69b   : > { %10507 = vmatpush1.bf16.msra.mxu0 %v16670_v47  ;;  %v16754_v47 = vld [vmem:[#allocation7 + $0x2d80] ss:$16 sps:$4 sm:$0xff]  }
 0x69c   : > { %11477 = vmatpush1.bf16.msra.mxu1 %v16673_v48  ;;  %10508 = vmatprep.subr.bf16.mxu0 %v16678_v49  ;;  %v16757_v48 = vld [vmem:[#allocation7 + $0x2ca8] ss:$16 sps:$4 sm:$0xff]   ;;  %v16762_v49 = vld [vmem:[#allocation7 + $0x2da4] ss:$16 sps:$4 sm:$0xff]  }
 0x69d   : > { %11478 = vmatprep.subr.bf16.mxu1 %v16681_v50  ;;  %v16765_v50 = vld [vmem:[#allocation7 + $0x2ccc] ss:$16 sps:$4 sm:$0xff]  }
 0x69f   : > { %10509 = vmatpush1.bf16.msra.mxu0 %v16676_v51  ;;  %v16760_v51 = vld [vmem:[#allocation7 + $0x2da0] ss:$16 sps:$4 sm:$0xff]  }
 0x6a0   : > { %11479 = vmatpush1.bf16.msra.mxu1 %v16679_v52  ;;  %10519 = vmatprep.subr.bf16.mxu0 %v16684_v54  ;;  %v16763_v52 = vld [vmem:[#allocation7 + $0x2cc8] ss:$16 sps:$4 sm:$0xff]   ;;  %v16771_v54 = vld [vmem:[#allocation7 + $0x2cec] ss:$16 sps:$4 sm:$0xff]  }
 0x6a1   : > { %11480 = vmatprep.subr.bf16.mxu1 %v16687_v55  ;;  %v16766_v55 = vld [vmem:[#allocation7 + $0x2dc0] ss:$16 sps:$4 sm:$0xff]  }
 0x6a2   : > { %10511 = vmatmul.mubr.bf16.vlgmr.msra.gmra.mrb[0].mxu0 %v17912_v56 }
 0x6a3   : > { %10520 = vmatpush1.bf16.msra.mxu0 %v16682_v58  ;;  %10551 = vmatprep.mubr.bf16.mxu0 %v17915_v62  ;;  %v16777_v58 = vld [vmem:[#allocation7 + $0x2d0c] ss:$16 sps:$4 sm:$0xff]  }
 0x6a4   : > { %11481 = vmatpush1.bf16.msra.mxu1 %v16685_v59  ;;  %10521 = vmatprep.subr.bf16.mxu0 %v16690_v60  ;;  %v16772_v59 = vld [vmem:[#allocation7 + $0x2de0] ss:$16 sps:$4 sm:$0xff]   ;;  %v16775_v60 = vld [vmem:[#allocation7 + $0x2d08] ss:$16 sps:$4 sm:$0xff]  }
 0x6a5   : > { %11482 = vmatprep.subr.bf16.mxu1 %v16693_v61  ;;  %v541_v61 = vld [vmem:[%s17672_s12 + $0x160] sm:$0xff]  ;;  %s17314_s12 = smov [#allocation19]  }
 0x6a7   : > { %10522 = vmatpush1.bf16.msra.mxu0 %v16688_v63  ;;  %v16822_v63 = vld [vmem:[#allocation10 + $0x4] ss:$8 sps:$4 sm:$0xff]  }
 0x6a8   : > { %11483 = vmatpush1.bf16.msra.mxu1 %v16691_v0  ;;  %10523 = vmatprep.subr.bf16.mxu0 %v16696_v1  ;;  %v17922_v0 = vpack.c.bf16 %v541_v61, %v541_v61  ;;  %v16778_v1 = vld [vmem:[#allocation7 + $0x2d28] ss:$16 sps:$4 sm:$0xff]   ;;  %v16865_v61 = vld [vmem:[#allocation10 + $0xf0] ss:$8 sps:$4 sm:$0xff]  }
 0x6a9   : > { %11484 = vmatprep.subr.bf16.mxu1 %v16699_v3  ;;  %v16820_v3 = vld [vmem:[#allocation10] ss:$8 sps:$4 sm:$0xff]  }
 0x6ab   : > { %10524 = vmatpush1.bf16.msra.mxu0 %v16694_v4  ;;  %v16783_v4 = vld [vmem:[#allocation7 + $0x2d4c] ss:$16 sps:$4 sm:$0xff]  }
 0x6ac   : > { %11485 = vmatpush1.bf16.msra.mxu1 %v16697_v5  ;;  %10525 = vmatprep.subr.bf16.mxu0 %v16702_v6  ;;  %v16825_v5 = vld [vmem:[#allocation10 + $0x14] ss:$8 sps:$4 sm:$0xff]  }
 0x6ad   : > { %11486 = vmatprep.subr.bf16.mxu1 %v16705_v7  ;;  %v16781_v6 = vld [vmem:[#allocation7 + $0x2d48] ss:$16 sps:$4 sm:$0xff]   ;;  %v16823_v7 = vld [vmem:[#allocation10 + $0x10] ss:$8 sps:$4 sm:$0xff]  }
 0x6af   : > { %10526 = vmatpush1.bf16.msra.mxu0 %v16700_v8  ;;  %v16786_v8 = vld [vmem:[#allocation7 + $0x2d6c] ss:$16 sps:$4 sm:$0xff]  }
 0x6b0   : > { %11487 = vmatpush1.bf16.msra.mxu1 %v16703_v9  ;;  %10527 = vmatprep.subr.bf16.mxu0 %v16708_v10  ;;  %v16828_v9 = vld [vmem:[#allocation10 + $0x24] ss:$8 sps:$4 sm:$0xff]  }
 0x6b1   : > { %11488 = vmatprep.subr.bf16.mxu1 %v16711_v11  ;;  %v16784_v10 = vld [vmem:[#allocation7 + $0x2d68] ss:$16 sps:$4 sm:$0xff]   ;;  %v16826_v11 = vld [vmem:[#allocation10 + $0x20] ss:$8 sps:$4 sm:$0xff]  }
 0x6b3   : > { %10528 = vmatpush1.bf16.msra.mxu0 %v16706_v12  ;;  %v16789_v12 = vld [vmem:[#allocation7 + $0x2d8c] ss:$16 sps:$4 sm:$0xff]  }
 0x6b4   : > { %11489 = vmatpush1.bf16.msra.mxu1 %v16709_v13  ;;  %10529 = vmatprep.subr.bf16.mxu0 %v16714_v15  ;;  %v16831_v13 = vld [vmem:[#allocation10 + $0x34] ss:$8 sps:$4 sm:$0xff]  }
 0x6b5   : > { %11490 = vmatprep.subr.bf16.mxu1 %v16717_v17  ;;  %v16787_v15 = vld [vmem:[#allocation7 + $0x2d88] ss:$16 sps:$4 sm:$0xff]   ;;  %v16829_v17 = vld [vmem:[#allocation10 + $0x30] ss:$8 sps:$4 sm:$0xff]  }
 0x6b7   : > { %10530 = vmatpush1.bf16.msra.mxu0 %v16712_v18  ;;  %v16792_v18 = vld [vmem:[#allocation7 + $0x2dac] ss:$16 sps:$4 sm:$0xff]  }
 0x6b8   : > { %11491 = vmatpush1.bf16.msra.mxu1 %v16715_v19  ;;  %10531 = vmatprep.subr.bf16.mxu0 %v16720_v20  ;;  %v16834_v19 = vld [vmem:[#allocation10 + $0x44] ss:$8 sps:$4 sm:$0xff]  }
 0x6b9   : > { %11492 = vmatprep.subr.bf16.mxu1 %v16723_v21  ;;  %v16790_v20 = vld [vmem:[#allocation7 + $0x2da8] ss:$16 sps:$4 sm:$0xff]   ;;  %v16832_v21 = vld [vmem:[#allocation10 + $0x40] ss:$8 sps:$4 sm:$0xff]  }
 0x6bb   : > { %10532 = vmatpush1.bf16.msra.mxu0 %v16718_v22  ;;  %v16795_v22 = vld [vmem:[#allocation7 + $0x2dcc] ss:$16 sps:$4 sm:$0xff]  }
 0x6bc   : > { %11493 = vmatpush1.bf16.msra.mxu1 %v16721_v23  ;;  %10533 = vmatprep.subr.bf16.mxu0 %v16726_v24  ;;  %v16837_v23 = vld [vmem:[#allocation10 + $0x54] ss:$8 sps:$4 sm:$0xff]  }
 0x6bd   : > { %11503 = vmatprep.subr.bf16.mxu1 %v16729_v25  ;;  %v16793_v24 = vld [vmem:[#allocation7 + $0x2dc8] ss:$16 sps:$4 sm:$0xff]   ;;  %v16835_v25 = vld [vmem:[#allocation10 + $0x50] ss:$8 sps:$4 sm:$0xff]  }
 0x6bf   : > { %11495 = vmatmul.mubr.bf16.vlgmr.msra.gmra.mrb[4].mxu1 %v17912_v56  ;;  %10534 = vmatpush1.bf16.msra.mxu0 %v16724_v26  ;;  %v16769_v56 = vld [vmem:[#allocation7 + $0x2ce8] ss:$16 sps:$4 sm:$0xff]   ;;  %v16798_v26 = vld [vmem:[#allocation7 + $0x2dec] ss:$16 sps:$4 sm:$0xff]  }
 0x6c0   : > { %11504 = vmatpush1.bf16.msra.mxu1 %v16727_v27  ;;  %10535 = vmatprep.subr.bf16.mxu0 %v16732_v28  ;;  %v16840_v27 = vld [vmem:[#allocation10 + $0x64] ss:$8 sps:$4 sm:$0xff]  }
 0x6c1   : > { %11505 = vmatprep.subr.bf16.mxu1 %v16735_v29  ;;  %11535 = vmatprep.mubr.bf16.mxu1 %v17915_v62  ;;  %v16780_v62 = vld [vmem:[#allocation7 + $0x2d2c] ss:$16 sps:$4 sm:$0xff]   ;;  %v16796_v28 = vld [vmem:[#allocation7 + $0x2de8] ss:$16 sps:$4 sm:$0xff]  }
 0x6c2   : > { %v16838_v29 = vld [vmem:[#allocation10 + $0x60] ss:$8 sps:$4 sm:$0xff]  }
 0x6c3   : > { %10536 = vmatpush1.bf16.msra.mxu0 %v16730_v30  ;;  %v16801_v30 = vld [vmem:[#allocation7 + $0x2e0c] ss:$16 sps:$4 sm:$0xff]  }
 0x6c4   : > { %11506 = vmatpush1.bf16.msra.mxu1 %v16733_v31  ;;  %10537 = vmatprep.subr.bf16.mxu0 %v16738_v32  ;;  %v16843_v31 = vld [vmem:[#allocation10 + $0x74] ss:$8 sps:$4 sm:$0xff]  }
 0x6c5   : > { %11507 = vmatprep.subr.bf16.mxu1 %v16741_v34  ;;  %v16799_v32 = vld [vmem:[#allocation7 + $0x2e08] ss:$16 sps:$4 sm:$0xff]   ;;  %v16804_v34 = vld [vmem:[#allocation7 + $0x2e2c] ss:$16 sps:$4 sm:$0xff]  }
 0x6c7   : > { %10538 = vmatpush1.bf16.msra.mxu0 %v16736_v35  ;;  %v16841_v35 = vld [vmem:[#allocation10 + $0x70] ss:$8 sps:$4 sm:$0xff]  }
 0x6c8   : > { %11508 = vmatpush1.bf16.msra.mxu1 %v16739_v36  ;;  %10539 = vmatprep.subr.bf16.mxu0 %v16744_v37  ;;  %v16846_v36 = vld [vmem:[#allocation10 + $0x84] ss:$8 sps:$4 sm:$0xff]  }
 0x6c9   : > { %11509 = vmatprep.subr.bf16.mxu1 %v16747_v38  ;;  %v16802_v37 = vld [vmem:[#allocation7 + $0x2e28] ss:$16 sps:$4 sm:$0xff]   ;;  %v16807_v38 = vld [vmem:[#allocation7 + $0x2e4c] ss:$16 sps:$4 sm:$0xff]  }
 0x6cb   : > { %10540 = vmatpush1.bf16.msra.mxu0 %v16742_v39  ;;  %v16844_v39 = vld [vmem:[#allocation10 + $0x80] ss:$8 sps:$4 sm:$0xff]  }
 0x6cc   : > { %11510 = vmatpush1.bf16.msra.mxu1 %v16745_v40  ;;  %10541 = vmatprep.subr.bf16.mxu0 %v16750_v41  ;;  %v16849_v40 = vld [vmem:[#allocation10 + $0x94] ss:$8 sps:$4 sm:$0xff]  }
 0x6cd   : > { %11511 = vmatprep.subr.bf16.mxu1 %v16753_v42  ;;  %v16805_v41 = vld [vmem:[#allocation7 + $0x2e48] ss:$16 sps:$4 sm:$0xff]   ;;  %v16810_v42 = vld [vmem:[#allocation7 + $0x2e6c] ss:$16 sps:$4 sm:$0xff]  }
 0x6cf   : > { %10542 = vmatpush1.bf16.msra.mxu0 %v16748_v43  ;;  %v16847_v43 = vld [vmem:[#allocation10 + $0x90] ss:$8 sps:$4 sm:$0xff]  }
 0x6d0   : > { %11512 = vmatpush1.bf16.msra.mxu1 %v16751_v44  ;;  %10543 = vmatprep.subr.bf16.mxu0 %v16756_v45  ;;  %v16852_v44 = vld [vmem:[#allocation10 + $0xa4] ss:$8 sps:$4 sm:$0xff]  }
 0x6d1   : > { %11513 = vmatprep.subr.bf16.mxu1 %v16759_v46  ;;  %v16808_v45 = vld [vmem:[#allocation7 + $0x2e68] ss:$16 sps:$4 sm:$0xff]   ;;  %v16813_v46 = vld [vmem:[#allocation7 + $0x2e8c] ss:$16 sps:$4 sm:$0xff]  }
 0x6d3   : > { %10544 = vmatpush1.bf16.msra.mxu0 %v16754_v47  ;;  %v16855_v47 = vld [vmem:[#allocation10 + $0xb4] ss:$8 sps:$4 sm:$0xff]  }
 0x6d4   : > { %11514 = vmatpush1.bf16.msra.mxu1 %v16757_v48  ;;  %10545 = vmatprep.subr.bf16.mxu0 %v16762_v49  ;;  %v16811_v48 = vld [vmem:[#allocation7 + $0x2e88] ss:$16 sps:$4 sm:$0xff]   ;;  %v16816_v49 = vld [vmem:[#allocation7 + $0x2eac] ss:$16 sps:$4 sm:$0xff]  }
 0x6d5   : > { %11515 = vmatprep.subr.bf16.mxu1 %v16765_v50  ;;  %v16853_v50 = vld [vmem:[#allocation10 + $0xb0] ss:$8 sps:$4 sm:$0xff]  }
 0x6d7   : > { %10546 = vmatpush1.bf16.msra.mxu0 %v16760_v51  ;;  %v16858_v51 = vld [vmem:[#allocation10 + $0xc4] ss:$8 sps:$4 sm:$0xff]  }
 0x6d8   : > { %11516 = vmatpush1.bf16.msra.mxu1 %v16763_v52  ;;  %10547 = vmatprep.subr.bf16.mxu0 %v16768_v53  ;;  %v16814_v52 = vld [vmem:[#allocation7 + $0x2ea8] ss:$16 sps:$4 sm:$0xff]   ;;  %v16819_v53 = vld [vmem:[#allocation7 + $0x2ecc] ss:$16 sps:$4 sm:$0xff]  }
 0x6d9   : > { %11517 = vmatprep.subr.bf16.mxu1 %v16771_v54  ;;  %v16856_v54 = vld [vmem:[#allocation10 + $0xc0] ss:$8 sps:$4 sm:$0xff]  }
 0x6db   : > { %10548 = vmatpush1.bf16.msra.mxu0 %v16766_v55  ;;  %v16861_v55 = vld [vmem:[#allocation10 + $0xd4] ss:$8 sps:$4 sm:$0xff]  }
 0x6dc   : > { %11518 = vmatpush1.bf16.msra.mxu1 %v16769_v56  ;;  %10549 = vmatprep.subr.bf16.mxu0 %v16774_v57  ;;  %v16817_v56 = vld [vmem:[#allocation7 + $0x2ec8] ss:$16 sps:$4 sm:$0xff]   ;;  %v16859_v57 = vld [vmem:[#allocation10 + $0xd0] ss:$8 sps:$4 sm:$0xff]  }
 0x6dd   : > { %11519 = vmatprep.subr.bf16.mxu1 %v16777_v58  ;;  %v16864_v58 = vld [vmem:[#allocation10 + $0xe4] ss:$8 sps:$4 sm:$0xff]  }
 0x6df   : > { %10550 = vmatpush1.bf16.msra.mxu0 %v16772_v59  ;;  %v16862_v59 = vld [vmem:[#allocation10 + $0xe0] ss:$8 sps:$4 sm:$0xff]  }
 0x6e0   : > { %11520 = vmatpush1.bf16.msra.mxu1 %v16775_v60  ;;  %11999 = vmatprep.subr.bf16.mxu0 %v16822_v63  ;;  %v16867_v60 = vld [vmem:[#allocation10 + $0xf4] ss:$8 sps:$4 sm:$0xff]   ;;  %v16916_v63 = vld [vmem:[#allocation13 + $0x40] sm:$0xff]  }
 0x6e1   : > { %11521 = vmatprep.subr.bf16.mxu1 %v16780_v62  ;;  %v16870_v62 = vld [vmem:[#allocation10 + $0x104] ss:$8 sps:$4 sm:$0xff]  }
 0x6e2   : > { %10552 = vmatmul.mubr.bf16.vlgmr.msra.gmra.mrb[0].mxu0 %v17922_v0 }
 0x6e3   : > { %12000 = vmatpush1.bf16.msra.mxu0 %v16820_v3  ;;  %v16919_v3 = vld [vmem:[#allocation13 + $0x8] sm:$0xff]  }
 0x6e4   : > { %11522 = vmatpush1.bf16.msra.mxu1 %v16778_v1  ;;  %12001 = vmatprep.subr.bf16.mxu0 %v16825_v5  ;;  %v16918_v1 = vld [vmem:[#allocation13 + $0x48] sm:$0xff]   ;;  %v16922_v5 = vld [vmem:[#allocation13 + $0x58] sm:$0xff]  }
 0x6e5   : > { %11523 = vmatprep.subr.bf16.mxu1 %v16783_v4  ;;  %v16920_v4 = vld [vmem:[#allocation13 + $0x50] sm:$0xff]  }
 0x6e7   : > { %12002 = vmatpush1.bf16.msra.mxu0 %v16823_v7  ;;  %v16924_v7 = vld [vmem:[#allocation13 + $0x60] sm:$0xff]  }
 0x6e8   : > { %11524 = vmatpush1.bf16.msra.mxu1 %v16781_v6  ;;  %12003 = vmatprep.subr.bf16.mxu0 %v16828_v9  ;;  %v16923_v6 = vld [vmem:[#allocation13 + $0x18] sm:$0xff]   ;;  %v16926_v9 = vld [vmem:[#allocation13 + $0x68] sm:$0xff]  }
 0x6e9   : > { %11525 = vmatprep.subr.bf16.mxu1 %v16786_v8  ;;  %v16925_v8 = vld [vmem:[#allocation13 + $0x20] sm:$0xff]  }
 0x6eb   : > { %12004 = vmatpush1.bf16.msra.mxu0 %v16826_v11  ;;  %v2093_v11 = vlaneseq }
 0x6ec   : > { %11526 = vmatpush1.bf16.msra.mxu1 %v16784_v10  ;;  %12005 = vmatprep.subr.bf16.mxu0 %v16831_v13  ;;  %v16927_v10 = vld [vmem:[#allocation13 + $0x28] sm:$0xff]  }
 0x6ed   : > { %11527 = vmatprep.subr.bf16.mxu1 %v16789_v12  ;;  %v17929_v12 = vshrl.u32 %v2093_v11, 7 }
 0x6ef   : > { %12006 = vmatpush1.bf16.msra.mxu0 %v16829_v17  ;;  %v2095_v13 = vsub.s32 0, %v17929_v12  ;;  %v2099_v17 = vsub.s32 1, %v17929_v12 }
 0x6f0   : > { %11528 = vmatpush1.bf16.msra.mxu1 %v16787_v15  ;;  %12007 = vmatprep.subr.bf16.mxu0 %v16834_v19  ;;  %v17932_v15 = vld [vmem:[#allocation9] sm:$0xf] }
 0x6f1   : > { %11529 = vmatprep.subr.bf16.mxu1 %v16792_v18  ;;  %v2096_v18 = vrot.slane %v17932_v15, %v2095_v13  ;;  %v2100_v19 = vrot.slane %v17932_v15, %v2099_v17 }
 0x6f3   : > { %12008 = vmatpush1.bf16.msra.mxu0 %v16832_v21 }
 0x6f4   : > { %11530 = vmatpush1.bf16.msra.mxu1 %v16790_v20  ;;  %12009 = vmatprep.subr.bf16.mxu0 %v16837_v23  ;;  %v17941_v23 = vstv %s11589_s20  ;;  %s17211_s20 = sshll.u32 %s17314_s12, 4  ;;  %s17212_s20 = int_to_ptr.vmem [resolvable:$false] %s17211_s20 }
 0x6f5   : > { %11531 = vmatprep.subr.bf16.mxu1 %v16795_v22  ;;  %p17214_p8 = scmp.lt.s32.totalorder %s17964_s30, %s17212_s20 }
 0x6f7   : > { %12010 = vmatpush1.bf16.msra.mxu0 %v16835_v25 }
 0x6f8   : > { %11532 = vmatpush1.bf16.msra.mxu1 %v16793_v24  ;;  %12011 = vmatprep.subr.bf16.mxu0 %v16840_v27 }
 0x6f9   : > { %11533 = vmatprep.subr.bf16.mxu1 %v16798_v26 }
 0x6fb   : > { %12012 = vmatpush1.bf16.msra.mxu0 %v16838_v29 }
 0x6fc   : > { %11534 = vmatpush1.bf16.msra.mxu1 %v16796_v28  ;;  %12013 = vmatprep.subr.bf16.mxu0 %v16843_v31 }
 0x6fd   : > { %11544 = vmatprep.subr.bf16.mxu1 %v16801_v30 }
 0x6ff   : > { %11536 = vmatmul.mubr.bf16.vlgmr.msra.gmra.mrb[4].mxu1 %v17922_v0  ;;  %12014 = vmatpush1.bf16.msra.mxu0 %v16841_v35  ;;  %v16917_v0 = vld [vmem:[#allocation13] sm:$0xff]  }
 0x700   : > { %11545 = vmatpush1.bf16.msra.mxu1 %v16799_v32  ;;  %11576 = vmatprep.mubr.bf16.mxu1 %v17311_v2  ;;  %v16850_v2 = vld [vmem:[#allocation10 + $0xa0] ss:$8 sps:$4 sm:$0xff]  }
 0x701   : > { %11546 = vmatprep.subr.bf16.mxu1 %v16804_v34  ;;  %12015 = vmatprep.subr.bf16.mxu0 %v16846_v36  ;;  %v16868_v35 = vld [vmem:[#allocation10 + $0x100] ss:$8 sps:$4 sm:$0xff]  }
 0x703   : > { %12016 = vmatpush1.bf16.msra.mxu0 %v16844_v39  ;;  %v16879_v39 = vld [vmem:[#allocation10 + $0x134] ss:$8 sps:$4 sm:$0xff]  }
 0x704   : > { %11547 = vmatpush1.bf16.msra.mxu1 %v16802_v37  ;;  %12017 = vmatprep.subr.bf16.mxu0 %v16849_v40  ;;  %v16873_v37 = vld [vmem:[#allocation10 + $0x114] ss:$8 sps:$4 sm:$0xff]   ;;  %v16877_v40 = vld [vmem:[#allocation10 + $0x130] ss:$8 sps:$4 sm:$0xff]  }
 0x705   : > { %11548 = vmatprep.subr.bf16.mxu1 %v16807_v38  ;;  %v16871_v38 = vld [vmem:[#allocation10 + $0x110] ss:$8 sps:$4 sm:$0xff]  }
 0x707   : > { %12018 = vmatpush1.bf16.msra.mxu0 %v16847_v43  ;;  %v16885_v43 = vld [vmem:[#allocation10 + $0x154] ss:$8 sps:$4 sm:$0xff]  }
 0x708   : > { %11549 = vmatpush1.bf16.msra.mxu1 %v16805_v41  ;;  %12019 = vmatprep.subr.bf16.mxu0 %v16852_v44  ;;  %v16882_v41 = vld [vmem:[#allocation10 + $0x144] ss:$8 sps:$4 sm:$0xff]   ;;  %v16883_v44 = vld [vmem:[#allocation10 + $0x150] ss:$8 sps:$4 sm:$0xff]  }
 0x709   : > { %11550 = vmatprep.subr.bf16.mxu1 %v16810_v42  ;;  %v16880_v42 = vld [vmem:[#allocation10 + $0x140] ss:$8 sps:$4 sm:$0xff]  }
 0x70b   : > { %12020 = vmatpush1.bf16.msra.mxu0 %v16850_v2  ;;  %v16891_v2 = vld [vmem:[#allocation10 + $0x174] ss:$8 sps:$4 sm:$0xff]  }
 0x70c   : > { %11551 = vmatpush1.bf16.msra.mxu1 %v16808_v45  ;;  %12021 = vmatprep.subr.bf16.mxu0 %v16855_v47  ;;  %v16888_v45 = vld [vmem:[#allocation10 + $0x164] ss:$8 sps:$4 sm:$0xff]   ;;  %v16889_v47 = vld [vmem:[#allocation10 + $0x170] ss:$8 sps:$4 sm:$0xff]  }
 0x70d   : > { %11552 = vmatprep.subr.bf16.mxu1 %v16813_v46  ;;  %v16886_v46 = vld [vmem:[#allocation10 + $0x160] ss:$8 sps:$4 sm:$0xff]  }
 0x70f   : > { %12022 = vmatpush1.bf16.msra.mxu0 %v16853_v50  ;;  %v16897_v50 = vld [vmem:[#allocation10 + $0x194] ss:$8 sps:$4 sm:$0xff]  }
 0x710   : > { %11553 = vmatpush1.bf16.msra.mxu1 %v16811_v48  ;;  %12023 = vmatprep.subr.bf16.mxu0 %v16858_v51  ;;  %v16894_v48 = vld [vmem:[#allocation10 + $0x184] ss:$8 sps:$4 sm:$0xff]   ;;  %v16895_v51 = vld [vmem:[#allocation10 + $0x190] ss:$8 sps:$4 sm:$0xff]  }
 0x711   : > { %11554 = vmatprep.subr.bf16.mxu1 %v16816_v49  ;;  %v16892_v49 = vld [vmem:[#allocation10 + $0x180] ss:$8 sps:$4 sm:$0xff]  }
 0x713   : > { %12024 = vmatpush1.bf16.msra.mxu0 %v16856_v54  ;;  %v2103_v54 = vsub.s32 2, %v17929_v12 }
 0x714   : > { %11555 = vmatpush1.bf16.msra.mxu1 %v16814_v52  ;;  %12025 = vmatprep.subr.bf16.mxu0 %v16861_v55  ;;  %v16900_v52 = vld [vmem:[#allocation10 + $0x1a4] ss:$8 sps:$4 sm:$0xff]   ;;  %v16903_v55 = vld [vmem:[#allocation10 + $0x1b4] ss:$8 sps:$4 sm:$0xff]  }
 0x715   : > { %11556 = vmatprep.subr.bf16.mxu1 %v16819_v53  ;;  %v16898_v53 = vld [vmem:[#allocation10 + $0x1a0] ss:$8 sps:$4 sm:$0xff]  }
 0x717   : > { %12026 = vmatpush1.bf16.msra.mxu0 %v16859_v57  ;;  %v16901_v57 = vld [vmem:[#allocation10 + $0x1b0] ss:$8 sps:$4 sm:$0xff]  }
 0x718   : > { %11557 = vmatpush1.bf16.msra.mxu1 %v16817_v56  ;;  %12027 = vmatprep.subr.bf16.mxu0 %v16864_v58  ;;  %v2107_v56 = vsub.s32 3, %v17929_v12  ;;  %v2104_v58 = vrot.slane %v17932_v15, %v2103_v54  ;;  %v16933_v12 = vld [vmem:[#allocation16 + $0x8] sm:$0xff]  }
 0x719   : > { %14178 = vmatprep.subr.bf16.mxu1 %v16916_v63 }
 0x71b   : > { %14081 = vmatmul.mubr.msk.bf16.vlgmr.msra.gmra.mrb[4].mxu1 %vm9613_vm0, %v17696_v33  ;;  %12028 = vmatpush1.bf16.msra.mxu0 %v16862_v59  ;;  %v16921_v33 = vld [vmem:[#allocation13 + $0x10] sm:$0xff]   ;;  %v2108_v59 = vrot.slane %v17932_v15, %v2107_v56  ;;  %v16910_v15 = vld [vmem:[#allocation10 + $0x1e0] ss:$8 sps:$4 sm:$0xff]   ;;  %v14165_v56 = vld [vmem:[#allocation18] ss:$0 sm:$0xff] }
 0x71c   : > { %12029 = vmatprep.subr.bf16.mxu0 %v16867_v60  ;;  %14179 = vmatpush3.bf16.msra.mxu1 %v16917_v0  ;;  %v16906_v60 = vld [vmem:[#allocation10 + $0x1c4] ss:$8 sps:$4 sm:$0xff]   ;;  %v16904_v0 = vld [vmem:[#allocation10 + $0x1c0] ss:$8 sps:$4 sm:$0xff]  }
 0x71d   : > { %14180 = vmatprep.subr.bf16.mxu1 %v16918_v1 }
 0x71f   : > { %12030 = vmatpush1.bf16.msra.mxu0 %v16865_v61 }
 0x720   : > { %12040 = vmatprep.subr.bf16.mxu0 %v16870_v62  ;;  %14181 = vmatpush3.bf16.msra.mxu1 %v16919_v3 }
 0x721   : > { %14182 = vmatprep.subr.bf16.mxu1 %v16920_v4  ;;  %v16909_v4 = vld [vmem:[#allocation10 + $0x1d4] ss:$8 sps:$4 sm:$0xff]  }
 0x724   : > { %14183 = vmatpush3.bf16.msra.mxu1 %v16921_v33 }
 0x725   : > { %14184 = vmatprep.subr.bf16.mxu1 %v16922_v5 }
 0x728   : > { %14185 = vmatpush3.bf16.msra.mxu1 %v16923_v6 }
 0x729   : > { %14186 = vmatprep.subr.bf16.mxu1 %v16924_v7 }
 0x72c   : > { %14187 = vmatpush3.bf16.msra.mxu1 %v16925_v8  ;;  %v16907_v8 = vld [vmem:[#allocation10 + $0x1d0] ss:$8 sps:$4 sm:$0xff]  }
 0x72d   : > { %14188 = vmatprep.subr.bf16.mxu1 %v16926_v9 }
 0x730   : > { %14189 = vmatpush3.bf16.msra.mxu1 %v16927_v10  ;;  %v16912_v10 = vld [vmem:[#allocation10 + $0x1e4] ss:$8 sps:$4 sm:$0xff]  }
 0x7b5   : > { %v10553_v20 = vpop.f32.mrb[0].mxu0 }
 0x7b6   : > { %v14229_v21 = vadd.f32 %v10553_v20, %v2096_v18  ;;  %v10555_v22 = vpop.f32.mrb[1].mxu0  ;;  %v16915_v18 = vld [vmem:[#allocation10 + $0x1f4] ss:$8 sps:$4 sm:$0xff]  }
 0x7b7   : > { %v14231_v24 = vadd.f32 %v10555_v22, %v2100_v19  ;;  %v10557_v25 = vpop.f32.mrb[2].mxu0  ;;  %v16913_v19 = vld [vmem:[#allocation10 + $0x1f0] ss:$8 sps:$4 sm:$0xff]  }
 0x7b8   : > { %v14230_v26 = vadd.f32 %v14229_v21, %v17727_v14  ;;  %v10558_v27 = vpop.f32.mrb[3].mxu0  ;;  %v16876_v14 = vld [vmem:[#allocation10 + $0x124] ss:$8 sps:$4 sm:$0xff]   ;;  %v16928_v21 = vld [vmem:[#allocation13 + $0x70] sm:$0xff]   ;;  %v17312_v25 = vmov 0.0  }
 0x7b9   : > { %v14232_v28 = vadd.f32 %v14231_v24, %v17729_v16  ;;  %v16874_v16 = vld [vmem:[#allocation10 + $0x120] ss:$8 sps:$4 sm:$0xff]   ;;  %v16929_v22 = vld [vmem:[#allocation13 + $0x30] sm:$0xff]   ;;  %14190 = vmatprep.subr.bf16.mxu1 %v16928_v21 }
 0x7ba   : > { %vm11585_vm1 = vcmp.ge.f32.partialorder %v14230_v26, 0.0  ;;  %v11591_v29 = vmul.f32 %v14230_v26, %v17941_v23  ;;  %14191 = vmatpush3.bf16.msra.mxu1 %v16929_v22  ;;  %v16931_v24 = vld [vmem:[#allocation13 + $0x38] sm:$0xff]  }
 0x7bb   : > { %v11592_v30 = vmul.f32 %v14232_v28, %v17941_v23  ;;  %vm11586_vm2 = vcmp.ge.f32.partialorder %v14232_v28, 0.0 }
 0x7bc   : > { %v11595_v31 = vsel %vm11585_vm1, %v14230_v26, %v11591_v29  ;;  %v11667_v26 = vld [vmem:[#allocation12] sm:$0x3] }
 0x7bd   : > { %v11596_v32 = vsel %vm11586_vm2, %v14232_v28, %v11592_v30  ;;  %v11599_v36 = vpack.c.bf16 %v11595_v31, %v11595_v31  ;;  %v11672_v27 = vrot.slane %v11667_v26, %v2095_v13  ;;  %v11676_v28 = vrot.slane %v11667_v26, %v2099_v17  ;;  %v16934_v13 = vld [vmem:[#allocation16 + $0x10] sm:$0xff]   ;;  %v16935_v17 = vld [vmem:[#allocation16 + $0x18] sm:$0xff]  }
 0x7be   : > { %v11600_v34 = vpack.c.bf16 %v11596_v32, %v11596_v32  ;;  %v12084_v30 = vstv %s14146_s24  ;;  %s17213_s24 = scalar_lea.vmem %s17212_s20, 256 }
 0x7bf   : > { %p17215_p4 = scmp.lt.s32.totalorder %s17213_s24, %s17207_s19 }
 0x7c0   : > { %12031 = vmatprep.mubr.bf16.mxu0 %v11600_v34 }
 0x7c1   : > { %12032 = vmatmul.mubr.bf16.vlgmr.msra.gmra.mrb[4].mxu0 %v11599_v36  ;;  %p17216_p6 = por %p17215_p4, %p17214_p8 }
 0x7c2   : > { %12041 = vmatpush1.bf16.msra.mxu0 %v16868_v35 }
 0x7c3   : > { %12042 = vmatprep.subr.bf16.mxu0 %v16873_v37  ;;  %p17217_p11 = pnand %p17216_p6, %p17210_p2 }
 0x7c6   : > { %12043 = vmatpush1.bf16.msra.mxu0 %v16871_v38 }
 0x7c7   : > { %12044 = vmatprep.subr.bf16.mxu0 %v16876_v14 }
 0x7ca   : > { %12045 = vmatpush1.bf16.msra.mxu0 %v16874_v16 }
 0x7cb   : > { %12046 = vmatprep.subr.bf16.mxu0 %v16879_v39 }
 0x7ce   : > { %12047 = vmatpush1.bf16.msra.mxu0 %v16877_v40  ;;  %v16932_v40 = vld [vmem:[#allocation16] sm:$0xff]  }
 0x7cf   : > { %12048 = vmatprep.subr.bf16.mxu0 %v16882_v41 }
 0x7d2   : > { %12049 = vmatpush1.bf16.msra.mxu0 %v16880_v42  ;;  %v16936_v42 = vld [vmem:[#allocation16 + $0x20] sm:$0xff]  }
 0x7d3   : > { %12050 = vmatprep.subr.bf16.mxu0 %v16885_v43  ;;  %v16937_v43 = vld [vmem:[#allocation16 + $0x28] sm:$0xff]  }
 0x7d6   : > { %12051 = vmatpush1.bf16.msra.mxu0 %v16883_v44  ;;  %v16938_v44 = vld [vmem:[#allocation16 + $0x30] sm:$0xff]  }
 0x7d7   : > { %12052 = vmatprep.subr.bf16.mxu0 %v16888_v45  ;;  %v16939_v45 = vld [vmem:[#allocation16 + $0x38] sm:$0xff]  }
 0x7da   : > { %12053 = vmatpush1.bf16.msra.mxu0 %v16886_v46 }
 0x7db   : > { %12054 = vmatprep.subr.bf16.mxu0 %v16891_v2  ;;  %v14147_v2 = vld [vmem:[#allocation15] ss:$0 sm:$0xff] }
 0x7de   : > { %12055 = vmatpush1.bf16.msra.mxu0 %v16889_v47 }
 0x7df   : > { %12056 = vmatprep.subr.bf16.mxu0 %v16894_v48 }
 0x7e2   : > { %12057 = vmatpush1.bf16.msra.mxu0 %v16892_v49 }
 0x7e3   : > { %12058 = vmatprep.subr.bf16.mxu0 %v16897_v50  ;;  %v12268_v50 = vstv %s14164_s11 }
 0x7e6   : > { %12059 = vmatpush1.bf16.msra.mxu0 %v16895_v51 }
 0x7e7   : > { %12060 = vmatprep.subr.bf16.mxu0 %v16900_v52 }
 0x7ea   : > { %12061 = vmatpush1.bf16.msra.mxu0 %v16898_v53 }
 0x7eb   : > { %12062 = vmatprep.subr.bf16.mxu0 %v16903_v55 }
 0x7ee   : > { %v11578_v61 = vpop.f32.mrb[4].mxu1  ;;  %12063 = vmatpush1.bf16.msra.mxu0 %v16901_v57 }
 0x7ef   : > { %v14233_v62 = vadd.f32 %v11578_v61, %v2104_v58  ;;  %v11580_v63 = vpop.f32.mrb[5].mxu1  ;;  %12064 = vmatprep.subr.bf16.mxu0 %v16906_v60 }
 0x7f0   : > { %v14234_v1 = vadd.f32 %v11580_v63, %v2108_v59  ;;  %v11582_v3 = vpop.f32.mrb[6].mxu1 }
 0x7f1   : > { %vm11587_vm3 = vcmp.ge.f32.partialorder %v14233_v62, 0.0  ;;  %v11593_v33 = vmul.f32 %v14233_v62, %v17941_v23  ;;  %v11583_v5 = vpop.f32.mrb[7].mxu1 }
 0x7f2   : > { %vm11588_vm4 = vcmp.ge.f32.partialorder %v14234_v1, 0.0  ;;  %v11594_v6 = vmul.f32 %v14234_v1, %v17941_v23  ;;  %12065 = vmatpush1.bf16.msra.mxu0 %v16904_v0  ;;  %v16930_v23 = vld [vmem:[#allocation13 + $0x78] sm:$0xff]  }
 0x7f3   : > { %v11597_v7 = vsel %vm11587_vm3, %v14233_v62, %v11593_v33  ;;  %12066 = vmatprep.subr.bf16.mxu0 %v16909_v4  ;;  %14192 = vmatprep.subr.bf16.mxu1 %v16930_v23 }
 0x7f4   : > { %v11598_v9 = vsel %vm11588_vm4, %v14234_v1, %v11594_v6  ;;  %v11601_v20 = vpack.c.bf16 %v11597_v7, %v11597_v7  ;;  %14193 = vmatpush3.bf16.msra.mxu1 %v16931_v24 }
 0x7f5   : > { %v11602_v11 = vpack.c.bf16 %v11598_v9, %v11598_v9  ;;  %14209 = vmatprep.subr.bf16.mxu1 %v17312_v25 }
 0x7f6   : > { %12067 = vmatpush1.bf16.msra.mxu0 %v16907_v8 }
 0x7f7   : > { %12072 = vmatprep.mubr.bf16.mxu0 %v11602_v11  ;;  %12068 = vmatprep.subr.bf16.mxu0 %v16912_v10 }
 0x7fa   : > { %12069 = vmatpush1.bf16.msra.mxu0 %v16910_v15 }
 0x7fb   : > { %12070 = vmatprep.subr.bf16.mxu0 %v16915_v18 }
 0x7fe   : > { %12071 = vmatpush1.bf16.msra.mxu0 %v16913_v19 }
 0x801   : > { %12073 = vmatmul.mubr.bf16.vlgmr.msra.gmra.mrb[4].mxu0 %v11601_v20 }
 0x8d4   : > { %v12074_v29 = vpop.f32.mrb[4].mxu0 }
 0x8d5   : > { %v14235_v31 = vadd.f32 %v12074_v29, %v11672_v27  ;;  %v12076_v32 = vpop.f32.mrb[5].mxu0 }
 0x8d6   : > { %v14236_v34 = vadd.f32 %v12076_v32, %v11676_v28  ;;  %v12078_v35 = vpop.f32.mrb[6].mxu0 }
 0x8d7   : > { %vm12081_vm5 = vcmp.ge.f32.partialorder %v14235_v31, 0.0  ;;  %v12085_v36 = vmul.f32 %v14235_v31, %v12084_v30  ;;  %v12079_v37 = vpop.f32.mrb[7].mxu0 }
 0x8d8   : > { %vm12082_vm6 = vcmp.ge.f32.partialorder %v14236_v34, 0.0  ;;  %v12086_v38 = vmul.f32 %v14236_v34, %v12084_v30 }
 0x8d9   : > { %v12087_v14 = vsel %vm12081_vm5, %v14235_v31, %v12085_v36 }
 0x8da   : > { %v12088_v16 = vsel %vm12082_vm6, %v14236_v34, %v12086_v38  ;;  %v12089_v41 = vpack.c.bf16 %v12087_v14, %v12087_v14 }
 0x8db   : > { %v12090_v39 = vpack.c.bf16 %v12088_v16, %v12088_v16 }
 0x8dd   : > { %12258 = vmatprep.mubr.bf16.mxu1 %v12090_v39 }
 0x8de   : > { %12259 = vmatmul.mubr.bf16.vlgmr.msra.gmra.mrb[8].mxu1 %v12089_v41 }
 0x8df   : > { %14210 = vmatpush3.bf16.msra.mxu1 %v16932_v40  ;;  %14225 = vmatprep.mubr.msk.bf16.mxu1 %vm17313_vm7, %v17312_v25 }
 0x8e0   : > { %14211 = vmatprep.subr.bf16.mxu1 %v17312_v25 }
 0x8e3   : > { %14212 = vmatpush3.bf16.msra.mxu1 %v16933_v12 }
 0x8e4   : > { %14213 = vmatprep.subr.bf16.mxu1 %v17312_v25 }
 0x8e7   : > { %14214 = vmatpush3.bf16.msra.mxu1 %v16934_v13 }
 0x8e8   : > { %14215 = vmatprep.subr.bf16.mxu1 %v17312_v25 }
 0x8eb   : > { %14216 = vmatpush3.bf16.msra.mxu1 %v16935_v17 }
 0x8ec   : > { %14217 = vmatprep.subr.bf16.mxu1 %v17312_v25 }
 0x8ef   : > { %14218 = vmatpush3.bf16.msra.mxu1 %v16936_v42 }
 0x8f0   : > { %14219 = vmatprep.subr.bf16.mxu1 %v17312_v25 }
 0x8f3   : > { %14220 = vmatpush3.bf16.msra.mxu1 %v16937_v43 }
 0x8f4   : > { %14221 = vmatprep.subr.bf16.mxu1 %v17312_v25 }
 0x8f7   : > { %14222 = vmatpush3.bf16.msra.mxu1 %v16938_v44 }
 0x8f8   : > { %14223 = vmatprep.subr.bf16.mxu1 %v17312_v25 }
 0x8fb   : > { %14224 = vmatpush3.bf16.msra.mxu1 %v16939_v45 }
 0x9b1   : > { %v14194_v46 = vpop.f32.mrb[8].mxu1 }
 0x9b2   : > { %v14195_v47 = vpop.f32.mrb[9].mxu1 }
 0x9b3   : > { %v14196_v48 = vadd.f32 %v14195_v47, %v14194_v46  ;;  %v14197_v49 = vpop.f32.mrb[10].mxu1 }
 0x9b4   : > { %v14198_v51 = vpop.f32.mrb[11].mxu1 }
 0x9b5   : > { %v12261_v52 = vadd.f32 %v14196_v48, %v14147_v2 }
 0x9b7   : > { %vm12266_vm8 = vcmp.ge.f32.partialorder %v12261_v52, 0.0  ;;  %v12269_v53 = vmul.f32 %v12268_v50, %v12261_v52 }
 0x9b9   : > { %v12270_v54 = vsel %vm12266_vm8, %v12261_v52, %v12269_v53 }
 0x9ba   : > { %v12271_v55 = vpack.c.bf16 %v12270_v54, %v12270_v54 }
 0x9bc   : > { %14226 = vmatmul.mubr.bf16.vlgmr.msra.gmra.mrb[12].mxu1 %v12271_v55 }
 0xa8f   : > { %v12377_v57 = vpop.f32.mrb[12].mxu1 }
 0xa90   : > { %v12378_v58 = vadd.f32 %v14165_v56, %v12377_v57  ;;  %v14227_v59 = vpop.f32.mrb[13].mxu1 }
 0xa91   : > { %v12380_v60 = vpop.f32.mrb[14].mxu1 }
 0xa92   : > { %12383 = vst [vmem:[%s495_s26] sm:$0xff] %v12378_v58  ;;  %v14228_v61 = vpop.f32.mrb[15].mxu1 }
 0xa93   : > { %17220 = shalt.err (!%p17217_p11)
}
 0xa94   : > { %s17221_s18 = scalar_lea.hbm %s17962_s17, 128  ;;  %s17225_s22 = scalar_lea.hbm %s18048_s2, 256 }
 0xa95   : > { %p17222_p12 = scmp.ne.s32.totalorder %s17962_s17, %s17221_s18  ;;  %p17226_p13 = scmp.lt.u32.totalorder %s17962_s17, %s18048_s2 }
 0xa96   : > { %p17227_p10 = scmp.lt.u32.totalorder %s17225_s22, %s17221_s18  ;;  %p17229_p5 = scmp.lt.u32.totalorder %s17221_s18, %s17962_s17 }
 0xa97   : > { %p17223_p1 = pnand %p17222_p12, %p18049_p7 }
 0xa98   : > { %p17228_p0 = por %p17227_p10, %p17226_p13 }
 0xa99   : > { %p17224_p3 = pneg %p17223_p1 }
 0xa9a   : > { %p17230_p9 = por %p17229_p5, %p17228_p0 }
 0xa9c   : > { %p17231_p2 = pnand %p17230_p9, %p17224_p3 }
 0xa9e   : > { %17234 = shalt.err (!%p17231_p2)
}
 0xa9f   : > { %14462 = dma.vmem_to_hbm [thread:$0]  (%p18049_p7), %s17964_s30, 128, %s17962_s17, %s12385_s29  }
 0xaa0 PF: > { %s12410_s0 = sand.u32 1, %s17281_s13   ;;  %p18050_p8 = scmp.ne.s32.totalorder %s18034_s28, 0 }
 0xaa1   : > { %p18051_p4 = scmp.ge.s32.totalorder %s17293_s16, 2  ;;  %s12411_s19 = scalar_lea.sflag [#allocation4], %s12410_s0 }
 0xaa3   : > { %p14497_p6 = pnand %p18051_p4, %p18050_p8 }
 0xaa5   : > { %17276 = dma.done.wait (!%p14497_p6), %s12411_s19, 128  }
 0xaa6   : > { %17278 = vsyncadd (!%p14497_p6), %s12411_s19, 4294967168  ;;  %p28_p11 = scmp.ge.s32.totalorder %s17594_s23, 4   ;;  %s18052_s13 = smov %s17285_s14 }
 0xaa7   : > { %s18053_s14 = smov %s17289_s15  ;;  %s18054_s15 = smov %s17606_s10 }
 0xaa8   : > { %s18055_s16 = smov %s17594_s23  ;;  %30 = sbr.rel (!%p28_p11) target bundleno = 14 (0xe), region = 142 }
 0xaaf   :  { %12416 = vsyncpa [#allocation3], 1 }
 0xab0   :  { %12418 = vsyncpa [#allocation3 + $0x1], 1 }
 0xab1   :  { %12419 = vsyncpa [#allocation8], 1 }
 0xab2   :  { %12420 = vsyncpa [#allocation11], 1 }
 0xab3   :  { %12421 = vsyncpa [#allocation14], 1 }
 0xab4   :  { %12422 = vsyncpa [#allocation17], 1 }
 0xab5   :  { %12423 = vsyncpa [#allocation4], 1 }
 0xab6   :  { %12425 = vsyncpa [#allocation4 + $0x1], 1 }
 0xab7   :  { %12426 = vsyncpa [#allocation5], 1 }
 0xab8   :  { %12428 = vsyncpa [#allocation5 + $0x1], 1 }

</bundles_post_ra>
